<compile_context>
chip_gen: v5e
topology: v5e:2x2
jax: 0.10.0
libtpu: 0.0.40
codegen_flags: <defaults>
</compile_context>

<pallas_src>
import math

import jax
import jax.numpy as jnp
from jax.experimental import pallas as pl
from jax.experimental.pallas import tpu as pltpu

# ---- static problem constants (28x28 MNIST LeNet) ----
KP1 = 32              # conv1 taps (25) padded to 32 lanes
C1P = 128             # conv1 out-channels (20) padded to 128 lanes
C2P = 128             # conv2 out-channels (50) padded to 128 lanes
NP = 512              # fc1 out-features (500) padded to 512 lanes
WP1 = 16              # pooled conv1 W (12) padded to 16 sublanes (tile-aligned reshapes)
KF = 4 * 8 * C2P      # fc1 contraction: 4 (H) x 8 (padded W) x 128 (padded C) = 4096
VMEM_LIMIT = 32 * 1024 * 1024


def _round_up(x, m):
    return ((x + m - 1) // m) * m


def _const_spec(shape, index_map):
    """BlockSpec for a weight whose block index never changes: request single buffering."""
    try:
        return pl.BlockSpec(shape, index_map, pipeline_mode=pl.Buffered(1))
    except Exception:  # pipeline_mode / Buffered unavailable -> fall back to default buffering
        return pl.BlockSpec(shape, index_map)


def _choose_tiles(batch):
    """Batch tiles for the fused conv kernel (tb) and the fc1 kernel (tm).

    tb is a power of two <= 16 and tm a multiple of tb in [8, 256]; both aim for >= 2 grid steps
    whenever batch >= 2 (keeps both v7x TensorCores busy) while staying VMEM-safe on v5e's
    default scoped VMEM.  The batch is zero-padded to bp (a multiple of tm, hence of tb).
    """
    half = max(1, -(-batch // 2))
    tb = 1
    while tb * 2 <= min(16, half):
        tb *= 2
    tm = min(256, _round_up(half, 8))
    tm = min(256, _round_up(tm, tb))
    bp = _round_up(batch, tm)
    return tb, tm, bp


# ----------------------------- Pallas kernels -----------------------------

def _conv_stack_kernel(p_ref, w1_ref, b1_ref, w2_ref, b2_ref, o_ref):
    """Fused conv1+ReLU+pool and conv2+ReLU+pool for one batch tile.

    p_ref : (4, TB, 12, 16, 32) bf16  phase-separated conv1 im2col patches (4 pool phases,
                                      pooled 12x12 grid with W padded to 16, 25 taps -> 32)
    w1_ref: (32, 128) bf16            conv1 weights (taps x padded Cout)
    b1_ref: (1, 128) f32
    w2_ref: (25, 128, 128) bf16       conv2 weights (tap x padded Cin x padded Cout)
    b2_ref: (1, 128) f32
    o_ref : (TB, 4, 8, 128) bf16      conv2 pooled output (pooled H, shifted-pair-max W, C);
                                      only even W columns are valid pooled values, the rest get
                                      zero weights in the fc1 packing.
    """
    tb = o_ref.shape[0]
    w1 = w1_ref[...]

    # ---- conv1 as 4 phase matmuls + phase max (= 2x2 maxpool) + bias + ReLU ----
    def phase(a):
        x = p_ref[a].reshape(tb * 12 * WP1, KP1)             # aligned merge (16 | 192)
        return jnp.dot(x, w1, preferred_element_type=jnp.float32)

    m = jnp.maximum(jnp.maximum(phase(0), phase(1)), jnp.maximum(phase(2), phase(3)))
    h1 = jnp.maximum(m + b1_ref[...], 0.0)                    # (tb*192, 128) f32
    h1 = h1.reshape(tb, 12, WP1, C1P)                         # aligned split (16 = 2 f32 tiles)

    # ---- conv2: 25 tap matmuls at M = tb*64; the W-offset slice is hoisted per dx ----
    acc = jnp.zeros((tb * 64, C2P), jnp.float32)
    for dx in range(5):
        # one sublane-offset slice per dx, merged tile-aligned while f32, single bf16 cast
        hdx = h1[:, :, dx:dx + 8, :].reshape(tb, 96, C1P).astype(jnp.bfloat16)
        for dy in range(5):
            xt = hdx[:, dy * 8:dy * 8 + 64, :].reshape(tb * 64, C1P)
            acc = acc + jnp.dot(xt, w2_ref[dy * 5 + dx],
                                preferred_element_type=jnp.float32)
    y = jnp.maximum(acc + b2_ref[...], 0.0)                   # bias + ReLU, (tb*64, 128)

    # ---- 2x2 max pool: H via paired rows, W via pair-max of shifted slices ----
    y = y.reshape(tb, 4, 2, 8, C2P)                           # aligned split (inner 8 rows)
    y = jnp.maximum(y[:, :, 0, :, :], y[:, :, 1, :, :])       # H pool -> (tb, 4, 8, 128)
    w_pair = jnp.maximum(y[:, :, 0:7, :], y[:, :, 1:8, :])    # W pair-max, valid at even cols
    o_ref[:, :, 0:7, :] = w_pair.astype(o_ref.dtype)
    o_ref[:, :, 7:8, :] = y[:, :, 7:8, :].astype(o_ref.dtype)  # finite filler (zero fc1 weight)


def _fc_kernel(x_ref, w_ref, b_ref, o_ref):
    """fc1 + bias + ReLU: (TM, 4096) @ (4096, 512) bf16 operands, f32 accumulate/output."""
    acc = jnp.dot(x_ref[...], w_ref[...], preferred_element_type=jnp.float32)
    o_ref[...] = jnp.maximum(acc + b_ref[...], 0.0)


# ----------------------------- wrappers / glue -----------------------------

def _conv1_pool_patches(imgs, bp):
    """Phase-separated im2col for conv1 fused with its 2x2 pool.

    imgs: (B, 28, 28) f32.  Returns (4, bp, 12, 16, 32) bf16; axis 0 = the four members of each
    2x2 pooling window, the pooled 12x12 grid has its W dim zero-padded to 16 and the 25 conv
    taps are zero-padded to 32.  The batch is zero-padded to bp.
    """
    b = imgs.shape[0]
    phases = []
    for a in (0, 1):
        for c in (0, 1):
            taps = []
            for dy in range(5):
                for dx in range(5):
                    taps.append(imgs[:, a + dy::2, c + dx::2][:, :12, :12])  # (B, 12, 12)
            phases.append(jnp.stack(taps, axis=-1))                          # (B, 12, 12, 25)
    p = jnp.stack(phases, axis=0)                                            # (4, B, 12, 12, 25)
    p = jnp.pad(p, ((0, 0), (0, bp - b), (0, 0), (0, WP1 - 12), (0, KP1 - 25)))
    return p.astype(jnp.bfloat16)


def mnist_mlp_forward(x, packed):
    w1p, b1p, w2p, b2p, fc1_wp, fc1_bp = packed
    batch = x.shape[0]
    imgs = x.reshape(batch, -1).reshape(batch, 28, 28)        # x.view(-1, num_flat_features(x))

    tb, tm, bp = _choose_tiles(batch)
    p = _conv1_pool_patches(imgs, bp)                         # (4, bp, 12, 16, 32) bf16

    # ---------------- fused conv1+ReLU+pool / conv2+ReLU+pool ----------------
    h2 = pl.pallas_call(
        _conv_stack_kernel,
        out_shape=jax.ShapeDtypeStruct((bp, 4, 8, C2P), jnp.bfloat16),
        grid_spec=pltpu.PrefetchScalarGridSpec(
            num_scalar_prefetch=0,
            grid=(bp // tb,),
            in_specs=[
                pl.BlockSpec((4, tb, 12, WP1, KP1), lambda i: (0, i, 0, 0, 0)),
                _const_spec((KP1, C1P), lambda i: (0, 0)),
                _const_spec((1, C1P), lambda i: (0, 0)),
                _const_spec((25, C1P, C2P), lambda i: (0, 0, 0)),
                _const_spec((1, C2P), lambda i: (0, 0)),
            ],
            out_specs=pl.BlockSpec((tb, 4, 8, C2P), lambda i: (i, 0, 0, 0)),
        ),
        compiler_params=pltpu.CompilerParams(
            dimension_semantics=("parallel",),
            vmem_limit_bytes=VMEM_LIMIT,
        ),
    )(p, w1p, b1p, w2p, b2p)

    # ---------------- fc1 + ReLU (M-tiled, lane-dense K = 4096) ----------------
    z = h2.reshape(bp, KF)                                    # contiguous -> free reshape
    out = pl.pallas_call(
        _fc_kernel,
        out_shape=jax.ShapeDtypeStruct((bp, NP), jnp.float32),
        grid_spec=pltpu.PrefetchScalarGridSpec(
            num_scalar_prefetch=0,
            grid=(bp // tm,),
            in_specs=[
                pl.BlockSpec((tm, KF), lambda i: (i, 0)),
                _const_spec((KF, NP), lambda i: (0, 0)),
                _const_spec((1, NP), lambda i: (0, 0)),
            ],
            out_specs=pl.BlockSpec((tm, NP), lambda i: (i, 0)),
        ),
        compiler_params=pltpu.CompilerParams(
            dimension_semantics=("parallel",),
            vmem_limit_bytes=VMEM_LIMIT,
        ),
    )(z, fc1_wp, fc1_bp)
    return out[:batch, :500]


# ----------------------------- parameters (deterministic, in-script) -----------------------------

def init_params(key):
    k1, k2, k3, k4, k5 = jax.random.split(key, 5)
    # Conv2d layers keep PyTorch's default init (xavier() only touches Linear modules).
    bound1 = 1.0 / math.sqrt(1 * 5 * 5)
    conv1_w = jax.random.uniform(k1, (20, 1, 5, 5), jnp.float32, -bound1, bound1)
    conv1_b = jax.random.uniform(k2, (20,), jnp.float32, -bound1, bound1)
    bound2 = 1.0 / math.sqrt(20 * 5 * 5)
    conv2_w = jax.random.uniform(k3, (50, 20, 5, 5), jnp.float32, -bound2, bound2)
    conv2_b = jax.random.uniform(k4, (50,), jnp.float32, -bound2, bound2)
    # fc1 gets Xavier uniform, zero bias (as in xavier()).
    a = math.sqrt(3.0) * math.sqrt(2.0 / (800 + 500))
    fc1_w = jax.random.uniform(k5, (500, 800), jnp.float32, -a, a)  # PyTorch Linear layout (out, in)
    fc1_b = jnp.zeros((500,), jnp.float32)
    return conv1_w, conv1_b, conv2_w, conv2_b, fc1_w, fc1_b


def pack_params(params):
    """One-time packing: lane-dense 128-padding, pre-transposes, dtype casts (no per-step glue)."""
    conv1_w, conv1_b, conv2_w, conv2_b, fc1_w, fc1_b = params
    # conv1: (20,1,5,5) -> (taps=32, Cout=128) bf16; tap index = dy*5 + dx.
    w1 = conv1_w.reshape(20, 25).T
    w1p = jnp.zeros((KP1, C1P), jnp.float32).at[:25, :20].set(w1).astype(jnp.bfloat16)
    b1p = jnp.zeros((1, C1P), jnp.float32).at[0, :20].set(conv1_b)
    # conv2: (50,20,5,5) -> (tap=25, Cin=128, Cout=128) bf16 (bf16-native MXU; f32 accumulation
    # stays in-kernel).
    w2 = jnp.transpose(conv2_w, (2, 3, 1, 0)).reshape(25, 20, 50)         # (tap, ci, co)
    w2p = jnp.zeros((25, C1P, C2P), jnp.float32).at[:, :20, :50].set(w2).astype(jnp.bfloat16)
    b2p = jnp.zeros((1, C2P), jnp.float32).at[0, :50].set(conv2_b)
    # fc1: (500, 800) torch layout (out, co*16 + u*4 + v) -> (u, w=2v, c, n) with zero rows for
    # the pool-invalid odd/padded w columns and the padded channels/features.  K = 4*8*128 = 4096.
    wf = jnp.transpose(fc1_w.reshape(500, 50, 4, 4), (2, 3, 1, 0))        # (u, v, co, n)
    fcp = jnp.zeros((4, 8, C2P, NP), jnp.float32).at[:, 0:8:2, :50, :500].set(wf)
    fc1_wp = fcp.reshape(KF, NP).astype(jnp.bfloat16)
    fc1_bp = jnp.zeros((1, NP), jnp.float32).at[0, :500].set(fc1_b)
    return w1p, b1p, w2p, b2p, fc1_wp, fc1_bp


# ----------------------------- pure-JAX reference -----------------------------

def reference_forward(x, params):
    conv1_w, conv1_b, conv2_w, conv2_b, fc1_w, fc1_b = params
    batch = x.shape[0]
    h = x.reshape(batch, 1, 28, 28)
    dn = ('NCHW', 'OIHW', 'NCHW')
    h = jax.lax.conv_general_dilated(h, conv1_w, (1, 1), 'VALID', dimension_numbers=dn,
                                     precision=jax.lax.Precision.HIGHEST)
    h = jax.nn.relu(h + conv1_b[None, :, None, None])
    h = jax.lax.reduce_window(h, -jnp.inf, jax.lax.max, (1, 1, 2, 2), (1, 1, 2, 2), 'VALID')
    h = jax.lax.conv_general_dilated(h, conv2_w, (1, 1), 'VALID', dimension_numbers=dn,
                                     precision=jax.lax.Precision.HIGHEST)
    h = jax.nn.relu(h + conv2_b[None, :, None, None])
    h = jax.lax.reduce_window(h, -jnp.inf, jax.lax.max, (1, 1, 2, 2), (1, 1, 2, 2), 'VALID')
    h = h.reshape(batch, -1)
    return jax.nn.relu(jnp.dot(h, fc1_w.T, precision=jax.lax.Precision.HIGHEST) + fc1_b)


# ----------------------------- main -----------------------------

if __name__ == "__main__":
    key = jax.random.PRNGKey(0)
    kx, kp = jax.random.split(key)
    x = jax.random.normal(kx, (2, 784), jnp.float32)     # batch=2, input_size=784 (MNIST 28x28)
    params = init_params(kp)
    packed = pack_params(params)                         # one-time weight packing

    fwd = jax.jit(mnist_mlp_forward)
    out = jax.block_until_ready(fwd(x, packed))
    assert out.shape == (2, 500) and out.dtype == jnp.float32

    ref = jax.block_until_ready(reference_forward(x, params))
    # bf16 matmul operands with f32 accumulation -> looser tolerance than pure f32.
    max_err = float(jnp.max(jnp.abs(out - ref)))
    assert jnp.allclose(out, ref, atol=5e-2, rtol=5e-2), (
        f"Pallas output mismatch vs reference, max abs err {max_err:.4f}")

    print("KERNEL_OK")
</pallas_src>

<mosaic_0001>
module attributes {stable_mosaic.version = 11 : i64} {
  func.func @_conv_stack_kernel(%arg0: i32, %arg1: memref<4x1x12x16x32xbf16, #tpu.memory_space<vmem>>, %arg2: memref<32x128xbf16, #tpu.memory_space<vmem>>, %arg3: memref<1x128xf32, #tpu.memory_space<vmem>>, %arg4: memref<25x128x128xbf16, #tpu.memory_space<vmem>>, %arg5: memref<1x128xf32, #tpu.memory_space<vmem>>, %arg6: memref<1x4x8x128xbf16, #tpu.memory_space<vmem>>) attributes {dimension_semantics = [#tpu.dimension_semantics<parallel>], iteration_bounds = array<i64: 8>, scalar_prefetch = 0 : i64, scratch_operands = 0 : i64, tpu.core_type = #tpu.core_type<tc>, window_params = [{transform_indices = @transform_0, window_bounds = array<i64: 4, 1, 12, 16, 32>}, {pipeline_mode = #tpu.pipeline_mode<synchronous>, transform_indices = @transform_1, window_bounds = array<i64: 32, 128>}, {pipeline_mode = #tpu.pipeline_mode<synchronous>, transform_indices = @transform_2, window_bounds = array<i64: 1, 128>}, {pipeline_mode = #tpu.pipeline_mode<synchronous>, transform_indices = @transform_3, window_bounds = array<i64: 25, 128, 128>}, {pipeline_mode = #tpu.pipeline_mode<synchronous>, transform_indices = @transform_4, window_bounds = array<i64: 1, 128>}, {transform_indices = @transform_5, window_bounds = array<i64: 1, 4, 8, 128>}]} {
    %c0 = arith.constant 0 : index
    %c0_0 = arith.constant 0 : index
    %0 = vector.load %arg2[%c0, %c0_0] : memref<32x128xbf16, #tpu.memory_space<vmem>>, vector<32x128xbf16>
    %c0_1 = arith.constant 0 : index
    %c0_2 = arith.constant 0 : index
    %c0_3 = arith.constant 0 : index
    %c0_4 = arith.constant 0 : index
    %c0_5 = arith.constant 0 : index
    %1 = vector.load %arg1[%c0_1, %c0_2, %c0_3, %c0_4, %c0_5] : memref<4x1x12x16x32xbf16, #tpu.memory_space<vmem>>, vector<1x1x12x16x32xbf16>
    %2 = vector.shape_cast %1 : vector<1x1x12x16x32xbf16> to vector<1x12x16x32xbf16>
    %3 = vector.shape_cast %2 : vector<1x12x16x32xbf16> to vector<192x32xbf16>
    %cst = arith.constant dense<0.000000e+00> : vector<192x128xf32>
    %4 = tpu.matmul %3, %0, %cst {dimension_numbers = #tpu.dot_dimension_numbers<[1], [0], [0], [1], [0, 0, 1, 1], [], []>} : vector<192x32xbf16>, vector<32x128xbf16>, vector<192x128xf32> -> vector<192x128xf32>
    %c1 = arith.constant 1 : index
    %c0_6 = arith.constant 0 : index
    %c0_7 = arith.constant 0 : index
    %c0_8 = arith.constant 0 : index
    %c0_9 = arith.constant 0 : index
    %5 = vector.load %arg1[%c1, %c0_6, %c0_7, %c0_8, %c0_9] : memref<4x1x12x16x32xbf16, #tpu.memory_space<vmem>>, vector<1x1x12x16x32xbf16>
    %6 = vector.shape_cast %5 : vector<1x1x12x16x32xbf16> to vector<1x12x16x32xbf16>
    %7 = vector.shape_cast %6 : vector<1x12x16x32xbf16> to vector<192x32xbf16>
    %cst_10 = arith.constant dense<0.000000e+00> : vector<192x128xf32>
    %8 = tpu.matmul %7, %0, %cst_10 {dimension_numbers = #tpu.dot_dimension_numbers<[1], [0], [0], [1], [0, 0, 1, 1], [], []>} : vector<192x32xbf16>, vector<32x128xbf16>, vector<192x128xf32> -> vector<192x128xf32>
    %9 = arith.maximumf %4, %8 : vector<192x128xf32>
    %c2 = arith.constant 2 : index
    %c0_11 = arith.constant 0 : index
    %c0_12 = arith.constant 0 : index
    %c0_13 = arith.constant 0 : index
    %c0_14 = arith.constant 0 : index
    %10 = vector.load %arg1[%c2, %c0_11, %c0_12, %c0_13, %c0_14] : memref<4x1x12x16x32xbf16, #tpu.memory_space<vmem>>, vector<1x1x12x16x32xbf16>
    %11 = vector.shape_cast %10 : vector<1x1x12x16x32xbf16> to vector<1x12x16x32xbf16>
    %12 = vector.shape_cast %11 : vector<1x12x16x32xbf16> to vector<192x32xbf16>
    %cst_15 = arith.constant dense<0.000000e+00> : vector<192x128xf32>
    %13 = tpu.matmul %12, %0, %cst_15 {dimension_numbers = #tpu.dot_dimension_numbers<[1], [0], [0], [1], [0, 0, 1, 1], [], []>} : vector<192x32xbf16>, vector<32x128xbf16>, vector<192x128xf32> -> vector<192x128xf32>
    %c3 = arith.constant 3 : index
    %c0_16 = arith.constant 0 : index
    %c0_17 = arith.constant 0 : index
    %c0_18 = arith.constant 0 : index
    %c0_19 = arith.constant 0 : index
    %14 = vector.load %arg1[%c3, %c0_16, %c0_17, %c0_18, %c0_19] : memref<4x1x12x16x32xbf16, #tpu.memory_space<vmem>>, vector<1x1x12x16x32xbf16>
    %15 = vector.shape_cast %14 : vector<1x1x12x16x32xbf16> to vector<1x12x16x32xbf16>
    %16 = vector.shape_cast %15 : vector<1x12x16x32xbf16> to vector<192x32xbf16>
    %cst_20 = arith.constant dense<0.000000e+00> : vector<192x128xf32>
    %17 = tpu.matmul %16, %0, %cst_20 {dimension_numbers = #tpu.dot_dimension_numbers<[1], [0], [0], [1], [0, 0, 1, 1], [], []>} : vector<192x32xbf16>, vector<32x128xbf16>, vector<192x128xf32> -> vector<192x128xf32>
    %18 = arith.maximumf %13, %17 : vector<192x128xf32>
    %19 = arith.maximumf %9, %18 : vector<192x128xf32>
    %c0_21 = arith.constant 0 : index
    %c0_22 = arith.constant 0 : index
    %20 = vector.load %arg3[%c0_21, %c0_22] : memref<1x128xf32, #tpu.memory_space<vmem>>, vector<1x128xf32>
    %21 = vector.broadcast %20 : vector<1x128xf32> to vector<192x128xf32>
    %22 = arith.addf %19, %21 : vector<192x128xf32>
    %cst_23 = arith.constant 0.000000e+00 : f32
    %23 = vector.broadcast %cst_23 : f32 to vector<192x128xf32>
    %24 = arith.maximumf %22, %23 : vector<192x128xf32>
    %25 = vector.shape_cast %24 : vector<192x128xf32> to vector<1x12x16x128xf32>
    %cst_24 = arith.constant 0.000000e+00 : f32
    %26 = vector.broadcast %cst_24 : f32 to vector<64x128xf32>
    %27 = vector.extract_strided_slice %25 {offsets = [0, 0, 0, 0], sizes = [1, 12, 8, 128], strides = [1, 1, 1, 1]} : vector<1x12x16x128xf32> to vector<1x12x8x128xf32>
    %28 = vector.shape_cast %27 : vector<1x12x8x128xf32> to vector<1x96x128xf32>
    %29 = arith.truncf %28 : vector<1x96x128xf32> to vector<1x96x128xbf16>
    %30 = vector.extract_strided_slice %29 {offsets = [0, 0, 0], sizes = [1, 64, 128], strides = [1, 1, 1]} : vector<1x96x128xbf16> to vector<1x64x128xbf16>
    %31 = vector.shape_cast %30 : vector<1x64x128xbf16> to vector<64x128xbf16>
    %c0_25 = arith.constant 0 : index
    %c0_26 = arith.constant 0 : index
    %c0_27 = arith.constant 0 : index
    %32 = vector.load %arg4[%c0_25, %c0_26, %c0_27] : memref<25x128x128xbf16, #tpu.memory_space<vmem>>, vector<1x128x128xbf16>
    %33 = vector.shape_cast %32 : vector<1x128x128xbf16> to vector<128x128xbf16>
    %cst_28 = arith.constant dense<0.000000e+00> : vector<64x128xf32>
    %34 = tpu.matmul %31, %33, %cst_28 {dimension_numbers = #tpu.dot_dimension_numbers<[1], [0], [0], [1], [0, 0, 1, 1], [], []>} : vector<64x128xbf16>, vector<128x128xbf16>, vector<64x128xf32> -> vector<64x128xf32>
    %35 = arith.addf %26, %34 : vector<64x128xf32>
    %36 = vector.extract_strided_slice %29 {offsets = [0, 8, 0], sizes = [1, 64, 128], strides = [1, 1, 1]} : vector<1x96x128xbf16> to vector<1x64x128xbf16>
    %37 = vector.shape_cast %36 : vector<1x64x128xbf16> to vector<64x128xbf16>
    %c5 = arith.constant 5 : index
    %c0_29 = arith.constant 0 : index
    %c0_30 = arith.constant 0 : index
    %38 = vector.load %arg4[%c5, %c0_29, %c0_30] : memref<25x128x128xbf16, #tpu.memory_space<vmem>>, vector<1x128x128xbf16>
    %39 = vector.shape_cast %38 : vector<1x128x128xbf16> to vector<128x128xbf16>
    %cst_31 = arith.constant dense<0.000000e+00> : vector<64x128xf32>
    %40 = tpu.matmul %37, %39, %cst_31 {dimension_numbers = #tpu.dot_dimension_numbers<[1], [0], [0], [1], [0, 0, 1, 1], [], []>} : vector<64x128xbf16>, vector<128x128xbf16>, vector<64x128xf32> -> vector<64x128xf32>
    %41 = arith.addf %35, %40 : vector<64x128xf32>
    %42 = vector.extract_strided_slice %29 {offsets = [0, 16, 0], sizes = [1, 64, 128], strides = [1, 1, 1]} : vector<1x96x128xbf16> to vector<1x64x128xbf16>
    %43 = vector.shape_cast %42 : vector<1x64x128xbf16> to vector<64x128xbf16>
    %c10 = arith.constant 10 : index
    %c0_32 = arith.constant 0 : index
    %c0_33 = arith.constant 0 : index
    %44 = vector.load %arg4[%c10, %c0_32, %c0_33] : memref<25x128x128xbf16, #tpu.memory_space<vmem>>, vector<1x128x128xbf16>
    %45 = vector.shape_cast %44 : vector<1x128x128xbf16> to vector<128x128xbf16>
    %cst_34 = arith.constant dense<0.000000e+00> : vector<64x128xf32>
    %46 = tpu.matmul %43, %45, %cst_34 {dimension_numbers = #tpu.dot_dimension_numbers<[1], [0], [0], [1], [0, 0, 1, 1], [], []>} : vector<64x128xbf16>, vector<128x128xbf16>, vector<64x128xf32> -> vector<64x128xf32>
    %47 = arith.addf %41, %46 : vector<64x128xf32>
    %48 = vector.extract_strided_slice %29 {offsets = [0, 24, 0], sizes = [1, 64, 128], strides = [1, 1, 1]} : vector<1x96x128xbf16> to vector<1x64x128xbf16>
    %49 = vector.shape_cast %48 : vector<1x64x128xbf16> to vector<64x128xbf16>
    %c15 = arith.constant 15 : index
    %c0_35 = arith.constant 0 : index
    %c0_36 = arith.constant 0 : index
    %50 = vector.load %arg4[%c15, %c0_35, %c0_36] : memref<25x128x128xbf16, #tpu.memory_space<vmem>>, vector<1x128x128xbf16>
    %51 = vector.shape_cast %50 : vector<1x128x128xbf16> to vector<128x128xbf16>
    %cst_37 = arith.constant dense<0.000000e+00> : vector<64x128xf32>
    %52 = tpu.matmul %49, %51, %cst_37 {dimension_numbers = #tpu.dot_dimension_numbers<[1], [0], [0], [1], [0, 0, 1, 1], [], []>} : vector<64x128xbf16>, vector<128x128xbf16>, vector<64x128xf32> -> vector<64x128xf32>
    %53 = arith.addf %47, %52 : vector<64x128xf32>
    %54 = vector.extract_strided_slice %29 {offsets = [0, 32, 0], sizes = [1, 64, 128], strides = [1, 1, 1]} : vector<1x96x128xbf16> to vector<1x64x128xbf16>
    %55 = vector.shape_cast %54 : vector<1x64x128xbf16> to vector<64x128xbf16>
    %c20 = arith.constant 20 : index
    %c0_38 = arith.constant 0 : index
    %c0_39 = arith.constant 0 : index
    %56 = vector.load %arg4[%c20, %c0_38, %c0_39] : memref<25x128x128xbf16, #tpu.memory_space<vmem>>, vector<1x128x128xbf16>
    %57 = vector.shape_cast %56 : vector<1x128x128xbf16> to vector<128x128xbf16>
    %cst_40 = arith.constant dense<0.000000e+00> : vector<64x128xf32>
    %58 = tpu.matmul %55, %57, %cst_40 {dimension_numbers = #tpu.dot_dimension_numbers<[1], [0], [0], [1], [0, 0, 1, 1], [], []>} : vector<64x128xbf16>, vector<128x128xbf16>, vector<64x128xf32> -> vector<64x128xf32>
    %59 = arith.addf %53, %58 : vector<64x128xf32>
    %60 = vector.extract_strided_slice %25 {offsets = [0, 0, 1, 0], sizes = [1, 12, 8, 128], strides = [1, 1, 1, 1]} : vector<1x12x16x128xf32> to vector<1x12x8x128xf32>
    %61 = vector.shape_cast %60 : vector<1x12x8x128xf32> to vector<1x96x128xf32>
    %62 = arith.truncf %61 : vector<1x96x128xf32> to vector<1x96x128xbf16>
    %63 = vector.extract_strided_slice %62 {offsets = [0, 0, 0], sizes = [1, 64, 128], strides = [1, 1, 1]} : vector<1x96x128xbf16> to vector<1x64x128xbf16>
    %64 = vector.shape_cast %63 : vector<1x64x128xbf16> to vector<64x128xbf16>
    %c1_41 = arith.constant 1 : index
    %c0_42 = arith.constant 0 : index
    %c0_43 = arith.constant 0 : index
    %65 = vector.load %arg4[%c1_41, %c0_42, %c0_43] : memref<25x128x128xbf16, #tpu.memory_space<vmem>>, vector<1x128x128xbf16>
    %66 = vector.shape_cast %65 : vector<1x128x128xbf16> to vector<128x128xbf16>
    %cst_44 = arith.constant dense<0.000000e+00> : vector<64x128xf32>
    %67 = tpu.matmul %64, %66, %cst_44 {dimension_numbers = #tpu.dot_dimension_numbers<[1], [0], [0], [1], [0, 0, 1, 1], [], []>} : vector<64x128xbf16>, vector<128x128xbf16>, vector<64x128xf32> -> vector<64x128xf32>
    %68 = arith.addf %59, %67 : vector<64x128xf32>
    %69 = vector.extract_strided_slice %62 {offsets = [0, 8, 0], sizes = [1, 64, 128], strides = [1, 1, 1]} : vector<1x96x128xbf16> to vector<1x64x128xbf16>
    %70 = vector.shape_cast %69 : vector<1x64x128xbf16> to vector<64x128xbf16>
    %c6 = arith.constant 6 : index
    %c0_45 = arith.constant 0 : index
    %c0_46 = arith.constant 0 : index
    %71 = vector.load %arg4[%c6, %c0_45, %c0_46] : memref<25x128x128xbf16, #tpu.memory_space<vmem>>, vector<1x128x128xbf16>
    %72 = vector.shape_cast %71 : vector<1x128x128xbf16> to vector<128x128xbf16>
    %cst_47 = arith.constant dense<0.000000e+00> : vector<64x128xf32>
    %73 = tpu.matmul %70, %72, %cst_47 {dimension_numbers = #tpu.dot_dimension_numbers<[1], [0], [0], [1], [0, 0, 1, 1], [], []>} : vector<64x128xbf16>, vector<128x128xbf16>, vector<64x128xf32> -> vector<64x128xf32>
    %74 = arith.addf %68, %73 : vector<64x128xf32>
    %75 = vector.extract_strided_slice %62 {offsets = [0, 16, 0], sizes = [1, 64, 128], strides = [1, 1, 1]} : vector<1x96x128xbf16> to vector<1x64x128xbf16>
    %76 = vector.shape_cast %75 : vector<1x64x128xbf16> to vector<64x128xbf16>
    %c11 = arith.constant 11 : index
    %c0_48 = arith.constant 0 : index
    %c0_49 = arith.constant 0 : index
    %77 = vector.load %arg4[%c11, %c0_48, %c0_49] : memref<25x128x128xbf16, #tpu.memory_space<vmem>>, vector<1x128x128xbf16>
    %78 = vector.shape_cast %77 : vector<1x128x128xbf16> to vector<128x128xbf16>
    %cst_50 = arith.constant dense<0.000000e+00> : vector<64x128xf32>
    %79 = tpu.matmul %76, %78, %cst_50 {dimension_numbers = #tpu.dot_dimension_numbers<[1], [0], [0], [1], [0, 0, 1, 1], [], []>} : vector<64x128xbf16>, vector<128x128xbf16>, vector<64x128xf32> -> vector<64x128xf32>
    %80 = arith.addf %74, %79 : vector<64x128xf32>
    %81 = vector.extract_strided_slice %62 {offsets = [0, 24, 0], sizes = [1, 64, 128], strides = [1, 1, 1]} : vector<1x96x128xbf16> to vector<1x64x128xbf16>
    %82 = vector.shape_cast %81 : vector<1x64x128xbf16> to vector<64x128xbf16>
    %c16 = arith.constant 16 : index
    %c0_51 = arith.constant 0 : index
    %c0_52 = arith.constant 0 : index
    %83 = vector.load %arg4[%c16, %c0_51, %c0_52] : memref<25x128x128xbf16, #tpu.memory_space<vmem>>, vector<1x128x128xbf16>
    %84 = vector.shape_cast %83 : vector<1x128x128xbf16> to vector<128x128xbf16>
    %cst_53 = arith.constant dense<0.000000e+00> : vector<64x128xf32>
    %85 = tpu.matmul %82, %84, %cst_53 {dimension_numbers = #tpu.dot_dimension_numbers<[1], [0], [0], [1], [0, 0, 1, 1], [], []>} : vector<64x128xbf16>, vector<128x128xbf16>, vector<64x128xf32> -> vector<64x128xf32>
    %86 = arith.addf %80, %85 : vector<64x128xf32>
    %87 = vector.extract_strided_slice %62 {offsets = [0, 32, 0], sizes = [1, 64, 128], strides = [1, 1, 1]} : vector<1x96x128xbf16> to vector<1x64x128xbf16>
    %88 = vector.shape_cast %87 : vector<1x64x128xbf16> to vector<64x128xbf16>
    %c21 = arith.constant 21 : index
    %c0_54 = arith.constant 0 : index
    %c0_55 = arith.constant 0 : index
    %89 = vector.load %arg4[%c21, %c0_54, %c0_55] : memref<25x128x128xbf16, #tpu.memory_space<vmem>>, vector<1x128x128xbf16>
    %90 = vector.shape_cast %89 : vector<1x128x128xbf16> to vector<128x128xbf16>
    %cst_56 = arith.constant dense<0.000000e+00> : vector<64x128xf32>
    %91 = tpu.matmul %88, %90, %cst_56 {dimension_numbers = #tpu.dot_dimension_numbers<[1], [0], [0], [1], [0, 0, 1, 1], [], []>} : vector<64x128xbf16>, vector<128x128xbf16>, vector<64x128xf32> -> vector<64x128xf32>
    %92 = arith.addf %86, %91 : vector<64x128xf32>
    %93 = vector.extract_strided_slice %25 {offsets = [0, 0, 2, 0], sizes = [1, 12, 8, 128], strides = [1, 1, 1, 1]} : vector<1x12x16x128xf32> to vector<1x12x8x128xf32>
    %94 = vector.shape_cast %93 : vector<1x12x8x128xf32> to vector<1x96x128xf32>
    %95 = arith.truncf %94 : vector<1x96x128xf32> to vector<1x96x128xbf16>
    %96 = vector.extract_strided_slice %95 {offsets = [0, 0, 0], sizes = [1, 64, 128], strides = [1, 1, 1]} : vector<1x96x128xbf16> to vector<1x64x128xbf16>
    %97 = vector.shape_cast %96 : vector<1x64x128xbf16> to vector<64x128xbf16>
    %c2_57 = arith.constant 2 : index
    %c0_58 = arith.constant 0 : index
    %c0_59 = arith.constant 0 : index
    %98 = vector.load %arg4[%c2_57, %c0_58, %c0_59] : memref<25x128x128xbf16, #tpu.memory_space<vmem>>, vector<1x128x128xbf16>
    %99 = vector.shape_cast %98 : vector<1x128x128xbf16> to vector<128x128xbf16>
    %cst_60 = arith.constant dense<0.000000e+00> : vector<64x128xf32>
    %100 = tpu.matmul %97, %99, %cst_60 {dimension_numbers = #tpu.dot_dimension_numbers<[1], [0], [0], [1], [0, 0, 1, 1], [], []>} : vector<64x128xbf16>, vector<128x128xbf16>, vector<64x128xf32> -> vector<64x128xf32>
    %101 = arith.addf %92, %100 : vector<64x128xf32>
    %102 = vector.extract_strided_slice %95 {offsets = [0, 8, 0], sizes = [1, 64, 128], strides = [1, 1, 1]} : vector<1x96x128xbf16> to vector<1x64x128xbf16>
    %103 = vector.shape_cast %102 : vector<1x64x128xbf16> to vector<64x128xbf16>
    %c7 = arith.constant 7 : index
    %c0_61 = arith.constant 0 : index
    %c0_62 = arith.constant 0 : index
    %104 = vector.load %arg4[%c7, %c0_61, %c0_62] : memref<25x128x128xbf16, #tpu.memory_space<vmem>>, vector<1x128x128xbf16>
    %105 = vector.shape_cast %104 : vector<1x128x128xbf16> to vector<128x128xbf16>
    %cst_63 = arith.constant dense<0.000000e+00> : vector<64x128xf32>
    %106 = tpu.matmul %103, %105, %cst_63 {dimension_numbers = #tpu.dot_dimension_numbers<[1], [0], [0], [1], [0, 0, 1, 1], [], []>} : vector<64x128xbf16>, vector<128x128xbf16>, vector<64x128xf32> -> vector<64x128xf32>
    %107 = arith.addf %101, %106 : vector<64x128xf32>
    %108 = vector.extract_strided_slice %95 {offsets = [0, 16, 0], sizes = [1, 64, 128], strides = [1, 1, 1]} : vector<1x96x128xbf16> to vector<1x64x128xbf16>
    %109 = vector.shape_cast %108 : vector<1x64x128xbf16> to vector<64x128xbf16>
    %c12 = arith.constant 12 : index
    %c0_64 = arith.constant 0 : index
    %c0_65 = arith.constant 0 : index
    %110 = vector.load %arg4[%c12, %c0_64, %c0_65] : memref<25x128x128xbf16, #tpu.memory_space<vmem>>, vector<1x128x128xbf16>
    %111 = vector.shape_cast %110 : vector<1x128x128xbf16> to vector<128x128xbf16>
    %cst_66 = arith.constant dense<0.000000e+00> : vector<64x128xf32>
    %112 = tpu.matmul %109, %111, %cst_66 {dimension_numbers = #tpu.dot_dimension_numbers<[1], [0], [0], [1], [0, 0, 1, 1], [], []>} : vector<64x128xbf16>, vector<128x128xbf16>, vector<64x128xf32> -> vector<64x128xf32>
    %113 = arith.addf %107, %112 : vector<64x128xf32>
    %114 = vector.extract_strided_slice %95 {offsets = [0, 24, 0], sizes = [1, 64, 128], strides = [1, 1, 1]} : vector<1x96x128xbf16> to vector<1x64x128xbf16>
    %115 = vector.shape_cast %114 : vector<1x64x128xbf16> to vector<64x128xbf16>
    %c17 = arith.constant 17 : index
    %c0_67 = arith.constant 0 : index
    %c0_68 = arith.constant 0 : index
    %116 = vector.load %arg4[%c17, %c0_67, %c0_68] : memref<25x128x128xbf16, #tpu.memory_space<vmem>>, vector<1x128x128xbf16>
    %117 = vector.shape_cast %116 : vector<1x128x128xbf16> to vector<128x128xbf16>
    %cst_69 = arith.constant dense<0.000000e+00> : vector<64x128xf32>
    %118 = tpu.matmul %115, %117, %cst_69 {dimension_numbers = #tpu.dot_dimension_numbers<[1], [0], [0], [1], [0, 0, 1, 1], [], []>} : vector<64x128xbf16>, vector<128x128xbf16>, vector<64x128xf32> -> vector<64x128xf32>
    %119 = arith.addf %113, %118 : vector<64x128xf32>
    %120 = vector.extract_strided_slice %95 {offsets = [0, 32, 0], sizes = [1, 64, 128], strides = [1, 1, 1]} : vector<1x96x128xbf16> to vector<1x64x128xbf16>
    %121 = vector.shape_cast %120 : vector<1x64x128xbf16> to vector<64x128xbf16>
    %c22 = arith.constant 22 : index
    %c0_70 = arith.constant 0 : index
    %c0_71 = arith.constant 0 : index
    %122 = vector.load %arg4[%c22, %c0_70, %c0_71] : memref<25x128x128xbf16, #tpu.memory_space<vmem>>, vector<1x128x128xbf16>
    %123 = vector.shape_cast %122 : vector<1x128x128xbf16> to vector<128x128xbf16>
    %cst_72 = arith.constant dense<0.000000e+00> : vector<64x128xf32>
    %124 = tpu.matmul %121, %123, %cst_72 {dimension_numbers = #tpu.dot_dimension_numbers<[1], [0], [0], [1], [0, 0, 1, 1], [], []>} : vector<64x128xbf16>, vector<128x128xbf16>, vector<64x128xf32> -> vector<64x128xf32>
    %125 = arith.addf %119, %124 : vector<64x128xf32>
    %126 = vector.extract_strided_slice %25 {offsets = [0, 0, 3, 0], sizes = [1, 12, 8, 128], strides = [1, 1, 1, 1]} : vector<1x12x16x128xf32> to vector<1x12x8x128xf32>
    %127 = vector.shape_cast %126 : vector<1x12x8x128xf32> to vector<1x96x128xf32>
    %128 = arith.truncf %127 : vector<1x96x128xf32> to vector<1x96x128xbf16>
    %129 = vector.extract_strided_slice %128 {offsets = [0, 0, 0], sizes = [1, 64, 128], strides = [1, 1, 1]} : vector<1x96x128xbf16> to vector<1x64x128xbf16>
    %130 = vector.shape_cast %129 : vector<1x64x128xbf16> to vector<64x128xbf16>
    %c3_73 = arith.constant 3 : index
    %c0_74 = arith.constant 0 : index
    %c0_75 = arith.constant 0 : index
    %131 = vector.load %arg4[%c3_73, %c0_74, %c0_75] : memref<25x128x128xbf16, #tpu.memory_space<vmem>>, vector<1x128x128xbf16>
    %132 = vector.shape_cast %131 : vector<1x128x128xbf16> to vector<128x128xbf16>
    %cst_76 = arith.constant dense<0.000000e+00> : vector<64x128xf32>
    %133 = tpu.matmul %130, %132, %cst_76 {dimension_numbers = #tpu.dot_dimension_numbers<[1], [0], [0], [1], [0, 0, 1, 1], [], []>} : vector<64x128xbf16>, vector<128x128xbf16>, vector<64x128xf32> -> vector<64x128xf32>
    %134 = arith.addf %125, %133 : vector<64x128xf32>
    %135 = vector.extract_strided_slice %128 {offsets = [0, 8, 0], sizes = [1, 64, 128], strides = [1, 1, 1]} : vector<1x96x128xbf16> to vector<1x64x128xbf16>
    %136 = vector.shape_cast %135 : vector<1x64x128xbf16> to vector<64x128xbf16>
    %c8 = arith.constant 8 : index
    %c0_77 = arith.constant 0 : index
    %c0_78 = arith.constant 0 : index
    %137 = vector.load %arg4[%c8, %c0_77, %c0_78] : memref<25x128x128xbf16, #tpu.memory_space<vmem>>, vector<1x128x128xbf16>
    %138 = vector.shape_cast %137 : vector<1x128x128xbf16> to vector<128x128xbf16>
    %cst_79 = arith.constant dense<0.000000e+00> : vector<64x128xf32>
    %139 = tpu.matmul %136, %138, %cst_79 {dimension_numbers = #tpu.dot_dimension_numbers<[1], [0], [0], [1], [0, 0, 1, 1], [], []>} : vector<64x128xbf16>, vector<128x128xbf16>, vector<64x128xf32> -> vector<64x128xf32>
    %140 = arith.addf %134, %139 : vector<64x128xf32>
    %141 = vector.extract_strided_slice %128 {offsets = [0, 16, 0], sizes = [1, 64, 128], strides = [1, 1, 1]} : vector<1x96x128xbf16> to vector<1x64x128xbf16>
    %142 = vector.shape_cast %141 : vector<1x64x128xbf16> to vector<64x128xbf16>
    %c13 = arith.constant 13 : index
    %c0_80 = arith.constant 0 : index
    %c0_81 = arith.constant 0 : index
    %143 = vector.load %arg4[%c13, %c0_80, %c0_81] : memref<25x128x128xbf16, #tpu.memory_space<vmem>>, vector<1x128x128xbf16>
    %144 = vector.shape_cast %143 : vector<1x128x128xbf16> to vector<128x128xbf16>
    %cst_82 = arith.constant dense<0.000000e+00> : vector<64x128xf32>
    %145 = tpu.matmul %142, %144, %cst_82 {dimension_numbers = #tpu.dot_dimension_numbers<[1], [0], [0], [1], [0, 0, 1, 1], [], []>} : vector<64x128xbf16>, vector<128x128xbf16>, vector<64x128xf32> -> vector<64x128xf32>
    %146 = arith.addf %140, %145 : vector<64x128xf32>
    %147 = vector.extract_strided_slice %128 {offsets = [0, 24, 0], sizes = [1, 64, 128], strides = [1, 1, 1]} : vector<1x96x128xbf16> to vector<1x64x128xbf16>
    %148 = vector.shape_cast %147 : vector<1x64x128xbf16> to vector<64x128xbf16>
    %c18 = arith.constant 18 : index
    %c0_83 = arith.constant 0 : index
    %c0_84 = arith.constant 0 : index
    %149 = vector.load %arg4[%c18, %c0_83, %c0_84] : memref<25x128x128xbf16, #tpu.memory_space<vmem>>, vector<1x128x128xbf16>
    %150 = vector.shape_cast %149 : vector<1x128x128xbf16> to vector<128x128xbf16>
    %cst_85 = arith.constant dense<0.000000e+00> : vector<64x128xf32>
    %151 = tpu.matmul %148, %150, %cst_85 {dimension_numbers = #tpu.dot_dimension_numbers<[1], [0], [0], [1], [0, 0, 1, 1], [], []>} : vector<64x128xbf16>, vector<128x128xbf16>, vector<64x128xf32> -> vector<64x128xf32>
    %152 = arith.addf %146, %151 : vector<64x128xf32>
    %153 = vector.extract_strided_slice %128 {offsets = [0, 32, 0], sizes = [1, 64, 128], strides = [1, 1, 1]} : vector<1x96x128xbf16> to vector<1x64x128xbf16>
    %154 = vector.shape_cast %153 : vector<1x64x128xbf16> to vector<64x128xbf16>
    %c23 = arith.constant 23 : index
    %c0_86 = arith.constant 0 : index
    %c0_87 = arith.constant 0 : index
    %155 = vector.load %arg4[%c23, %c0_86, %c0_87] : memref<25x128x128xbf16, #tpu.memory_space<vmem>>, vector<1x128x128xbf16>
    %156 = vector.shape_cast %155 : vector<1x128x128xbf16> to vector<128x128xbf16>
    %cst_88 = arith.constant dense<0.000000e+00> : vector<64x128xf32>
    %157 = tpu.matmul %154, %156, %cst_88 {dimension_numbers = #tpu.dot_dimension_numbers<[1], [0], [0], [1], [0, 0, 1, 1], [], []>} : vector<64x128xbf16>, vector<128x128xbf16>, vector<64x128xf32> -> vector<64x128xf32>
    %158 = arith.addf %152, %157 : vector<64x128xf32>
    %159 = vector.extract_strided_slice %25 {offsets = [0, 0, 4, 0], sizes = [1, 12, 8, 128], strides = [1, 1, 1, 1]} : vector<1x12x16x128xf32> to vector<1x12x8x128xf32>
    %160 = vector.shape_cast %159 : vector<1x12x8x128xf32> to vector<1x96x128xf32>
    %161 = arith.truncf %160 : vector<1x96x128xf32> to vector<1x96x128xbf16>
    %162 = vector.extract_strided_slice %161 {offsets = [0, 0, 0], sizes = [1, 64, 128], strides = [1, 1, 1]} : vector<1x96x128xbf16> to vector<1x64x128xbf16>
    %163 = vector.shape_cast %162 : vector<1x64x128xbf16> to vector<64x128xbf16>
    %c4 = arith.constant 4 : index
    %c0_89 = arith.constant 0 : index
    %c0_90 = arith.constant 0 : index
    %164 = vector.load %arg4[%c4, %c0_89, %c0_90] : memref<25x128x128xbf16, #tpu.memory_space<vmem>>, vector<1x128x128xbf16>
    %165 = vector.shape_cast %164 : vector<1x128x128xbf16> to vector<128x128xbf16>
    %cst_91 = arith.constant dense<0.000000e+00> : vector<64x128xf32>
    %166 = tpu.matmul %163, %165, %cst_91 {dimension_numbers = #tpu.dot_dimension_numbers<[1], [0], [0], [1], [0, 0, 1, 1], [], []>} : vector<64x128xbf16>, vector<128x128xbf16>, vector<64x128xf32> -> vector<64x128xf32>
    %167 = arith.addf %158, %166 : vector<64x128xf32>
    %168 = vector.extract_strided_slice %161 {offsets = [0, 8, 0], sizes = [1, 64, 128], strides = [1, 1, 1]} : vector<1x96x128xbf16> to vector<1x64x128xbf16>
    %169 = vector.shape_cast %168 : vector<1x64x128xbf16> to vector<64x128xbf16>
    %c9 = arith.constant 9 : index
    %c0_92 = arith.constant 0 : index
    %c0_93 = arith.constant 0 : index
    %170 = vector.load %arg4[%c9, %c0_92, %c0_93] : memref<25x128x128xbf16, #tpu.memory_space<vmem>>, vector<1x128x128xbf16>
    %171 = vector.shape_cast %170 : vector<1x128x128xbf16> to vector<128x128xbf16>
    %cst_94 = arith.constant dense<0.000000e+00> : vector<64x128xf32>
    %172 = tpu.matmul %169, %171, %cst_94 {dimension_numbers = #tpu.dot_dimension_numbers<[1], [0], [0], [1], [0, 0, 1, 1], [], []>} : vector<64x128xbf16>, vector<128x128xbf16>, vector<64x128xf32> -> vector<64x128xf32>
    %173 = arith.addf %167, %172 : vector<64x128xf32>
    %174 = vector.extract_strided_slice %161 {offsets = [0, 16, 0], sizes = [1, 64, 128], strides = [1, 1, 1]} : vector<1x96x128xbf16> to vector<1x64x128xbf16>
    %175 = vector.shape_cast %174 : vector<1x64x128xbf16> to vector<64x128xbf16>
    %c14 = arith.constant 14 : index
    %c0_95 = arith.constant 0 : index
    %c0_96 = arith.constant 0 : index
    %176 = vector.load %arg4[%c14, %c0_95, %c0_96] : memref<25x128x128xbf16, #tpu.memory_space<vmem>>, vector<1x128x128xbf16>
    %177 = vector.shape_cast %176 : vector<1x128x128xbf16> to vector<128x128xbf16>
    %cst_97 = arith.constant dense<0.000000e+00> : vector<64x128xf32>
    %178 = tpu.matmul %175, %177, %cst_97 {dimension_numbers = #tpu.dot_dimension_numbers<[1], [0], [0], [1], [0, 0, 1, 1], [], []>} : vector<64x128xbf16>, vector<128x128xbf16>, vector<64x128xf32> -> vector<64x128xf32>
    %179 = arith.addf %173, %178 : vector<64x128xf32>
    %180 = vector.extract_strided_slice %161 {offsets = [0, 24, 0], sizes = [1, 64, 128], strides = [1, 1, 1]} : vector<1x96x128xbf16> to vector<1x64x128xbf16>
    %181 = vector.shape_cast %180 : vector<1x64x128xbf16> to vector<64x128xbf16>
    %c19 = arith.constant 19 : index
    %c0_98 = arith.constant 0 : index
    %c0_99 = arith.constant 0 : index
    %182 = vector.load %arg4[%c19, %c0_98, %c0_99] : memref<25x128x128xbf16, #tpu.memory_space<vmem>>, vector<1x128x128xbf16>
    %183 = vector.shape_cast %182 : vector<1x128x128xbf16> to vector<128x128xbf16>
    %cst_100 = arith.constant dense<0.000000e+00> : vector<64x128xf32>
    %184 = tpu.matmul %181, %183, %cst_100 {dimension_numbers = #tpu.dot_dimension_numbers<[1], [0], [0], [1], [0, 0, 1, 1], [], []>} : vector<64x128xbf16>, vector<128x128xbf16>, vector<64x128xf32> -> vector<64x128xf32>
    %185 = arith.addf %179, %184 : vector<64x128xf32>
    %186 = vector.extract_strided_slice %161 {offsets = [0, 32, 0], sizes = [1, 64, 128], strides = [1, 1, 1]} : vector<1x96x128xbf16> to vector<1x64x128xbf16>
    %187 = vector.shape_cast %186 : vector<1x64x128xbf16> to vector<64x128xbf16>
    %c24 = arith.constant 24 : index
    %c0_101 = arith.constant 0 : index
    %c0_102 = arith.constant 0 : index
    %188 = vector.load %arg4[%c24, %c0_101, %c0_102] : memref<25x128x128xbf16, #tpu.memory_space<vmem>>, vector<1x128x128xbf16>
    %189 = vector.shape_cast %188 : vector<1x128x128xbf16> to vector<128x128xbf16>
    %cst_103 = arith.constant dense<0.000000e+00> : vector<64x128xf32>
    %190 = tpu.matmul %187, %189, %cst_103 {dimension_numbers = #tpu.dot_dimension_numbers<[1], [0], [0], [1], [0, 0, 1, 1], [], []>} : vector<64x128xbf16>, vector<128x128xbf16>, vector<64x128xf32> -> vector<64x128xf32>
    %191 = arith.addf %185, %190 : vector<64x128xf32>
    %c0_104 = arith.constant 0 : index
    %c0_105 = arith.constant 0 : index
    %192 = vector.load %arg5[%c0_104, %c0_105] : memref<1x128xf32, #tpu.memory_space<vmem>>, vector<1x128xf32>
    %193 = vector.broadcast %192 : vector<1x128xf32> to vector<64x128xf32>
    %194 = arith.addf %191, %193 : vector<64x128xf32>
    %cst_106 = arith.constant 0.000000e+00 : f32
    %195 = vector.broadcast %cst_106 : f32 to vector<64x128xf32>
    %196 = arith.maximumf %194, %195 : vector<64x128xf32>
    %197 = vector.shape_cast %196 : vector<64x128xf32> to vector<1x4x2x8x128xf32>
    %198 = vector.extract_strided_slice %197 {offsets = [0, 0, 0, 0, 0], sizes = [1, 4, 1, 8, 128], strides = [1, 1, 1, 1, 1]} : vector<1x4x2x8x128xf32> to vector<1x4x1x8x128xf32>
    %199 = vector.shape_cast %198 : vector<1x4x1x8x128xf32> to vector<1x4x8x128xf32>
    %200 = vector.extract_strided_slice %197 {offsets = [0, 0, 1, 0, 0], sizes = [1, 4, 1, 8, 128], strides = [1, 1, 1, 1, 1]} : vector<1x4x2x8x128xf32> to vector<1x4x1x8x128xf32>
    %201 = vector.shape_cast %200 : vector<1x4x1x8x128xf32> to vector<1x4x8x128xf32>
    %202 = arith.maximumf %199, %201 : vector<1x4x8x128xf32>
    %203 = vector.extract_strided_slice %202 {offsets = [0, 0, 0, 0], sizes = [1, 4, 7, 128], strides = [1, 1, 1, 1]} : vector<1x4x8x128xf32> to vector<1x4x7x128xf32>
    %204 = vector.extract_strided_slice %202 {offsets = [0, 0, 1, 0], sizes = [1, 4, 7, 128], strides = [1, 1, 1, 1]} : vector<1x4x8x128xf32> to vector<1x4x7x128xf32>
    %205 = arith.maximumf %203, %204 : vector<1x4x7x128xf32>
    %206 = arith.truncf %205 : vector<1x4x7x128xf32> to vector<1x4x7x128xbf16>
    %c0_107 = arith.constant 0 : index
    %c0_108 = arith.constant 0 : index
    %c0_109 = arith.constant 0 : index
    %c0_110 = arith.constant 0 : index
    %207 = vector.load %arg6[%c0_107, %c0_108, %c0_109, %c0_110] : memref<1x4x8x128xbf16, #tpu.memory_space<vmem>>, vector<1x4x7x128xbf16>
    tpu.vector_store %arg6[%c0_107, %c0_108, %c0_109, %c0_110], %206 {strides = array<i32>} : memref<1x4x8x128xbf16, #tpu.memory_space<vmem>>, vector<1x4x7x128xbf16>,
    %208 = vector.extract_strided_slice %202 {offsets = [0, 0, 7, 0], sizes = [1, 4, 1, 128], strides = [1, 1, 1, 1]} : vector<1x4x8x128xf32> to vector<1x4x1x128xf32>
    %209 = arith.truncf %208 : vector<1x4x1x128xf32> to vector<1x4x1x128xbf16>
    %c0_111 = arith.constant 0 : index
    %c0_112 = arith.constant 0 : index
    %c7_113 = arith.constant 7 : index
    %c0_114 = arith.constant 0 : index
    %210 = vector.load %arg6[%c0_111, %c0_112, %c7_113, %c0_114] : memref<1x4x8x128xbf16, #tpu.memory_space<vmem>>, vector<1x4x1x128xbf16>
    tpu.vector_store %arg6[%c0_111, %c0_112, %c7_113, %c0_114], %209 {strides = array<i32>} : memref<1x4x8x128xbf16, #tpu.memory_space<vmem>>, vector<1x4x1x128xbf16>,
    return
  }
  func.func @transform_0(%arg0: i32) -> (i32, i32, i32, i32, i32) {
    %c0_i32 = arith.constant 0 : i32
    %c0_i32_0 = arith.constant 0 : i32
    %c0_i32_1 = arith.constant 0 : i32
    %c0_i32_2 = arith.constant 0 : i32
    %c0_i32_3 = arith.constant 0 : i32
    return %c0_i32, %arg0, %c0_i32_0, %c0_i32_1, %c0_i32_2 : i32, i32, i32, i32, i32
  }
  func.func @transform_1(%arg0: i32) -> (i32, i32) {
    %c0_i32 = arith.constant 0 : i32
    %c0_i32_0 = arith.constant 0 : i32
    %c0_i32_1 = arith.constant 0 : i32
    return %c0_i32, %c0_i32_0 : i32, i32
  }
  func.func @transform_2(%arg0: i32) -> (i32, i32) {
    %c0_i32 = arith.constant 0 : i32
    %c0_i32_0 = arith.constant 0 : i32
    %c0_i32_1 = arith.constant 0 : i32
    return %c0_i32, %c0_i32_0 : i32, i32
  }
  func.func @transform_3(%arg0: i32) -> (i32, i32, i32) {
    %c0_i32 = arith.constant 0 : i32
    %c0_i32_0 = arith.constant 0 : i32
    %c0_i32_1 = arith.constant 0 : i32
    %c0_i32_2 = arith.constant 0 : i32
    return %c0_i32, %c0_i32_0, %c0_i32_1 : i32, i32, i32
  }
  func.func @transform_4(%arg0: i32) -> (i32, i32) {
    %c0_i32 = arith.constant 0 : i32
    %c0_i32_0 = arith.constant 0 : i32
    %c0_i32_1 = arith.constant 0 : i32
    return %c0_i32, %c0_i32_0 : i32, i32
  }
  func.func @transform_5(%arg0: i32) -> (i32, i32, i32, i32) {
    %c0_i32 = arith.constant 0 : i32
    %c0_i32_0 = arith.constant 0 : i32
    %c0_i32_1 = arith.constant 0 : i32
    %c0_i32_2 = arith.constant 0 : i32
    return %arg0, %c0_i32, %c0_i32_0, %c0_i32_1 : i32, i32, i32, i32
  }
}

module attributes {stable_mosaic.version = 11 : i64} {
  func.func @_fc_kernel(%arg0: i32, %arg1: memref<8x4096xbf16, #tpu.memory_space<vmem>>, %arg2: memref<4096x512xbf16, #tpu.memory_space<vmem>>, %arg3: memref<1x512xf32, #tpu.memory_space<vmem>>, %arg4: memref<8x512xf32, #tpu.memory_space<vmem>>) attributes {dimension_semantics = [#tpu.dimension_semantics<parallel>], iteration_bounds = array<i64: 1>, scalar_prefetch = 0 : i64, scratch_operands = 0 : i64, tpu.core_type = #tpu.core_type<tc>, window_params = [{transform_indices = @transform_0, window_bounds = array<i64: 8, 4096>}, {pipeline_mode = #tpu.pipeline_mode<synchronous>, transform_indices = @transform_1, window_bounds = array<i64: 4096, 512>}, {pipeline_mode = #tpu.pipeline_mode<synchronous>, transform_indices = @transform_2, window_bounds = array<i64: 1, 512>}, {transform_indices = @transform_3, window_bounds = array<i64: 8, 512>}]} {
    %c0 = arith.constant 0 : index
    %c0_0 = arith.constant 0 : index
    %0 = vector.load %arg1[%c0, %c0_0] : memref<8x4096xbf16, #tpu.memory_space<vmem>>, vector<8x4096xbf16>
    %c0_1 = arith.constant 0 : index
    %c0_2 = arith.constant 0 : index
    %1 = vector.load %arg2[%c0_1, %c0_2] : memref<4096x512xbf16, #tpu.memory_space<vmem>>, vector<4096x512xbf16>
    %cst = arith.constant dense<0.000000e+00> : vector<8x512xf32>
    %2 = tpu.matmul %0, %1, %cst {dimension_numbers = #tpu.dot_dimension_numbers<[1], [0], [0], [1], [0, 0, 1, 1], [], []>} : vector<8x4096xbf16>, vector<4096x512xbf16>, vector<8x512xf32> -> vector<8x512xf32>
    %c0_3 = arith.constant 0 : index
    %c0_4 = arith.constant 0 : index
    %3 = vector.load %arg3[%c0_3, %c0_4] : memref<1x512xf32, #tpu.memory_space<vmem>>, vector<1x512xf32>
    %4 = vector.broadcast %3 : vector<1x512xf32> to vector<8x512xf32>
    %5 = arith.addf %2, %4 : vector<8x512xf32>
    %cst_5 = arith.constant 0.000000e+00 : f32
    %6 = vector.broadcast %cst_5 : f32 to vector<8x512xf32>
    %7 = arith.maximumf %5, %6 : vector<8x512xf32>
    %c0_6 = arith.constant 0 : index
    %c0_7 = arith.constant 0 : index
    %8 = vector.load %arg4[%c0_6, %c0_7] : memref<8x512xf32, #tpu.memory_space<vmem>>, vector<8x512xf32>
    tpu.vector_store %arg4[%c0_6, %c0_7], %7 {strides = array<i32>} : memref<8x512xf32, #tpu.memory_space<vmem>>, vector<8x512xf32>,
    return
  }
  func.func @transform_0(%arg0: i32) -> (i32, i32) {
    %c0_i32 = arith.constant 0 : i32
    %c0_i32_0 = arith.constant 0 : i32
    return %arg0, %c0_i32 : i32, i32
  }
  func.func @transform_1(%arg0: i32) -> (i32, i32) {
    %c0_i32 = arith.constant 0 : i32
    %c0_i32_0 = arith.constant 0 : i32
    %c0_i32_1 = arith.constant 0 : i32
    return %c0_i32, %c0_i32_0 : i32, i32
  }
  func.func @transform_2(%arg0: i32) -> (i32, i32) {
    %c0_i32 = arith.constant 0 : i32
    %c0_i32_0 = arith.constant 0 : i32
    %c0_i32_1 = arith.constant 0 : i32
    return %c0_i32, %c0_i32_0 : i32, i32
  }
  func.func @transform_3(%arg0: i32) -> (i32, i32) {
    %c0_i32 = arith.constant 0 : i32
    %c0_i32_0 = arith.constant 0 : i32
    return %arg0, %c0_i32 : i32, i32
  }
}

</mosaic_0001>

<bundles_post_ra>
// kernel: mnist_mlp_forward.2
= control target key start
LH: loop header
LB: loop body
LE: loop exit
PB: predicated region body
PF: predicated region fallthrough
CT: control target
= control target key end

     0   :  { %s6593_s18 = smov 0   ;;  %s6595_s19 = smov 0   ;;  %s8356_s0 = inlined_call_operand.vmem [shape: bf16[4,8,12,16,32], index: 0, kind: input, shape index: {}]   ;;  %s8357_s1 = inlined_call_operand.vmem [shape: bf16[32,128], index: 1, kind: input, shape index: {}]   ;;  %s8358_s2 = inlined_call_operand.vmem [shape: f32[1,128], index: 2, kind: input, shape index: {}]   ;;  %s8359_s3 = inlined_call_operand.vmem [shape: bf16[25,128,128], index: 3, kind: input, shape index: {}]   ;;  %s8360_s4 = inlined_call_operand.vmem [shape: f32[1,128], index: 4, kind: input, shape index: {}]   ;;  %s8361_s5 = inlined_call_operand.vmem [shape: bf16[8,4,8,128], index: 5, kind: output, shape index: {}]  }
   0x1   :  { %s6597_s20 = smov 0  }
   0x2 LB: > { %s4732_s21 = sadd.s32 4294967295, %s6561_s20   ;;  %s6610_s22 = sadd.s32 1, %s6561_s20   ;;  %s6561_s20 = sphi %s6597_s20, %s8409_s20   ;;  %s6557_s19 = sphi %s6595_s19, %s8408_s19   ;;  %s6553_s18 = sphi %s6593_s18, %s8407_s18  }
   0x3   : > { %s19_s23 = ssub.s32 %s6561_s20, %s6610_s22  ;;  %s22_s24 = sadd.s32 1, %s6557_s19 }
   0x4   : > { %p20_p0 = scmp.eq.s32.totalorder %s19_s23, 0  ;;  %p29_p1 = scmp.ne.s32.totalorder %s6557_s19, %s6553_s18 }
   0x5   : > { %p30_p2 = scmp.eq.s32.totalorder %s6561_s20, 0  ;;  %p4735_p4 = scmp.ge.s32.totalorder %s6561_s20, 8 }
   0x6   : > { %s6619_s25 = scalar_select %p20_p0, %s6557_s19, %s22_s24  }
   0x7   : > { %p31_p3 = por %p30_p2, %p29_p1  ;;  %177 = sbr.rel (%p4735_p4) target bundleno = 65 (0x41), region = 32 }
   0xc   : > { %180 = sbr.rel (!%p31_p3) target bundleno = 65 (0x41), region = 36  ;;  %s182_s26 = sand.u32 (%p31_p3), 1, %s6557_s19  }
   0xd   : > { %s6510_s27 = smul.u32 (%p31_p3), 96, %s6561_s20 }
   0xe   : > { %s6509_s28 = smul.u32 (%p31_p3), 384, %s182_s26 }
   0xf   : > { %s6627_s6 = scalar_lea.vmem (%p31_p3), %s8356_s0, %s6510_s27 }
  0x10   : > { %v204_v0 = vld [vmem:[%s6627_s6] sm:$0xff] (%p31_p3)   ;;  %v208_v1 = vld [vmem:[%s6627_s6 + $0x8] sm:$0xff] (%p31_p3)   ;;  %v212_v2 = vld [vmem:[%s6627_s6 + $0x10] sm:$0xff] (%p31_p3)   ;;  %s6632_s7 = scalar_lea.vmem (%p31_p3), [#allocation2], %s6509_s28 }
  0x11   : > { %205 = vst [vmem:[%s6632_s7] sm:$0xff] %v204_v0   ;;  %v216_v3 = vld [vmem:[%s6627_s6 + $0x18] sm:$0xff]   ;;  %v220_v4 = vld [vmem:[%s6627_s6 + $0x20] sm:$0xff]   ;;  %v224_v5 = vld [vmem:[%s6627_s6 + $0x28] sm:$0xff]  }
  0x12   : > { %209 = vst [vmem:[%s6632_s7 + $0x8] sm:$0xff] %v208_v1   ;;  %v228_v6 = vld [vmem:[%s6627_s6 + $0x30] sm:$0xff]   ;;  %v232_v7 = vld [vmem:[%s6627_s6 + $0x38] sm:$0xff]   ;;  %v236_v8 = vld [vmem:[%s6627_s6 + $0x40] sm:$0xff]  }
  0x13   : > { %213 = vst [vmem:[%s6632_s7 + $0x10] sm:$0xff] %v212_v2   ;;  %v240_v9 = vld [vmem:[%s6627_s6 + $0x48] sm:$0xff]   ;;  %v244_v10 = vld [vmem:[%s6627_s6 + $0x50] sm:$0xff]   ;;  %v248_v11 = vld [vmem:[%s6627_s6 + $0x58] sm:$0xff]  }
  0x14   : > { %217 = vst [vmem:[%s6632_s7 + $0x18] sm:$0xff] %v216_v3   ;;  %v252_v12 = vld [vmem:[%s6627_s6 + $0x300] sm:$0xff]   ;;  %v256_v13 = vld [vmem:[%s6627_s6 + $0x308] sm:$0xff]   ;;  %v260_v14 = vld [vmem:[%s6627_s6 + $0x310] sm:$0xff]  }
  0x15   : > { %221 = vst [vmem:[%s6632_s7 + $0x20] sm:$0xff] %v220_v4   ;;  %v264_v15 = vld [vmem:[%s6627_s6 + $0x318] sm:$0xff]   ;;  %v268_v16 = vld [vmem:[%s6627_s6 + $0x320] sm:$0xff]   ;;  %v272_v17 = vld [vmem:[%s6627_s6 + $0x328] sm:$0xff]  }
  0x16   : > { %225 = vst [vmem:[%s6632_s7 + $0x28] sm:$0xff] %v224_v5   ;;  %v276_v18 = vld [vmem:[%s6627_s6 + $0x330] sm:$0xff]   ;;  %v280_v19 = vld [vmem:[%s6627_s6 + $0x338] sm:$0xff]   ;;  %v284_v20 = vld [vmem:[%s6627_s6 + $0x340] sm:$0xff]  }
  0x17   : > { %229 = vst [vmem:[%s6632_s7 + $0x30] sm:$0xff] %v228_v6   ;;  %v288_v21 = vld [vmem:[%s6627_s6 + $0x348] sm:$0xff]   ;;  %v292_v22 = vld [vmem:[%s6627_s6 + $0x350] sm:$0xff]   ;;  %v296_v23 = vld [vmem:[%s6627_s6 + $0x358] sm:$0xff]  }
  0x18   : > { %233 = vst [vmem:[%s6632_s7 + $0x38] sm:$0xff] %v232_v7   ;;  %v300_v24 = vld [vmem:[%s6627_s6 + $0x600] sm:$0xff]   ;;  %v304_v25 = vld [vmem:[%s6627_s6 + $0x608] sm:$0xff]   ;;  %v308_v26 = vld [vmem:[%s6627_s6 + $0x610] sm:$0xff]  }
  0x19   : > { %237 = vst [vmem:[%s6632_s7 + $0x40] sm:$0xff] %v236_v8   ;;  %v312_v27 = vld [vmem:[%s6627_s6 + $0x618] sm:$0xff]   ;;  %v316_v28 = vld [vmem:[%s6627_s6 + $0x620] sm:$0xff]   ;;  %v320_v29 = vld [vmem:[%s6627_s6 + $0x628] sm:$0xff]  }
  0x1a   : > { %241 = vst [vmem:[%s6632_s7 + $0x48] sm:$0xff] %v240_v9   ;;  %v324_v30 = vld [vmem:[%s6627_s6 + $0x630] sm:$0xff]   ;;  %v328_v31 = vld [vmem:[%s6627_s6 + $0x638] sm:$0xff]   ;;  %v332_v32 = vld [vmem:[%s6627_s6 + $0x640] sm:$0xff]  }
  0x1b   : > { %245 = vst [vmem:[%s6632_s7 + $0x50] sm:$0xff] %v244_v10   ;;  %v336_v33 = vld [vmem:[%s6627_s6 + $0x648] sm:$0xff]   ;;  %v340_v34 = vld [vmem:[%s6627_s6 + $0x650] sm:$0xff]   ;;  %v344_v35 = vld [vmem:[%s6627_s6 + $0x658] sm:$0xff]  }
  0x1c   : > { %249 = vst [vmem:[%s6632_s7 + $0x58] sm:$0xff] %v248_v11   ;;  %v348_v36 = vld [vmem:[%s6627_s6 + $0x900] sm:$0xff]   ;;  %v352_v37 = vld [vmem:[%s6627_s6 + $0x908] sm:$0xff]   ;;  %v356_v38 = vld [vmem:[%s6627_s6 + $0x910] sm:$0xff]  }
  0x1d   : > { %253 = vst [vmem:[%s6632_s7 + $0x60] sm:$0xff] %v252_v12   ;;  %v360_v39 = vld [vmem:[%s6627_s6 + $0x918] sm:$0xff]   ;;  %v364_v40 = vld [vmem:[%s6627_s6 + $0x920] sm:$0xff]   ;;  %v368_v41 = vld [vmem:[%s6627_s6 + $0x928] sm:$0xff]  }
  0x1e   : > { %257 = vst [vmem:[%s6632_s7 + $0x68] sm:$0xff] %v256_v13   ;;  %v372_v42 = vld [vmem:[%s6627_s6 + $0x930] sm:$0xff]   ;;  %v376_v43 = vld [vmem:[%s6627_s6 + $0x938] sm:$0xff]   ;;  %v380_v44 = vld [vmem:[%s6627_s6 + $0x940] sm:$0xff]  }
  0x1f   : > { %261 = vst [vmem:[%s6632_s7 + $0x70] sm:$0xff] %v260_v14   ;;  %v384_v45 = vld [vmem:[%s6627_s6 + $0x948] sm:$0xff]   ;;  %v388_v46 = vld [vmem:[%s6627_s6 + $0x950] sm:$0xff]   ;;  %v392_v47 = vld [vmem:[%s6627_s6 + $0x958] sm:$0xff]  }
  0x20   : > { %265 = vst [vmem:[%s6632_s7 + $0x78] sm:$0xff] %v264_v15  }
  0x21   : > { %269 = vst [vmem:[%s6632_s7 + $0x80] sm:$0xff] %v268_v16  }
  0x22   : > { %273 = vst [vmem:[%s6632_s7 + $0x88] sm:$0xff] %v272_v17  }
  0x23   : > { %277 = vst [vmem:[%s6632_s7 + $0x90] sm:$0xff] %v276_v18  }
  0x24   : > { %281 = vst [vmem:[%s6632_s7 + $0x98] sm:$0xff] %v280_v19  }
  0x25   : > { %285 = vst [vmem:[%s6632_s7 + $0xa0] sm:$0xff] %v284_v20  }
  0x26   : > { %289 = vst [vmem:[%s6632_s7 + $0xa8] sm:$0xff] %v288_v21  }
  0x27   : > { %293 = vst [vmem:[%s6632_s7 + $0xb0] sm:$0xff] %v292_v22  }
  0x28   : > { %297 = vst [vmem:[%s6632_s7 + $0xb8] sm:$0xff] %v296_v23  }
  0x29   : > { %301 = vst [vmem:[%s6632_s7 + $0xc0] sm:$0xff] %v300_v24  }
  0x2a   : > { %305 = vst [vmem:[%s6632_s7 + $0xc8] sm:$0xff] %v304_v25  }
  0x2b   : > { %309 = vst [vmem:[%s6632_s7 + $0xd0] sm:$0xff] %v308_v26  }
  0x2c   : > { %313 = vst [vmem:[%s6632_s7 + $0xd8] sm:$0xff] %v312_v27  }
  0x2d   : > { %317 = vst [vmem:[%s6632_s7 + $0xe0] sm:$0xff] %v316_v28  }
  0x2e   : > { %321 = vst [vmem:[%s6632_s7 + $0xe8] sm:$0xff] %v320_v29  }
  0x2f   : > { %325 = vst [vmem:[%s6632_s7 + $0xf0] sm:$0xff] %v324_v30  }
  0x30   : > { %329 = vst [vmem:[%s6632_s7 + $0xf8] sm:$0xff] %v328_v31  }
  0x31   : > { %333 = vst [vmem:[%s6632_s7 + $0x100] sm:$0xff] %v332_v32  }
  0x32   : > { %337 = vst [vmem:[%s6632_s7 + $0x108] sm:$0xff] %v336_v33  }
  0x33   : > { %341 = vst [vmem:[%s6632_s7 + $0x110] sm:$0xff] %v340_v34  }
  0x34   : > { %345 = vst [vmem:[%s6632_s7 + $0x118] sm:$0xff] %v344_v35  }
  0x35   : > { %349 = vst [vmem:[%s6632_s7 + $0x120] sm:$0xff] %v348_v36  }
  0x36   : > { %353 = vst [vmem:[%s6632_s7 + $0x128] sm:$0xff] %v352_v37  }
  0x37   : > { %357 = vst [vmem:[%s6632_s7 + $0x130] sm:$0xff] %v356_v38  }
  0x38   : > { %361 = vst [vmem:[%s6632_s7 + $0x138] sm:$0xff] %v360_v39  }
  0x39   : > { %365 = vst [vmem:[%s6632_s7 + $0x140] sm:$0xff] %v364_v40  }
  0x3a   : > { %369 = vst [vmem:[%s6632_s7 + $0x148] sm:$0xff] %v368_v41  }
  0x3b   : > { %373 = vst [vmem:[%s6632_s7 + $0x150] sm:$0xff] %v372_v42  }
  0x3c   : > { %377 = vst [vmem:[%s6632_s7 + $0x158] sm:$0xff] %v376_v43  }
  0x3d   : > { %381 = vst [vmem:[%s6632_s7 + $0x160] sm:$0xff] %v380_v44  }
  0x3e   : > { %385 = vst [vmem:[%s6632_s7 + $0x168] sm:$0xff] %v384_v45  }
  0x3f   : > { %389 = vst [vmem:[%s6632_s7 + $0x170] sm:$0xff] %v388_v46  }
  0x40   : > { %393 = vst [vmem:[%s6632_s7 + $0x178] sm:$0xff] %v392_v47  }
  0x41 PF: > { %p4737_p5 = scmp.ge.s32.totalorder %s6561_s20, 1  ;;  %p610_p6 = scmp.lt.s32.totalorder %s6561_s20, 9 }
  0x43   : > { %p611_p7 = pnand %p4737_p5, %p610_p6 }
  0x45   : > { %614 = sbr.rel (%p611_p7) target bundleno = 921 (0x399), region = 77 }
  0x4a   : > { %v6248_v48 = vld [vmem:[%s8357_s1 + $0x8] sm:$0xff]  ;;  %s617_s10 = sand.u32 1, %s6553_s18   ;;  %v6247_v49 = vld [vmem:[%s8357_s1] sm:$0xff]  ;;  %vm750_vm0 = vcmask 261120   ;;  %v6312_v6 = vld [vmem:[%s8359_s3 + $0x178] sm:$0xff]  ;;  %vm2125_vm1 = vcmask 1046528  }
  0x4b   : > { %s6511_s11 = smul.u32 384, %s617_s10  ;;  %6497 = vmatpush.bf16.msra.mxu2 %v6248_v48  ;;  %6499 = vmatpush.bf16.msra.mxu3 %v6248_v48  ;;  %v6320_v7 = vld [vmem:[%s8359_s3 + $0x2b8] sm:$0xff]  ;;  %v6311_v13 = vld [vmem:[%s8359_s3 + $0x170] sm:$0xff]  ;;  %v6310_v22 = vld [vmem:[%s8359_s3 + $0x168] sm:$0xff]  ;;  %vm2742_vm2 = vcmask 1045504   ;;  %vm3359_vm3 = vcmask 1044480  }
  0x4c   : > { %793 = vmatpush.bf16.msra.mxu0 %v6248_v48  ;;  %983 = vmatpush.bf16.msra.mxu1 %v6248_v48  ;;  %v6328_v12 = vld [vmem:[%s8359_s3 + $0x3f8] sm:$0xff]  ;;  %v6319_v18 = vld [vmem:[%s8359_s3 + $0x2b0] sm:$0xff]  ;;  %v6318_v35 = vld [vmem:[%s8359_s3 + $0x2a8] sm:$0xff]  ;;  %vm3976_vm4 = vcmask 1043456   ;;  %p644_p8 = scmp.lt.s32.totalorder %s4732_s21, 7  ;;  %vm4656_vm7 = vcmask 1043459  }
  0x4d   : > { %s6736_s14 = scalar_lea.vmem [#allocation2], %s6511_s11  ;;  %v6327_v19 = vld [vmem:[%s8359_s3 + $0x3f0] sm:$0xff]  ;;  %v6326_v36 = vld [vmem:[%s8359_s3 + $0x3e8] sm:$0xff]  ;;  %v6309_v44 = vld [vmem:[%s8359_s3 + $0x160] sm:$0xff]  ;;  %vm4638_vm5 = vsmask.f32 3328 }
  0x4e   : > { %v6260_v50 = vld [vmem:[%s6736_s14 + $0x58] sm:$0xff]  ;;  %v6249_v52 = vld [vmem:[%s6736_s14] sm:$0xff]  ;;  %v6250_v56 = vld [vmem:[%s6736_s14 + $0x8] sm:$0xff]  ;;  %s8411_s21 = smov (!%p644_p8, %s4732_s21), 7  ;;  %vm4657_vm8 = vsmask.f32 7950 }
  0x4f   : > { %v6272_v51 = vld [vmem:[%s6736_s14 + $0xb8] sm:$0xff]  ;;  %6498 = vmatpush.bf16.msra.mxu2 %v6247_v49  ;;  %6500 = vmatpush.bf16.msra.mxu3 %v6247_v49  ;;  %v6261_v53 = vld [vmem:[%s6736_s14 + $0x60] sm:$0xff]  ;;  %v6262_v57 = vld [vmem:[%s6736_s14 + $0x68] sm:$0xff]  ;;  %s6246_s28 = sshll.u32 %s8411_s21, 4 }
  0x50   : > { %794 = vmatpush.bf16.msra.mxu0 %v6247_v49  ;;  %984 = vmatpush.bf16.msra.mxu1 %v6247_v49  ;;  %v6273_v54 = vld [vmem:[%s6736_s14 + $0xc0] sm:$0xff]  ;;  %v6274_v58 = vld [vmem:[%s6736_s14 + $0xc8] sm:$0xff]  ;;  %v6251_v60 = vld [vmem:[%s6736_s14 + $0x10] sm:$0xff]  ;;  %s8285_s6 = scalar_lea.vmem %s8361_s5, %s6246_s28 }
  0x51   : > { %v6285_v55 = vld [vmem:[%s6736_s14 + $0x120] sm:$0xff]  ;;  %v6286_v59 = vld [vmem:[%s6736_s14 + $0x128] sm:$0xff]  ;;  %v6263_v61 = vld [vmem:[%s6736_s14 + $0x70] sm:$0xff] }
  0x52   : > { %4807 = vmatmul.msk.bf16.vlgmr.msra.gmra.mxu2 %vm750_vm0, %v6260_v50  ;;  %4891 = vmatmul.msk.bf16.vlgmr.msra.gmra.mxu3 %vm750_vm0, %v6272_v51  ;;  %v6275_v62 = vld [vmem:[%s6736_s14 + $0xd0] sm:$0xff]  ;;  %v6252_v0 = vld [vmem:[%s6736_s14 + $0x18] sm:$0xff]  ;;  %v6253_v4 = vld [vmem:[%s6736_s14 + $0x20] sm:$0xff] }
  0x53   : > { %1197 = vmatpush.bf16.msrb.mxu2 %v6248_v48  ;;  %1387 = vmatpush.bf16.msrb.mxu3 %v6248_v48  ;;  %v6287_v63 = vld [vmem:[%s6736_s14 + $0x130] sm:$0xff]  ;;  %v6264_v1 = vld [vmem:[%s6736_s14 + $0x78] sm:$0xff]  ;;  %v6265_v5 = vld [vmem:[%s6736_s14 + $0x80] sm:$0xff] }
  0x54   : > { %4796 = vmatmul.msk.bf16.vlgmr.msra.gmra.mxu0 %vm750_vm0, %v6249_v52  ;;  %4880 = vmatmul.msk.bf16.vlgmr.msra.gmra.mxu1 %vm750_vm0, %v6261_v53  ;;  %v6276_v2 = vld [vmem:[%s6736_s14 + $0xd8] sm:$0xff]  ;;  %v6277_v8 = vld [vmem:[%s6736_s14 + $0xe0] sm:$0xff]  ;;  %v6254_v10 = vld [vmem:[%s6736_s14 + $0x28] sm:$0xff] }
  0x55   : > { %v6288_v3 = vld [vmem:[%s6736_s14 + $0x138] sm:$0xff]  ;;  %6501 = vmatpush.bf16.msrb.mxu1 %v6312_v6  ;;  %1667 = vmatpush.bf16.msrb.mxu0 %v6312_v6  ;;  %v6289_v9 = vld [vmem:[%s6736_s14 + $0x140] sm:$0xff]  ;;  %v6266_v11 = vld [vmem:[%s6736_s14 + $0x88] sm:$0xff] }
  0x56   : > { %v6278_v14 = vld [vmem:[%s6736_s14 + $0xe8] sm:$0xff]  ;;  %v6255_v16 = vld [vmem:[%s6736_s14 + $0x30] sm:$0xff]  ;;  %v6256_v23 = vld [vmem:[%s6736_s14 + $0x38] sm:$0xff] }
  0x57   : > { %1198 = vmatpush.bf16.msrb.mxu2 %v6247_v49  ;;  %1388 = vmatpush.bf16.msrb.mxu3 %v6247_v49  ;;  %v6290_v15 = vld [vmem:[%s6736_s14 + $0x148] sm:$0xff]  ;;  %v6267_v17 = vld [vmem:[%s6736_s14 + $0x90] sm:$0xff]  ;;  %v6268_v24 = vld [vmem:[%s6736_s14 + $0x98] sm:$0xff] }
  0x58   : > { %v6279_v20 = vld [vmem:[%s6736_s14 + $0xf0] sm:$0xff]  ;;  %v6280_v25 = vld [vmem:[%s6736_s14 + $0xf8] sm:$0xff]  ;;  %v6257_v27 = vld [vmem:[%s6736_s14 + $0x40] sm:$0xff] }
  0x59   : > { %6502 = vmatpush.bf16.msrb.mxu1 %v6311_v13  ;;  %1668 = vmatpush.bf16.msrb.mxu0 %v6311_v13  ;;  %v6291_v21 = vld [vmem:[%s6736_s14 + $0x150] sm:$0xff]  ;;  %v6292_v26 = vld [vmem:[%s6736_s14 + $0x158] sm:$0xff]  ;;  %v6269_v28 = vld [vmem:[%s6736_s14 + $0xa0] sm:$0xff] }
  0x5a   : > { %v6281_v42 = vld [vmem:[%s6736_s14 + $0x100] sm:$0xff]  ;;  %v6258_v45 = vld [vmem:[%s6736_s14 + $0x48] sm:$0xff]  ;;  %v6308_v49 = vld [vmem:[%s8359_s3 + $0x158] sm:$0xff] }
  0x5b   : > { %1852 = vmatpush.bf16.msra.mxu2 %v6320_v7  ;;  %1958 = vmatpush.bf16.msra.mxu3 %v6328_v12  ;;  %v6293_v43 = vld [vmem:[%s6736_s14 + $0x160] sm:$0xff]  ;;  %v6270_v46 = vld [vmem:[%s6736_s14 + $0xa8] sm:$0xff]  ;;  %v6259_v7 = vld [vmem:[%s6736_s14 + $0x50] sm:$0xff] }
  0x5c   : > { %v6316_v13 = vld [vmem:[%s8359_s3 + $0x298] sm:$0xff]  ;;  %vm8289_vm6 = vmand %vm3976_vm4, %vm4638_vm5 }
  0x5d   : > { %6503 = vmatpush.bf16.msrb.mxu1 %v6310_v22  ;;  %1669 = vmatpush.bf16.msrb.mxu0 %v6310_v22  ;;  %vm8302_vm9 = vmand %vm4656_vm7, %vm4657_vm8 }
  0x5f   : > { %1853 = vmatpush.bf16.msra.mxu2 %v6319_v18  ;;  %1959 = vmatpush.bf16.msra.mxu3 %v6327_v19 }
  0x61   : > { %6504 = vmatpush.bf16.msrb.mxu1 %v6309_v44  ;;  %1670 = vmatpush.bf16.msrb.mxu0 %v6309_v44 }
  0x62   : > { %4964 = vmatmul.msk.bf16.vlgmr.msrb.gmra.mxu2 %vm750_vm0, %v6273_v54  ;;  %5048 = vmatmul.msk.bf16.vlgmr.msrb.gmra.mxu3 %vm750_vm0, %v6285_v55  ;;  %v6307_v54 = vld [vmem:[%s8359_s3 + $0x150] sm:$0xff]  ;;  %v6873_v55 = vld [vmem:[%s8358_s2] ss:$0 sm:$0xff] }
  0x63   : > { %1854 = vmatpush.bf16.msra.mxu2 %v6318_v35  ;;  %1960 = vmatpush.bf16.msra.mxu3 %v6326_v36 }
  0x64   : > { %4797 = vmatmul.msk.bf16.gmra.mxu0 %vm750_vm0, %v6250_v56  ;;  %4881 = vmatmul.msk.bf16.gmra.mxu1 %vm750_vm0, %v6262_v57 }
  0x65   : > { %1671 = vmatpush.bf16.msrb.mxu0 %v6308_v49  ;;  %6505 = vmatpush.bf16.msrb.mxu1 %v6308_v49 }
  0x69   : > { %1672 = vmatpush.bf16.msrb.mxu0 %v6307_v54  ;;  %6506 = vmatpush.bf16.msrb.mxu1 %v6307_v54 }
  0x72   : > { %4965 = vmatmul.msk.bf16.gmra.mxu2 %vm750_vm0, %v6274_v58  ;;  %5049 = vmatmul.msk.bf16.gmra.mxu3 %vm750_vm0, %v6286_v59  ;;  %v6306_v58 = vld [vmem:[%s8359_s3 + $0x148] sm:$0xff] }
  0x73   : > { %1673 = vmatpush.bf16.msrb.mxu0 %v6306_v58  ;;  %6507 = vmatpush.bf16.msrb.mxu1 %v6306_v58 }
  0x74   : > { %4798 = vmatmul.msk.bf16.gmra.mxu0 %vm750_vm0, %v6251_v60  ;;  %4882 = vmatmul.msk.bf16.gmra.mxu1 %vm750_vm0, %v6263_v61 }
  0x82   : > { %4966 = vmatmul.msk.bf16.gmra.mxu2 %vm750_vm0, %v6275_v62  ;;  %5050 = vmatmul.msk.bf16.gmra.mxu3 %vm750_vm0, %v6287_v63  ;;  %v6282_v62 = vld [vmem:[%s6736_s14 + $0x108] sm:$0xff] }
  0x83   : > { %v6294_v63 = vld [vmem:[%s6736_s14 + $0x168] sm:$0xff] }
  0x84   : > { %4799 = vmatmul.msk.bf16.gmra.mxu0 %vm750_vm0, %v6252_v0  ;;  %4883 = vmatmul.msk.bf16.gmra.mxu1 %vm750_vm0, %v6264_v1  ;;  %v6317_v0 = vld [vmem:[%s8359_s3 + $0x2a0] sm:$0xff] }
  0x85   : > { %v6325_v1 = vld [vmem:[%s8359_s3 + $0x3e0] sm:$0xff]  ;;  %1855 = vmatpush.bf16.msra.mxu2 %v6317_v0 }
  0x86   : > { %1961 = vmatpush.bf16.msra.mxu3 %v6325_v1 }
  0x89   : > { %1856 = vmatpush.bf16.msra.mxu2 %v6316_v13  ;;  %v6323_v13 = vld [vmem:[%s8359_s3 + $0x3d0] sm:$0xff] }
  0x92   : > { %4967 = vmatmul.msk.bf16.gmra.mxu2 %vm750_vm0, %v6276_v2  ;;  %5051 = vmatmul.msk.bf16.gmra.mxu3 %vm750_vm0, %v6288_v3 }
  0x94   : > { %4800 = vmatmul.msk.bf16.gmra.mxu0 %vm750_vm0, %v6253_v4  ;;  %4884 = vmatmul.msk.bf16.gmra.mxu1 %vm750_vm0, %v6265_v5  ;;  %v6305_v4 = vld [vmem:[%s8359_s3 + $0x140] sm:$0xff] }
  0x95   : > { %1674 = vmatpush.bf16.msrb.mxu0 %v6305_v4  ;;  %6508 = vmatpush.bf16.msrb.mxu1 %v6305_v4 }
  0xa2   : > { %4968 = vmatmul.msk.bf16.gmra.mxu2 %vm750_vm0, %v6277_v8  ;;  %5052 = vmatmul.msk.bf16.gmra.mxu3 %vm750_vm0, %v6289_v9  ;;  %v6271_v8 = vld [vmem:[%s6736_s14 + $0xb0] sm:$0xff] }
  0xa4   : > { %4801 = vmatmul.msk.bf16.gmra.mxu0 %vm750_vm0, %v6254_v10  ;;  %4885 = vmatmul.msk.bf16.gmra.mxu1 %vm750_vm0, %v6266_v11 }
  0xb2   : > { %4969 = vmatmul.msk.bf16.gmra.mxu2 %vm750_vm0, %v6278_v14  ;;  %5053 = vmatmul.msk.bf16.gmra.mxu3 %vm750_vm0, %v6290_v15 }
  0xb4   : > { %4802 = vmatmul.msk.bf16.gmra.mxu0 %vm750_vm0, %v6255_v16  ;;  %4886 = vmatmul.msk.bf16.gmra.mxu1 %vm750_vm0, %v6267_v17 }
  0xc2   : > { %4970 = vmatmul.msk.bf16.gmra.mxu2 %vm750_vm0, %v6279_v20  ;;  %5054 = vmatmul.msk.bf16.gmra.mxu3 %vm750_vm0, %v6291_v21 }
  0xc4   : > { %4803 = vmatmul.msk.bf16.gmra.mxu0 %vm750_vm0, %v6256_v23  ;;  %4887 = vmatmul.msk.bf16.gmra.mxu1 %vm750_vm0, %v6268_v24 }
  0xd1   : > { %v796_v29 = vpop.f32.mrf.mxu0  ;;  %v986_v30 = vpop.f32.mrf.mxu1 }
  0xd2   : > { %4971 = vmatmul.msk.bf16.gmra.mxu2 %vm750_vm0, %v6280_v25  ;;  %5055 = vmatmul.msk.bf16.gmra.mxu3 %vm750_vm0, %v6292_v26  ;;  %v1046_v31 = vmax.f32 %v796_v29, %v986_v30 }
  0xd4   : > { %4804 = vmatmul.msk.bf16.gmra.mxu0 %vm750_vm0, %v6257_v27  ;;  %4888 = vmatmul.msk.bf16.gmra.mxu1 %vm750_vm0, %v6269_v28  ;;  %v6315_v27 = vld [vmem:[%s8359_s3 + $0x290] sm:$0xff] }
  0xd5   : > { %v6829_v32 = vpop.f32.mrf.mxu2  ;;  %v6831_v33 = vpop.f32.mrf.mxu3  ;;  %1857 = vmatpush.bf16.msra.mxu2 %v6315_v27 }
  0xd9   : > { %v798_v37 = vpop.f32.mrf.mxu0  ;;  %v988_v38 = vpop.f32.mrf.mxu1 }
  0xda   : > { %v1047_v2 = vmax.f32 %v798_v37, %v988_v38 }
  0xdd   : > { %v6843_v39 = vpop.f32.mrf.mxu2  ;;  %v6845_v40 = vpop.f32.mrf.mxu3 }
  0xe1   : > { %v6858_v47 = vpop.f32.mrf.mxu0  ;;  %v6860_v48 = vpop.f32.mrf.mxu1 }
  0xe2   : > { %4972 = vmatmul.msk.bf16.gmra.mxu2 %vm750_vm0, %v6281_v42  ;;  %5056 = vmatmul.msk.bf16.gmra.mxu3 %vm750_vm0, %v6293_v43  ;;  %v1048_v12 = vmax.f32 %v6858_v47, %v6860_v48  ;;  %v6314_v42 = vld [vmem:[%s8359_s3 + $0x288] sm:$0xff]  ;;  %v6295_v47 = vld [vmem:[%s6736_s14 + $0x170] sm:$0xff] }
  0xe3   : > { %1858 = vmatpush.bf16.msra.mxu2 %v6314_v42 }
  0xe4   : > { %4805 = vmatmul.msk.bf16.gmra.mxu0 %vm750_vm0, %v6258_v45  ;;  %4889 = vmatmul.msk.bf16.gmra.mxu1 %vm750_vm0, %v6270_v46  ;;  %v6283_v46 = vld [vmem:[%s6736_s14 + $0x110] sm:$0xff] }
  0xe5   : > { %v1200_v50 = vpop.f32.mrf.mxu2  ;;  %v1390_v51 = vpop.f32.mrf.mxu3 }
  0xe6   : > { %v1450_v52 = vmax.f32 %v1200_v50, %v1390_v51  ;;  %v6313_v51 = vld [vmem:[%s8359_s3 + $0x280] sm:$0xff] }
  0xe7   : > { %1859 = vmatpush.bf16.msra.mxu2 %v6313_v51 }
  0xe8   : > { %v1474_v53 = vmax.f32 %v1046_v31, %v1450_v52 }
  0xe9   : > { %v6875_v56 = vpop.f32.mrf.mxu0  ;;  %v6877_v57 = vpop.f32.mrf.mxu1 }
  0xea   : > { %v1502_v59 = vadd.f32 %v6873_v55, %v1474_v53  ;;  %v1049_v48 = vmax.f32 %v6875_v56, %v6877_v57 }
  0xec   : > { %v1526_v5 = vmax.f32 %v1502_v59, 0.0 }
  0xed   : > { %v1202_v60 = vpop.f32.mrf.mxu2  ;;  %v1392_v61 = vpop.f32.mrf.mxu3 }
  0xee   : > { %v1451_v3 = vmax.f32 %v1202_v60, %v1392_v61  ;;  %v2126_v14 = vrot.slane %v1526_v5, 1  ;;  %v2743_v18 = vrot.slane %v1526_v5, 2  ;;  %v3360_v19 = vrot.slane %v1526_v5, 3  ;;  %v6324_v61 = vld [vmem:[%s8359_s3 + $0x3d8] sm:$0xff] }
  0xef   : > { %v3977_v20 = vrot.slane %v1526_v5, 4  ;;  %v1550_v45 = vpack.c.bf16 %v1526_v5, %v1526_v5  ;;  %1962 = vmatpush.bf16.msra.mxu3 %v6324_v61 }
  0xf0   : > { %v1475_v6 = vmax.f32 %v1047_v2, %v1451_v3 }
  0xf1   : > { %v6898_v9 = vpop.f32.mrf.mxu0  ;;  %v6900_v10 = vpop.f32.mrf.mxu1  ;;  %v6942_v54 = vunpack.c.l.b16 %v1550_v45 }
  0xf2   : > { %4973 = vmatmul.msk.bf16.gmra.mxu2 %vm750_vm0, %v6282_v62  ;;  %5057 = vmatmul.msk.bf16.gmra.mxu3 %vm750_vm0, %v6294_v63  ;;  %v1503_v11 = vadd.f32 %v6873_v55, %v1475_v6  ;;  %v1050_v60 = vmax.f32 %v6898_v9, %v6900_v10  ;;  %v6336_v62 = vld [vmem:[%s8359_s3 + $0x538] sm:$0xff] }
  0xf3   : > { %2064 = vmatpush.bf16.msra.mxu0 %v6336_v62  ;;  %1963 = vmatpush.bf16.msra.mxu3 %v6323_v13 }
  0xf4   : > { %v1527_v15 = vmax.f32 %v1503_v11, 0.0  ;;  %4806 = vmatmul.msk.bf16.gmra.mxu0 %vm750_vm0, %v6259_v7  ;;  %4890 = vmatmul.msk.bf16.gmra.mxu1 %vm750_vm0, %v6271_v8 }
  0xf5   : > { %v1205_v16 = vpop.f32.mrf.mxu2  ;;  %v1395_v17 = vpop.f32.mrf.mxu3 }
  0xf6   : > { %v1452_v21 = vmax.f32 %v1205_v16, %v1395_v17  ;;  %v2127_v22 = vrot.slane %v1527_v15, 1  ;;  %v2744_v23 = vrot.slane %v1527_v15, 2  ;;  %v3361_v24 = vrot.slane %v1527_v15, 3 }
  0xf7   : > { %v3978_v25 = vrot.slane %v1527_v15, 4 }
  0xf8   : > { %v1476_v26 = vmax.f32 %v1048_v12, %v1452_v21  ;;  %v6914_v28 = vsel %vm2125_vm1, %v2126_v14, %v2127_v22  ;;  %v6917_v29 = vsel %vm2742_vm2, %v2743_v18, %v2744_v23  ;;  %v6920_v30 = vsel %vm3359_vm3, %v3360_v19, %v3361_v24  ;;  %v6335_v14 = vld [vmem:[%s8359_s3 + $0x530] sm:$0xff] }
  0xf9   : > { %v6923_v31 = vsel %vm3976_vm4, %v3977_v20, %v3978_v25  ;;  %v6926_v36 = vpop.f32.mrf.mxu0  ;;  %v6928_v37 = vpop.f32.mrf.mxu1  ;;  %v2174_v3 = vpack.c.bf16 %v6914_v28, %v6914_v28  ;;  %v2791_v15 = vpack.c.bf16 %v6917_v29, %v6917_v29  ;;  %v3408_v16 = vpack.c.bf16 %v6920_v30, %v6920_v30  ;;  %2065 = vmatpush.bf16.msra.mxu0 %v6335_v14 }
  0xfa   : > { %v1504_v35 = vadd.f32 %v6873_v55, %v1476_v26  ;;  %v4025_v17 = vpack.c.bf16 %v6923_v31, %v6923_v31  ;;  %v1051_v27 = vmax.f32 %v6926_v36, %v6928_v37  ;;  %v6322_v31 = vld [vmem:[%s8359_s3 + $0x3c8] sm:$0xff] }
  0xfb   : > { %v6994_v42 = vunpack.c.l.b16 %v2174_v3  ;;  %v7000_v45 = vunpack.c.l.b16 %v3408_v16  ;;  %1964 = vmatpush.bf16.msra.mxu3 %v6322_v31 }
  0xfc   : > { %v1528_v38 = vmax.f32 %v1504_v35, 0.0  ;;  %v6334_v35 = vld [vmem:[%s8359_s3 + $0x528] sm:$0xff] }
  0xfd   : > { %v1207_v43 = vpop.f32.mrf.mxu2  ;;  %v1397_v44 = vpop.f32.mrf.mxu3  ;;  %2066 = vmatpush.bf16.msra.mxu0 %v6334_v35 }
  0xfe   : > { %v1453_v49 = vmax.f32 %v1207_v43, %v1397_v44  ;;  %v1551_v50 = vpack.c.bf16 %v1528_v38, %v1528_v38  ;;  %v2129_v63 = vrot.slane %v1528_v38, 1  ;;  %v2746_v4 = vrot.slane %v1528_v38, 2 }
  0xff   : > { %v3363_v5 = vrot.slane %v1528_v38, 3  ;;  %v3980_v6 = vrot.slane %v1528_v38, 4  ;;  %v6998_v44 = vunpack.c.l.b16 %v2791_v15 }
 0x100   : > { %v1477_v52 = vmax.f32 %v1049_v48, %v1453_v49  ;;  %v6940_v53 = vunpack.c.l.b16 %v1551_v50  ;;  %v6284_v49 = vld [vmem:[%s6736_s14 + $0x118] sm:$0xff] }
 0x101   : > { %v6946_v58 = vpop.f32.mrf.mxu0  ;;  %v6948_v59 = vpop.f32.mrf.mxu1  ;;  %v6296_v50 = vld [vmem:[%s6736_s14 + $0x178] sm:$0xff] }
 0x102   : > { %4974 = vmatmul.msk.bf16.gmra.mxu2 %vm750_vm0, %v6283_v46  ;;  %5058 = vmatmul.msk.bf16.gmra.mxu3 %vm750_vm0, %v6295_v47  ;;  %v1505_v56 = vadd.f32 %v6873_v55, %v1477_v52 }
 0x104   : > { %v1529_v0 = vmax.f32 %v1505_v56, 0.0  ;;  %v7010_v56 = vunpack.c.l.b16 %v4025_v17 }
 0x105   : > { %v1210_v1 = vpop.f32.mrf.mxu2  ;;  %v1400_v2 = vpop.f32.mrf.mxu3 }
 0x106   : > { %v1454_v7 = vmax.f32 %v1210_v1, %v1400_v2  ;;  %v2130_v8 = vrot.slane %v1529_v0, 1  ;;  %v2747_v9 = vrot.slane %v1529_v0, 2  ;;  %v3364_v10 = vrot.slane %v1529_v0, 3  ;;  %8370 = vst [vmem:[#allocation3_spill] sm:$0xff] %v7010_v56  ;;  %v6333_v1 = vld [vmem:[%s8359_s3 + $0x520] sm:$0xff] }
 0x107   : > { %v3981_v11 = vrot.slane %v1529_v0, 4  ;;  %v6321_v0 = vld [vmem:[%s8359_s3 + $0x3c0] sm:$0xff]  ;;  %2067 = vmatpush.bf16.msra.mxu0 %v6333_v1 }
 0x108   : > { %v1478_v12 = vmax.f32 %v1050_v60, %v1454_v7  ;;  %v2131_v18 = vsel %vm2125_vm1, %v2129_v63, %v2130_v8  ;;  %v2748_v19 = vsel %vm2742_vm2, %v2746_v4, %v2747_v9  ;;  %v3365_v20 = vsel %vm3359_vm3, %v3363_v5, %v3364_v10  ;;  %1965 = vmatpush.bf16.msra.mxu3 %v6321_v0  ;;  %v6332_v9 = vld [vmem:[%s8359_s3 + $0x518] sm:$0xff] }
 0x109   : > { %v3982_v21 = vsel %vm3976_vm4, %v3980_v6, %v3981_v11  ;;  %v6980_v23 = vpop.f32.mrf.mxu0  ;;  %v6982_v24 = vpop.f32.mrf.mxu1  ;;  %v2175_v25 = vpack.c.bf16 %v2131_v18, %v2131_v18  ;;  %v2792_v26 = vpack.c.bf16 %v2748_v19, %v2748_v19  ;;  %v3409_v28 = vpack.c.bf16 %v3365_v20, %v3365_v20 }
 0x10a   : > { %v1506_v22 = vadd.f32 %v6873_v55, %v1478_v12  ;;  %v4026_v29 = vpack.c.bf16 %v3982_v21, %v3982_v21  ;;  %v1052_v7 = vmax.f32 %v6946_v58, %v6948_v59  ;;  %v6331_v58 = vld [vmem:[%s8359_s3 + $0x510] sm:$0xff] }
 0x10b   : > { %v6992_v38 = vunpack.c.l.b16 %v2175_v25  ;;  %v6996_v43 = vunpack.c.l.b16 %v2792_v26  ;;  %v7002_v46 = vunpack.c.l.b16 %v3409_v28  ;;  %2068 = vmatpush.bf16.msra.mxu0 %v6332_v9 }
 0x10c   : > { %v1530_v30 = vmax.f32 %v1506_v22, 0.0  ;;  %v7004_v47 = vunpack.c.l.b16 %v4026_v29 }
 0x10d   : > { %v1212_v36 = vpop.f32.mrf.mxu2  ;;  %v1402_v37 = vpop.f32.mrf.mxu3 }
 0x10e   : > { %v1455_v48 = vmax.f32 %v1212_v36, %v1402_v37  ;;  %v1552_v51 = vpack.c.bf16 %v1530_v30, %v1530_v30  ;;  %v2132_v10 = vrot.slane %v1530_v30, 1  ;;  %v2749_v13 = vrot.slane %v1530_v30, 2 }
 0x10f   : > { %v3366_v14 = vrot.slane %v1530_v30, 3  ;;  %v3983_v19 = vrot.slane %v1530_v30, 4  ;;  %2069 = vmatpush.bf16.msra.mxu0 %v6331_v58 }
 0x110   : > { %v1479_v62 = vmax.f32 %v1051_v27, %v1455_v48  ;;  %v1604_v63 = vunpack.c.l.b16 %v1552_v51  ;;  %v6330_v51 = vld [vmem:[%s8359_s3 + $0x508] sm:$0xff] }
 0x111   : > { %v7028_v5 = vpop.f32.mrf.mxu0  ;;  %v7030_v6 = vpop.f32.mrf.mxu1 }
 0x112   : > { %v1507_v3 = vadd.f32 %v6873_v55, %v1479_v62  ;;  %4975 = vmatmul.msk.bf16.gmra.mxu2 %vm750_vm0, %v6284_v49  ;;  %5059 = vmatmul.msk.bf16.gmra.mxu3 %vm750_vm0, %v6296_v50  ;;  %v1611_v4 = vpack.c.b16 %v1604_v63, %v6940_v53 }
 0x113   : > { %2070 = vmatpush.bf16.msra.mxu0 %v6330_v51 }
 0x114   : > { %v1531_v8 = vmax.f32 %v1507_v3, 0.0  ;;  %1675 = vmatmul.bf16.vlgmr.msrb.gmra.mxu0 %v1611_v4 }
 0x115   : > { %v1215_v11 = vpop.f32.mrf.mxu2  ;;  %v1405_v12 = vpop.f32.mrf.mxu3 }
 0x116   : > { %v2133_v15 = vrot.slane %v1531_v8, 1  ;;  %v1456_v16 = vmax.f32 %v1215_v11, %v1405_v12  ;;  %v2750_v17 = vrot.slane %v1531_v8, 2  ;;  %v3367_v18 = vrot.slane %v1531_v8, 3 }
 0x117   : > { %v3984_v20 = vrot.slane %v1531_v8, 4  ;;  %v1053_v8 = vmax.f32 %v6980_v23, %v6982_v24  ;;  %v1054_v23 = vmax.f32 %v7028_v5, %v7030_v6 }
 0x118   : > { %v1480_v21 = vmax.f32 %v1052_v7, %v1456_v16  ;;  %v2134_v59 = vsel %vm2125_vm1, %v2132_v10, %v2133_v15  ;;  %v2751_v22 = vsel %vm2742_vm2, %v2749_v13, %v2750_v17  ;;  %v3368_v25 = vsel %vm3359_vm3, %v3366_v14, %v3367_v18  ;;  %v6329_v14 = vld [vmem:[%s8359_s3 + $0x500] sm:$0xff] }
 0x119   : > { %v2176_v26 = vpack.c.bf16 %v2134_v59, %v2134_v59  ;;  %v2793_v27 = vpack.c.bf16 %v2751_v22, %v2751_v22  ;;  %v3410_v28 = vpack.c.bf16 %v3368_v25, %v3368_v25  ;;  %v3985_v29 = vsel %vm3976_vm4, %v3983_v19, %v3984_v20  ;;  %v7045_v30 = vpop.f32.mrf.mxu0  ;;  %v7047_v35 = vpop.f32.mrf.mxu1  ;;  %2071 = vmatpush.bf16.msra.mxu0 %v6329_v14 }
 0x11a   : > { %v1508_v31 = vadd.f32 %v6873_v55, %v1480_v21  ;;  %v4027_v36 = vpack.c.bf16 %v3985_v29, %v3985_v29 }
 0x11b   : > { %v7049_v37 = vunpack.c.l.b16 %v2176_v26  ;;  %v7051_v48 = vunpack.c.l.b16 %v2793_v27  ;;  %v7053_v49 = vunpack.c.l.b16 %v3410_v28 }
 0x11c   : > { %v1532_v50 = vmax.f32 %v1508_v31, 0.0  ;;  %v7058_v62 = vunpack.c.l.b16 %v4027_v36 }
 0x11d   : > { %v1217_v0 = vpop.f32.mrf.mxu2  ;;  %v1407_v1 = vpop.f32.mrf.mxu3 }
 0x11e   : > { %8371 = vst [vmem:[#allocation4_spill] sm:$0xff] %v7058_v62  ;;  %v1457_v9 = vmax.f32 %v1217_v0, %v1407_v1  ;;  %v1553_v10 = vpack.c.bf16 %v1532_v50, %v1532_v50  ;;  %v2135_v21 = vrot.slane %v1532_v50, 1  ;;  %v2752_v58 = vrot.slane %v1532_v50, 2 }
 0x11f   : > { %v3369_v59 = vrot.slane %v1532_v50, 3  ;;  %v3986_v27 = vrot.slane %v1532_v50, 4 }
 0x120   : > { %v1481_v12 = vmax.f32 %v1053_v8, %v1457_v9  ;;  %v1605_v13 = vunpack.c.l.b16 %v1553_v10 }
 0x121   : > { %v7076_v17 = vpop.f32.mrf.mxu0  ;;  %v7078_v18 = vpop.f32.mrf.mxu1 }
 0x122   : > { %v1509_v15 = vadd.f32 %v6873_v55, %v1481_v12  ;;  %v7074_v16 = vpack.c.b16 %v1605_v13, %v1604_v63 }
 0x124   : > { %v1533_v24 = vmax.f32 %v1509_v15, 0.0  ;;  %1860 = vmatmul.bf16.vlgmr.msra.gmra.mxu2 %v7074_v16 }
 0x125   : > { %v1220_v19 = vpop.f32.mrf.mxu2  ;;  %v1410_v20 = vpop.f32.mrf.mxu3 }
 0x126   : > { %v1458_v22 = vmax.f32 %v1220_v19, %v1410_v20  ;;  %v2136_v25 = vrot.slane %v1533_v24, 1  ;;  %v2753_v63 = vrot.slane %v1533_v24, 2  ;;  %v3370_v26 = vrot.slane %v1533_v24, 3 }
 0x127   : > { %v3987_v28 = vrot.slane %v1533_v24, 4 }
 0x128   : > { %v1482_v29 = vmax.f32 %v1054_v23, %v1458_v22  ;;  %v2137_v31 = vsel %vm2125_vm1, %v2135_v21, %v2136_v25  ;;  %v2754_v36 = vsel %vm2742_vm2, %v2752_v58, %v2753_v63  ;;  %v3371_v5 = vsel %vm3359_vm3, %v3369_v59, %v3370_v26 }
 0x129   : > { %v2177_v6 = vpack.c.bf16 %v2137_v31, %v2137_v31  ;;  %v2794_v51 = vpack.c.bf16 %v2754_v36, %v2754_v36  ;;  %v3411_v0 = vpack.c.bf16 %v3371_v5, %v3371_v5  ;;  %v3988_v1 = vsel %vm3976_vm4, %v3986_v27, %v3987_v28  ;;  %v7088_v9 = vpop.f32.mrf.mxu0  ;;  %v7090_v10 = vpop.f32.mrf.mxu1 }
 0x12a   : > { %v1510_v8 = vadd.f32 %v6873_v55, %v1482_v29  ;;  %v4028_v50 = vpack.c.bf16 %v3988_v1, %v3988_v1  ;;  %v1055_v22 = vmax.f32 %v7045_v30, %v7047_v35 }
 0x12b   : > { %v2214_v12 = vunpack.c.l.b16 %v2177_v6  ;;  %v2831_v14 = vunpack.c.l.b16 %v2794_v51  ;;  %v3448_v15 = vunpack.c.l.b16 %v3411_v0  ;;  %v1056_v6 = vmax.f32 %v7076_v17, %v7078_v18 }
 0x12c   : > { %v1534_v23 = vmax.f32 %v1510_v8, 0.0  ;;  %v4065_v24 = vunpack.c.l.b16 %v4028_v50 }
 0x12d   : > { %v1222_v19 = vpop.f32.mrf.mxu2  ;;  %v1412_v20 = vpop.f32.mrf.mxu3  ;;  %v7093_v21 = vpack.c.b16 %v2214_v12, %v7049_v37  ;;  %v7096_v58 = vpack.c.b16 %v2831_v14, %v7051_v48  ;;  %v7099_v59 = vpack.c.b16 %v3448_v15, %v7053_v49 }
 0x12e   : > { %v1459_v25 = vmax.f32 %v1222_v19, %v1412_v20  ;;  %v1554_v63 = vpack.c.bf16 %v1534_v23, %v1534_v23  ;;  %v7104_v26 = vpack.c.b16 %v4065_v24, %v7058_v62  ;;  %v2138_v0 = vrot.slane %v1534_v23, 1  ;;  %v6359_v62 = vld [vmem:[%s8359_s3 + $0x2f0] sm:$0xff] }
 0x12f   : > { %v2755_v1 = vrot.slane %v1534_v23, 2  ;;  %v3372_v8 = vrot.slane %v1534_v23, 3 }
 0x130   : > { %8372 = vst [vmem:[#allocation5_spill] sm:$0xff] %v7104_v26  ;;  %v1483_v27 = vmax.f32 %v1055_v22, %v1459_v25  ;;  %v1606_v28 = vunpack.c.l.b16 %v1554_v63 }
 0x131   : > { %v7107_v36 = vpop.f32.mrf.mxu0  ;;  %v7109_v5 = vpop.f32.mrf.mxu1 }
 0x132   : > { %v1511_v29 = vadd.f32 %v6873_v55, %v1483_v27  ;;  %v1612_v31 = vpack.c.b16 %v1606_v28, %v1605_v13  ;;  %v3989_v13 = vrot.slane %v1534_v23, 4 }
 0x134   : > { %v1535_v51 = vmax.f32 %v1511_v29, 0.0  ;;  %1680 = vmatmul.bf16.gmra.mxu0 %v1612_v31  ;;  %1966 = vmatmul.bf16.vlgmr.msra.gmra.mxu3 %v1612_v31 }
 0x135   : > { %v1225_v30 = vpop.f32.mrf.mxu2  ;;  %v1415_v35 = vpop.f32.mrf.mxu3 }
 0x136   : > { %v1460_v50 = vmax.f32 %v1225_v30, %v1415_v35  ;;  %v2139_v19 = vrot.slane %v1535_v51, 1  ;;  %v2756_v20 = vrot.slane %v1535_v51, 2  ;;  %v3373_v22 = vrot.slane %v1535_v51, 3 }
 0x137   : > { %v3990_v25 = vrot.slane %v1535_v51, 4 }
 0x138   : > { %v1484_v63 = vmax.f32 %v1056_v6, %v1460_v50  ;;  %v2140_v27 = vsel %vm2125_vm1, %v2138_v0, %v2139_v19  ;;  %v2757_v11 = vsel %vm2742_vm2, %v2755_v1, %v2756_v20  ;;  %v3374_v17 = vsel %vm3359_vm3, %v3372_v8, %v3373_v22 }
 0x139   : > { %v2178_v18 = vpack.c.bf16 %v2140_v27, %v2140_v27  ;;  %v2795_v29 = vpack.c.bf16 %v2757_v11, %v2757_v11  ;;  %v3412_v31 = vpack.c.bf16 %v3374_v17, %v3374_v17  ;;  %v3991_v2 = vsel %vm3976_vm4, %v3989_v13, %v3990_v25  ;;  %v7118_v30 = vpop.f32.mrf.mxu1  ;;  %v7120_v50 = vpop.f32.mrf.mxu0 }
 0x13a   : > { %v1512_v7 = vadd.f32 %v6873_v55, %v1484_v63  ;;  %v4029_v35 = vpack.c.bf16 %v3991_v2, %v3991_v2  ;;  %v1057_v22 = vmax.f32 %v7088_v9, %v7090_v10  ;;  %v6304_v9 = vld [vmem:[%s8359_s3 + $0x38] sm:$0xff] }
 0x13b   : > { %v2215_v61 = vunpack.c.l.b16 %v2178_v18  ;;  %v2832_v23 = vunpack.c.l.b16 %v2795_v29  ;;  %v3449_v51 = vunpack.c.l.b16 %v3412_v31  ;;  %1754 = vmatpush.bf16.msra.mxu1 %v6304_v9 }
 0x13c   : > { %v1536_v6 = vmax.f32 %v1512_v7, 0.0  ;;  %v4066_v0 = vunpack.c.l.b16 %v4029_v35 }
 0x13d   : > { %v1227_v1 = vpop.f32.mrf.mxu2  ;;  %v1417_v19 = vpop.f32.mrf.mxu3  ;;  %v7122_v8 = vpack.c.b16 %v2215_v61, %v2214_v12  ;;  %v7124_v11 = vpack.c.b16 %v2832_v23, %v2831_v14  ;;  %v7126_v20 = vpack.c.b16 %v3449_v51, %v3448_v15  ;;  %v1058_v12 = vmax.f32 %v7107_v36, %v7109_v5 }
 0x13e   : > { %v1461_v13 = vmax.f32 %v1227_v1, %v1417_v19  ;;  %v1555_v2 = vpack.c.bf16 %v1536_v6, %v1536_v6  ;;  %v7130_v25 = vpack.c.b16 %v4066_v0, %v4065_v24  ;;  %v2141_v18 = vrot.slane %v1536_v6, 1 }
 0x13f   : > { %v2758_v29 = vrot.slane %v1536_v6, 2  ;;  %v3992_v19 = vrot.slane %v1536_v6, 4 }
 0x140   : > { %8373 = vst [vmem:[#allocation6_spill] sm:$0xff] %v7130_v25  ;;  %v1485_v63 = vmax.f32 %v1057_v22, %v1461_v13  ;;  %v1607_v7 = vunpack.c.l.b16 %v1555_v2  ;;  %v6303_v2 = vld [vmem:[%s8359_s3 + $0x30] sm:$0xff] }
 0x141   : > { %v7139_v15 = vpop.f32.mrf.mxu1  ;;  %v7144_v35 = vpop.f32.mrf.mxu0  ;;  %1755 = vmatpush.bf16.msra.mxu1 %v6303_v2 }
 0x142   : > { %v1513_v27 = vadd.f32 %v6873_v55, %v1485_v63  ;;  %v7133_v17 = vpack.c.b16 %v1607_v7, %v1606_v28  ;;  %v3375_v28 = vrot.slane %v1536_v6, 3 }
 0x144   : > { %v1537_v14 = vmax.f32 %v1513_v27, 0.0  ;;  %1865 = vmatmul.bf16.gmra.mxu2 %v7133_v17  ;;  %2072 = vmatmul.bf16.vlgmr.msra.gmra.mxu0 %v7133_v17 }
 0x145   : > { %v1230_v10 = vpop.f32.mrf.mxu2  ;;  %v1420_v24 = vpop.f32.mrf.mxu3 }
 0x146   : > { %v1462_v31 = vmax.f32 %v1230_v10, %v1420_v24  ;;  %v2142_v36 = vrot.slane %v1537_v14, 1  ;;  %v2759_v5 = vrot.slane %v1537_v14, 2  ;;  %v3376_v1 = vrot.slane %v1537_v14, 3 }
 0x147   : > { %v3993_v22 = vrot.slane %v1537_v14, 4 }
 0x148   : > { %v1486_v13 = vmax.f32 %v1058_v12, %v1462_v31  ;;  %v2143_v63 = vsel %vm2125_vm1, %v2141_v18, %v2142_v36  ;;  %v2760_v27 = vsel %vm2742_vm2, %v2758_v29, %v2759_v5  ;;  %v3377_v4 = vsel %vm3359_vm3, %v3375_v28, %v3376_v1  ;;  %v6302_v29 = vld [vmem:[%s8359_s3 + $0x28] sm:$0xff] }
 0x149   : > { %v2179_v10 = vpack.c.bf16 %v2143_v63, %v2143_v63  ;;  %v2796_v24 = vpack.c.bf16 %v2760_v27, %v2760_v27  ;;  %v3413_v60 = vpack.c.bf16 %v3377_v4, %v3377_v4  ;;  %v3994_v9 = vsel %vm3976_vm4, %v3992_v19, %v3993_v22  ;;  %1756 = vmatpush.bf16.msra.mxu1 %v6302_v29  ;;  %v833_v27 = vpop.f32.mrf.mxu0 }
 0x14a   : > { %v1514_v52 = vadd.f32 %v6873_v55, %v1486_v13  ;;  %v4030_v6 = vpack.c.bf16 %v3994_v9, %v3994_v9  ;;  %v7176_v13 = vpop.f32.mrf.mxu1 }
 0x14b   : > { %v7154_v12 = vunpack.c.l.b16 %v2179_v10  ;;  %v7156_v14 = vunpack.c.l.b16 %v2796_v24  ;;  %v7158_v31 = vunpack.c.l.b16 %v3413_v60  ;;  %v6352_v24 = vld [vmem:[%s8359_s3 + $0x1b8] sm:$0xff] }
 0x14c   : > { %v1538_v18 = vmax.f32 %v1514_v52, 0.0  ;;  %v7163_v28 = vunpack.c.l.b16 %v4030_v6  ;;  %v1059_v52 = vmax.f32 %v7120_v50, %v7118_v30  ;;  %v1060_v50 = vmax.f32 %v7144_v35, %v7139_v15  ;;  %2387 = vmatpush.bf16.msrb.mxu2 %v6352_v24 }
 0x14d   : > { %v1232_v4 = vpop.f32.mrf.mxu2  ;;  %v1422_v36 = vpop.f32.mrf.mxu3  ;;  %v7166_v5 = vpack.c.b16 %v7154_v12, %v2215_v61  ;;  %v7169_v1 = vpack.c.b16 %v7156_v14, %v2832_v23  ;;  %v7172_v19 = vpack.c.b16 %v7158_v31, %v3449_v51  ;;  %v6301_v23 = vld [vmem:[%s8359_s3 + $0x20] sm:$0xff] }
 0x14e   : > { %v1463_v60 = vmax.f32 %v1232_v4, %v1422_v36  ;;  %v1556_v22 = vpack.c.bf16 %v1538_v18, %v1538_v18  ;;  %v7179_v2 = vpack.c.b16 %v7163_v28, %v4066_v0  ;;  %1757 = vmatpush.bf16.msra.mxu1 %v6301_v23  ;;  %v6300_v0 = vld [vmem:[%s8359_s3 + $0x18] sm:$0xff]  ;;  %v2144_v29 = vrot.slane %v1538_v18, 1 }
 0x14f   : > { %v2761_v4 = vrot.slane %v1538_v18, 2 }
 0x150   : > { %8374 = vst [vmem:[#allocation7_spill] sm:$0xff] %v7179_v2  ;;  %v1487_v63 = vmax.f32 %v1059_v52, %v1463_v60  ;;  %v7181_v61 = vunpack.c.l.b16 %v1556_v22  ;;  %v3995_v60 = vrot.slane %v1538_v18, 4 }
 0x151   : > { %v836_v41 = vpop.f32.mrf.mxu0 }
 0x152   : > { %v1515_v51 = vadd.f32 %v6873_v55, %v1487_v63  ;;  %v1613_v30 = vpack.c.b16 %v7181_v61, %v1607_v7  ;;  %v3378_v7 = vrot.slane %v1538_v18, 3  ;;  %1758 = vmatpush.bf16.msra.mxu1 %v6300_v0  ;;  %v7196_v23 = vpop.f32.mrf.mxu1 }
 0x154   : > { %v1539_v10 = vmax.f32 %v1515_v51, 0.0  ;;  %1685 = vmatmul.bf16.vlgmr.msrb.gmra.mxu1 %v1613_v30  ;;  %1971 = vmatmul.bf16.gmra.mxu3 %v1613_v30  ;;  %v6299_v51 = vld [vmem:[%s8359_s3 + $0x10] sm:$0xff] }
 0x155   : > { %v1235_v9 = vpop.f32.mrf.mxu2  ;;  %v1425_v6 = vpop.f32.mrf.mxu3  ;;  %v6351_v30 = vld [vmem:[%s8359_s3 + $0x1b0] sm:$0xff] }
 0x156   : > { %v1464_v36 = vmax.f32 %v1235_v9, %v1425_v6  ;;  %v2145_v15 = vrot.slane %v1539_v10, 1  ;;  %v2762_v35 = vrot.slane %v1539_v10, 2  ;;  %v3379_v52 = vrot.slane %v1539_v10, 3  ;;  %1759 = vmatpush.bf16.msra.mxu1 %v6299_v51  ;;  %2388 = vmatpush.bf16.msrb.mxu2 %v6351_v30 }
 0x157   : > { %v3996_v22 = vrot.slane %v1539_v10, 4  ;;  %v1061_v30 = vmax.f32 %v833_v27, %v7176_v13 }
 0x158   : > { %v1488_v63 = vmax.f32 %v1060_v50, %v1464_v36  ;;  %v2146_v9 = vsel %vm2125_vm1, %v2144_v29, %v2145_v15  ;;  %v2763_v0 = vsel %vm2742_vm2, %v2761_v4, %v2762_v35  ;;  %v3380_v24 = vsel %vm3359_vm3, %v3378_v7, %v3379_v52  ;;  %v6298_v7 = vld [vmem:[%s8359_s3 + $0x8] sm:$0xff] }
 0x159   : > { %v2180_v6 = vpack.c.bf16 %v2146_v9, %v2146_v9  ;;  %v2797_v18 = vpack.c.bf16 %v2763_v0, %v2763_v0  ;;  %v3414_v10 = vpack.c.bf16 %v3380_v24, %v3380_v24  ;;  %v3997_v50 = vsel %vm3976_vm4, %v3995_v60, %v3996_v22  ;;  %v6350_v15 = vld [vmem:[%s8359_s3 + $0x1a8] sm:$0xff] }
 0x15a   : > { %v1516_v36 = vadd.f32 %v6873_v55, %v1488_v63  ;;  %v4031_v34 = vpack.c.bf16 %v3997_v50, %v3997_v50  ;;  %1760 = vmatpush.bf16.msra.mxu1 %v6298_v7  ;;  %2389 = vmatpush.bf16.msrb.mxu2 %v6350_v15  ;;  %v6360_v50 = vld [vmem:[%s8359_s3 + $0x2f8] sm:$0xff] }
 0x15b   : > { %v7209_v3 = vunpack.c.l.b16 %v2180_v6  ;;  %v7211_v57 = vunpack.c.l.b16 %v2797_v18  ;;  %v7213_v29 = vunpack.c.l.b16 %v3414_v10  ;;  %v7253_v6 = vpop.f32.mrf.mxu1  ;;  %v838_v10 = vpop.f32.mrf.mxu0  ;;  %2493 = vmatpush.bf16.msrb.mxu3 %v6360_v50 }
 0x15c   : > { %v1540_v4 = vmax.f32 %v1516_v36, 0.0  ;;  %v7221_v35 = vunpack.c.l.b16 %v4031_v34 }
 0x15d   : > { %v1237_v52 = vpop.f32.mrf.mxu2  ;;  %v1427_v60 = vpop.f32.mrf.mxu3  ;;  %v7225_v22 = vpack.c.b16 %v7209_v3, %v7154_v12  ;;  %v7229_v63 = vpack.c.b16 %v7211_v57, %v7156_v14  ;;  %v7233_v51 = vpack.c.b16 %v7213_v29, %v7158_v31  ;;  %v6297_v14 = vld [vmem:[%s8359_s3] sm:$0xff] }
 0x15e   : > { %v1465_v9 = vmax.f32 %v1237_v52, %v1427_v60  ;;  %v1557_v0 = vpack.c.bf16 %v1540_v4, %v1540_v4  ;;  %v7238_v34 = vpack.c.b16 %v7221_v35, %v7163_v28  ;;  %v6349_v31 = vld [vmem:[%s8359_s3 + $0x1a0] sm:$0xff]  ;;  %1761 = vmatpush.bf16.msra.mxu1 %v6297_v14  ;;  %v1062_v28 = vmax.f32 %v836_v41, %v7196_v23  ;;  %v6344_v41 = vld [vmem:[%s8359_s3 + $0x78] sm:$0xff] }
 0x15f   : > { %2390 = vmatpush.bf16.msrb.mxu2 %v6349_v31  ;;  %v2147_v23 = vrot.slane %v1540_v4, 1  ;;  %v2764_v15 = vrot.slane %v1540_v4, 2  ;;  %v3381_v52 = vrot.slane %v1540_v4, 3  ;;  %2494 = vmatpush.bf16.msrb.mxu3 %v6359_v62  ;;  %v6346_v62 = vld [vmem:[%s8359_s3 + $0x188] sm:$0xff] }
 0x160   : > { %8375 = vst [vmem:[#allocation8_spill] sm:$0xff] %v7238_v34  ;;  %v1489_v12 = vmax.f32 %v1061_v30, %v1465_v9  ;;  %v7240_v24 = vunpack.c.l.b16 %v1557_v0 }
 0x162   : > { %v1517_v13 = vadd.f32 %v6873_v55, %v1489_v12  ;;  %v7251_v27 = vpack.c.b16 %v7240_v24, %v7181_v61  ;;  %v6348_v61 = vld [vmem:[%s8359_s3 + $0x198] sm:$0xff]  ;;  %2275 = vmatpush.bf16.msrb.mxu1 %v6344_v41  ;;  %v3998_v12 = vrot.slane %v1540_v4, 4 }
 0x163   : > { %2391 = vmatpush.bf16.msrb.mxu2 %v6348_v61 }
 0x164   : > { %v1541_v18 = vmax.f32 %v1517_v13, 0.0  ;;  %1870 = vmatmul.bf16.gmra.mxu2 %v7251_v27  ;;  %2077 = vmatmul.bf16.gmra.mxu0 %v7251_v27  ;;  %v6347_v13 = vld [vmem:[%s8359_s3 + $0x190] sm:$0xff] }
 0x165   : > { %v1240_v36 = vpop.f32.mrf.mxu2  ;;  %v1430_v7 = vpop.f32.mrf.mxu3 }
 0x166   : > { %v1466_v60 = vmax.f32 %v1240_v36, %v1430_v7  ;;  %v2148_v30 = vrot.slane %v1541_v18, 1  ;;  %v2765_v9 = vrot.slane %v1541_v18, 2  ;;  %v3382_v0 = vrot.slane %v1541_v18, 3 }
 0x167   : > { %v3999_v14 = vrot.slane %v1541_v18, 4  ;;  %v1031_v18 = vpop.f32.mrf.mxu1  ;;  %2392 = vmatpush.bf16.msrb.mxu2 %v6347_v13 }
 0x168   : > { %v1490_v31 = vmax.f32 %v1062_v28, %v1466_v60  ;;  %v2149_v34 = vsel %vm2125_vm1, %v2147_v23, %v2148_v30  ;;  %v2766_v50 = vsel %vm2742_vm2, %v2764_v15, %v2765_v9  ;;  %v3383_v61 = vsel %vm3359_vm3, %v3381_v52, %v3382_v0  ;;  %v841_v30 = vpop.f32.mrf.mxu0  ;;  %v6343_v52 = vld [vmem:[%s8359_s3 + $0x70] sm:$0xff] }
 0x169   : > { %v2181_v36 = vpack.c.bf16 %v2149_v34, %v2149_v34  ;;  %v2798_v7 = vpack.c.bf16 %v2766_v50, %v2766_v50  ;;  %v3415_v41 = vpack.c.bf16 %v3383_v61, %v3383_v61  ;;  %v4000_v4 = vsel %vm3976_vm4, %v3998_v12, %v3999_v14  ;;  %v6368_v34 = vld [vmem:[%s8359_s3 + $0x438] sm:$0xff]  ;;  %v6358_v14 = vld [vmem:[%s8359_s3 + $0x2e8] sm:$0xff]  ;;  %2276 = vmatpush.bf16.msrb.mxu1 %v6343_v52 }
 0x16a   : > { %v1518_v28 = vadd.f32 %v6873_v55, %v1490_v31  ;;  %v4032_v60 = vpack.c.bf16 %v4000_v4, %v4000_v4  ;;  %v1063_v61 = vmax.f32 %v838_v10, %v7253_v6  ;;  %2599 = vmatpush.bf16.msrb.mxu0 %v6368_v34  ;;  %2495 = vmatpush.bf16.msrb.mxu3 %v6358_v14  ;;  %v6367_v34 = vld [vmem:[%s8359_s3 + $0x430] sm:$0xff]  ;;  %v6342_v52 = vld [vmem:[%s8359_s3 + $0x68] sm:$0xff] }
 0x16b   : > { %v7278_v25 = vunpack.c.l.b16 %v2181_v36  ;;  %v7280_v2 = vunpack.c.l.b16 %v2798_v7  ;;  %v7282_v23 = vunpack.c.l.b16 %v3415_v41  ;;  %2393 = vmatpush.bf16.msrb.mxu2 %v6346_v62 }
 0x16c   : > { %v1542_v15 = vmax.f32 %v1518_v28, 0.0  ;;  %v7293_v9 = vunpack.c.l.b16 %v4032_v60  ;;  %v1064_v28 = vmax.f32 %v841_v30, %v1031_v18 }
 0x16d   : > { %v1242_v0 = vpop.f32.mrf.mxu2  ;;  %v1432_v12 = vpop.f32.mrf.mxu3  ;;  %v7300_v31 = vpack.c.b16 %v7278_v25, %v7209_v3  ;;  %v7304_v13 = vpack.c.b16 %v7280_v2, %v7211_v57  ;;  %v7308_v50 = vpack.c.b16 %v7282_v23, %v7213_v29  ;;  %v6345_v57 = vld [vmem:[%s8359_s3 + $0x180] sm:$0xff]  ;;  %2277 = vmatpush.bf16.msrb.mxu1 %v6342_v52 }
 0x16e   : > { %v1467_v36 = vmax.f32 %v1242_v0, %v1432_v12  ;;  %v1558_v7 = vpack.c.bf16 %v1542_v15, %v1542_v15  ;;  %v7313_v3 = vpack.c.b16 %v7293_v9, %v7221_v35  ;;  %v6357_v29 = vld [vmem:[%s8359_s3 + $0x2e0] sm:$0xff]  ;;  %v2150_v0 = vrot.slane %v1542_v15, 1  ;;  %2600 = vmatpush.bf16.msrb.mxu0 %v6367_v34 }
 0x16f   : > { %2394 = vmatpush.bf16.msrb.mxu2 %v6345_v57  ;;  %2496 = vmatpush.bf16.msrb.mxu3 %v6357_v29  ;;  %v1033_v60 = vpop.f32.mrf.mxu1  ;;  %v2767_v12 = vrot.slane %v1542_v15, 2  ;;  %v3384_v14 = vrot.slane %v1542_v15, 3 }
 0x170   : > { %8376 = vst [vmem:[#allocation9_spill] sm:$0xff] %v7313_v3  ;;  %v1491_v41 = vmax.f32 %v1063_v61, %v1467_v36  ;;  %v7315_v4 = vunpack.c.l.b16 %v1558_v7  ;;  %v843_v7 = vpop.f32.mrf.mxu0 }
 0x172   : > { %v1519_v6 = vadd.f32 %v6873_v55, %v1491_v41  ;;  %v1614_v10 = vpack.c.b16 %v7315_v4, %v7240_v24  ;;  %v6356_v55 = vld [vmem:[%s8359_s3 + $0x2d8] sm:$0xff]  ;;  %v4001_v41 = vrot.slane %v1542_v15, 4  ;;  %v7345_v15 = vld [vmem:[%s8358_s2] ss:$0 sm:$0xff] }
 0x173   : > { %2497 = vmatpush.bf16.msrb.mxu3 %v6356_v55 }
 0x174   : > { %v1543_v35 = vmax.f32 %v1519_v6, 0.0  ;;  %1690 = vmatmul.bf16.gmra.mxu1 %v1614_v10  ;;  %1976 = vmatmul.bf16.gmra.mxu3 %v1614_v10  ;;  %v6355_v6 = vld [vmem:[%s8359_s3 + $0x2d0] sm:$0xff] }
 0x175   : > { %v1245_v24 = vpop.f32.mrf.mxu2  ;;  %v1435_v62 = vpop.f32.mrf.mxu3 }
 0x176   : > { %v1468_v61 = vmax.f32 %v1245_v24, %v1435_v62  ;;  %v2151_v18 = vrot.slane %v1543_v35, 1  ;;  %v2768_v30 = vrot.slane %v1543_v35, 2  ;;  %v3385_v36 = vrot.slane %v1543_v35, 3 }
 0x177   : > { %v4002_v57 = vrot.slane %v1543_v35, 4  ;;  %2498 = vmatpush.bf16.msrb.mxu3 %v6355_v6 }
 0x178   : > { %v1492_v29 = vmax.f32 %v1064_v28, %v1468_v61  ;;  %v2152_v10 = vsel %vm2125_vm1, %v2150_v0, %v2151_v18  ;;  %v2769_v3 = vsel %vm2742_vm2, %v2767_v12, %v2768_v30  ;;  %v3386_v24 = vsel %vm3359_vm3, %v3384_v14, %v3385_v36  ;;  %v6366_v61 = vld [vmem:[%s8359_s3 + $0x428] sm:$0xff]  ;;  %v6341_v18 = vld [vmem:[%s8359_s3 + $0x60] sm:$0xff] }
 0x179   : > { %v2182_v34 = vpack.c.bf16 %v2152_v10, %v2152_v10  ;;  %v2799_v52 = vpack.c.bf16 %v2769_v3, %v2769_v3  ;;  %v3416_v62 = vpack.c.bf16 %v3386_v24, %v3386_v24  ;;  %v4003_v26 = vsel %vm3976_vm4, %v4001_v41, %v4002_v57  ;;  %2601 = vmatpush.bf16.msrb.mxu0 %v6366_v61  ;;  %v1036_v10 = vpop.f32.mrf.mxu1  ;;  %v6340_v61 = vld [vmem:[%s8359_s3 + $0x58] sm:$0xff] }
 0x17a   : > { %v1520_v35 = vadd.f32 %v7345_v15, %v1492_v29  ;;  %v4033_v28 = vpack.c.bf16 %v4003_v26, %v4003_v26  ;;  %v1065_v3 = vmax.f32 %v843_v7, %v1033_v60  ;;  %v6354_v26 = vld [vmem:[%s8359_s3 + $0x2c8] sm:$0xff]  ;;  %2278 = vmatpush.bf16.msrb.mxu1 %v6341_v18  ;;  %v6364_v18 = vld [vmem:[%s8359_s3 + $0x418] sm:$0xff] }
 0x17b   : > { %v7348_v55 = vunpack.c.l.b16 %v2182_v34  ;;  %v7350_v0 = vunpack.c.l.b16 %v2799_v52  ;;  %v7352_v12 = vunpack.c.l.b16 %v3416_v62  ;;  %2499 = vmatpush.bf16.msrb.mxu3 %v6354_v26  ;;  %v846_v52 = vpop.f32.mrf.mxu0 }
 0x17c   : > { %v1544_v14 = vmax.f32 %v1520_v35, 0.0  ;;  %v7363_v30 = vunpack.c.l.b16 %v4033_v28 }
 0x17d   : > { %v1247_v36 = vpop.f32.mrf.mxu2  ;;  %v1437_v41 = vpop.f32.mrf.mxu3  ;;  %v7367_v57 = vpack.c.b16 %v7348_v55, %v7278_v25  ;;  %v7371_v60 = vpack.c.b16 %v7350_v0, %v7280_v2  ;;  %v7375_v7 = vpack.c.b16 %v7352_v12, %v7282_v23  ;;  %v6353_v2 = vld [vmem:[%s8359_s3 + $0x2c0] sm:$0xff] }
 0x17e   : > { %v1469_v29 = vmax.f32 %v1247_v36, %v1437_v41  ;;  %v1559_v6 = vpack.c.bf16 %v1544_v14, %v1544_v14  ;;  %v7379_v24 = vpack.c.b16 %v7363_v30, %v7293_v9  ;;  %v6365_v23 = vld [vmem:[%s8359_s3 + $0x420] sm:$0xff]  ;;  %v1066_v9 = vmax.f32 %v846_v52, %v1036_v10  ;;  %2279 = vmatpush.bf16.msrb.mxu1 %v6340_v61 }
 0x17f   : > { %2602 = vmatpush.bf16.msrb.mxu0 %v6365_v23  ;;  %2500 = vmatpush.bf16.msrb.mxu3 %v6353_v2  ;;  %v2153_v26 = vrot.slane %v1544_v14, 1  ;;  %v2770_v36 = vrot.slane %v1544_v14, 2  ;;  %v6363_v2 = vld [vmem:[%s8359_s3 + $0x410] sm:$0xff] }
 0x180   : > { %8377 = vst [vmem:[#allocation10_spill] sm:$0xff] %v7379_v24  ;;  %v1493_v25 = vmax.f32 %v1065_v3, %v1469_v29  ;;  %v7381_v34 = vunpack.c.l.b16 %v1559_v6  ;;  %v8378_v3 = vpack.c.b16 %v6940_v53, %v6942_v54  ;;  %v4004_v6 = vrot.slane %v1544_v14, 4  ;;  %v6339_v23 = vld [vmem:[%s8359_s3 + $0x50] sm:$0xff] }
 0x181   : > { %v1038_v61 = vpop.f32.mrf.mxu1 }
 0x182   : > { %v1521_v62 = vadd.f32 %v7345_v15, %v1493_v25  ;;  %v1802_v35 = vpack.c.b16 %v7381_v34, %v7315_v4  ;;  %v3387_v4 = vrot.slane %v1544_v14, 3  ;;  %2280 = vmatpush.bf16.msrb.mxu1 %v6339_v23 }
 0x183   : > { %2603 = vmatpush.bf16.msrb.mxu0 %v6364_v18 }
 0x184   : > { %v1545_v28 = vmax.f32 %v1521_v62, 0.0  ;;  %1762 = vmatmul.bf16.vlgmr.msra.gmra.mxu1 %v8378_v3  ;;  %1875 = vmatmul.bf16.gmra.mxu2 %v1802_v35 }
 0x185   : > { %2082 = vmatmul.bf16.gmra.mxu0 %v1802_v35  ;;  %v1250_v41 = vpop.f32.mrf.mxu2  ;;  %v1440_v29 = vpop.f32.mrf.mxu3 }
 0x186   : > { %v1470_v10 = vmax.f32 %v1250_v41, %v1440_v29  ;;  %v2154_v53 = vrot.slane %v1545_v28, 1  ;;  %v2771_v54 = vrot.slane %v1545_v28, 2  ;;  %v3388_v25 = vrot.slane %v1545_v28, 3 }
 0x187   : > { %v4005_v52 = vrot.slane %v1545_v28, 4  ;;  %2604 = vmatpush.bf16.msrb.mxu0 %v6363_v2 }
 0x188   : > { %v1494_v62 = vmax.f32 %v1066_v9, %v1470_v10  ;;  %v2155_v35 = vsel %vm2125_vm1, %v2153_v26, %v2154_v53  ;;  %v2772_v14 = vsel %vm2742_vm2, %v2770_v36, %v2771_v54  ;;  %v3389_v3 = vsel %vm3359_vm3, %v3387_v4, %v3388_v25  ;;  %v6362_v9 = vld [vmem:[%s8359_s3 + $0x408] sm:$0xff]  ;;  %v848_v26 = vpop.f32.mrf.mxu0 }
 0x189   : > { %v2183_v18 = vpack.c.bf16 %v2155_v35, %v2155_v35  ;;  %v2800_v41 = vpack.c.bf16 %v2772_v14, %v2772_v14  ;;  %v3417_v29 = vpack.c.bf16 %v3389_v3, %v3389_v3  ;;  %v4006_v24 = vsel %vm3976_vm4, %v4004_v6, %v4005_v52 }
 0x18a   : > { %v1522_v56 = vadd.f32 %v7345_v15, %v1494_v62  ;;  %v4034_v28 = vpack.c.bf16 %v4006_v24, %v4006_v24  ;;  %v1067_v54 = vmax.f32 %v848_v26, %v1038_v61 }
 0x18b   : > { %v7415_v10 = vunpack.c.l.b16 %v2183_v18  ;;  %v7417_v36 = vunpack.c.l.b16 %v2800_v41  ;;  %v7419_v4 = vunpack.c.l.b16 %v3417_v29  ;;  %2605 = vmatpush.bf16.msrb.mxu0 %v6362_v9  ;;  %v6384_v18 = vld [vmem:[%s8359_s3 + $0xb8] sm:$0xff] }
 0x18c   : > { %v1546_v53 = vmax.f32 %v1522_v56, 0.0  ;;  %v7421_v25 = vunpack.c.l.b16 %v4034_v28  ;;  %v8379_v28 = vpack.c.b16 %v7049_v37, %v6992_v38  ;;  %2892 = vmatpush.bf16.msra.mxu2 %v6384_v18 }
 0x18d   : > { %v1252_v6 = vpop.f32.mrf.mxu2  ;;  %v1442_v52 = vpop.f32.mrf.mxu3  ;;  %v7425_v2 = vpack.c.b16 %v7415_v10, %v7348_v55  ;;  %v7429_v24 = vpack.c.b16 %v7417_v36, %v7350_v0  ;;  %v7433_v23 = vpack.c.b16 %v7419_v4, %v7352_v12  ;;  %v6361_v55 = vld [vmem:[%s8359_s3 + $0x400] sm:$0xff] }
 0x18e   : > { %v1471_v62 = vmax.f32 %v1252_v6, %v1442_v52  ;;  %v1560_v35 = vpack.c.bf16 %v1546_v53, %v1546_v53  ;;  %v7437_v56 = vpack.c.b16 %v7421_v25, %v7363_v30  ;;  %v6338_v30 = vld [vmem:[%s8359_s3 + $0x48] sm:$0xff]  ;;  %v2156_v41 = vrot.slane %v1546_v53, 1 }
 0x18f   : > { %2606 = vmatpush.bf16.msrb.mxu0 %v6361_v55  ;;  %v2773_v29 = vrot.slane %v1546_v53, 2  ;;  %v3390_v9 = vrot.slane %v1546_v53, 3  ;;  %2281 = vmatpush.bf16.msrb.mxu1 %v6338_v30  ;;  %v6337_v30 = vld [vmem:[%s8359_s3 + $0x40] sm:$0xff] }
 0x190   : > { %v1495_v14 = vmax.f32 %v1067_v54, %v1471_v62  ;;  %v7439_v3 = vunpack.c.l.b16 %v1560_v35  ;;  %v4007_v54 = vrot.slane %v1546_v53, 4 }
 0x192   : > { %v1523_v0 = vadd.f32 %v7345_v15, %v1495_v14  ;;  %v1908_v12 = vpack.c.b16 %v7439_v3, %v7381_v34  ;;  %v8380_v14 = vmax.f32 %v6829_v32, %v6831_v33 }
 0x193   : > { %2282 = vmatpush.bf16.msrb.mxu1 %v6337_v30 }
 0x194   : > { %v1547_v61 = vmax.f32 %v1523_v0, 0.0  ;;  %1767 = vmatmul.bf16.gmra.mxu1 %v7074_v16  ;;  %1981 = vmatmul.bf16.gmra.mxu3 %v1908_v12  ;;  %v6383_v0 = vld [vmem:[%s8359_s3 + $0xb0] sm:$0xff] }
 0x195   : > { %2395 = vmatmul.bf16.vlgmr.msrb.gmra.mxu2 %v8379_v28  ;;  %v1255_v34 = vpop.f32.mrf.mxu2  ;;  %v1445_v26 = vpop.f32.mrf.mxu3 }
 0x196   : > { %v1472_v16 = vmax.f32 %v1255_v34, %v1445_v26  ;;  %v2157_v6 = vrot.slane %v1547_v61, 1  ;;  %v2774_v52 = vrot.slane %v1547_v61, 2  ;;  %v3391_v62 = vrot.slane %v1547_v61, 3  ;;  %2893 = vmatpush.bf16.msra.mxu2 %v6383_v0 }
 0x197   : > { %v4008_v35 = vrot.slane %v1547_v61, 4 }
 0x198   : > { %v1496_v55 = vmax.f32 %v8380_v14, %v1472_v16  ;;  %v2158_v37 = vsel %vm2125_vm1, %v2156_v41, %v2157_v6  ;;  %v2775_v12 = vsel %vm2742_vm2, %v2773_v29, %v2774_v52  ;;  %v3392_v53 = vsel %vm3359_vm3, %v3390_v9, %v3391_v62  ;;  %v6382_v41 = vld [vmem:[%s8359_s3 + $0xa8] sm:$0xff] }
 0x199   : > { %v2184_v18 = vpack.c.bf16 %v2158_v37, %v2158_v37  ;;  %v2801_v61 = vpack.c.bf16 %v2775_v12, %v2775_v12  ;;  %v3418_v28 = vpack.c.bf16 %v3392_v53, %v3392_v53  ;;  %v4009_v32 = vsel %vm3976_vm4, %v4007_v54, %v4008_v35  ;;  %v6429_v37 = vld [vmem:[%s8359_s3 + $0x220] sm:$0xff] }
 0x19a   : > { %v1524_v33 = vadd.f32 %v7345_v15, %v1496_v55  ;;  %v4035_v34 = vpack.c.bf16 %v4009_v32, %v4009_v32  ;;  %2894 = vmatpush.bf16.msra.mxu2 %v6382_v41  ;;  %v8381_v12 = vmax.f32 %v6843_v39, %v6845_v40  ;;  %v6380_v39 = vld [vmem:[%s8359_s3 + $0x98] sm:$0xff] }
 0x19b   : > { %v7474_v29 = vunpack.c.l.b16 %v2184_v18  ;;  %v7476_v9 = vunpack.c.l.b16 %v2801_v61  ;;  %v7478_v26 = vunpack.c.l.b16 %v3418_v28  ;;  %v6381_v18 = vld [vmem:[%s8359_s3 + $0xa0] sm:$0xff]  ;;  %v6392_v61 = vld [vmem:[%s8359_s3 + $0x1f8] sm:$0xff] }
 0x19c   : > { %v1548_v16 = vmax.f32 %v1524_v33, 0.0  ;;  %v7480_v6 = vunpack.c.l.b16 %v4035_v34  ;;  %3004 = vmatpush.bf16.msra.mxu3 %v6392_v61  ;;  %v6376_v40 = vld [vmem:[%s8359_s3 + $0x578] sm:$0xff] }
 0x19d   : > { %v1257_v52 = vpop.f32.mrf.mxu2  ;;  %v1447_v54 = vpop.f32.mrf.mxu3  ;;  %v2549_v62 = vpack.c.b16 %v7474_v29, %v7415_v10  ;;  %2705 = vmatpush.bf16.msra.mxu1 %v6376_v40  ;;  %v6400_v61 = vld [vmem:[%s8359_s3 + $0x338] sm:$0xff] }
 0x19e   : > { %v1473_v55 = vmax.f32 %v1257_v52, %v1447_v54  ;;  %v1561_v0 = vpack.c.bf16 %v1548_v16, %v1548_v16  ;;  %2895 = vmatpush.bf16.msra.mxu2 %v6381_v18  ;;  %v3393_v41 = vrot.slane %v1548_v16, 3  ;;  %v4010_v34 = vrot.slane %v1548_v16, 4  ;;  %3110 = vmatpush.bf16.msra.mxu0 %v6400_v61  ;;  %v6388_v61 = vld [vmem:[%s8359_s3 + $0x1d8] sm:$0xff] }
 0x1a0   : > { %v1497_v53 = vmax.f32 %v8381_v12, %v1473_v55  ;;  %v2013_v30 = vunpack.c.l.b16 %v1561_v0  ;;  %v6379_v0 = vld [vmem:[%s8359_s3 + $0x90] sm:$0xff] }
 0x1a1   : > { %v6391_v12 = vld [vmem:[%s8359_s3 + $0x1f0] sm:$0xff] }
 0x1a2   : > { %v1525_v28 = vadd.f32 %v7345_v15, %v1497_v53  ;;  %v2014_v32 = vpack.c.b16 %v2013_v30, %v7439_v3  ;;  %v2159_v15 = vrot.slane %v1548_v16, 1  ;;  %v2776_v3 = vrot.slane %v1548_v16, 2  ;;  %2896 = vmatpush.bf16.msra.mxu2 %v6380_v39  ;;  %3005 = vmatpush.bf16.msra.mxu3 %v6391_v12  ;;  %v6417_v12 = vld [vmem:[%s8359_s3 + $0xc0] sm:$0xff] }
 0x1a4   : > { %v1549_v33 = vmax.f32 %v1525_v28, 0.0  ;;  %1772 = vmatmul.bf16.gmra.mxu1 %v7133_v17  ;;  %2087 = vmatmul.bf16.gmra.mxu0 %v2014_v32  ;;  %v6375_v28 = vld [vmem:[%s8359_s3 + $0x570] sm:$0xff] }
 0x1a5   : > { %2400 = vmatmul.bf16.gmra.mxu2 %v7122_v8  ;;  %2501 = vmatmul.bf16.vlgmr.msrb.gmra.mxu3 %v7093_v21 }
 0x1a6   : > { %v2160_v52 = vrot.slane %v1549_v33, 1  ;;  %v2777_v17 = vrot.slane %v1549_v33, 2  ;;  %v3394_v54 = vrot.slane %v1549_v33, 3  ;;  %v4011_v55 = vrot.slane %v1549_v33, 4  ;;  %2897 = vmatpush.bf16.msra.mxu2 %v6379_v0  ;;  %2706 = vmatpush.bf16.msra.mxu1 %v6375_v28  ;;  %v6373_v28 = vld [vmem:[%s8359_s3 + $0x560] sm:$0xff] }
 0x1a8   : > { %v2161_v53 = vsel %vm2125_vm1, %v2159_v15, %v2160_v52  ;;  %v2778_v30 = vsel %vm2742_vm2, %v2776_v3, %v2777_v17  ;;  %v3395_v16 = vsel %vm3359_vm3, %v3393_v41, %v3394_v54  ;;  %v4012_v18 = vsel %vm3976_vm4, %v4010_v34, %v4011_v55  ;;  %v6378_v15 = vld [vmem:[%s8359_s3 + $0x88] sm:$0xff] }
 0x1a9   : > { %v2185_v32 = vpack.c.bf16 %v2161_v53, %v2161_v53  ;;  %v2802_v33 = vpack.c.bf16 %v2778_v30, %v2778_v30  ;;  %v3419_v39 = vpack.c.bf16 %v3395_v16, %v3395_v16  ;;  %v4036_v40 = vpack.c.bf16 %v4012_v18, %v4012_v18  ;;  %v6390_v3 = vld [vmem:[%s8359_s3 + $0x1e8] sm:$0xff]  ;;  %v6377_v53 = vld [vmem:[%s8359_s3 + $0x80] sm:$0xff]  ;;  %v6399_v16 = vld [vmem:[%s8359_s3 + $0x330] sm:$0xff] }
 0x1aa   : > { %2898 = vmatpush.bf16.msra.mxu2 %v6378_v15  ;;  %3006 = vmatpush.bf16.msra.mxu3 %v6390_v3  ;;  %v6389_v30 = vld [vmem:[%s8359_s3 + $0x1e0] sm:$0xff]  ;;  %v6374_v18 = vld [vmem:[%s8359_s3 + $0x568] sm:$0xff]  ;;  %v6372_v15 = vld [vmem:[%s8359_s3 + $0x558] sm:$0xff]  ;;  %v7592_v3 = vpop.f32.mrf.mxu0 }
 0x1ab   : > { %v7532_v41 = vunpack.c.l.b16 %v2185_v32  ;;  %v7534_v34 = vunpack.c.l.b16 %v2802_v33  ;;  %v7536_v52 = vunpack.c.l.b16 %v3419_v39  ;;  %v7538_v17 = vunpack.c.l.b16 %v4036_v40  ;;  %3111 = vmatpush.bf16.msra.mxu0 %v6399_v16  ;;  %2707 = vmatpush.bf16.msra.mxu1 %v6374_v18  ;;  %v6386_v32 = vld [vmem:[%s8359_s3 + $0x1c8] sm:$0xff]  ;;  %v6385_v33 = vld [vmem:[%s8359_s3 + $0x1c0] sm:$0xff]  ;;  %v7610_v16 = vpop.f32.mrf.mxu2 }
 0x1ac   : > { %v6397_v39 = vld [vmem:[%s8359_s3 + $0x320] sm:$0xff]  ;;  %v8382_v40 = vpack.c.b16 %v6992_v38, %v6994_v42  ;;  %v6395_v38 = vld [vmem:[%s8359_s3 + $0x310] sm:$0xff] }
 0x1ad   : > { %v2655_v54 = vpack.c.b16 %v7532_v41, %v7474_v29  ;;  %v6371_v42 = vld [vmem:[%s8359_s3 + $0x550] sm:$0xff]  ;;  %v6393_v18 = vld [vmem:[%s8359_s3 + $0x300] sm:$0xff]  ;;  %v6452_v29 = vld [vmem:[%s8359_s3 + $0x5d8] sm:$0xff] }
 0x1ae   : > { %2899 = vmatpush.bf16.msra.mxu2 %v6377_v53  ;;  %3007 = vmatpush.bf16.msra.mxu3 %v6389_v30  ;;  %v6396_v53 = vld [vmem:[%s8359_s3 + $0x318] sm:$0xff] }
 0x1af   : > { %2708 = vmatpush.bf16.msra.mxu1 %v6373_v28 }
 0x1b2   : > { %3008 = vmatpush.bf16.msra.mxu3 %v6388_v61  ;;  %v7608_v30 = vpop.f32.mrf.mxu0  ;;  %v6370_v61 = vld [vmem:[%s8359_s3 + $0x548] sm:$0xff] }
 0x1b3   : > { %2709 = vmatpush.bf16.msra.mxu1 %v6372_v15  ;;  %v6413_v15 = vld [vmem:[%s8359_s3 + $0x5a0] sm:$0xff] }
 0x1b4   : > { %1777 = vmatmul.bf16.gmra.mxu1 %v7251_v27  ;;  %2607 = vmatmul.bf16.vlgmr.msrb.gmra.mxu0 %v7122_v8  ;;  %v6387_v27 = vld [vmem:[%s8359_s3 + $0x1d0] sm:$0xff]  ;;  %v6398_v8 = vld [vmem:[%s8359_s3 + $0x328] sm:$0xff] }
 0x1b5   : > { %2405 = vmatmul.bf16.gmra.mxu2 %v7225_v22  ;;  %2506 = vmatmul.bf16.gmra.mxu3 %v7166_v5 }
 0x1b6   : > { %3009 = vmatpush.bf16.msra.mxu3 %v6387_v27  ;;  %3112 = vmatpush.bf16.msra.mxu0 %v6398_v8  ;;  %v8383_v27 = vpack.c.b16 %v6996_v43, %v6998_v44  ;;  %v6416_v8 = vld [vmem:[%s8359_s3 + $0x5b8] sm:$0xff]  ;;  %v6414_v44 = vld [vmem:[%s8359_s3 + $0x5a8] sm:$0xff] }
 0x1b7   : > { %2710 = vmatpush.bf16.msra.mxu1 %v6371_v42  ;;  %3322 = vmatpush.bf16.msrb.mxu2 %v6416_v8  ;;  %v8384_v42 = vpack.c.b16 %v7051_v48, %v6996_v43  ;;  %v6423_v43 = vld [vmem:[%s8359_s3 + $0xf0] sm:$0xff] }
 0x1b8   : > { %v6407_v8 = vld [vmem:[%s8359_s3 + $0x470] sm:$0xff] }
 0x1ba   : > { %3010 = vmatpush.bf16.msra.mxu3 %v6386_v32  ;;  %3113 = vmatpush.bf16.msra.mxu0 %v6397_v39  ;;  %v7627_v28 = vpop.f32.mrf.mxu0  ;;  %v7635_v32 = vpop.f32.mrf.mxu2 }
 0x1bb   : > { %2711 = vmatpush.bf16.msra.mxu1 %v6370_v61  ;;  %v7642_v39 = vpop.f32.mrf.mxu3 }
 0x1be   : > { %3011 = vmatpush.bf16.msra.mxu3 %v6385_v33  ;;  %3114 = vmatpush.bf16.msra.mxu0 %v6396_v53 }
 0x1c2   : > { %3115 = vmatpush.bf16.msra.mxu0 %v6395_v38  ;;  %v6424_v38 = vld [vmem:[%s8359_s3 + $0xf8] sm:$0xff] }
 0x1c3   : > { %3509 = vmatpush.bf16.msrb.mxu3 %v6424_v38  ;;  %v7676_v48 = vpop.f32.mrf.mxu3  ;;  %v6409_v38 = vld [vmem:[%s8359_s3 + $0x580] sm:$0xff] }
 0x1c4   : > { %2283 = vmatmul.bf16.vlgmr.msrb.gmra.mxu1 %v8382_v40  ;;  %2612 = vmatmul.bf16.gmra.mxu0 %v7225_v22  ;;  %v6394_v22 = vld [vmem:[%s8359_s3 + $0x308] sm:$0xff]  ;;  %v7644_v40 = vpop.f32.mrf.mxu0 }
 0x1c5   : > { %2410 = vmatmul.bf16.gmra.mxu2 %v7367_v57  ;;  %2511 = vmatmul.bf16.gmra.mxu3 %v7300_v31 }
 0x1c6   : > { %3116 = vmatpush.bf16.msra.mxu0 %v6394_v22  ;;  %v6408_v22 = vld [vmem:[%s8359_s3 + $0x478] sm:$0xff] }
 0x1c7   : > { %v7649_v53 = vpop.f32.mrf.mxu2  ;;  %3510 = vmatpush.bf16.msrb.mxu3 %v6423_v43 }
 0x1ca   : > { %3117 = vmatpush.bf16.msra.mxu0 %v6393_v18  ;;  %v6412_v18 = vld [vmem:[%s8359_s3 + $0x598] sm:$0xff] }
 0x1cc   : > { %v2073_v61 = vpop.f32.mrf.mxu0 }
 0x1d1   : > { %v7640_v33 = vpop.f32.mrf.mxu1 }
 0x1d4   : > { %2288 = vmatmul.bf16.gmra.mxu1 %v7093_v21  ;;  %2617 = vmatmul.bf16.gmra.mxu0 %v7367_v57  ;;  %v6415_v21 = vld [vmem:[%s8359_s3 + $0x5b0] sm:$0xff]  ;;  %v6369_v57 = vld [vmem:[%s8359_s3 + $0x540] sm:$0xff] }
 0x1d5   : > { %2516 = vmatmul.bf16.gmra.mxu3 %v7425_v2  ;;  %2900 = vmatmul.bf16.vlgmr.msra.gmra.mxu2 %v8383_v27  ;;  %v6432_v27 = vld [vmem:[%s8359_s3 + $0x238] sm:$0xff] }
 0x1d6   : > { %3323 = vmatpush.bf16.msrb.mxu2 %v6415_v21  ;;  %2712 = vmatpush.bf16.msra.mxu1 %v6369_v57  ;;  %v6410_v21 = vld [vmem:[%s8359_s3 + $0x588] sm:$0xff]  ;;  %v7687_v57 = vpop.f32.mrf.mxu2 }
 0x1d7   : > { %3621 = vmatpush.bf16.msrb.mxu0 %v6432_v27  ;;  %v6406_v27 = vld [vmem:[%s8359_s3 + $0x468] sm:$0xff] }
 0x1d9   : > { %v7668_v10 = vpop.f32.mrf.mxu1 }
 0x1da   : > { %3324 = vmatpush.bf16.msrb.mxu2 %v6414_v44  ;;  %3216 = vmatpush.bf16.msrb.mxu1 %v6408_v22  ;;  %v6422_v44 = vld [vmem:[%s8359_s3 + $0xe8] sm:$0xff]  ;;  %v7700_v22 = vpop.f32.mrf.mxu3 }
 0x1db   : > { %3511 = vmatpush.bf16.msrb.mxu3 %v6422_v44 }
 0x1de   : > { %3325 = vmatpush.bf16.msrb.mxu2 %v6413_v15  ;;  %3217 = vmatpush.bf16.msrb.mxu1 %v6407_v8 }
 0x1e2   : > { %3326 = vmatpush.bf16.msrb.mxu2 %v6412_v18  ;;  %v6431_v18 = vld [vmem:[%s8359_s3 + $0x230] sm:$0xff]  ;;  %3218 = vmatpush.bf16.msrb.mxu1 %v6406_v27  ;;  %v7724_v44 = vpop.f32.mrf.mxu3 }
 0x1e3   : > { %3622 = vmatpush.bf16.msrb.mxu0 %v6431_v18  ;;  %v6418_v18 = vld [vmem:[%s8359_s3 + $0xc8] sm:$0xff] }
 0x1e4   : > { %2293 = vmatmul.bf16.gmra.mxu1 %v7166_v5  ;;  %2622 = vmatmul.bf16.gmra.mxu0 %v2549_v62  ;;  %v6411_v62 = vld [vmem:[%s8359_s3 + $0x590] sm:$0xff] }
 0x1e5   : > { %2905 = vmatmul.bf16.gmra.mxu2 %v7096_v58  ;;  %3012 = vmatmul.bf16.vlgmr.msra.gmra.mxu3 %v8384_v42  ;;  %v6421_v42 = vld [vmem:[%s8359_s3 + $0xe0] sm:$0xff] }
 0x1e6   : > { %3327 = vmatpush.bf16.msrb.mxu2 %v6411_v62  ;;  %3512 = vmatpush.bf16.msrb.mxu3 %v6421_v42  ;;  %v7707_v62 = vpop.f32.mrf.mxu0  ;;  %v6405_v42 = vld [vmem:[%s8359_s3 + $0x460] sm:$0xff] }
 0x1e7   : > { %v7709_v43 = vpop.f32.mrf.mxu2  ;;  %3219 = vmatpush.bf16.msrb.mxu1 %v6405_v42  ;;  %v6404_v42 = vld [vmem:[%s8359_s3 + $0x458] sm:$0xff] }
 0x1ea   : > { %3328 = vmatpush.bf16.msrb.mxu2 %v6410_v21  ;;  %v6419_v21 = vld [vmem:[%s8359_s3 + $0xd0] sm:$0xff] }
 0x1eb   : > { %3220 = vmatpush.bf16.msrb.mxu1 %v6404_v42 }
 0x1ee   : > { %3329 = vmatpush.bf16.msrb.mxu2 %v6409_v38  ;;  %v6430_v38 = vld [vmem:[%s8359_s3 + $0x228] sm:$0xff]  ;;  %v2078_v27 = vpop.f32.mrf.mxu0 }
 0x1ef   : > { %3623 = vmatpush.bf16.msrb.mxu0 %v6430_v38 }
 0x1f1   : > { %v7692_v15 = vpop.f32.mrf.mxu1 }
 0x1f3   : > { %3624 = vmatpush.bf16.msrb.mxu0 %v6429_v37  ;;  %v6428_v37 = vld [vmem:[%s8359_s3 + $0x218] sm:$0xff] }
 0x1f4   : > { %2298 = vmatmul.bf16.gmra.mxu1 %v7300_v31  ;;  %3118 = vmatmul.bf16.vlgmr.msra.gmra.mxu0 %v7096_v58  ;;  %v6420_v58 = vld [vmem:[%s8359_s3 + $0xd8] sm:$0xff] }
 0x1f5   : > { %2910 = vmatmul.bf16.gmra.mxu2 %v7169_v1  ;;  %3017 = vmatmul.bf16.gmra.mxu3 %v7124_v11 }
 0x1f6   : > { %3513 = vmatpush.bf16.msrb.mxu3 %v6420_v58  ;;  %v7735_v58 = vpop.f32.mrf.mxu2 }
 0x1f7   : > { %v7744_v14 = vpop.f32.mrf.mxu3  ;;  %3625 = vmatpush.bf16.msrb.mxu0 %v6428_v37 }
 0x1f9   : > { %v7719_v8 = vpop.f32.mrf.mxu1 }
 0x1fa   : > { %3514 = vmatpush.bf16.msrb.mxu3 %v6419_v21 }
 0x1fe   : > { %3515 = vmatpush.bf16.msrb.mxu3 %v6418_v18  ;;  %v6427_v18 = vld [vmem:[%s8359_s3 + $0x210] sm:$0xff] }
 0x1ff   : > { %3626 = vmatpush.bf16.msrb.mxu0 %v6427_v18 }
 0x201   : > { %v1763_v21 = vpop.f32.mrf.mxu1 }
 0x202   : > { %v1764_v0 = vadd.f32 %v1763_v21, %v7592_v3  ;;  %3516 = vmatpush.bf16.msrb.mxu3 %v6417_v12  ;;  %v6403_v21 = vld [vmem:[%s8359_s3 + $0x450] sm:$0xff] }
 0x203   : > { %3221 = vmatpush.bf16.msrb.mxu1 %v6403_v21  ;;  %v6402_v21 = vld [vmem:[%s8359_s3 + $0x448] sm:$0xff] }
 0x204   : > { %v1881_v38 = vadd.f32 %v7610_v16, %v1764_v0  ;;  %2713 = vmatmul.bf16.vlgmr.msra.gmra.mxu1 %v7166_v5  ;;  %3123 = vmatmul.bf16.gmra.mxu0 %v7169_v1  ;;  %v7758_v0 = vpop.f32.mrf.mxu0 }
 0x205   : > { %2915 = vmatmul.bf16.gmra.mxu2 %v7304_v13  ;;  %3022 = vmatmul.bf16.gmra.mxu3 %v7229_v63 }
 0x206   : > { %v1987_v12 = vadd.f32 %v7642_v39, %v1881_v38  ;;  %v6426_v39 = vld [vmem:[%s8359_s3 + $0x208] sm:$0xff]  ;;  %v7775_v38 = vpop.f32.mrf.mxu3 }
 0x207   : > { %v7760_v5 = vpop.f32.mrf.mxu2  ;;  %3627 = vmatpush.bf16.msrb.mxu0 %v6426_v39  ;;  %v6448_v39 = vld [vmem:[%s8359_s3 + $0x4b8] sm:$0xff]  ;;  %3222 = vmatpush.bf16.msrb.mxu1 %v6402_v21 }
 0x208   : > { %v7762_v3 = vadd.f32 %v2073_v61, %v1987_v12  ;;  %v6425_v12 = vld [vmem:[%s8359_s3 + $0x200] sm:$0xff]  ;;  %3833 = vmatpush.bf16.msra.mxu2 %v6448_v39 }
 0x209   : > { %v7764_v16 = vpop.f32.mrf.mxu1 }
 0x20b   : > { %3628 = vmatpush.bf16.msrb.mxu0 %v6425_v12 }
 0x20c   : > { %v2083_v61 = vpop.f32.mrf.mxu0 }
 0x20f   : > { %v7777_v42 = vpop.f32.mrf.mxu2 }
 0x211   : > { %v1768_v37 = vpop.f32.mrf.mxu1 }
 0x212   : > { %v1769_v18 = vadd.f32 %v1768_v37, %v7627_v28 }
 0x214   : > { %v1883_v35 = vadd.f32 %v7649_v53, %v1769_v18  ;;  %2718 = vmatmul.bf16.gmra.mxu1 %v7300_v31  ;;  %3128 = vmatmul.bf16.gmra.mxu0 %v7304_v13  ;;  %v2085_v12 = vpop.f32.mrf.mxu0 }
 0x215   : > { %3027 = vmatmul.bf16.gmra.mxu3 %v7371_v60  ;;  %3330 = vmatmul.bf16.vlgmr.msrb.gmra.mxu2 %v7169_v1  ;;  %v6447_v1 = vld [vmem:[%s8359_s3 + $0x4b0] sm:$0xff] }
 0x216   : > { %v1989_v28 = vadd.f32 %v7700_v22, %v1883_v35  ;;  %3834 = vmatpush.bf16.msra.mxu2 %v6447_v1  ;;  %v6401_v35 = vld [vmem:[%s8359_s3 + $0x440] sm:$0xff]  ;;  %v6446_v22 = vld [vmem:[%s8359_s3 + $0x4a8] sm:$0xff] }
 0x217   : > { %v7795_v53 = vpop.f32.mrf.mxu3  ;;  %3223 = vmatpush.bf16.msrb.mxu1 %v6401_v35 }
 0x218   : > { %v7797_v31 = vpop.f32.mrf.mxu2  ;;  %v7799_v37 = vadd.f32 %v2078_v27, %v1989_v28 }
 0x219   : > { %v1770_v18 = vpop.f32.mrf.mxu1 }
 0x21a   : > { %v1771_v55 = vadd.f32 %v1770_v18, %v7644_v40  ;;  %3835 = vmatpush.bf16.msra.mxu2 %v6446_v22 }
 0x21c   : > { %v1884_v21 = vadd.f32 %v7687_v57, %v1771_v55  ;;  %v6445_v55 = vld [vmem:[%s8359_s3 + $0x4a0] sm:$0xff] }
 0x21e   : > { %v7813_v27 = vadd.f32 %v7724_v44, %v1884_v21  ;;  %3836 = vmatpush.bf16.msra.mxu2 %v6445_v55  ;;  %v6456_v44 = vld [vmem:[%s8359_s3 + $0x5f8] sm:$0xff]  ;;  %v8385_v21 = vpack.c.b16 %v7002_v46, %v7000_v45  ;;  %v6443_v55 = vld [vmem:[%s8359_s3 + $0x490] sm:$0xff] }
 0x21f   : > { %v7815_v39 = vpop.f32.mrf.mxu3  ;;  %3939 = vmatpush.bf16.msra.mxu3 %v6456_v44  ;;  %v6439_v44 = vld [vmem:[%s8359_s3 + $0x370] sm:$0xff] }
 0x220   : > { %v7817_v28 = vpop.f32.mrf.mxu2 }
 0x221   : > { %v1773_v40 = vpop.f32.mrf.mxu1  ;;  %v2088_v18 = vpop.f32.mrf.mxu0 }
 0x222   : > { %v1774_v57 = vadd.f32 %v1773_v40, %v7640_v33  ;;  %v6440_v33 = vld [vmem:[%s8359_s3 + $0x378] sm:$0xff] }
 0x223   : > { %3727 = vmatpush.bf16.msra.mxu1 %v6440_v33 }
 0x224   : > { %v1885_v1 = vadd.f32 %v7709_v43, %v1774_v57  ;;  %2723 = vmatmul.bf16.gmra.mxu1 %v7425_v2  ;;  %3133 = vmatmul.bf16.gmra.mxu0 %v7429_v24  ;;  %v6444_v2 = vld [vmem:[%s8359_s3 + $0x498] sm:$0xff]  ;;  %v6455_v57 = vld [vmem:[%s8359_s3 + $0x5f0] sm:$0xff] }
 0x225   : > { %3335 = vmatmul.bf16.gmra.mxu2 %v7304_v13  ;;  %3517 = vmatmul.bf16.vlgmr.msrb.gmra.mxu3 %v8385_v21  ;;  %v6442_v21 = vld [vmem:[%s8359_s3 + $0x488] sm:$0xff] }
 0x226   : > { %v1991_v43 = vadd.f32 %v7744_v14, %v1885_v1  ;;  %3837 = vmatpush.bf16.msra.mxu2 %v6444_v2  ;;  %3940 = vmatpush.bf16.msra.mxu3 %v6455_v57  ;;  %v6441_v57 = vld [vmem:[%s8359_s3 + $0x480] sm:$0xff] }
 0x227   : > { %3728 = vmatpush.bf16.msra.mxu1 %v6439_v44  ;;  %v6451_v44 = vld [vmem:[%s8359_s3 + $0x5d0] sm:$0xff] }
 0x228   : > { %v7840_v35 = vpop.f32.mrf.mxu2  ;;  %v7842_v13 = vpop.f32.mrf.mxu3  ;;  %v7844_v22 = vadd.f32 %v2083_v61, %v1991_v43  ;;  %v6464_v61 = vld [vmem:[%s8359_s3 + $0x138] sm:$0xff] }
 0x229   : > { %v1775_v45 = vpop.f32.mrf.mxu1  ;;  %v2090_v40 = vpop.f32.mrf.mxu0  ;;  %4126 = vmatpush.bf16.msra.mxu0 %v6464_v61  ;;  %v6463_v61 = vld [vmem:[%s8359_s3 + $0x130] sm:$0xff] }
 0x22a   : > { %v1776_v14 = vadd.f32 %v1775_v45, %v7668_v10  ;;  %3838 = vmatpush.bf16.msra.mxu2 %v6443_v55  ;;  %v6454_v10 = vld [vmem:[%s8359_s3 + $0x5e8] sm:$0xff] }
 0x22b   : > { %3941 = vmatpush.bf16.msra.mxu3 %v6454_v10 }
 0x22c   : > { %v1886_v1 = vadd.f32 %v7735_v58, %v1776_v14  ;;  %v6453_v14 = vld [vmem:[%s8359_s3 + $0x5e0] sm:$0xff] }
 0x22d   : > { %4127 = vmatpush.bf16.msra.mxu0 %v6463_v61  ;;  %v6436_v61 = vld [vmem:[%s8359_s3 + $0x358] sm:$0xff] }
 0x22e   : > { %v1992_v58 = vadd.f32 %v7775_v38, %v1886_v1  ;;  %3839 = vmatpush.bf16.msra.mxu2 %v6442_v21 }
 0x22f   : > { %3942 = vmatpush.bf16.msra.mxu3 %v6453_v14 }
 0x230   : > { %v7867_v33 = vpop.f32.mrf.mxu2  ;;  %v7869_v2 = vpop.f32.mrf.mxu3  ;;  %v7871_v43 = vadd.f32 %v2085_v12, %v1992_v58  ;;  %v8386_v12 = vpack.c.b16 %v7053_v49, %v7002_v46  ;;  %v6462_v58 = vld [vmem:[%s8359_s3 + $0x128] sm:$0xff] }
 0x231   : > { %v1778_v45 = vpop.f32.mrf.mxu1  ;;  %v2608_v55 = vpop.f32.mrf.mxu0  ;;  %4128 = vmatpush.bf16.msra.mxu0 %v6462_v58 }
 0x232   : > { %v1779_v38 = vadd.f32 %v1778_v45, %v7692_v15  ;;  %3840 = vmatpush.bf16.msra.mxu2 %v6441_v57  ;;  %v6438_v15 = vld [vmem:[%s8359_s3 + $0x368] sm:$0xff] }
 0x233   : > { %3729 = vmatpush.bf16.msra.mxu1 %v6438_v15  ;;  %3943 = vmatpush.bf16.msra.mxu3 %v6452_v29  ;;  %v6450_v45 = vld [vmem:[%s8359_s3 + $0x5c8] sm:$0xff]  ;;  %v8387_v15 = vpack.c.b16 %v7534_v34, %v7476_v9 }
 0x234   : > { %v1887_v1 = vadd.f32 %v7760_v5, %v1779_v38  ;;  %2728 = vmatmul.bf16.gmra.mxu1 %v2655_v54  ;;  %3629 = vmatmul.bf16.vlgmr.msrb.gmra.mxu0 %v8386_v12  ;;  %v6461_v12 = vld [vmem:[%s8359_s3 + $0x120] sm:$0xff] }
 0x235   : > { %3340 = vmatmul.bf16.gmra.mxu2 %v7429_v24  ;;  %3522 = vmatmul.bf16.gmra.mxu3 %v7099_v59 }
 0x236   : > { %v1993_v46 = vadd.f32 %v7795_v53, %v1887_v1  ;;  %v1766_v53 = vadd.f32 %v7764_v16, %v7608_v30  ;;  %v6449_v1 = vld [vmem:[%s8359_s3 + $0x5c0] sm:$0xff]  ;;  %4129 = vmatpush.bf16.msra.mxu0 %v6461_v12 }
 0x237   : > { %3944 = vmatpush.bf16.msra.mxu3 %v6451_v44  ;;  %v6459_v44 = vld [vmem:[%s8359_s3 + $0x110] sm:$0xff] }
 0x238   : > { %v7899_v49 = vpop.f32.mrf.mxu2  ;;  %v7901_v41 = vpop.f32.mrf.mxu3  ;;  %v7903_v24 = vadd.f32 %v2088_v18, %v1993_v46  ;;  %v6437_v18 = vld [vmem:[%s8359_s3 + $0x360] sm:$0xff]  ;;  %v1882_v30 = vadd.f32 %v7635_v32, %v1766_v53 }
 0x239   : > { %v1780_v54 = vpop.f32.mrf.mxu1  ;;  %v2610_v5 = vpop.f32.mrf.mxu0  ;;  %3730 = vmatpush.bf16.msra.mxu1 %v6437_v18 }
 0x23a   : > { %v1781_v21 = vadd.f32 %v1780_v54, %v7719_v8 }
 0x23b   : > { %3945 = vmatpush.bf16.msra.mxu3 %v6450_v45 }
 0x23c   : > { %v1888_v10 = vadd.f32 %v7777_v42, %v1781_v21 }
 0x23d   : > { %3731 = vmatpush.bf16.msra.mxu1 %v6436_v61 }
 0x23e   : > { %v1994_v8 = vadd.f32 %v7815_v39, %v1888_v10 }
 0x23f   : > { %3946 = vmatpush.bf16.msra.mxu3 %v6449_v1  ;;  %v2096_v1 = vadd.f32 %v7758_v0, %v7813_v27  ;;  %v6478_v0 = vld [vmem:[%s8359_s3 + $0x3a8] sm:$0xff] }
 0x240   : > { %v7923_v16 = vpop.f32.mrf.mxu2  ;;  %v7925_v42 = vpop.f32.mrf.mxu3  ;;  %v7927_v57 = vadd.f32 %v2090_v40, %v1994_v8  ;;  %v1988_v40 = vadd.f32 %v7676_v48, %v1882_v30  ;;  %v6457_v8 = vld [vmem:[%s8359_s3 + $0x100] sm:$0xff] }
 0x241   : > { %v2284_v14 = vpop.f32.mrf.mxu1  ;;  %v2613_v38 = vpop.f32.mrf.mxu0 }
 0x242   : > { %v2304_v39 = vadd.f32 %v2284_v14, %v7762_v3  ;;  %v6460_v3 = vld [vmem:[%s8359_s3 + $0x118] sm:$0xff]  ;;  %v2094_v29 = vadd.f32 %v7707_v62, %v1988_v40  ;;  %v6458_v62 = vld [vmem:[%s8359_s3 + $0x108] sm:$0xff]  ;;  %v6479_v40 = vld [vmem:[%s8359_s3 + $0x3b0] sm:$0xff] }
 0x243   : > { %4130 = vmatpush.bf16.msra.mxu0 %v6460_v3 }
 0x244   : > { %v2416_v32 = vadd.f32 %v7797_v31, %v2304_v39  ;;  %3224 = vmatmul.bf16.vlgmr.msrb.gmra.mxu1 %v7124_v11  ;;  %3634 = vmatmul.bf16.gmra.mxu0 %v7126_v20 }
 0x245   : > { %3345 = vmatmul.bf16.gmra.mxu2 %v8387_v15  ;;  %3527 = vmatmul.bf16.gmra.mxu3 %v7172_v19 }
 0x246   : > { %v2522_v11 = vadd.f32 %v7842_v13, %v2416_v32  ;;  %v6435_v13 = vld [vmem:[%s8359_s3 + $0x350] sm:$0xff] }
 0x247   : > { %4131 = vmatpush.bf16.msra.mxu0 %v6459_v44  ;;  %3732 = vmatpush.bf16.msra.mxu1 %v6435_v13 }
 0x248   : > { %v7951_v31 = vpop.f32.mrf.mxu2  ;;  %v7953_v48 = vpop.f32.mrf.mxu3  ;;  %v7956_v46 = vadd.f32 %v2608_v55, %v2522_v11 }
 0x249   : > { %v2286_v34 = vpop.f32.mrf.mxu1  ;;  %v2615_v54 = vpop.f32.mrf.mxu0 }
 0x24a   : > { %v2305_v21 = vadd.f32 %v2286_v34, %v2094_v29  ;;  %v6477_v34 = vld [vmem:[%s8359_s3 + $0x3a0] sm:$0xff] }
 0x24b   : > { %4132 = vmatpush.bf16.msra.mxu0 %v6458_v62 }
 0x24c   : > { %v2417_v53 = vadd.f32 %v7817_v28, %v2305_v21 }
 0x24e   : > { %v2523_v55 = vadd.f32 %v7869_v2, %v2417_v53  ;;  %v6434_v2 = vld [vmem:[%s8359_s3 + $0x348] sm:$0xff] }
 0x24f   : > { %4133 = vmatpush.bf16.msra.mxu0 %v6457_v8  ;;  %3733 = vmatpush.bf16.msra.mxu1 %v6434_v2  ;;  %v6486_v8 = vld [vmem:[%s8359_s3 + $0x4e8] sm:$0xff] }
 0x250   : > { %v7969_v10 = vpop.f32.mrf.mxu2  ;;  %v7971_v58 = vpop.f32.mrf.mxu3  ;;  %v7973_v18 = vadd.f32 %v2610_v5, %v2523_v55  ;;  %v6480_v5 = vld [vmem:[%s8359_s3 + $0x3b8] sm:$0xff]  ;;  %v6475_v55 = vld [vmem:[%s8359_s3 + $0x390] sm:$0xff] }
 0x251   : > { %v2289_v45 = vpop.f32.mrf.mxu1  ;;  %v2618_v28 = vpop.f32.mrf.mxu0  ;;  %4344 = vmatpush.bf16.msrb.mxu2 %v6480_v5 }
 0x252   : > { %v2306_v30 = vadd.f32 %v2289_v45, %v7799_v37 }
 0x254   : > { %v2418_v14 = vadd.f32 %v7840_v35, %v2306_v30  ;;  %3229 = vmatmul.bf16.gmra.mxu1 %v7229_v63  ;;  %3639 = vmatmul.bf16.gmra.mxu0 %v7233_v51  ;;  %v6474_v30 = vld [vmem:[%s8359_s3 + $0x388] sm:$0xff] }
 0x255   : > { %3532 = vmatmul.bf16.gmra.mxu3 %v7308_v50  ;;  %3841 = vmatmul.bf16.vlgmr.msra.gmra.mxu2 %v7126_v20 }
 0x256   : > { %v2524_v37 = vadd.f32 %v7901_v41, %v2418_v14  ;;  %4345 = vmatpush.bf16.msrb.mxu2 %v6479_v40  ;;  %v6433_v41 = vld [vmem:[%s8359_s3 + $0x340] sm:$0xff] }
 0x257   : > { %3734 = vmatpush.bf16.msra.mxu1 %v6433_v41 }
 0x258   : > { %v7991_v35 = vpop.f32.mrf.mxu3  ;;  %v7993_v63 = vpop.f32.mrf.mxu2  ;;  %v7997_v12 = vadd.f32 %v2613_v38, %v2524_v37 }
 0x259   : > { %v2291_v39 = vpop.f32.mrf.mxu1  ;;  %v2620_v32 = vpop.f32.mrf.mxu0 }
 0x25a   : > { %v2307_v20 = vadd.f32 %v2291_v39, %v2096_v1  ;;  %4346 = vmatpush.bf16.msrb.mxu2 %v6478_v0 }
 0x25c   : > { %v2419_v61 = vadd.f32 %v7867_v33, %v2307_v20  ;;  %v6473_v20 = vld [vmem:[%s8359_s3 + $0x380] sm:$0xff] }
 0x25e   : > { %v2525_v27 = vadd.f32 %v7925_v42, %v2419_v61  ;;  %v6488_v42 = vld [vmem:[%s8359_s3 + $0x4f8] sm:$0xff]  ;;  %4347 = vmatpush.bf16.msrb.mxu2 %v6477_v34  ;;  %v8388_v61 = vpack.c.b16 %v7476_v9, %v7417_v36 }
 0x25f   : > { %4450 = vmatpush.bf16.msrb.mxu3 %v6488_v42  ;;  %v6484_v36 = vld [vmem:[%s8359_s3 + $0x4d8] sm:$0xff] }
 0x260   : > { %v8010_v38 = vpop.f32.mrf.mxu3  ;;  %v8012_v15 = vpop.f32.mrf.mxu2  ;;  %v8014_v3 = vadd.f32 %v2615_v54, %v2525_v27 }
 0x261   : > { %v2294_v33 = vpop.f32.mrf.mxu1  ;;  %v2623_v11 = vpop.f32.mrf.mxu0 }
 0x262   : > { %v2308_v29 = vadd.f32 %v2294_v33, %v7844_v22  ;;  %v6472_v22 = vld [vmem:[%s8359_s3 + $0x278] sm:$0xff] }
 0x263   : > { %4238 = vmatpush.bf16.msrb.mxu1 %v6472_v22 }
 0x264   : > { %v2420_v44 = vadd.f32 %v7899_v49, %v2308_v29  ;;  %3234 = vmatmul.bf16.gmra.mxu1 %v7371_v60  ;;  %3644 = vmatmul.bf16.gmra.mxu0 %v7375_v7  ;;  %v6476_v60 = vld [vmem:[%s8359_s3 + $0x398] sm:$0xff] }
 0x265   : > { %3846 = vmatmul.bf16.gmra.mxu2 %v7233_v51  ;;  %3947 = vmatmul.bf16.vlgmr.msra.gmra.mxu3 %v7172_v19 }
 0x266   : > { %v2526_v49 = vadd.f32 %v7953_v48, %v2420_v44  ;;  %4348 = vmatpush.bf16.msrb.mxu2 %v6476_v60  ;;  %v6487_v48 = vld [vmem:[%s8359_s3 + $0x4f0] sm:$0xff] }
 0x267   : > { %4451 = vmatpush.bf16.msrb.mxu3 %v6487_v48  ;;  %v6483_v44 = vld [vmem:[%s8359_s3 + $0x4d0] sm:$0xff]  ;;  %v6481_v48 = vld [vmem:[%s8359_s3 + $0x4c0] sm:$0xff] }
 0x268   : > { %v8035_v54 = vpop.f32.mrf.mxu2  ;;  %v8037_v21 = vpop.f32.mrf.mxu3  ;;  %v8039_v51 = vadd.f32 %v2618_v28, %v2526_v49  ;;  %v6496_v28 = vld [vmem:[%s8359_s3 + $0x638] sm:$0xff] }
 0x269   : > { %v2296_v53 = vpop.f32.mrf.mxu1  ;;  %v2625_v13 = vpop.f32.mrf.mxu0  ;;  %4556 = vmatpush.bf16.msrb.mxu0 %v6496_v28  ;;  %v8391_v28 = vld [vmem:[#allocation5_spill] sm:$0xff] }
 0x26a   : > { %v2309_v62 = vadd.f32 %v2296_v53, %v7871_v43  ;;  %v6471_v43 = vld [vmem:[%s8359_s3 + $0x270] sm:$0xff]  ;;  %4349 = vmatpush.bf16.msrb.mxu2 %v6475_v55 }
 0x26b   : > { %4239 = vmatpush.bf16.msrb.mxu1 %v6471_v43  ;;  %4452 = vmatpush.bf16.msrb.mxu3 %v6486_v8 }
 0x26c   : > { %v2421_v45 = vadd.f32 %v7923_v16, %v2309_v62 }
 0x26e   : > { %v2527_v16 = vadd.f32 %v7971_v58, %v2421_v45  ;;  %4350 = vmatpush.bf16.msrb.mxu2 %v6474_v30  ;;  %v6485_v58 = vld [vmem:[%s8359_s3 + $0x4e0] sm:$0xff] }
 0x26f   : > { %4453 = vmatpush.bf16.msrb.mxu3 %v6485_v58  ;;  %v6493_v45 = vld [vmem:[%s8359_s3 + $0x620] sm:$0xff] }
 0x270   : > { %v8062_v14 = vpop.f32.mrf.mxu2  ;;  %v8064_v2 = vpop.f32.mrf.mxu3  ;;  %v8066_v5 = vadd.f32 %v2620_v32, %v2527_v16  ;;  %v8389_v32 = vld [vmem:[#allocation3_spill] sm:$0xff] }
 0x271   : > { %v2299_v37 = vpop.f32.mrf.mxu1  ;;  %v3119_v1 = vpop.f32.mrf.mxu0  ;;  %v8390_v41 = vpack.c.b16 %v7004_v47, %v8389_v32 }
 0x272   : > { %v2310_v39 = vadd.f32 %v2299_v37, %v7903_v24  ;;  %v6495_v24 = vld [vmem:[%s8359_s3 + $0x630] sm:$0xff]  ;;  %4351 = vmatpush.bf16.msrb.mxu2 %v6473_v20 }
 0x273   : > { %4557 = vmatpush.bf16.msrb.mxu0 %v6495_v24  ;;  %4454 = vmatpush.bf16.msrb.mxu3 %v6484_v36  ;;  %v6489_v24 = vld [vmem:[%s8359_s3 + $0x600] sm:$0xff] }
 0x274   : > { %v2422_v40 = vadd.f32 %v7951_v31, %v2310_v39  ;;  %3239 = vmatmul.bf16.gmra.mxu1 %v8388_v61  ;;  %4134 = vmatmul.bf16.vlgmr.msra.gmra.mxu0 %v8390_v41  ;;  %v6470_v31 = vld [vmem:[%s8359_s3 + $0x268] sm:$0xff]  ;;  %v6491_v39 = vld [vmem:[%s8359_s3 + $0x610] sm:$0xff]  ;;  %v8393_v36 = vld [vmem:[#allocation7_spill] sm:$0xff] }
 0x275   : > { %3851 = vmatmul.bf16.gmra.mxu2 %v7375_v7  ;;  %3952 = vmatmul.bf16.gmra.mxu3 %v7308_v50 }
 0x276   : > { %v2528_v9 = vadd.f32 %v7991_v35, %v2422_v40  ;;  %4240 = vmatpush.bf16.msrb.mxu1 %v6470_v31  ;;  %v6494_v35 = vld [vmem:[%s8359_s3 + $0x628] sm:$0xff] }
 0x277   : > { %4455 = vmatpush.bf16.msrb.mxu3 %v6483_v44  ;;  %4558 = vmatpush.bf16.msrb.mxu0 %v6494_v35 }
 0x278   : > { %v8094_v0 = vpop.f32.mrf.mxu2  ;;  %v8096_v27 = vpop.f32.mrf.mxu3  ;;  %v8098_v7 = vadd.f32 %v2623_v11, %v2528_v9  ;;  %v6469_v11 = vld [vmem:[%s8359_s3 + $0x260] sm:$0xff]  ;;  %v8394_v9 = vpack.c.b16 %v7536_v52, %v7478_v26 }
 0x279   : > { %v2301_v33 = vpop.f32.mrf.mxu1  ;;  %v3121_v29 = vpop.f32.mrf.mxu0 }
 0x27a   : > { %v2311_v34 = vadd.f32 %v2301_v33, %v7927_v57  ;;  %v6482_v57 = vld [vmem:[%s8359_s3 + $0x4c8] sm:$0xff]  ;;  %4241 = vmatpush.bf16.msrb.mxu1 %v6469_v11 }
 0x27b   : > { %4456 = vmatpush.bf16.msrb.mxu3 %v6482_v57  ;;  %4559 = vmatpush.bf16.msrb.mxu0 %v6493_v45 }
 0x27c   : > { %v2423_v42 = vadd.f32 %v7969_v10, %v2311_v34 }
 0x27e   : > { %v2529_v22 = vadd.f32 %v8010_v38, %v2423_v42 }
 0x27f   : > { %4457 = vmatpush.bf16.msrb.mxu3 %v6481_v48 }
 0x280   : > { %v8115_v60 = vpop.f32.mrf.mxu2  ;;  %v3020_v10 = vpop.f32.mrf.mxu3  ;;  %v8117_v49 = vadd.f32 %v2625_v13, %v2529_v22  ;;  %v6468_v13 = vld [vmem:[%s8359_s3 + $0x258] sm:$0xff] }
 0x281   : > { %v2714_v53 = vpop.f32.mrf.mxu1  ;;  %v3124_v62 = vpop.f32.mrf.mxu0  ;;  %4242 = vmatpush.bf16.msrb.mxu1 %v6468_v13 }
 0x282   : > { %v2734_v55 = vadd.f32 %v2714_v53, %v7956_v46  ;;  %v8392_v46 = vpack.c.b16 %v7478_v26, %v7419_v4  ;;  %v6465_v26 = vld [vmem:[%s8359_s3 + $0x240] sm:$0xff] }
 0x284   : > { %v2921_v38 = vadd.f32 %v7993_v63, %v2734_v55  ;;  %3735 = vmatmul.bf16.vlgmr.msra.gmra.mxu1 %v7099_v59  ;;  %4139 = vmatmul.bf16.gmra.mxu0 %v8391_v28  ;;  %v6492_v63 = vld [vmem:[%s8359_s3 + $0x618] sm:$0xff] }
 0x285   : > { %3856 = vmatmul.bf16.gmra.mxu2 %v8392_v46  ;;  %3957 = vmatmul.bf16.gmra.mxu3 %v7433_v23 }
 0x286   : > { %v3033_v59 = vadd.f32 %v8037_v21, %v2921_v38  ;;  %4560 = vmatpush.bf16.msrb.mxu0 %v6492_v63  ;;  %v6467_v21 = vld [vmem:[%s8359_s3 + $0x250] sm:$0xff] }
 0x287   : > { %4243 = vmatpush.bf16.msrb.mxu1 %v6467_v21 }
 0x288   : > { %v8140_v43 = vpop.f32.mrf.mxu2  ;;  %v3023_v8 = vpop.f32.mrf.mxu3  ;;  %v8142_v30 = vadd.f32 %v3119_v1, %v3033_v59  ;;  %v6490_v1 = vld [vmem:[%s8359_s3 + $0x608] sm:$0xff] }
 0x289   : > { %v2716_v16 = vpop.f32.mrf.mxu1  ;;  %v3126_v37 = vpop.f32.mrf.mxu0 }
 0x28a   : > { %v2735_v4 = vadd.f32 %v2716_v16, %v7973_v18  ;;  %4561 = vmatpush.bf16.msrb.mxu0 %v6491_v39 }
 0x28c   : > { %v2922_v20 = vadd.f32 %v8012_v15, %v2735_v4 }
 0x28e   : > { %v3034_v58 = vadd.f32 %v8064_v2, %v2922_v20  ;;  %4562 = vmatpush.bf16.msrb.mxu0 %v6490_v1  ;;  %v6466_v2 = vld [vmem:[%s8359_s3 + $0x248] sm:$0xff] }
 0x28f   : > { %4244 = vmatpush.bf16.msrb.mxu1 %v6466_v2 }
 0x290   : > { %v8156_v18 = vpop.f32.mrf.mxu2  ;;  %v3025_v40 = vpop.f32.mrf.mxu3  ;;  %v8158_v61 = vadd.f32 %v3121_v29, %v3034_v58 }
 0x291   : > { %v2719_v32 = vpop.f32.mrf.mxu1  ;;  %v3129_v41 = vpop.f32.mrf.mxu0 }
 0x292   : > { %v2736_v15 = vadd.f32 %v2719_v32, %v7997_v12  ;;  %4563 = vmatpush.bf16.msrb.mxu0 %v6489_v24 }
 0x293   : > { %4245 = vmatpush.bf16.msrb.mxu1 %v6465_v26 }
 0x294   : > { %v2923_v31 = vadd.f32 %v8035_v54, %v2736_v15  ;;  %3740 = vmatmul.bf16.gmra.mxu1 %v7172_v19  ;;  %4144 = vmatmul.bf16.gmra.mxu0 %v8393_v36 }
 0x295   : > { %3962 = vmatmul.bf16.gmra.mxu3 %v8394_v9  ;;  %4352 = vmatmul.bf16.vlgmr.msrb.gmra.mxu2 %v8391_v28 }
 0x296   : > { %v3035_v12 = vadd.f32 %v8096_v27, %v2923_v31  ;;  %v8398_v31 = vld [vmem:[#allocation4_spill] sm:$0xff] }
 0x298   : > { %v3028_v33 = vpop.f32.mrf.mxu3  ;;  %v3331_v54 = vpop.f32.mrf.mxu2  ;;  %v8175_v29 = vadd.f32 %v3124_v62, %v3035_v12 }
 0x299   : > { %v2721_v19 = vpop.f32.mrf.mxu1  ;;  %v3131_v34 = vpop.f32.mrf.mxu0 }
 0x29a   : > { %v2737_v44 = vadd.f32 %v2721_v19, %v8014_v3  ;;  %v8395_v3 = vld [vmem:[#allocation9_spill] sm:$0xff] }
 0x29c   : > { %v2924_v42 = vadd.f32 %v8062_v14, %v2737_v44  ;;  %v8396_v14 = vld [vmem:[#allocation6_spill] sm:$0xff] }
 0x29e   : > { %v3036_v52 = vadd.f32 %v3020_v10, %v2924_v42 }
 0x2a0   : > { %v3030_v35 = vpop.f32.mrf.mxu3  ;;  %v3333_v11 = vpop.f32.mrf.mxu2  ;;  %v8182_v57 = vadd.f32 %v3126_v37, %v3036_v52 }
 0x2a1   : > { %v2724_v27 = vpop.f32.mrf.mxu1  ;;  %v3134_v22 = vpop.f32.mrf.mxu0 }
 0x2a2   : > { %v2738_v53 = vadd.f32 %v2724_v27, %v8039_v51 }
 0x2a4   : > { %v2925_v62 = vadd.f32 %v8094_v0, %v2738_v53  ;;  %3745 = vmatmul.bf16.gmra.mxu1 %v7308_v50  ;;  %4149 = vmatmul.bf16.gmra.mxu0 %v8395_v3 }
 0x2a5   : > { %4357 = vmatmul.bf16.gmra.mxu2 %v8393_v36  ;;  %4458 = vmatmul.bf16.vlgmr.msrb.gmra.mxu3 %v8396_v14 }
 0x2a6   : > { %v3037_v55 = vadd.f32 %v3023_v8, %v2925_v62 }
 0x2a8   : > { %v3336_v10 = vpop.f32.mrf.mxu2  ;;  %v3518_v48 = vpop.f32.mrf.mxu3  ;;  %v8190_v45 = vadd.f32 %v3129_v41, %v3037_v55 }
 0x2a9   : > { %v2726_v38 = vpop.f32.mrf.mxu1  ;;  %v3136_v28 = vpop.f32.mrf.mxu0 }
 0x2aa   : > { %v2739_v13 = vadd.f32 %v2726_v38, %v8066_v5  ;;  %v8397_v5 = vld [vmem:[#allocation8_spill] sm:$0xff] }
 0x2ac   : > { %v2926_v51 = vadd.f32 %v8115_v60, %v2739_v13 }
 0x2ae   : > { %v3038_v0 = vadd.f32 %v3025_v40, %v2926_v51 }
 0x2b0   : > { %v3520_v46 = vpop.f32.mrf.mxu3  ;;  %v8194_v50 = vadd.f32 %v3131_v34, %v3038_v0  ;;  %v3338_v16 = vpop.f32.mrf.mxu2  ;;  %v8402_v0 = vpack.c.b16 %v7538_v17, %v7480_v6 }
 0x2b1   : > { %v2729_v63 = vpop.f32.mrf.mxu1  ;;  %v3630_v59 = vpop.f32.mrf.mxu0 }
 0x2b2   : > { %v2740_v37 = vadd.f32 %v2729_v63, %v8098_v7 }
 0x2b4   : > { %v2927_v8 = vadd.f32 %v8140_v43, %v2740_v37  ;;  %3750 = vmatmul.bf16.gmra.mxu1 %v7433_v23  ;;  %4564 = vmatmul.bf16.vlgmr.msrb.gmra.mxu0 %v8393_v36  ;;  %v8399_v36 = vpack.c.b16 %v8398_v31, %v7004_v47 }
 0x2b5   : > { %4362 = vmatmul.bf16.gmra.mxu2 %v8395_v3  ;;  %4463 = vmatmul.bf16.gmra.mxu3 %v8397_v5 }
 0x2b6   : > { %v3039_v60 = vadd.f32 %v3028_v33, %v2927_v8 }
 0x2b8   : > { %v3523_v4 = vpop.f32.mrf.mxu3  ;;  %v8202_v39 = vadd.f32 %v3134_v22, %v3039_v60  ;;  %v3341_v58 = vpop.f32.mrf.mxu2  ;;  %v8401_v22 = vpack.c.b16 %v7480_v6, %v7421_v25 }
 0x2b9   : > { %v2731_v20 = vpop.f32.mrf.mxu1  ;;  %v3632_v21 = vpop.f32.mrf.mxu0 }
 0x2ba   : > { %v2741_v1 = vadd.f32 %v2731_v20, %v8117_v49  ;;  %v8400_v49 = vld [vmem:[#allocation10_spill] sm:$0xff] }
 0x2bc   : > { %v2928_v7 = vadd.f32 %v8156_v18, %v2741_v1 }
 0x2be   : > { %v3040_v43 = vadd.f32 %v3030_v35, %v2928_v7 }
 0x2c0   : > { %v3525_v40 = vpop.f32.mrf.mxu3  ;;  %v8206_v23 = vadd.f32 %v3136_v28, %v3040_v43  ;;  %v3343_v18 = vpop.f32.mrf.mxu2 }
 0x2c1   : > { %v3225_v32 = vpop.f32.mrf.mxu1  ;;  %v3635_v41 = vpop.f32.mrf.mxu0 }
 0x2c2   : > { %v3245_v15 = vadd.f32 %v3225_v32, %v8142_v30 }
 0x2c4   : > { %v3351_v24 = vadd.f32 %v3331_v54, %v3245_v15  ;;  %4246 = vmatmul.bf16.vlgmr.msrb.gmra.mxu1 %v8399_v36  ;;  %4569 = vmatmul.bf16.gmra.mxu0 %v8395_v3 }
 0x2c5   : > { %4367 = vmatmul.bf16.gmra.mxu2 %v7437_v56  ;;  %4468 = vmatmul.bf16.gmra.mxu3 %v8400_v49 }
 0x2c6   : > { %v3538_v2 = vadd.f32 %v3518_v48, %v3351_v24 }
 0x2c8   : > { %v3528_v9 = vpop.f32.mrf.mxu3  ;;  %v3650_v12 = vadd.f32 %v3630_v59, %v3538_v2  ;;  %v3346_v44 = vpop.f32.mrf.mxu2 }
 0x2c9   : > { %v3227_v33 = vpop.f32.mrf.mxu1  ;;  %v3637_v19 = vpop.f32.mrf.mxu0 }
 0x2ca   : > { %v3246_v34 = vadd.f32 %v3227_v33, %v8158_v61 }
 0x2cc   : > { %v3352_v30 = vadd.f32 %v3333_v11, %v3246_v34 }
 0x2ce   : > { %v3539_v54 = vadd.f32 %v3520_v46, %v3352_v30 }
 0x2d0   : > { %v3530_v42 = vpop.f32.mrf.mxu3  ;;  %v8216_v47 = vadd.f32 %v3632_v21, %v3539_v54  ;;  %v3348_v55 = vpop.f32.mrf.mxu2 }
 0x2d1   : > { %v3230_v26 = vpop.f32.mrf.mxu1  ;;  %v3640_v52 = vpop.f32.mrf.mxu0 }
 0x2d2   : > { %v3247_v35 = vadd.f32 %v3230_v26, %v8175_v29 }
 0x2d4   : > { %v3353_v27 = vadd.f32 %v3336_v10, %v3247_v35  ;;  %4251 = vmatmul.bf16.gmra.mxu1 %v8396_v14  ;;  %4574 = vmatmul.bf16.gmra.mxu0 %v7437_v56 }
 0x2d5   : > { %4473 = vmatmul.bf16.gmra.mxu3 %v8401_v22 }
 0x2d6   : > { %v3540_v61 = vadd.f32 %v3523_v4, %v3353_v27 }
 0x2d8   : > { %v3533_v11 = vpop.f32.mrf.mxu3  ;;  %v3652_v53 = vadd.f32 %v3635_v41, %v3540_v61  ;;  %v3842_v51 = vpop.f32.mrf.mxu2 }
 0x2d9   : > { %v3232_v62 = vpop.f32.mrf.mxu1  ;;  %v3642_v3 = vpop.f32.mrf.mxu0 }
 0x2da   : > { %v3248_v48 = vadd.f32 %v3232_v62, %v8182_v57 }
 0x2dc   : > { %v3354_v38 = vadd.f32 %v3338_v16, %v3248_v48 }
 0x2de   : > { %v3541_v28 = vadd.f32 %v3525_v40, %v3354_v38 }
 0x2e0   : > { %v3535_v29 = vpop.f32.mrf.mxu3  ;;  %v8225_v10 = vadd.f32 %v3637_v19, %v3541_v28  ;;  %v8233_v60 = vpop.f32.mrf.mxu2 }
 0x2e1   : > { %v3235_v14 = vpop.f32.mrf.mxu1  ;;  %v3645_v13 = vpop.f32.mrf.mxu0 }
 0x2e2   : > { %v3249_v56 = vadd.f32 %v3235_v14, %v8190_v45 }
 0x2e4   : > { %v3355_v25 = vadd.f32 %v3341_v58, %v3249_v56  ;;  %4256 = vmatmul.bf16.gmra.mxu1 %v8397_v5  ;;  %4579 = vmatmul.bf16.gmra.mxu0 %v8402_v0 }
 0x2e6   : > { %v3542_v46 = vadd.f32 %v3528_v9, %v3355_v25 }
 0x2e8   : > { %v3948_v63 = vpop.f32.mrf.mxu3  ;;  %v3654_v57 = vadd.f32 %v3640_v52, %v3542_v46  ;;  %v3847_v58 = vpop.f32.mrf.mxu2 }
 0x2e9   : > { %v3237_v59 = vpop.f32.mrf.mxu1  ;;  %v3647_v16 = vpop.f32.mrf.mxu0 }
 0x2ea   : > { %v3250_v37 = vadd.f32 %v3237_v59, %v8194_v50 }
 0x2ec   : > { %v3356_v8 = vadd.f32 %v3343_v18, %v3250_v37 }
 0x2ee   : > { %v3543_v4 = vadd.f32 %v3530_v42, %v3356_v8 }
 0x2f0   : > { %v8235_v45 = vpop.f32.mrf.mxu3  ;;  %v8237_v20 = vadd.f32 %v3642_v3, %v3543_v4  ;;  %v3849_v2 = vpop.f32.mrf.mxu2 }
 0x2f1   : > { %v3240_v5 = vpop.f32.mrf.mxu1  ;;  %v4135_v21 = vpop.f32.mrf.mxu0 }
 0x2f2   : > { %v3251_v6 = vadd.f32 %v3240_v5, %v8202_v39 }
 0x2f4   : > { %v3357_v17 = vadd.f32 %v3346_v44, %v3251_v6  ;;  %4261 = vmatmul.bf16.gmra.mxu1 %v8400_v49 }
 0x2f6   : > { %v3544_v1 = vadd.f32 %v3533_v11, %v3357_v17 }
 0x2f8   : > { %v3656_v7 = vadd.f32 %v3645_v13, %v3544_v1  ;;  %v3953_v32 = vpop.f32.mrf.mxu3  ;;  %v3852_v30 = vpop.f32.mrf.mxu2 }
 0x2f9   : > { %v3242_v43 = vpop.f32.mrf.mxu1  ;;  %v4137_v50 = vpop.f32.mrf.mxu0 }
 0x2fa   : > { %v3252_v40 = vadd.f32 %v3242_v43, %v8206_v23 }
 0x2fc   : > { %v3358_v41 = vadd.f32 %v3348_v55, %v3252_v40 }
 0x2fe   : > { %v3545_v15 = vadd.f32 %v3535_v29, %v3358_v41 }
 0x300   : > { %v8242_v24 = vadd.f32 %v3647_v16, %v3545_v15  ;;  %v8244_v9 = vpop.f32.mrf.mxu3  ;;  %v8248_v35 = vpop.f32.mrf.mxu2 }
 0x301   : > { %v3736_v31 = vpop.f32.mrf.mxu1  ;;  %v4140_v36 = vpop.f32.mrf.mxu0 }
 0x302   : > { %v3756_v18 = vadd.f32 %v3736_v31, %v3650_v12 }
 0x304   : > { %v3862_v39 = vadd.f32 %v3842_v51, %v3756_v18 }
 0x306   : > { %v3968_v49 = vadd.f32 %v3948_v63, %v3862_v39 }
 0x308   : > { %v4155_v33 = vadd.f32 %v4135_v21, %v3968_v49  ;;  %v3958_v54 = vpop.f32.mrf.mxu3  ;;  %v3857_v11 = vpop.f32.mrf.mxu2 }
 0x309   : > { %v3738_v19 = vpop.f32.mrf.mxu1  ;;  %v8246_v34 = vpop.f32.mrf.mxu0 }
 0x30a   : > { %v3757_v8 = vadd.f32 %v3738_v19, %v8216_v47 }
 0x30c   : > { %v3863_v5 = vadd.f32 %v8233_v60, %v3757_v8  ;;  %v8273_v60 = vld [vmem:[%s8360_s4] ss:$0 sm:$0xff] }
 0x310   : > { %v8250_v12 = vpop.f32.mrf.mxu3  ;;  %v8256_v14 = vpop.f32.mrf.mxu2 }
 0x311   : > { %v3741_v23 = vpop.f32.mrf.mxu1  ;;  %v4145_v44 = vpop.f32.mrf.mxu0 }
 0x312   : > { %v3758_v42 = vadd.f32 %v3741_v23, %v3652_v53 }
 0x314   : > { %v3864_v26 = vadd.f32 %v3847_v58, %v3758_v42 }
 0x316   : > { %v3970_v52 = vadd.f32 %v3953_v32, %v3864_v26 }
 0x318   : > { %v4157_v27 = vadd.f32 %v4140_v36, %v3970_v52  ;;  %v3963_v55 = vpop.f32.mrf.mxu3  ;;  %v4353_v46 = vpop.f32.mrf.mxu2 }
 0x319   : > { %v3743_v22 = vpop.f32.mrf.mxu1  ;;  %v8252_v61 = vpop.f32.mrf.mxu0 }
 0x31a   : > { %v3759_v47 = vadd.f32 %v3743_v22, %v8225_v10 }
 0x31c   : > { %v3865_v49 = vadd.f32 %v3849_v2, %v3759_v47 }
 0x31e   : > { %v3971_v26 = vadd.f32 %v8244_v9, %v3865_v49 }
 0x320   : > { %v8258_v13 = vpop.f32.mrf.mxu3  ;;  %v4355_v4 = vpop.f32.mrf.mxu2 }
 0x321   : > { %v3746_v62 = vpop.f32.mrf.mxu1  ;;  %v4150_v38 = vpop.f32.mrf.mxu0 }
 0x322   : > { %v3760_v3 = vadd.f32 %v3746_v62, %v3654_v57  ;;  %v4158_v62 = vadd.f32 %v8246_v34, %v3971_v26 }
 0x324   : > { %v3866_v48 = vadd.f32 %v3852_v30, %v3760_v3 }
 0x326   : > { %v3972_v28 = vadd.f32 %v3958_v54, %v3866_v48 }
 0x328   : > { %v8254_v29 = vadd.f32 %v4145_v44, %v3972_v28  ;;  %v4459_v59 = vpop.f32.mrf.mxu3  ;;  %v4358_v32 = vpop.f32.mrf.mxu2 }
 0x329   : > { %v3748_v53 = vpop.f32.mrf.mxu1  ;;  %v8260_v56 = vpop.f32.mrf.mxu0 }
 0x32a   : > { %v3761_v28 = vadd.f32 %v3748_v53, %v8237_v20 }
 0x330   : > { %v4461_v21 = vpop.f32.mrf.mxu3  ;;  %v4360_v54 = vpop.f32.mrf.mxu2 }
 0x331   : > { %v3751_v51 = vpop.f32.mrf.mxu1  ;;  %v4565_v16 = vpop.f32.mrf.mxu0 }
 0x332   : > { %v3762_v25 = vadd.f32 %v3751_v51, %v3656_v7  ;;  %v3969_v7 = vadd.f32 %v8235_v45, %v3863_v5 }
 0x334   : > { %v3868_v0 = vadd.f32 %v3857_v11, %v3762_v25  ;;  %v4156_v40 = vadd.f32 %v4137_v50, %v3969_v7 }
 0x336   : > { %v3974_v63 = vadd.f32 %v3963_v55, %v3868_v0 }
 0x338   : > { %v8262_v57 = vadd.f32 %v4150_v38, %v3974_v63  ;;  %v4464_v31 = vpop.f32.mrf.mxu3  ;;  %v4640_v38 = vld [vmem:[%s8285_s6] sm:$0xf] }
 0x339   : > { %v8264_v37 = vpop.f32.mrf.mxu1  ;;  %v4567_v1 = vpop.f32.mrf.mxu0 }
 0x340   : > { %v4466_v52 = vpop.f32.mrf.mxu3 }
 0x341   : > { %v4247_v6 = vpop.f32.mrf.mxu1  ;;  %v4570_v39 = vpop.f32.mrf.mxu0 }
 0x342   : > { %v4267_v17 = vadd.f32 %v4247_v6, %v4155_v33 }
 0x344   : > { %v4373_v58 = vadd.f32 %v4353_v46, %v4267_v17  ;;  %v4363_v46 = vpop.f32.mrf.mxu2 }
 0x346   : > { %v4479_v43 = vadd.f32 %v4459_v59, %v4373_v58 }
 0x348   : > { %v4585_v36 = vadd.f32 %v4565_v16, %v4479_v43  ;;  %v4469_v34 = vpop.f32.mrf.mxu3  ;;  %v3867_v16 = vadd.f32 %v8248_v35, %v3761_v28 }
 0x349   : > { %v4249_v41 = vpop.f32.mrf.mxu1  ;;  %v4572_v11 = vpop.f32.mrf.mxu0 }
 0x34a   : > { %v4268_v15 = vadd.f32 %v4249_v41, %v4156_v40  ;;  %v4597_v50 = vadd.f32 %v8273_v60, %v4585_v36  ;;  %v3973_v58 = vadd.f32 %v8250_v12, %v3867_v16  ;;  %v3763_v12 = vadd.f32 %v8264_v37, %v8242_v24 }
 0x34c   : > { %v4374_v18 = vadd.f32 %v4355_v4, %v4268_v15  ;;  %v4605_v23 = vmax.f32 %v4597_v50, 0.0 }
 0x34e   : > { %v4480_v45 = vadd.f32 %v4461_v21, %v4374_v18 }
 0x350   : > { %v4586_v33 = vadd.f32 %v4567_v1, %v4480_v45  ;;  %v4471_v47 = vpop.f32.mrf.mxu3  ;;  %v4643_v45 = vld [vmem:[%s8285_s6 + $0x4] sm:$0xf] }
 0x351   : > { %v4252_v19 = vpop.f32.mrf.mxu1  ;;  %v4575_v20 = vpop.f32.mrf.mxu0 }
 0x352   : > { %v4598_v10 = vadd.f32 %v8273_v60, %v4586_v33  ;;  %v4269_v30 = vadd.f32 %v4252_v19, %v4157_v27 }
 0x354   : > { %v4606_v44 = vmax.f32 %v4598_v10, 0.0  ;;  %v4375_v42 = vadd.f32 %v4358_v32, %v4269_v30  ;;  %v4365_v32 = vpop.f32.mrf.mxu2 }
 0x356   : > { %v4613_v22 = vmax.f32 %v4605_v23, %v4606_v44  ;;  %v4481_v27 = vadd.f32 %v4464_v31, %v4375_v42  ;;  %v4160_v31 = vadd.f32 %v8252_v61, %v3973_v58  ;;  %v3869_v61 = vadd.f32 %v8256_v14, %v3763_v12 }
 0x358   : > { %v4621_v2 = vrot.slane %v4613_v22, 1  ;;  %v4587_v25 = vadd.f32 %v4570_v39, %v4481_v27  ;;  %v4652_v7 = vpack.c.bf16 %v4613_v22, %v4613_v22  ;;  %v4474_v37 = vpop.f32.mrf.mxu3 }
 0x359   : > { %v4254_v3 = vpop.f32.mrf.mxu1  ;;  %v4577_v49 = vpop.f32.mrf.mxu0 }
 0x35a   : > { %v4629_v55 = vmax.f32 %v4613_v22, %v4621_v2  ;;  %v4270_v48 = vadd.f32 %v4254_v3, %v4158_v62  ;;  %v4599_v8 = vadd.f32 %v8273_v60, %v4587_v25  ;;  %v3975_v2 = vadd.f32 %v8258_v13, %v3869_v61 }
 0x35c   : > { %v4633_v51 = vpack.c.bf16 %v4629_v55, %v4629_v55  ;;  %v4376_v0 = vadd.f32 %v4360_v54, %v4270_v48  ;;  %v4607_v17 = vmax.f32 %v4599_v8, 0.0  ;;  %v4368_v44 = vpop.f32.mrf.mxu2 }
 0x35e   : > { %v4641_v63 = vsel %vm8289_vm6, %v4633_v51, %v4640_v38  ;;  %v4482_v59 = vadd.f32 %v4466_v52, %v4376_v0 }
 0x35f   : > { %4642 = vst [vmem:[%s8285_s6] sm:$0xf] %v4641_v63 }
 0x360   : > { %v4588_v4 = vadd.f32 %v4572_v11, %v4482_v59 }
 0x361   : > { %v4257_v53 = vpop.f32.mrf.mxu1  ;;  %v4580_v62 = vpop.f32.mrf.mxu0 }
 0x362   : > { %v4600_v5 = vadd.f32 %v8273_v60, %v4588_v4  ;;  %v4271_v21 = vadd.f32 %v4257_v53, %v8254_v29 }
 0x364   : > { %v4608_v1 = vmax.f32 %v4600_v5, 0.0  ;;  %v4377_v35 = vadd.f32 %v4363_v46, %v4271_v21  ;;  %v4370_v0 = vpop.f32.mrf.mxu2  ;;  %v4646_v46 = vld [vmem:[%s8285_s6 + $0x8] sm:$0xf] }
 0x366   : > { %v4659_v43 = vld [vmem:[%s8285_s6] sm:$0x8]  ;;  %v4614_v40 = vmax.f32 %v4607_v17, %v4608_v1  ;;  %v4483_v15 = vadd.f32 %v4469_v34, %v4377_v35  ;;  %v4476_v34 = vpop.f32.mrf.mxu3 }
 0x367   : > { %v4660_v41 = vsel %vm8302_vm9, %v4652_v7, %v4659_v43 }
 0x368   : > { %4661 = vst [vmem:[%s8285_s6] sm:$0x8] %v4660_v41  ;;  %v4622_v29 = vrot.slane %v4614_v40, 1  ;;  %v4589_v33 = vadd.f32 %v4575_v20, %v4483_v15  ;;  %v4653_v27 = vpack.c.bf16 %v4614_v40, %v4614_v40 }
 0x369   : > { %v4259_v36 = vpop.f32.mrf.mxu1  ;;  %v4582_v4 = vpop.f32.mrf.mxu0 }
 0x36a   : > { %v4630_v18 = vmax.f32 %v4614_v40, %v4622_v29  ;;  %v4272_v39 = vadd.f32 %v4259_v36, %v4160_v31  ;;  %v4601_v54 = vadd.f32 %v8273_v60, %v4589_v33  ;;  %v4649_v40 = vld [vmem:[%s8285_s6 + $0xc] sm:$0xf] }
 0x36c   : > { %v4634_v50 = vpack.c.bf16 %v4630_v18, %v4630_v18  ;;  %v4378_v19 = vadd.f32 %v4365_v32, %v4272_v39  ;;  %v4609_v52 = vmax.f32 %v4601_v54, 0.0 }
 0x36e   : > { %v4644_v10 = vsel %vm8289_vm6, %v4634_v50, %v4643_v45  ;;  %v4484_v30 = vadd.f32 %v4471_v47, %v4378_v19 }
 0x36f   : > { %4645 = vst [vmem:[%s8285_s6 + $0x4] sm:$0xf] %v4644_v10 }
 0x370   : > { %v4590_v23 = vadd.f32 %v4577_v49, %v4484_v30 }
 0x371   : > { %v4262_v42 = vpop.f32.mrf.mxu1 }
 0x372   : > { %v4602_v26 = vadd.f32 %v8273_v60, %v4590_v23  ;;  %v4273_v24 = vadd.f32 %v4262_v42, %v8262_v57  ;;  %v4162_v57 = vadd.f32 %v8260_v56, %v3975_v2 }
 0x374   : > { %v4610_v22 = vmax.f32 %v4602_v26, 0.0  ;;  %v4379_v11 = vadd.f32 %v4368_v44, %v4273_v24 }
 0x376   : > { %v4662_v14 = vld [vmem:[%s8285_s6 + $0x4] sm:$0x8]  ;;  %v4615_v3 = vmax.f32 %v4609_v52, %v4610_v22  ;;  %v4485_v38 = vadd.f32 %v4474_v37, %v4379_v11 }
 0x377   : > { %v4663_v55 = vsel %vm8302_vm9, %v4653_v27, %v4662_v14 }
 0x378   : > { %4664 = vst [vmem:[%s8285_s6 + $0x4] sm:$0x8] %v4663_v55  ;;  %v4623_v48 = vrot.slane %v4615_v3, 1  ;;  %v4591_v63 = vadd.f32 %v4580_v62, %v4485_v38  ;;  %v4654_v17 = vpack.c.bf16 %v4615_v3, %v4615_v3 }
 0x379   : > { %v4264_v28 = vpop.f32.mrf.mxu1 }
 0x37a   : > { %v4631_v51 = vmax.f32 %v4615_v3, %v4623_v48  ;;  %v4274_v25 = vadd.f32 %v4264_v28, %v4162_v57  ;;  %v4603_v56 = vadd.f32 %v8273_v60, %v4591_v63 }
 0x37c   : > { %v4635_v13 = vpack.c.bf16 %v4631_v51, %v4631_v51  ;;  %v4380_v59 = vadd.f32 %v4370_v0, %v4274_v25  ;;  %v4611_v5 = vmax.f32 %v4603_v56, 0.0 }
 0x37e   : > { %v4647_v16 = vsel %vm8289_vm6, %v4635_v13, %v4646_v46  ;;  %v4486_v8 = vadd.f32 %v4476_v34, %v4380_v59 }
 0x37f   : > { %4648 = vst [vmem:[%s8285_s6 + $0x8] sm:$0xf] %v4647_v16 }
 0x380   : > { %v4592_v20 = vadd.f32 %v4582_v4, %v4486_v8 }
 0x382   : > { %v4604_v53 = vadd.f32 %v8273_v60, %v4592_v20 }
 0x384   : > { %v4612_v21 = vmax.f32 %v4604_v53, 0.0 }
 0x386   : > { %v4665_v1 = vld [vmem:[%s8285_s6 + $0x8] sm:$0x8]  ;;  %v4616_v35 = vmax.f32 %v4611_v5, %v4612_v21 }
 0x387   : > { %v4666_v58 = vsel %vm8302_vm9, %v4654_v17, %v4665_v1 }
 0x388   : > { %4667 = vst [vmem:[%s8285_s6 + $0x8] sm:$0x8] %v4666_v58  ;;  %v4624_v7 = vrot.slane %v4616_v35, 1  ;;  %v4655_v29 = vpack.c.bf16 %v4616_v35, %v4616_v35 }
 0x38a   : > { %v4632_v43 = vmax.f32 %v4616_v35, %v4624_v7 }
 0x38c   : > { %v4636_v32 = vpack.c.bf16 %v4632_v43, %v4632_v43 }
 0x38e   : > { %v4650_v41 = vsel %vm8289_vm6, %v4636_v32, %v4649_v40 }
 0x38f   : > { %4651 = vst [vmem:[%s8285_s6 + $0xc] sm:$0xf] %v4650_v41 }
 0x396   : > { %v4668_v60 = vld [vmem:[%s8285_s6 + $0xc] sm:$0x8] }
 0x397   : > { %v4669_v15 = vsel %vm8302_vm9, %v4655_v29, %v4668_v60 }
 0x398   : > { %4670 = vst [vmem:[%s8285_s6 + $0xc] sm:$0x8] %v4669_v15 }
 0x399 PF: > { %p12_p9 = scmp.ge.s32.totalorder %s6610_s22, 10   ;;  %s8407_s18 = smov %s6557_s19 }
 0x39a   : > { %s8408_s19 = smov %s6619_s25  ;;  %s8409_s20 = smov %s6610_s22 }
 0x39b   :  { %14 = sbr.rel (!%p12_p9) target bundleno = 2 (0x2), region = 143 }

// kernel: mnist_mlp_forward.3
= control target key start
LH: loop header
LB: loop body
LE: loop exit
PB: predicated region body
PF: predicated region fallthrough
CT: control target
= control target key end

     0   :  { %s19646_s1 = inlined_call_operand.vmem [shape: bf16[4096,512], index: 1, kind: input, shape index: {}]   ;;  %s19647_s0 = inlined_call_operand.vmem [shape: bf16[8,4096], index: 0, kind: input, shape index: {}]   ;;  %s19648_s2 = inlined_call_operand.vmem [shape: f32[1,512], index: 2, kind: input, shape index: {}]   ;;  %s19649_s3 = inlined_call_operand.vmem [shape: f32[8,512], index: 3, kind: output, shape index: {}]  }
   0x1   :  { %v8086_v0 = vld [vmem:[%s19646_s1 + $0xe0] sm:$0xf]  ;;  %v12098_v1 = vld [vmem:[%s19646_s1 + $0xec] sm:$0xf0] }
   0x2   :  { %v8214_v2 = vld [vmem:[%s19646_s1 + $0x1e0] sm:$0xf]  ;;  %v8087_v3 = vor.u32 %v12098_v1, %v8086_v0  ;;  %v12130_v4 = vld [vmem:[%s19646_s1 + $0x1ec] sm:$0xf0] }
   0x3   :  { %v8342_v5 = vld [vmem:[%s19646_s1 + $0x2e0] sm:$0xf]  ;;  %v12162_v6 = vld [vmem:[%s19646_s1 + $0x2ec] sm:$0xf0]  ;;  %v8215_v7 = vor.u32 %v12130_v4, %v8214_v2 }
   0x4   :  { %v8343_v8 = vor.u32 %v12162_v6, %v8342_v5  ;;  %v8470_v9 = vld [vmem:[%s19646_s1 + $0x3e0] sm:$0xf]  ;;  %v12194_v10 = vld [vmem:[%s19646_s1 + $0x3ec] sm:$0xf0]  ;;  %6296 = vmatpush.bf16.msra.mxu0 %v8087_v3 }
   0x5   :  { %v8070_v11 = vld [vmem:[%s19646_s1 + $0xc0] sm:$0xf]  ;;  %v8471_v12 = vor.u32 %v12194_v10, %v8470_v9  ;;  %v12094_v13 = vld [vmem:[%s19646_s1 + $0xcc] sm:$0xf0]  ;;  %6309 = vmatpush.bf16.msra.mxu1 %v8215_v7 }
   0x6   :  { %v8198_v14 = vld [vmem:[%s19646_s1 + $0x1c0] sm:$0xf]  ;;  %v12126_v15 = vld [vmem:[%s19646_s1 + $0x1cc] sm:$0xf0]  ;;  %6322 = vmatpush.bf16.msra.mxu2 %v8343_v8  ;;  %v8071_v16 = vor.u32 %v12094_v13, %v8070_v11 }
   0x7   :  { %v8199_v17 = vor.u32 %v12126_v15, %v8198_v14  ;;  %v8326_v18 = vld [vmem:[%s19646_s1 + $0x2c0] sm:$0xf]  ;;  %v12158_v19 = vld [vmem:[%s19646_s1 + $0x2cc] sm:$0xf0]  ;;  %6335 = vmatpush.bf16.msra.mxu3 %v8471_v12 }
   0x8   :  { %v8454_v20 = vld [vmem:[%s19646_s1 + $0x3c0] sm:$0xf]  ;;  %v8327_v21 = vor.u32 %v12158_v19, %v8326_v18  ;;  %v12190_v22 = vld [vmem:[%s19646_s1 + $0x3cc] sm:$0xf0]  ;;  %6297 = vmatpush.bf16.msra.mxu0 %v8071_v16 }
   0x9   :  { %v8054_v23 = vld [vmem:[%s19646_s1 + $0xa0] sm:$0xf]  ;;  %v12090_v24 = vld [vmem:[%s19646_s1 + $0xac] sm:$0xf0]  ;;  %v8455_v25 = vor.u32 %v12190_v22, %v8454_v20  ;;  %6310 = vmatpush.bf16.msra.mxu1 %v8199_v17 }
   0xa   :  { %v8182_v26 = vld [vmem:[%s19646_s1 + $0x1a0] sm:$0xf]  ;;  %v12122_v27 = vld [vmem:[%s19646_s1 + $0x1ac] sm:$0xf0]  ;;  %v8055_v29 = vor.u32 %v12090_v24, %v8054_v23  ;;  %6323 = vmatpush.bf16.msra.mxu2 %v8327_v21 }
   0xb   :  { %v8310_v28 = vld [vmem:[%s19646_s1 + $0x2a0] sm:$0xf]  ;;  %v12154_v30 = vld [vmem:[%s19646_s1 + $0x2ac] sm:$0xf0]  ;;  %v8183_v33 = vor.u32 %v12122_v27, %v8182_v26  ;;  %6336 = vmatpush.bf16.msra.mxu3 %v8455_v25 }
   0xc   :  { %v8438_v31 = vld [vmem:[%s19646_s1 + $0x3a0] sm:$0xf]  ;;  %v12186_v32 = vld [vmem:[%s19646_s1 + $0x3ac] sm:$0xf0]  ;;  %v8311_v34 = vor.u32 %v12154_v30, %v8310_v28  ;;  %6298 = vmatpush.bf16.msra.mxu0 %v8055_v29 }
   0xd   :  { %v8038_v35 = vld [vmem:[%s19646_s1 + $0x80] sm:$0xf]  ;;  %v12086_v36 = vld [vmem:[%s19646_s1 + $0x8c] sm:$0xf0]  ;;  %v8439_v38 = vor.u32 %v12186_v32, %v8438_v31  ;;  %6311 = vmatpush.bf16.msra.mxu1 %v8183_v33 }
   0xe   :  { %v8166_v37 = vld [vmem:[%s19646_s1 + $0x180] sm:$0xf]  ;;  %v12118_v39 = vld [vmem:[%s19646_s1 + $0x18c] sm:$0xf0]  ;;  %v8039_v44 = vor.u32 %v12086_v36, %v8038_v35  ;;  %6324 = vmatpush.bf16.msra.mxu2 %v8311_v34 }
   0xf   :  { %v8294_v40 = vld [vmem:[%s19646_s1 + $0x280] sm:$0xf]  ;;  %v12150_v41 = vld [vmem:[%s19646_s1 + $0x28c] sm:$0xf0]  ;;  %v8167_v45 = vor.u32 %v12118_v39, %v8166_v37  ;;  %6337 = vmatpush.bf16.msra.mxu3 %v8439_v38 }
  0x10   :  { %v8422_v42 = vld [vmem:[%s19646_s1 + $0x380] sm:$0xf]  ;;  %v12182_v43 = vld [vmem:[%s19646_s1 + $0x38c] sm:$0xf0]  ;;  %v8295_v46 = vor.u32 %v12150_v41, %v8294_v40  ;;  %6299 = vmatpush.bf16.msra.mxu0 %v8039_v44 }
  0x11   :  { %v8022_v47 = vld [vmem:[%s19646_s1 + $0x60] sm:$0xf]  ;;  %v12082_v48 = vld [vmem:[%s19646_s1 + $0x6c] sm:$0xf0]  ;;  %v8423_v50 = vor.u32 %v12182_v43, %v8422_v42  ;;  %6312 = vmatpush.bf16.msra.mxu1 %v8167_v45 }
  0x12   :  { %v8150_v49 = vld [vmem:[%s19646_s1 + $0x160] sm:$0xf]  ;;  %v12114_v51 = vld [vmem:[%s19646_s1 + $0x16c] sm:$0xf0]  ;;  %v8023_v56 = vor.u32 %v12082_v48, %v8022_v47  ;;  %6325 = vmatpush.bf16.msra.mxu2 %v8295_v46 }
  0x13   :  { %v8278_v52 = vld [vmem:[%s19646_s1 + $0x260] sm:$0xf]  ;;  %v12146_v53 = vld [vmem:[%s19646_s1 + $0x26c] sm:$0xf0]  ;;  %v8151_v57 = vor.u32 %v12114_v51, %v8150_v49  ;;  %6338 = vmatpush.bf16.msra.mxu3 %v8423_v50 }
  0x14   :  { %v8406_v54 = vld [vmem:[%s19646_s1 + $0x360] sm:$0xf]  ;;  %v12178_v55 = vld [vmem:[%s19646_s1 + $0x36c] sm:$0xf0]  ;;  %v8279_v58 = vor.u32 %v12146_v53, %v8278_v52  ;;  %6300 = vmatpush.bf16.msra.mxu0 %v8023_v56 }
  0x15   :  { %v8006_v59 = vld [vmem:[%s19646_s1 + $0x40] sm:$0xf]  ;;  %v12078_v60 = vld [vmem:[%s19646_s1 + $0x4c] sm:$0xf0]  ;;  %v8407_v62 = vor.u32 %v12178_v55, %v8406_v54  ;;  %6313 = vmatpush.bf16.msra.mxu1 %v8151_v57 }
  0x16   :  { %v8134_v61 = vld [vmem:[%s19646_s1 + $0x140] sm:$0xf]  ;;  %v12110_v63 = vld [vmem:[%s19646_s1 + $0x14c] sm:$0xf0]  ;;  %v8007_v4 = vor.u32 %v12078_v60, %v8006_v59  ;;  %6326 = vmatpush.bf16.msra.mxu2 %v8279_v58  ;;  %v15_v58 = vld [vmem:[%s19647_s0 + $0x8] sm:$0xff] }
  0x17   :  { %v8262_v0 = vld [vmem:[%s19646_s1 + $0x240] sm:$0xf]  ;;  %v12142_v1 = vld [vmem:[%s19646_s1 + $0x24c] sm:$0xf0]  ;;  %v8135_v5 = vor.u32 %v12110_v63, %v8134_v61  ;;  %6339 = vmatpush.bf16.msra.mxu3 %v8407_v62  ;;  %v1082_v63 = vunpack.c.l.b16 %v15_v58 }
  0x18   :  { %v8390_v2 = vld [vmem:[%s19646_s1 + $0x340] sm:$0xf]  ;;  %v12174_v3 = vld [vmem:[%s19646_s1 + $0x34c] sm:$0xf0]  ;;  %v8263_v6 = vor.u32 %v12142_v1, %v8262_v0  ;;  %6301 = vmatpush.bf16.msra.mxu0 %v8007_v4  ;;  %v1083_v0 = vunpack.c.h.b16 %v15_v58 }
  0x19   :  { %v7990_v7 = vld [vmem:[%s19646_s1 + $0x20] sm:$0xf]  ;;  %v12074_v8 = vld [vmem:[%s19646_s1 + $0x2c] sm:$0xf0]  ;;  %v8391_v10 = vor.u32 %v12174_v3, %v8390_v2  ;;  %6314 = vmatpush.bf16.msra.mxu1 %v8135_v5  ;;  %v13382_v4 = vpack.c.b16 %v1082_v63, %v1082_v63 }
  0x1a   :  { %v8118_v9 = vld [vmem:[%s19646_s1 + $0x120] sm:$0xf]  ;;  %v12106_v11 = vld [vmem:[%s19646_s1 + $0x12c] sm:$0xf0]  ;;  %v7991_v16 = vor.u32 %v12074_v8, %v7990_v7  ;;  %6327 = vmatpush.bf16.msra.mxu2 %v8263_v6  ;;  %v13387_v6 = vpack.c.b16 %v1083_v0, %v1083_v0 }
  0x1b   :  { %v8246_v12 = vld [vmem:[%s19646_s1 + $0x220] sm:$0xf]  ;;  %v12138_v13 = vld [vmem:[%s19646_s1 + $0x22c] sm:$0xf0]  ;;  %v8119_v19 = vor.u32 %v12106_v11, %v8118_v9  ;;  %6340 = vmatpush.bf16.msra.mxu3 %v8391_v10 }
  0x1c   :  { %v8374_v14 = vld [vmem:[%s19646_s1 + $0x320] sm:$0xf]  ;;  %v12170_v15 = vld [vmem:[%s19646_s1 + $0x32c] sm:$0xf0]  ;;  %v8247_v20 = vor.u32 %v12138_v13, %v8246_v12  ;;  %6302 = vmatpush.bf16.msra.mxu0 %v7991_v16 }
  0x1d   :  { %v7974_v17 = vld [vmem:[%s19646_s1] sm:$0xf]  ;;  %v12070_v18 = vld [vmem:[%s19646_s1 + $0xc] sm:$0xf0]  ;;  %v8375_v24 = vor.u32 %v12170_v15, %v8374_v14  ;;  %6315 = vmatpush.bf16.msra.mxu1 %v8119_v19 }
  0x1e   :  { %v8102_v21 = vld [vmem:[%s19646_s1 + $0x100] sm:$0xf]  ;;  %v12102_v22 = vld [vmem:[%s19646_s1 + $0x10c] sm:$0xf0]  ;;  %v7975_v31 = vor.u32 %v12070_v18, %v7974_v17  ;;  %6328 = vmatpush.bf16.msra.mxu2 %v8247_v20 }
  0x1f   :  { %v8230_v23 = vld [vmem:[%s19646_s1 + $0x200] sm:$0xf]  ;;  %v12134_v25 = vld [vmem:[%s19646_s1 + $0x20c] sm:$0xf0]  ;;  %v8103_v35 = vor.u32 %v12102_v22, %v8102_v21  ;;  %6341 = vmatpush.bf16.msra.mxu3 %v8375_v24 }
  0x20   :  { %v8358_v26 = vld [vmem:[%s19646_s1 + $0x300] sm:$0xf]  ;;  %v12166_v27 = vld [vmem:[%s19646_s1 + $0x30c] sm:$0xf0]  ;;  %v8231_v36 = vor.u32 %v12134_v25, %v8230_v23  ;;  %6303 = vmatpush.bf16.msra.mxu0 %v7975_v31 }
  0x21   :  { %v8598_v28 = vld [vmem:[%s19646_s1 + $0x4e0] sm:$0xf]  ;;  %v12226_v29 = vld [vmem:[%s19646_s1 + $0x4ec] sm:$0xf0]  ;;  %v8359_v39 = vor.u32 %v12166_v27, %v8358_v26  ;;  %6316 = vmatpush.bf16.msra.mxu1 %v8103_v35 }
  0x22   :  { %v8726_v30 = vld [vmem:[%s19646_s1 + $0x5e0] sm:$0xf]  ;;  %v12258_v32 = vld [vmem:[%s19646_s1 + $0x5ec] sm:$0xf0]  ;;  %v8599_v40 = vor.u32 %v12226_v29, %v8598_v28  ;;  %6329 = vmatpush.bf16.msra.mxu2 %v8231_v36 }
  0x23   :  { %v8854_v33 = vld [vmem:[%s19646_s1 + $0x6e0] sm:$0xf]  ;;  %v12290_v34 = vld [vmem:[%s19646_s1 + $0x6ec] sm:$0xf0]  ;;  %v8727_v41 = vor.u32 %v12258_v32, %v8726_v30  ;;  %6342 = vmatpush.bf16.msra.mxu3 %v8359_v39 }
  0x24   :  { %v8982_v37 = vld [vmem:[%s19646_s1 + $0x7e0] sm:$0xf]  ;;  %v12322_v38 = vld [vmem:[%s19646_s1 + $0x7ec] sm:$0xf0]  ;;  %v8855_v42 = vor.u32 %v12290_v34, %v8854_v33  ;;  %6348 = vmatpush.bf16.msrb.mxu0 %v8599_v40 }
  0x25   :  { %v8582_v43 = vld [vmem:[%s19646_s1 + $0x4c0] sm:$0xf]  ;;  %v12222_v44 = vld [vmem:[%s19646_s1 + $0x4cc] sm:$0xf0]  ;;  %v8983_v46 = vor.u32 %v12322_v38, %v8982_v37  ;;  %6361 = vmatpush.bf16.msrb.mxu1 %v8727_v41  ;;  %6330 = vmatmul.bf16.vlgmr.msra.gmra.mxu2 %v13382_v4 }
  0x26   :  { %v8710_v45 = vld [vmem:[%s19646_s1 + $0x5c0] sm:$0xf]  ;;  %v12254_v47 = vld [vmem:[%s19646_s1 + $0x5cc] sm:$0xf0]  ;;  %v8583_v52 = vor.u32 %v12222_v44, %v8582_v43  ;;  %6374 = vmatpush.bf16.msrb.mxu2 %v8855_v42  ;;  %6343 = vmatmul.bf16.vlgmr.msra.gmra.mxu3 %v13387_v6 }
  0x27   :  { %v8838_v48 = vld [vmem:[%s19646_s1 + $0x6c0] sm:$0xf]  ;;  %v12286_v49 = vld [vmem:[%s19646_s1 + $0x6cc] sm:$0xf0]  ;;  %v8711_v54 = vor.u32 %v12254_v47, %v8710_v45  ;;  %6387 = vmatpush.bf16.msrb.mxu3 %v8983_v46 }
  0x28   :  { %v8966_v50 = vld [vmem:[%s19646_s1 + $0x7c0] sm:$0xf]  ;;  %v12318_v51 = vld [vmem:[%s19646_s1 + $0x7cc] sm:$0xf0]  ;;  %v8839_v55 = vor.u32 %v12286_v49, %v8838_v48  ;;  %6349 = vmatpush.bf16.msrb.mxu0 %v8583_v52 }
  0x29   :  { %v8566_v53 = vld [vmem:[%s19646_s1 + $0x4a0] sm:$0xf]  ;;  %v12218_v56 = vld [vmem:[%s19646_s1 + $0x4ac] sm:$0xf0]  ;;  %v8967_v59 = vor.u32 %v12318_v51, %v8966_v50  ;;  %6362 = vmatpush.bf16.msrb.mxu1 %v8711_v54 }
  0x2a   :  { %v8694_v57 = vld [vmem:[%s19646_s1 + $0x5a0] sm:$0xf]  ;;  %v12250_v60 = vld [vmem:[%s19646_s1 + $0x5ac] sm:$0xf0]  ;;  %v8567_v3 = vor.u32 %v12218_v56, %v8566_v53  ;;  %6375 = vmatpush.bf16.msrb.mxu2 %v8839_v55 }
  0x2b   :  { %v8822_v61 = vld [vmem:[%s19646_s1 + $0x6a0] sm:$0xf]  ;;  %v12282_v62 = vld [vmem:[%s19646_s1 + $0x6ac] sm:$0xf0]  ;;  %v8695_v7 = vor.u32 %v12250_v60, %v8694_v57  ;;  %6388 = vmatpush.bf16.msrb.mxu3 %v8967_v59 }
  0x2c   :  { %v8950_v1 = vld [vmem:[%s19646_s1 + $0x7a0] sm:$0xf]  ;;  %v12314_v2 = vld [vmem:[%s19646_s1 + $0x7ac] sm:$0xf0]  ;;  %v8823_v8 = vor.u32 %v12282_v62, %v8822_v61  ;;  %6350 = vmatpush.bf16.msrb.mxu0 %v8567_v3  ;;  %v17_v3 = vld [vmem:[%s19647_s0 + $0x18] sm:$0xff] }
  0x2d   :  { %v14_v5 = vld [vmem:[%s19647_s0] sm:$0xff]  ;;  %v12214_v10 = vld [vmem:[%s19646_s1 + $0x48c] sm:$0xf0]  ;;  %v8951_v14 = vor.u32 %v12314_v2, %v8950_v1  ;;  %6363 = vmatpush.bf16.msrb.mxu1 %v8695_v7 }
  0x2e   :  { %v8550_v9 = vld [vmem:[%s19646_s1 + $0x480] sm:$0xf]  ;;  %v1080_v12 = vunpack.c.l.b16 %v14_v5  ;;  %v1081_v13 = vunpack.c.h.b16 %v14_v5  ;;  %v12246_v15 = vld [vmem:[%s19646_s1 + $0x58c] sm:$0xf0]  ;;  %6376 = vmatpush.bf16.msrb.mxu2 %v8823_v8 }
  0x2f   :  { %v8678_v11 = vld [vmem:[%s19646_s1 + $0x580] sm:$0xf]  ;;  %v12278_v17 = vld [vmem:[%s19646_s1 + $0x68c] sm:$0xf0]  ;;  %v8551_v22 = vor.u32 %v12214_v10, %v8550_v9  ;;  %6389 = vmatpush.bf16.msrb.mxu3 %v8951_v14 }
  0x30   :  { %v8806_v16 = vld [vmem:[%s19646_s1 + $0x680] sm:$0xf]  ;;  %v12310_v19 = vld [vmem:[%s19646_s1 + $0x78c] sm:$0xf0]  ;;  %v13414_v20 = vpack.c.b16 %v1080_v12, %v1080_v12  ;;  %v13417_v21 = vpack.c.b16 %v1081_v13, %v1081_v13  ;;  %v8679_v23 = vor.u32 %v12246_v15, %v8678_v11 }
  0x31   :  { %v8934_v18 = vld [vmem:[%s19646_s1 + $0x780] sm:$0xf]  ;;  %v8807_v24 = vor.u32 %v12278_v17, %v8806_v16  ;;  %v12210_v26 = vld [vmem:[%s19646_s1 + $0x46c] sm:$0xf0]  ;;  %6351 = vmatpush.bf16.msrb.mxu0 %v8551_v22  ;;  %v1086_v17 = vunpack.c.l.b16 %v17_v3 }
  0x32   :  { %v8534_v25 = vld [vmem:[%s19646_s1 + $0x460] sm:$0xf]  ;;  %v8935_v28 = vor.u32 %v12310_v19, %v8934_v18  ;;  %v12242_v29 = vld [vmem:[%s19646_s1 + $0x56c] sm:$0xf0]  ;;  %6304 = vmatmul.bf16.vlgmr.msra.gmra.mxu0 %v13414_v20  ;;  %6317 = vmatmul.bf16.vlgmr.msra.gmra.mxu1 %v13417_v21 }
  0x33   :  { %v8662_v27 = vld [vmem:[%s19646_s1 + $0x560] sm:$0xf]  ;;  %v12274_v31 = vld [vmem:[%s19646_s1 + $0x66c] sm:$0xf0]  ;;  %v8535_v34 = vor.u32 %v12210_v26, %v8534_v25  ;;  %6364 = vmatpush.bf16.msrb.mxu1 %v8679_v23  ;;  %6377 = vmatpush.bf16.msrb.mxu2 %v8807_v24  ;;  %v1087_v25 = vunpack.c.h.b16 %v17_v3 }
  0x34   :  { %v8790_v30 = vld [vmem:[%s19646_s1 + $0x660] sm:$0xf]  ;;  %v12306_v33 = vld [vmem:[%s19646_s1 + $0x76c] sm:$0xf0]  ;;  %v8663_v35 = vor.u32 %v12242_v29, %v8662_v27  ;;  %6390 = vmatpush.bf16.msrb.mxu3 %v8935_v28 }
  0x35   :  { %v8918_v32 = vld [vmem:[%s19646_s1 + $0x760] sm:$0xf]  ;;  %v8791_v36 = vor.u32 %v12274_v31, %v8790_v30  ;;  %v12206_v38 = vld [vmem:[%s19646_s1 + $0x44c] sm:$0xf0]  ;;  %6352 = vmatpush.bf16.msrb.mxu0 %v8535_v34 }
  0x36   :  { %v8518_v37 = vld [vmem:[%s19646_s1 + $0x440] sm:$0xf]  ;;  %v8919_v40 = vor.u32 %v12306_v33, %v8918_v32  ;;  %v12238_v41 = vld [vmem:[%s19646_s1 + $0x54c] sm:$0xf0] }
  0x37   :  { %v8646_v39 = vld [vmem:[%s19646_s1 + $0x540] sm:$0xf]  ;;  %v12270_v43 = vld [vmem:[%s19646_s1 + $0x64c] sm:$0xf0]  ;;  %v8519_v46 = vor.u32 %v12206_v38, %v8518_v37  ;;  %6365 = vmatpush.bf16.msrb.mxu1 %v8663_v35  ;;  %6378 = vmatpush.bf16.msrb.mxu2 %v8791_v36  ;;  %v13565_v38 = vpack.c.b16 %v1086_v17, %v1086_v17 }
  0x38   :  { %v8774_v42 = vld [vmem:[%s19646_s1 + $0x640] sm:$0xf]  ;;  %v12302_v45 = vld [vmem:[%s19646_s1 + $0x74c] sm:$0xf0]  ;;  %v8647_v47 = vor.u32 %v12238_v41, %v8646_v39  ;;  %6391 = vmatpush.bf16.msrb.mxu3 %v8919_v40 }
  0x39   :  { %v8902_v44 = vld [vmem:[%s19646_s1 + $0x740] sm:$0xf]  ;;  %v8775_v48 = vor.u32 %v12270_v43, %v8774_v42  ;;  %v12202_v50 = vld [vmem:[%s19646_s1 + $0x42c] sm:$0xf0]  ;;  %6353 = vmatpush.bf16.msrb.mxu0 %v8519_v46  ;;  %v13575_v42 = vpack.c.b16 %v1087_v25, %v1087_v25 }
  0x3a   :  { %v8502_v49 = vld [vmem:[%s19646_s1 + $0x420] sm:$0xf]  ;;  %v8903_v52 = vor.u32 %v12302_v45, %v8902_v44  ;;  %v12234_v53 = vld [vmem:[%s19646_s1 + $0x52c] sm:$0xf0] }
  0x3b   :  { %v8630_v51 = vld [vmem:[%s19646_s1 + $0x520] sm:$0xf]  ;;  %v12266_v55 = vld [vmem:[%s19646_s1 + $0x62c] sm:$0xf0]  ;;  %v8503_v59 = vor.u32 %v12202_v50, %v8502_v49  ;;  %6366 = vmatpush.bf16.msrb.mxu1 %v8647_v47  ;;  %6379 = vmatpush.bf16.msrb.mxu2 %v8775_v48 }
  0x3c   :  { %v8758_v54 = vld [vmem:[%s19646_s1 + $0x620] sm:$0xf]  ;;  %v12298_v57 = vld [vmem:[%s19646_s1 + $0x72c] sm:$0xf0]  ;;  %v8631_v63 = vor.u32 %v12234_v53, %v8630_v51  ;;  %6392 = vmatpush.bf16.msrb.mxu3 %v8903_v52 }
  0x3d   :  { %v8886_v56 = vld [vmem:[%s19646_s1 + $0x720] sm:$0xf]  ;;  %v12198_v60 = vld [vmem:[%s19646_s1 + $0x40c] sm:$0xf0]  ;;  %v8759_v0 = vor.u32 %v12266_v55, %v8758_v54  ;;  %6354 = vmatpush.bf16.msrb.mxu0 %v8503_v59 }
  0x3e   :  { %v8486_v58 = vld [vmem:[%s19646_s1 + $0x400] sm:$0xf]  ;;  %v12230_v62 = vld [vmem:[%s19646_s1 + $0x50c] sm:$0xf0]  ;;  %v8887_v5 = vor.u32 %v12298_v57, %v8886_v56 }
  0x3f   :  { %v8614_v61 = vld [vmem:[%s19646_s1 + $0x500] sm:$0xf]  ;;  %v12262_v2 = vld [vmem:[%s19646_s1 + $0x60c] sm:$0xf0]  ;;  %v8487_v13 = vor.u32 %v12198_v60, %v8486_v58  ;;  %6367 = vmatpush.bf16.msrb.mxu1 %v8631_v63  ;;  %6380 = vmatpush.bf16.msrb.mxu2 %v8759_v0 }
  0x40   :  { %v8742_v1 = vld [vmem:[%s19646_s1 + $0x600] sm:$0xf]  ;;  %v12294_v8 = vld [vmem:[%s19646_s1 + $0x70c] sm:$0xf0]  ;;  %v8615_v18 = vor.u32 %v12230_v62, %v8614_v61  ;;  %6393 = vmatpush.bf16.msrb.mxu3 %v8887_v5 }
  0x41   :  { %v8870_v7 = vld [vmem:[%s19646_s1 + $0x700] sm:$0xf]  ;;  %v16_v9 = vld [vmem:[%s19647_s0 + $0x10] sm:$0xff]  ;;  %v8743_v19 = vor.u32 %v12262_v2, %v8742_v1  ;;  %6355 = vmatpush.bf16.msrb.mxu0 %v8487_v13 }
  0x42   :  { %v9110_v10 = vld [vmem:[%s19646_s1 + $0x8e0] sm:$0xf]  ;;  %v12354_v11 = vld [vmem:[%s19646_s1 + $0x8ec] sm:$0xf0]  ;;  %v1084_v24 = vunpack.c.l.b16 %v16_v9  ;;  %v8871_v26 = vor.u32 %v12294_v8, %v8870_v7  ;;  %v1085_v28 = vunpack.c.h.b16 %v16_v9 }
  0x43   :  { %v9238_v12 = vld [vmem:[%s19646_s1 + $0x9e0] sm:$0xf]  ;;  %v12386_v14 = vld [vmem:[%s19646_s1 + $0x9ec] sm:$0xf0]  ;;  %v9111_v27 = vor.u32 %v12354_v11, %v9110_v10  ;;  %6368 = vmatpush.bf16.msrb.mxu1 %v8615_v18  ;;  %6381 = vmatpush.bf16.msrb.mxu2 %v8743_v19 }
  0x44   :  { %v9366_v15 = vld [vmem:[%s19646_s1 + $0xae0] sm:$0xf]  ;;  %v12418_v16 = vld [vmem:[%s19646_s1 + $0xaec] sm:$0xf0]  ;;  %v9239_v29 = vor.u32 %v12386_v14, %v9238_v12  ;;  %v13573_v41 = vpack.c.b16 %v1084_v24, %v1084_v24  ;;  %6394 = vmatpush.bf16.msrb.mxu3 %v8871_v26  ;;  %v13577_v44 = vpack.c.b16 %v1085_v28, %v1085_v28 }
  0x45   :  { %v9494_v22 = vld [vmem:[%s19646_s1 + $0xbe0] sm:$0xf]  ;;  %v12450_v23 = vld [vmem:[%s19646_s1 + $0xbec] sm:$0xf0]  ;;  %v9367_v30 = vor.u32 %v12418_v16, %v9366_v15  ;;  %6400 = vmatpush.bf16.msra.mxu0 %v9111_v27 }
  0x46   :  { %v9094_v31 = vld [vmem:[%s19646_s1 + $0x8c0] sm:$0xf]  ;;  %v12350_v32 = vld [vmem:[%s19646_s1 + $0x8cc] sm:$0xf0]  ;;  %v9495_v34 = vor.u32 %v12450_v23, %v9494_v22  ;;  %6382 = vmatmul.bf16.vlgmr.msrb.gmra.mxu2 %v13565_v38  ;;  %6356 = vmatmul.bf16.vlgmr.msrb.gmra.mxu0 %v13573_v41 }
  0x47   :  { %v9222_v33 = vld [vmem:[%s19646_s1 + $0x9c0] sm:$0xf]  ;;  %v12382_v35 = vld [vmem:[%s19646_s1 + $0x9cc] sm:$0xf0]  ;;  %v9095_v43 = vor.u32 %v12350_v32, %v9094_v31  ;;  %6413 = vmatpush.bf16.msra.mxu1 %v9239_v29  ;;  %6426 = vmatpush.bf16.msra.mxu2 %v9367_v30 }
  0x48   :  { %v9350_v36 = vld [vmem:[%s19646_s1 + $0xac0] sm:$0xf]  ;;  %v12414_v37 = vld [vmem:[%s19646_s1 + $0xacc] sm:$0xf0]  ;;  %v9223_v45 = vor.u32 %v12382_v35, %v9222_v33  ;;  %6439 = vmatpush.bf16.msra.mxu3 %v9495_v34  ;;  %6369 = vmatmul.bf16.vlgmr.msrb.gmra.mxu1 %v13577_v44 }
  0x49   :  { %v9478_v39 = vld [vmem:[%s19646_s1 + $0xbc0] sm:$0xf]  ;;  %v12446_v40 = vld [vmem:[%s19646_s1 + $0xbcc] sm:$0xf0]  ;;  %v9351_v46 = vor.u32 %v12414_v37, %v9350_v36  ;;  %6395 = vmatmul.bf16.vlgmr.msrb.gmra.mxu3 %v13575_v42  ;;  %6401 = vmatpush.bf16.msra.mxu0 %v9095_v43 }
  0x4a   :  { %v9078_v47 = vld [vmem:[%s19646_s1 + $0x8a0] sm:$0xf]  ;;  %v12346_v48 = vld [vmem:[%s19646_s1 + $0x8ac] sm:$0xf0]  ;;  %v9479_v50 = vor.u32 %v12446_v40, %v9478_v39 }
  0x4b   :  { %v9206_v49 = vld [vmem:[%s19646_s1 + $0x9a0] sm:$0xf]  ;;  %v12378_v51 = vld [vmem:[%s19646_s1 + $0x9ac] sm:$0xf0]  ;;  %v9079_v56 = vor.u32 %v12346_v48, %v9078_v47  ;;  %6414 = vmatpush.bf16.msra.mxu1 %v9223_v45  ;;  %6427 = vmatpush.bf16.msra.mxu2 %v9351_v46 }
  0x4c   :  { %v9334_v52 = vld [vmem:[%s19646_s1 + $0xaa0] sm:$0xf]  ;;  %v12410_v53 = vld [vmem:[%s19646_s1 + $0xaac] sm:$0xf0]  ;;  %v9207_v57 = vor.u32 %v12378_v51, %v9206_v49  ;;  %6440 = vmatpush.bf16.msra.mxu3 %v9479_v50 }
  0x4d   :  { %v9462_v54 = vld [vmem:[%s19646_s1 + $0xba0] sm:$0xf]  ;;  %v12442_v55 = vld [vmem:[%s19646_s1 + $0xbac] sm:$0xf0]  ;;  %v9335_v58 = vor.u32 %v12410_v53, %v9334_v52  ;;  %6402 = vmatpush.bf16.msra.mxu0 %v9079_v56 }
  0x4e   :  { %v9062_v59 = vld [vmem:[%s19646_s1 + $0x880] sm:$0xf]  ;;  %v12342_v60 = vld [vmem:[%s19646_s1 + $0x88c] sm:$0xf0]  ;;  %v9463_v62 = vor.u32 %v12442_v55, %v9462_v54 }
  0x4f   :  { %v9190_v61 = vld [vmem:[%s19646_s1 + $0x980] sm:$0xf]  ;;  %v12374_v63 = vld [vmem:[%s19646_s1 + $0x98c] sm:$0xf0]  ;;  %v9063_v5 = vor.u32 %v12342_v60, %v9062_v59  ;;  %6415 = vmatpush.bf16.msra.mxu1 %v9207_v57  ;;  %6428 = vmatpush.bf16.msra.mxu2 %v9335_v58 }
  0x50   :  { %v9318_v0 = vld [vmem:[%s19646_s1 + $0xa80] sm:$0xf]  ;;  %v12406_v1 = vld [vmem:[%s19646_s1 + $0xa8c] sm:$0xf0]  ;;  %v9191_v7 = vor.u32 %v12374_v63, %v9190_v61  ;;  %6441 = vmatpush.bf16.msra.mxu3 %v9463_v62  ;;  %v19_v61 = vld [vmem:[%s19647_s0 + $0x28] sm:$0xff] }
  0x51   :  { %v9446_v2 = vld [vmem:[%s19646_s1 + $0xb80] sm:$0xf]  ;;  %v12438_v3 = vld [vmem:[%s19646_s1 + $0xb8c] sm:$0xf0]  ;;  %v9319_v8 = vor.u32 %v12406_v1, %v9318_v0  ;;  %6403 = vmatpush.bf16.msra.mxu0 %v9063_v5 }
  0x52   :  { %v9046_v9 = vld [vmem:[%s19646_s1 + $0x860] sm:$0xf]  ;;  %v12338_v10 = vld [vmem:[%s19646_s1 + $0x86c] sm:$0xf0]  ;;  %v9447_v12 = vor.u32 %v12438_v3, %v9446_v2 }
  0x53   :  { %v9174_v11 = vld [vmem:[%s19646_s1 + $0x960] sm:$0xf]  ;;  %v12370_v13 = vld [vmem:[%s19646_s1 + $0x96c] sm:$0xf0]  ;;  %v9047_v18 = vor.u32 %v12338_v10, %v9046_v9  ;;  %6416 = vmatpush.bf16.msra.mxu1 %v9191_v7  ;;  %6429 = vmatpush.bf16.msra.mxu2 %v9319_v8 }
  0x54   :  { %v9302_v14 = vld [vmem:[%s19646_s1 + $0xa60] sm:$0xf]  ;;  %v12402_v15 = vld [vmem:[%s19646_s1 + $0xa6c] sm:$0xf0]  ;;  %v9175_v19 = vor.u32 %v12370_v13, %v9174_v11  ;;  %6442 = vmatpush.bf16.msra.mxu3 %v9447_v12  ;;  %v1090_v12 = vunpack.c.l.b16 %v19_v61 }
  0x55   :  { %v9430_v16 = vld [vmem:[%s19646_s1 + $0xb60] sm:$0xf]  ;;  %v12434_v17 = vld [vmem:[%s19646_s1 + $0xb6c] sm:$0xf0]  ;;  %v9303_v22 = vor.u32 %v12402_v15, %v9302_v14  ;;  %6404 = vmatpush.bf16.msra.mxu0 %v9047_v18 }
  0x56   :  { %v9030_v23 = vld [vmem:[%s19646_s1 + $0x840] sm:$0xf]  ;;  %v12334_v24 = vld [vmem:[%s19646_s1 + $0x84c] sm:$0xf0]  ;;  %v9431_v26 = vor.u32 %v12434_v17, %v9430_v16  ;;  %v1091_v16 = vunpack.c.h.b16 %v19_v61 }
  0x57   :  { %v9158_v25 = vld [vmem:[%s19646_s1 + $0x940] sm:$0xf]  ;;  %v12366_v27 = vld [vmem:[%s19646_s1 + $0x94c] sm:$0xf0]  ;;  %v9031_v32 = vor.u32 %v12334_v24, %v9030_v23  ;;  %6417 = vmatpush.bf16.msra.mxu1 %v9175_v19  ;;  %6430 = vmatpush.bf16.msra.mxu2 %v9303_v22 }
  0x58   :  { %v9286_v28 = vld [vmem:[%s19646_s1 + $0xa40] sm:$0xf]  ;;  %v12398_v29 = vld [vmem:[%s19646_s1 + $0xa4c] sm:$0xf0]  ;;  %v9159_v33 = vor.u32 %v12366_v27, %v9158_v25  ;;  %6443 = vmatpush.bf16.msra.mxu3 %v9431_v26 }
  0x59   :  { %v9414_v30 = vld [vmem:[%s19646_s1 + $0xb40] sm:$0xf]  ;;  %v12430_v31 = vld [vmem:[%s19646_s1 + $0xb4c] sm:$0xf0]  ;;  %v9287_v34 = vor.u32 %v12398_v29, %v9286_v28  ;;  %6405 = vmatpush.bf16.msra.mxu0 %v9031_v32  ;;  %v13777_v29 = vpack.c.b16 %v1090_v12, %v1090_v12 }
  0x5a   :  { %v9014_v35 = vld [vmem:[%s19646_s1 + $0x820] sm:$0xf]  ;;  %v12330_v36 = vld [vmem:[%s19646_s1 + $0x82c] sm:$0xf0]  ;;  %v9415_v39 = vor.u32 %v12430_v31, %v9414_v30 }
  0x5b   :  { %v9142_v37 = vld [vmem:[%s19646_s1 + $0x920] sm:$0xf]  ;;  %v12362_v40 = vld [vmem:[%s19646_s1 + $0x92c] sm:$0xf0]  ;;  %v9015_v49 = vor.u32 %v12330_v36, %v9014_v35  ;;  %6418 = vmatpush.bf16.msra.mxu1 %v9159_v33  ;;  %6431 = vmatpush.bf16.msra.mxu2 %v9287_v34  ;;  %v13787_v33 = vpack.c.b16 %v1091_v16, %v1091_v16 }
  0x5c   :  { %v9270_v43 = vld [vmem:[%s19646_s1 + $0xa20] sm:$0xf]  ;;  %v12394_v45 = vld [vmem:[%s19646_s1 + $0xa2c] sm:$0xf0]  ;;  %v9143_v53 = vor.u32 %v12362_v40, %v9142_v37  ;;  %6444 = vmatpush.bf16.msra.mxu3 %v9415_v39 }
  0x5d   :  { %v9398_v46 = vld [vmem:[%s19646_s1 + $0xb20] sm:$0xf]  ;;  %v12426_v47 = vld [vmem:[%s19646_s1 + $0xb2c] sm:$0xf0]  ;;  %v9271_v54 = vor.u32 %v12394_v45, %v9270_v43  ;;  %6406 = vmatpush.bf16.msra.mxu0 %v9015_v49 }
  0x5e   :  { %v8998_v48 = vld [vmem:[%s19646_s1 + $0x800] sm:$0xf]  ;;  %v12326_v50 = vld [vmem:[%s19646_s1 + $0x80c] sm:$0xf0]  ;;  %v9399_v58 = vor.u32 %v12426_v47, %v9398_v46 }
  0x5f   :  { %v9126_v51 = vld [vmem:[%s19646_s1 + $0x900] sm:$0xf]  ;;  %v12358_v52 = vld [vmem:[%s19646_s1 + $0x90c] sm:$0xf0]  ;;  %v8999_v1 = vor.u32 %v12326_v50, %v8998_v48  ;;  %6419 = vmatpush.bf16.msra.mxu1 %v9143_v53  ;;  %6432 = vmatpush.bf16.msra.mxu2 %v9271_v54 }
  0x60   :  { %v9254_v55 = vld [vmem:[%s19646_s1 + $0xa00] sm:$0xf]  ;;  %v12390_v56 = vld [vmem:[%s19646_s1 + $0xa0c] sm:$0xf0]  ;;  %v9127_v8 = vor.u32 %v12358_v52, %v9126_v51  ;;  %6445 = vmatpush.bf16.msra.mxu3 %v9399_v58 }
  0x61   :  { %v18_v57 = vld [vmem:[%s19647_s0 + $0x20] sm:$0xff]  ;;  %v12422_v60 = vld [vmem:[%s19646_s1 + $0xb0c] sm:$0xf0]  ;;  %v9255_v9 = vor.u32 %v12390_v56, %v9254_v55  ;;  %6407 = vmatpush.bf16.msra.mxu0 %v8999_v1 }
  0x62   :  { %v9382_v59 = vld [vmem:[%s19646_s1 + $0xb00] sm:$0xf]  ;;  %v12482_v63 = vld [vmem:[%s19646_s1 + $0xcec] sm:$0xf0]  ;;  %v1088_v7 = vunpack.c.l.b16 %v18_v57  ;;  %v1089_v13 = vunpack.c.h.b16 %v18_v57 }
  0x63   :  { %v9622_v62 = vld [vmem:[%s19646_s1 + $0xce0] sm:$0xf]  ;;  %v12514_v2 = vld [vmem:[%s19646_s1 + $0xdec] sm:$0xf0]  ;;  %v9383_v14 = vor.u32 %v12422_v60, %v9382_v59  ;;  %6420 = vmatpush.bf16.msra.mxu1 %v9127_v8  ;;  %6433 = vmatpush.bf16.msra.mxu2 %v9255_v9 }
  0x64   :  { %v9750_v0 = vld [vmem:[%s19646_s1 + $0xde0] sm:$0xf]  ;;  %v12546_v5 = vld [vmem:[%s19646_s1 + $0xeec] sm:$0xf0]  ;;  %v9623_v15 = vor.u32 %v12482_v63, %v9622_v62  ;;  %v13766_v25 = vpack.c.b16 %v1088_v7, %v1088_v7  ;;  %v13779_v30 = vpack.c.b16 %v1089_v13, %v1089_v13 }
  0x65   :  { %v9878_v3 = vld [vmem:[%s19646_s1 + $0xee0] sm:$0xf]  ;;  %v12578_v11 = vld [vmem:[%s19646_s1 + $0xfec] sm:$0xf0]  ;;  %v9751_v17 = vor.u32 %v12514_v2, %v9750_v0  ;;  %6446 = vmatpush.bf16.msra.mxu3 %v9383_v14 }
  0x66   :  { %v10006_v10 = vld [vmem:[%s19646_s1 + $0xfe0] sm:$0xf]  ;;  %v9879_v18 = vor.u32 %v12546_v5, %v9878_v3  ;;  %v12478_v22 = vld [vmem:[%s19646_s1 + $0xccc] sm:$0xf0]  ;;  %6452 = vmatpush.bf16.msrb.mxu0 %v9623_v15  ;;  %6434 = vmatmul.bf16.vlgmr.msra.gmra.mxu2 %v13777_v29 }
  0x67   :  { %v9606_v19 = vld [vmem:[%s19646_s1 + $0xcc0] sm:$0xf]  ;;  %v10007_v24 = vor.u32 %v12578_v11, %v10006_v10  ;;  %v12510_v26 = vld [vmem:[%s19646_s1 + $0xdcc] sm:$0xf0]  ;;  %6465 = vmatpush.bf16.msrb.mxu1 %v9751_v17  ;;  %6408 = vmatmul.bf16.vlgmr.msra.gmra.mxu0 %v13766_v25 }
  0x68   :  { %v9734_v23 = vld [vmem:[%s19646_s1 + $0xdc0] sm:$0xf]  ;;  %v12542_v28 = vld [vmem:[%s19646_s1 + $0xecc] sm:$0xf0]  ;;  %v9607_v34 = vor.u32 %v12478_v22, %v9606_v19  ;;  %6478 = vmatpush.bf16.msrb.mxu2 %v9879_v18  ;;  %6421 = vmatmul.bf16.vlgmr.msra.gmra.mxu1 %v13779_v30 }
  0x69   :  { %v9862_v27 = vld [vmem:[%s19646_s1 + $0xec0] sm:$0xf]  ;;  %v12574_v32 = vld [vmem:[%s19646_s1 + $0xfcc] sm:$0xf0]  ;;  %v9735_v35 = vor.u32 %v12510_v26, %v9734_v23  ;;  %6491 = vmatpush.bf16.msrb.mxu3 %v10007_v24 }
  0x6a   :  { %v9990_v31 = vld [vmem:[%s19646_s1 + $0xfc0] sm:$0xf]  ;;  %v9863_v36 = vor.u32 %v12542_v28, %v9862_v27  ;;  %v12474_v39 = vld [vmem:[%s19646_s1 + $0xcac] sm:$0xf0]  ;;  %6447 = vmatmul.bf16.vlgmr.msra.gmra.mxu3 %v13787_v33  ;;  %6453 = vmatpush.bf16.msrb.mxu0 %v9607_v34 }
  0x6b   :  { %v9590_v37 = vld [vmem:[%s19646_s1 + $0xca0] sm:$0xf]  ;;  %v9991_v43 = vor.u32 %v12574_v32, %v9990_v31  ;;  %v12506_v45 = vld [vmem:[%s19646_s1 + $0xdac] sm:$0xf0]  ;;  %6466 = vmatpush.bf16.msrb.mxu1 %v9735_v35 }
  0x6c   :  { %v9718_v40 = vld [vmem:[%s19646_s1 + $0xda0] sm:$0xf]  ;;  %v12538_v47 = vld [vmem:[%s19646_s1 + $0xeac] sm:$0xf0]  ;;  %v9591_v50 = vor.u32 %v12474_v39, %v9590_v37  ;;  %6479 = vmatpush.bf16.msrb.mxu2 %v9863_v36 }
  0x6d   :  { %v9846_v46 = vld [vmem:[%s19646_s1 + $0xea0] sm:$0xf]  ;;  %v12570_v49 = vld [vmem:[%s19646_s1 + $0xfac] sm:$0xf0]  ;;  %v9719_v51 = vor.u32 %v12506_v45, %v9718_v40  ;;  %6492 = vmatpush.bf16.msrb.mxu3 %v9991_v43 }
  0x6e   :  { %v9974_v48 = vld [vmem:[%s19646_s1 + $0xfa0] sm:$0xf]  ;;  %v9847_v52 = vor.u32 %v12538_v47, %v9846_v46  ;;  %v12470_v54 = vld [vmem:[%s19646_s1 + $0xc8c] sm:$0xf0]  ;;  %6454 = vmatpush.bf16.msrb.mxu0 %v9591_v50 }
  0x6f   :  { %v9574_v53 = vld [vmem:[%s19646_s1 + $0xc80] sm:$0xf]  ;;  %v9975_v56 = vor.u32 %v12570_v49, %v9974_v48  ;;  %v12502_v57 = vld [vmem:[%s19646_s1 + $0xd8c] sm:$0xf0]  ;;  %6467 = vmatpush.bf16.msrb.mxu1 %v9719_v51 }
  0x70   :  { %v9702_v55 = vld [vmem:[%s19646_s1 + $0xd80] sm:$0xf]  ;;  %v12534_v59 = vld [vmem:[%s19646_s1 + $0xe8c] sm:$0xf0]  ;;  %v9575_v62 = vor.u32 %v12470_v54, %v9574_v53  ;;  %6480 = vmatpush.bf16.msrb.mxu2 %v9847_v52 }
  0x71   :  { %v9830_v58 = vld [vmem:[%s19646_s1 + $0xe80] sm:$0xf]  ;;  %v12566_v61 = vld [vmem:[%s19646_s1 + $0xf8c] sm:$0xf0]  ;;  %v9703_v63 = vor.u32 %v12502_v57, %v9702_v55  ;;  %6493 = vmatpush.bf16.msrb.mxu3 %v9975_v56 }
  0x72   :  { %v9958_v60 = vld [vmem:[%s19646_s1 + $0xf80] sm:$0xf]  ;;  %v9831_v0 = vor.u32 %v12534_v59, %v9830_v58  ;;  %v12466_v2 = vld [vmem:[%s19646_s1 + $0xc6c] sm:$0xf0]  ;;  %6455 = vmatpush.bf16.msrb.mxu0 %v9575_v62  ;;  %v21_v59 = vld [vmem:[%s19647_s0 + $0x38] sm:$0xff] }
  0x73   :  { %v9558_v1 = vld [vmem:[%s19646_s1 + $0xc60] sm:$0xf]  ;;  %v9959_v5 = vor.u32 %v12566_v61, %v9958_v60  ;;  %v12498_v7 = vld [vmem:[%s19646_s1 + $0xd6c] sm:$0xf0]  ;;  %6468 = vmatpush.bf16.msrb.mxu1 %v9703_v63 }
  0x74   :  { %v9686_v3 = vld [vmem:[%s19646_s1 + $0xd60] sm:$0xf]  ;;  %v12530_v9 = vld [vmem:[%s19646_s1 + $0xe6c] sm:$0xf0]  ;;  %v9559_v12 = vor.u32 %v12466_v2, %v9558_v1  ;;  %6481 = vmatpush.bf16.msrb.mxu2 %v9831_v0 }
  0x75   :  { %v9814_v8 = vld [vmem:[%s19646_s1 + $0xe60] sm:$0xf]  ;;  %v12562_v11 = vld [vmem:[%s19646_s1 + $0xf6c] sm:$0xf0]  ;;  %v9687_v13 = vor.u32 %v12498_v7, %v9686_v3  ;;  %6494 = vmatpush.bf16.msrb.mxu3 %v9959_v5 }
  0x76   :  { %v9942_v10 = vld [vmem:[%s19646_s1 + $0xf60] sm:$0xf]  ;;  %v9815_v14 = vor.u32 %v12530_v9, %v9814_v8  ;;  %v12462_v16 = vld [vmem:[%s19646_s1 + $0xc4c] sm:$0xf0]  ;;  %6456 = vmatpush.bf16.msrb.mxu0 %v9559_v12 }
  0x77   :  { %v9542_v15 = vld [vmem:[%s19646_s1 + $0xc40] sm:$0xf]  ;;  %v9943_v18 = vor.u32 %v12562_v11, %v9942_v10  ;;  %v12494_v19 = vld [vmem:[%s19646_s1 + $0xd4c] sm:$0xf0]  ;;  %6469 = vmatpush.bf16.msrb.mxu1 %v9687_v13  ;;  %v1094_v10 = vunpack.c.l.b16 %v21_v59 }
  0x78   :  { %v9670_v17 = vld [vmem:[%s19646_s1 + $0xd40] sm:$0xf]  ;;  %v12526_v23 = vld [vmem:[%s19646_s1 + $0xe4c] sm:$0xf0]  ;;  %v9543_v27 = vor.u32 %v12462_v16, %v9542_v15  ;;  %6482 = vmatpush.bf16.msrb.mxu2 %v9815_v14  ;;  %v1095_v14 = vunpack.c.h.b16 %v21_v59 }
  0x79   :  { %v9798_v22 = vld [vmem:[%s19646_s1 + $0xe40] sm:$0xf]  ;;  %v12558_v26 = vld [vmem:[%s19646_s1 + $0xf4c] sm:$0xf0]  ;;  %v9671_v28 = vor.u32 %v12494_v19, %v9670_v17  ;;  %6495 = vmatpush.bf16.msrb.mxu3 %v9943_v18 }
  0x7a   :  { %v9926_v24 = vld [vmem:[%s19646_s1 + $0xf40] sm:$0xf]  ;;  %v9799_v31 = vor.u32 %v12526_v23, %v9798_v22  ;;  %v12458_v34 = vld [vmem:[%s19646_s1 + $0xc2c] sm:$0xf0]  ;;  %6457 = vmatpush.bf16.msrb.mxu0 %v9543_v27 }
  0x7b   :  { %v9526_v32 = vld [vmem:[%s19646_s1 + $0xc20] sm:$0xf]  ;;  %v9927_v36 = vor.u32 %v12558_v26, %v9926_v24  ;;  %v12490_v37 = vld [vmem:[%s19646_s1 + $0xd2c] sm:$0xf0]  ;;  %6470 = vmatpush.bf16.msrb.mxu1 %v9671_v28  ;;  %v13987_v28 = vpack.c.b16 %v1094_v10, %v1094_v10 }
  0x7c   :  { %v9654_v35 = vld [vmem:[%s19646_s1 + $0xd20] sm:$0xf]  ;;  %v12522_v40 = vld [vmem:[%s19646_s1 + $0xe2c] sm:$0xf0]  ;;  %v9527_v47 = vor.u32 %v12458_v34, %v9526_v32  ;;  %6483 = vmatpush.bf16.msrb.mxu2 %v9799_v31 }
  0x7d   :  { %v9782_v39 = vld [vmem:[%s19646_s1 + $0xe20] sm:$0xf]  ;;  %v12554_v45 = vld [vmem:[%s19646_s1 + $0xf2c] sm:$0xf0]  ;;  %v9655_v51 = vor.u32 %v12490_v37, %v9654_v35  ;;  %6496 = vmatpush.bf16.msrb.mxu3 %v9927_v36  ;;  %v13997_v35 = vpack.c.b16 %v1095_v14, %v1095_v14 }
  0x7e   :  { %v9910_v43 = vld [vmem:[%s19646_s1 + $0xf20] sm:$0xf]  ;;  %v12454_v48 = vld [vmem:[%s19646_s1 + $0xc0c] sm:$0xf0]  ;;  %v9783_v52 = vor.u32 %v12522_v40, %v9782_v39  ;;  %6458 = vmatpush.bf16.msrb.mxu0 %v9527_v47 }
  0x7f   :  { %v9510_v46 = vld [vmem:[%s19646_s1 + $0xc00] sm:$0xf]  ;;  %v12486_v50 = vld [vmem:[%s19646_s1 + $0xd0c] sm:$0xf0]  ;;  %v9911_v56 = vor.u32 %v12554_v45, %v9910_v43  ;;  %6471 = vmatpush.bf16.msrb.mxu1 %v9655_v51 }
  0x80   :  { %v9638_v49 = vld [vmem:[%s19646_s1 + $0xd00] sm:$0xf]  ;;  %v12518_v54 = vld [vmem:[%s19646_s1 + $0xe0c] sm:$0xf0]  ;;  %v9511_v63 = vor.u32 %v12454_v48, %v9510_v46  ;;  %6484 = vmatpush.bf16.msrb.mxu2 %v9783_v52 }
  0x81   :  { %v9766_v53 = vld [vmem:[%s19646_s1 + $0xe00] sm:$0xf]  ;;  %v20_v55 = vld [vmem:[%s19647_s0 + $0x30] sm:$0xff]  ;;  %v9639_v5 = vor.u32 %v12486_v50, %v9638_v49  ;;  %6497 = vmatpush.bf16.msrb.mxu3 %v9911_v56 }
  0x82   :  { %v9894_v57 = vld [vmem:[%s19646_s1 + $0xf00] sm:$0xf]  ;;  %v12550_v58 = vld [vmem:[%s19646_s1 + $0xf0c] sm:$0xf0]  ;;  %v1092_v3 = vunpack.c.l.b16 %v20_v55  ;;  %v9767_v7 = vor.u32 %v12518_v54, %v9766_v53  ;;  %v1093_v11 = vunpack.c.h.b16 %v20_v55  ;;  %6459 = vmatpush.bf16.msrb.mxu0 %v9511_v63 }
  0x83   :  { %v10134_v60 = vld [vmem:[%s19646_s1 + $0x10e0] sm:$0xf]  ;;  %v12610_v61 = vld [vmem:[%s19646_s1 + $0x10ec] sm:$0xf0]  ;;  %v9895_v12 = vor.u32 %v12550_v58, %v9894_v57  ;;  %6472 = vmatpush.bf16.msrb.mxu1 %v9639_v5 }
  0x84   :  { %v10262_v62 = vld [vmem:[%s19646_s1 + $0x11e0] sm:$0xf]  ;;  %v12642_v0 = vld [vmem:[%s19646_s1 + $0x11ec] sm:$0xf0]  ;;  %v10135_v13 = vor.u32 %v12610_v61, %v10134_v60  ;;  %v13976_v23 = vpack.c.b16 %v1092_v3, %v1092_v3  ;;  %6485 = vmatpush.bf16.msrb.mxu2 %v9767_v7  ;;  %v13989_v31 = vpack.c.b16 %v1093_v11, %v1093_v11 }
  0x85   :  { %v10390_v1 = vld [vmem:[%s19646_s1 + $0x12e0] sm:$0xf]  ;;  %v12674_v2 = vld [vmem:[%s19646_s1 + $0x12ec] sm:$0xf0]  ;;  %v10263_v15 = vor.u32 %v12642_v0, %v10262_v62  ;;  %6498 = vmatpush.bf16.msrb.mxu3 %v9895_v12 }
  0x86   :  { %v10518_v8 = vld [vmem:[%s19646_s1 + $0x13e0] sm:$0xf]  ;;  %v12706_v9 = vld [vmem:[%s19646_s1 + $0x13ec] sm:$0xf0]  ;;  %v10391_v16 = vor.u32 %v12674_v2, %v10390_v1  ;;  %6504 = vmatpush.bf16.msra.mxu0 %v10135_v13  ;;  %6473 = vmatmul.bf16.vlgmr.msrb.gmra.mxu1 %v13989_v31 }
  0x87   :  { %v10118_v17 = vld [vmem:[%s19646_s1 + $0x10c0] sm:$0xf]  ;;  %v12606_v18 = vld [vmem:[%s19646_s1 + $0x10cc] sm:$0xf0]  ;;  %v10519_v22 = vor.u32 %v12706_v9, %v10518_v8  ;;  %6517 = vmatpush.bf16.msra.mxu1 %v10263_v15  ;;  %6460 = vmatmul.bf16.vlgmr.msrb.gmra.mxu0 %v13976_v23 }
  0x88   :  { %v10246_v19 = vld [vmem:[%s19646_s1 + $0x11c0] sm:$0xf]  ;;  %v12638_v24 = vld [vmem:[%s19646_s1 + $0x11cc] sm:$0xf0]  ;;  %v10119_v36 = vor.u32 %v12606_v18, %v10118_v17  ;;  %6530 = vmatpush.bf16.msra.mxu2 %v10391_v16  ;;  %6499 = vmatmul.bf16.vlgmr.msrb.gmra.mxu3 %v13997_v35 }
  0x89   :  { %v10374_v26 = vld [vmem:[%s19646_s1 + $0x12c0] sm:$0xf]  ;;  %v12670_v27 = vld [vmem:[%s19646_s1 + $0x12cc] sm:$0xf0]  ;;  %v10247_v37 = vor.u32 %v12638_v24, %v10246_v19  ;;  %6543 = vmatpush.bf16.msra.mxu3 %v10519_v22  ;;  %6486 = vmatmul.bf16.vlgmr.msrb.gmra.mxu2 %v13987_v28 }
  0x8a   :  { %v10502_v32 = vld [vmem:[%s19646_s1 + $0x13c0] sm:$0xf]  ;;  %v12702_v34 = vld [vmem:[%s19646_s1 + $0x13cc] sm:$0xf0]  ;;  %v10375_v39 = vor.u32 %v12670_v27, %v10374_v26  ;;  %6505 = vmatpush.bf16.msra.mxu0 %v10119_v36 }
  0x8b   :  { %v10102_v40 = vld [vmem:[%s19646_s1 + $0x10a0] sm:$0xf]  ;;  %v12602_v43 = vld [vmem:[%s19646_s1 + $0x10ac] sm:$0xf0]  ;;  %v10503_v46 = vor.u32 %v12702_v34, %v10502_v32  ;;  %6518 = vmatpush.bf16.msra.mxu1 %v10247_v37 }
  0x8c   :  { %v10230_v45 = vld [vmem:[%s19646_s1 + $0x11a0] sm:$0xf]  ;;  %v12634_v47 = vld [vmem:[%s19646_s1 + $0x11ac] sm:$0xf0]  ;;  %v10103_v52 = vor.u32 %v12602_v43, %v10102_v40  ;;  %6531 = vmatpush.bf16.msra.mxu2 %v10375_v39 }
  0x8d   :  { %v10358_v48 = vld [vmem:[%s19646_s1 + $0x12a0] sm:$0xf]  ;;  %v12666_v49 = vld [vmem:[%s19646_s1 + $0x12ac] sm:$0xf0]  ;;  %v10231_v53 = vor.u32 %v12634_v47, %v10230_v45  ;;  %6544 = vmatpush.bf16.msra.mxu3 %v10503_v46 }
  0x8e   :  { %v10486_v50 = vld [vmem:[%s19646_s1 + $0x13a0] sm:$0xf]  ;;  %v12698_v51 = vld [vmem:[%s19646_s1 + $0x13ac] sm:$0xf0]  ;;  %v10359_v54 = vor.u32 %v12666_v49, %v10358_v48  ;;  %6506 = vmatpush.bf16.msra.mxu0 %v10103_v52 }
  0x8f   :  { %v10086_v55 = vld [vmem:[%s19646_s1 + $0x1080] sm:$0xf]  ;;  %v12598_v56 = vld [vmem:[%s19646_s1 + $0x108c] sm:$0xf0]  ;;  %v10487_v58 = vor.u32 %v12698_v51, %v10486_v50  ;;  %6519 = vmatpush.bf16.msra.mxu1 %v10231_v53 }
  0x90   :  { %v10214_v57 = vld [vmem:[%s19646_s1 + $0x1180] sm:$0xf]  ;;  %v12630_v59 = vld [vmem:[%s19646_s1 + $0x118c] sm:$0xf0]  ;;  %v10087_v0 = vor.u32 %v12598_v56, %v10086_v55  ;;  %6532 = vmatpush.bf16.msra.mxu2 %v10359_v54 }
  0x91   :  { %v10342_v60 = vld [vmem:[%s19646_s1 + $0x1280] sm:$0xf]  ;;  %v12662_v61 = vld [vmem:[%s19646_s1 + $0x128c] sm:$0xf0]  ;;  %v10215_v1 = vor.u32 %v12630_v59, %v10214_v57  ;;  %6545 = vmatpush.bf16.msra.mxu3 %v10487_v58 }
  0x92   :  { %v10470_v62 = vld [vmem:[%s19646_s1 + $0x1380] sm:$0xf]  ;;  %v12694_v63 = vld [vmem:[%s19646_s1 + $0x138c] sm:$0xf0]  ;;  %v10343_v2 = vor.u32 %v12662_v61, %v10342_v60  ;;  %6507 = vmatpush.bf16.msra.mxu0 %v10087_v0 }
  0x93   :  { %v10070_v3 = vld [vmem:[%s19646_s1 + $0x1060] sm:$0xf]  ;;  %v12594_v5 = vld [vmem:[%s19646_s1 + $0x106c] sm:$0xf0]  ;;  %v10471_v8 = vor.u32 %v12694_v63, %v10470_v62  ;;  %6520 = vmatpush.bf16.msra.mxu1 %v10215_v1  ;;  %v23_v1 = vld [vmem:[%s19647_s0 + $0x48] sm:$0xff] }
  0x94   :  { %v10198_v7 = vld [vmem:[%s19646_s1 + $0x1160] sm:$0xf]  ;;  %v12626_v9 = vld [vmem:[%s19646_s1 + $0x116c] sm:$0xf0]  ;;  %v10071_v14 = vor.u32 %v12594_v5, %v10070_v3  ;;  %6533 = vmatpush.bf16.msra.mxu2 %v10343_v2 }
  0x95   :  { %v10326_v10 = vld [vmem:[%s19646_s1 + $0x1260] sm:$0xf]  ;;  %v12658_v11 = vld [vmem:[%s19646_s1 + $0x126c] sm:$0xf0]  ;;  %v10199_v15 = vor.u32 %v12626_v9, %v10198_v7  ;;  %6546 = vmatpush.bf16.msra.mxu3 %v10471_v8 }
  0x96   :  { %v10454_v12 = vld [vmem:[%s19646_s1 + $0x1360] sm:$0xf]  ;;  %v12690_v13 = vld [vmem:[%s19646_s1 + $0x136c] sm:$0xf0]  ;;  %v10327_v16 = vor.u32 %v12658_v11, %v10326_v10  ;;  %6508 = vmatpush.bf16.msra.mxu0 %v10071_v14 }
  0x97   :  { %v10054_v17 = vld [vmem:[%s19646_s1 + $0x1040] sm:$0xf]  ;;  %v12590_v18 = vld [vmem:[%s19646_s1 + $0x104c] sm:$0xf0]  ;;  %v10455_v22 = vor.u32 %v12690_v13, %v10454_v12  ;;  %6521 = vmatpush.bf16.msra.mxu1 %v10199_v15 }
  0x98   :  { %v10182_v19 = vld [vmem:[%s19646_s1 + $0x1140] sm:$0xf]  ;;  %v12622_v24 = vld [vmem:[%s19646_s1 + $0x114c] sm:$0xf0]  ;;  %v10055_v36 = vor.u32 %v12590_v18, %v10054_v17  ;;  %6534 = vmatpush.bf16.msra.mxu2 %v10327_v16  ;;  %v1098_v16 = vunpack.c.l.b16 %v23_v1 }
  0x99   :  { %v10310_v26 = vld [vmem:[%s19646_s1 + $0x1240] sm:$0xf]  ;;  %v12654_v27 = vld [vmem:[%s19646_s1 + $0x124c] sm:$0xf0]  ;;  %v10183_v37 = vor.u32 %v12622_v24, %v10182_v19  ;;  %6547 = vmatpush.bf16.msra.mxu3 %v10455_v22  ;;  %v1099_v22 = vunpack.c.h.b16 %v23_v1 }
  0x9a   :  { %v10438_v32 = vld [vmem:[%s19646_s1 + $0x1340] sm:$0xf]  ;;  %v12686_v34 = vld [vmem:[%s19646_s1 + $0x134c] sm:$0xf0]  ;;  %v10311_v39 = vor.u32 %v12654_v27, %v10310_v26  ;;  %6509 = vmatpush.bf16.msra.mxu0 %v10055_v36 }
  0x9b   :  { %v10038_v40 = vld [vmem:[%s19646_s1 + $0x1020] sm:$0xf]  ;;  %v12586_v43 = vld [vmem:[%s19646_s1 + $0x102c] sm:$0xf0]  ;;  %v10439_v46 = vor.u32 %v12686_v34, %v10438_v32  ;;  %6522 = vmatpush.bf16.msra.mxu1 %v10183_v37 }
  0x9c   :  { %v10166_v45 = vld [vmem:[%s19646_s1 + $0x1120] sm:$0xf]  ;;  %v12618_v47 = vld [vmem:[%s19646_s1 + $0x112c] sm:$0xf0]  ;;  %v10039_v53 = vor.u32 %v12586_v43, %v10038_v40  ;;  %6535 = vmatpush.bf16.msra.mxu2 %v10311_v39 }
  0x9d   :  { %v10294_v48 = vld [vmem:[%s19646_s1 + $0x1220] sm:$0xf]  ;;  %v12650_v49 = vld [vmem:[%s19646_s1 + $0x122c] sm:$0xf0]  ;;  %v10167_v57 = vor.u32 %v12618_v47, %v10166_v45  ;;  %6548 = vmatpush.bf16.msra.mxu3 %v10439_v46  ;;  %v14197_v45 = vpack.c.b16 %v1098_v16, %v1098_v16 }
  0x9e   :  { %v10422_v50 = vld [vmem:[%s19646_s1 + $0x1320] sm:$0xf]  ;;  %v12682_v51 = vld [vmem:[%s19646_s1 + $0x132c] sm:$0xf0]  ;;  %v10295_v58 = vor.u32 %v12650_v49, %v10294_v48  ;;  %6510 = vmatpush.bf16.msra.mxu0 %v10039_v53  ;;  %v14207_v49 = vpack.c.b16 %v1099_v22, %v1099_v22 }
  0x9f   :  { %v10022_v52 = vld [vmem:[%s19646_s1 + $0x1000] sm:$0xf]  ;;  %v12582_v54 = vld [vmem:[%s19646_s1 + $0x100c] sm:$0xf0]  ;;  %v10423_v62 = vor.u32 %v12682_v51, %v10422_v50  ;;  %6523 = vmatpush.bf16.msra.mxu1 %v10167_v57 }
  0xa0   :  { %v10150_v55 = vld [vmem:[%s19646_s1 + $0x1100] sm:$0xf]  ;;  %v12614_v56 = vld [vmem:[%s19646_s1 + $0x110c] sm:$0xf0]  ;;  %v10023_v7 = vor.u32 %v12582_v54, %v10022_v52  ;;  %6536 = vmatpush.bf16.msra.mxu2 %v10295_v58 }
  0xa1   :  { %v10278_v59 = vld [vmem:[%s19646_s1 + $0x1200] sm:$0xf]  ;;  %v12646_v60 = vld [vmem:[%s19646_s1 + $0x120c] sm:$0xf0]  ;;  %v10151_v12 = vor.u32 %v12614_v56, %v10150_v55  ;;  %6549 = vmatpush.bf16.msra.mxu3 %v10423_v62 }
  0xa2   :  { %v22_v61 = vld [vmem:[%s19647_s0 + $0x40] sm:$0xff]  ;;  %v12678_v0 = vld [vmem:[%s19646_s1 + $0x130c] sm:$0xf0]  ;;  %v10279_v13 = vor.u32 %v12646_v60, %v10278_v59  ;;  %6511 = vmatpush.bf16.msra.mxu0 %v10023_v7 }
  0xa3   :  { %v10406_v63 = vld [vmem:[%s19646_s1 + $0x1300] sm:$0xf]  ;;  %v12738_v3 = vld [vmem:[%s19646_s1 + $0x14ec] sm:$0xf0]  ;;  %v1096_v11 = vunpack.c.l.b16 %v22_v61  ;;  %v1097_v17 = vunpack.c.h.b16 %v22_v61  ;;  %6524 = vmatpush.bf16.msra.mxu1 %v10151_v12 }
  0xa4   :  { %v10646_v2 = vld [vmem:[%s19646_s1 + $0x14e0] sm:$0xf]  ;;  %v12770_v8 = vld [vmem:[%s19646_s1 + $0x15ec] sm:$0xf0]  ;;  %v10407_v18 = vor.u32 %v12678_v0, %v10406_v63  ;;  %6537 = vmatpush.bf16.msra.mxu2 %v10279_v13 }
  0xa5   :  { %v10774_v5 = vld [vmem:[%s19646_s1 + $0x15e0] sm:$0xf]  ;;  %v12802_v10 = vld [vmem:[%s19646_s1 + $0x16ec] sm:$0xf0]  ;;  %v10647_v19 = vor.u32 %v12738_v3, %v10646_v2  ;;  %v14186_v37 = vpack.c.b16 %v1096_v11, %v1096_v11  ;;  %v14199_v46 = vpack.c.b16 %v1097_v17, %v1097_v17 }
  0xa6   :  { %v10902_v9 = vld [vmem:[%s19646_s1 + $0x16e0] sm:$0xf]  ;;  %v12834_v15 = vld [vmem:[%s19646_s1 + $0x17ec] sm:$0xf0]  ;;  %v10775_v24 = vor.u32 %v12770_v8, %v10774_v5  ;;  %6550 = vmatpush.bf16.msra.mxu3 %v10407_v18 }
  0xa7   :  { %v11030_v14 = vld [vmem:[%s19646_s1 + $0x17e0] sm:$0xf]  ;;  %v10903_v26 = vor.u32 %v12802_v10, %v10902_v9  ;;  %v12734_v32 = vld [vmem:[%s19646_s1 + $0x14cc] sm:$0xf0]  ;;  %6556 = vmatpush.bf16.msrb.mxu0 %v10647_v19  ;;  %6538 = vmatmul.bf16.vlgmr.msra.gmra.mxu2 %v14197_v45 }
  0xa8   :  { %v10630_v27 = vld [vmem:[%s19646_s1 + $0x14c0] sm:$0xf]  ;;  %v11031_v36 = vor.u32 %v12834_v15, %v11030_v14  ;;  %v12766_v39 = vld [vmem:[%s19646_s1 + $0x15cc] sm:$0xf0]  ;;  %6569 = vmatpush.bf16.msrb.mxu1 %v10775_v24  ;;  %6512 = vmatmul.bf16.vlgmr.msra.gmra.mxu0 %v14186_v37 }
  0xa9   :  { %v10758_v34 = vld [vmem:[%s19646_s1 + $0x15c0] sm:$0xf]  ;;  %v12798_v43 = vld [vmem:[%s19646_s1 + $0x16cc] sm:$0xf0]  ;;  %v10631_v50 = vor.u32 %v12734_v32, %v10630_v27  ;;  %6582 = vmatpush.bf16.msrb.mxu2 %v10903_v26  ;;  %6525 = vmatmul.bf16.vlgmr.msra.gmra.mxu1 %v14199_v46 }
  0xaa   :  { %v10886_v40 = vld [vmem:[%s19646_s1 + $0x16c0] sm:$0xf]  ;;  %v12830_v48 = vld [vmem:[%s19646_s1 + $0x17cc] sm:$0xf0]  ;;  %v10759_v51 = vor.u32 %v12766_v39, %v10758_v34  ;;  %6595 = vmatpush.bf16.msrb.mxu3 %v11031_v36 }
  0xab   :  { %v11014_v47 = vld [vmem:[%s19646_s1 + $0x17c0] sm:$0xf]  ;;  %v10887_v52 = vor.u32 %v12798_v43, %v10886_v40  ;;  %v12730_v54 = vld [vmem:[%s19646_s1 + $0x14ac] sm:$0xf0]  ;;  %6551 = vmatmul.bf16.vlgmr.msra.gmra.mxu3 %v14207_v49  ;;  %6557 = vmatpush.bf16.msrb.mxu0 %v10631_v50 }
  0xac   :  { %v10614_v53 = vld [vmem:[%s19646_s1 + $0x14a0] sm:$0xf]  ;;  %v11015_v56 = vor.u32 %v12830_v48, %v11014_v47  ;;  %v12762_v57 = vld [vmem:[%s19646_s1 + $0x15ac] sm:$0xf0]  ;;  %6570 = vmatpush.bf16.msrb.mxu1 %v10759_v51 }
  0xad   :  { %v10742_v55 = vld [vmem:[%s19646_s1 + $0x15a0] sm:$0xf]  ;;  %v12794_v59 = vld [vmem:[%s19646_s1 + $0x16ac] sm:$0xf0]  ;;  %v10615_v62 = vor.u32 %v12730_v54, %v10614_v53  ;;  %6583 = vmatpush.bf16.msrb.mxu2 %v10887_v52 }
  0xae   :  { %v10870_v58 = vld [vmem:[%s19646_s1 + $0x16a0] sm:$0xf]  ;;  %v12826_v61 = vld [vmem:[%s19646_s1 + $0x17ac] sm:$0xf0]  ;;  %v10743_v63 = vor.u32 %v12762_v57, %v10742_v55  ;;  %6596 = vmatpush.bf16.msrb.mxu3 %v11015_v56 }
  0xaf   :  { %v10998_v60 = vld [vmem:[%s19646_s1 + $0x17a0] sm:$0xf]  ;;  %v10871_v0 = vor.u32 %v12794_v59, %v10870_v58  ;;  %v12726_v2 = vld [vmem:[%s19646_s1 + $0x148c] sm:$0xf0]  ;;  %6558 = vmatpush.bf16.msrb.mxu0 %v10615_v62  ;;  %v6305_v56 = vpop.f32.mrf.mxu0  ;;  %v6318_v59 = vpop.f32.mrf.mxu1 }
  0xb0   :  { %v10598_v1 = vld [vmem:[%s19646_s1 + $0x1480] sm:$0xf]  ;;  %v10999_v5 = vor.u32 %v12826_v61, %v10998_v60  ;;  %v12758_v7 = vld [vmem:[%s19646_s1 + $0x158c] sm:$0xf0]  ;;  %6571 = vmatpush.bf16.msrb.mxu1 %v10743_v63 }
  0xb1   :  { %v10726_v3 = vld [vmem:[%s19646_s1 + $0x1580] sm:$0xf]  ;;  %v12790_v9 = vld [vmem:[%s19646_s1 + $0x168c] sm:$0xf0]  ;;  %v10599_v12 = vor.u32 %v12726_v2, %v10598_v1  ;;  %6584 = vmatpush.bf16.msrb.mxu2 %v10871_v0  ;;  %v6331_v1 = vpop.f32.mrf.mxu2 }
  0xb2   :  { %v10854_v8 = vld [vmem:[%s19646_s1 + $0x1680] sm:$0xf]  ;;  %v12822_v11 = vld [vmem:[%s19646_s1 + $0x178c] sm:$0xf0]  ;;  %v10727_v14 = vor.u32 %v12758_v7, %v10726_v3  ;;  %6597 = vmatpush.bf16.msrb.mxu3 %v10999_v5 }
  0xb3   :  { %v10982_v10 = vld [vmem:[%s19646_s1 + $0x1780] sm:$0xf]  ;;  %v10855_v15 = vor.u32 %v12790_v9, %v10854_v8  ;;  %v12722_v16 = vld [vmem:[%s19646_s1 + $0x146c] sm:$0xf0]  ;;  %6559 = vmatpush.bf16.msrb.mxu0 %v10599_v12  ;;  %v6344_v9 = vpop.f32.mrf.mxu3 }
  0xb4   :  { %v10582_v13 = vld [vmem:[%s19646_s1 + $0x1460] sm:$0xf]  ;;  %v10983_v19 = vor.u32 %v12822_v11, %v10982_v10  ;;  %v12754_v22 = vld [vmem:[%s19646_s1 + $0x156c] sm:$0xf0]  ;;  %6572 = vmatpush.bf16.msrb.mxu1 %v10727_v14 }
  0xb5   :  { %v10710_v17 = vld [vmem:[%s19646_s1 + $0x1560] sm:$0xf]  ;;  %v12786_v26 = vld [vmem:[%s19646_s1 + $0x166c] sm:$0xf0]  ;;  %v10583_v34 = vor.u32 %v12722_v16, %v10582_v13  ;;  %6585 = vmatpush.bf16.msrb.mxu2 %v10855_v15 }
  0xb6   :  { %v1054_v18 = vld [vmem:[%s19648_s2] sm:$0xf]  ;;  %v12818_v32 = vld [vmem:[%s19646_s1 + $0x176c] sm:$0xf0]  ;;  %v10711_v39 = vor.u32 %v12754_v22, %v10710_v17  ;;  %6598 = vmatpush.bf16.msrb.mxu3 %v10983_v19 }
  0xb7   :  { %v10838_v24 = vld [vmem:[%s19646_s1 + $0x1660] sm:$0xf]  ;;  %v1056_v36 = vperm.slane %v1054_v18, 0  ;;  %v12718_v47 = vld [vmem:[%s19646_s1 + $0x144c] sm:$0xf0]  ;;  %6560 = vmatpush.bf16.msrb.mxu0 %v10583_v34 }
  0xb8   :  { %v10966_v27 = vld [vmem:[%s19646_s1 + $0x1760] sm:$0xf]  ;;  %v10839_v40 = vor.u32 %v12786_v26, %v10838_v24  ;;  %v12750_v51 = vld [vmem:[%s19646_s1 + $0x154c] sm:$0xf0]  ;;  %6573 = vmatpush.bf16.msrb.mxu1 %v10711_v39 }
  0xb9   :  { %v10566_v43 = vld [vmem:[%s19646_s1 + $0x1440] sm:$0xf]  ;;  %v10967_v50 = vor.u32 %v12818_v32, %v10966_v27  ;;  %v12782_v53 = vld [vmem:[%s19646_s1 + $0x164c] sm:$0xf0]  ;;  %v6306_v58 = vadd.f32 %v6305_v56, %v1056_v36  ;;  %v25_v36 = vld [vmem:[%s19647_s0 + $0x58] sm:$0xff] }
  0xba   :  { %v10694_v48 = vld [vmem:[%s19646_s1 + $0x1540] sm:$0xf]  ;;  %v12814_v55 = vld [vmem:[%s19646_s1 + $0x174c] sm:$0xf0]  ;;  %v10567_v57 = vor.u32 %v12718_v47, %v10566_v43  ;;  %6586 = vmatpush.bf16.msrb.mxu2 %v10839_v40 }
  0xbb   :  { %v10822_v52 = vld [vmem:[%s19646_s1 + $0x1640] sm:$0xf]  ;;  %v10695_v60 = vor.u32 %v12750_v51, %v10694_v48  ;;  %v12714_v63 = vld [vmem:[%s19646_s1 + $0x142c] sm:$0xf0]  ;;  %6599 = vmatpush.bf16.msrb.mxu3 %v10967_v50  ;;  %v6319_v8 = vadd.f32 %v6318_v59, %v6306_v58  ;;  %v6307_v48 = vpop.f32.mrf.mxu0 }
  0xbc   :  { %v10950_v54 = vld [vmem:[%s19646_s1 + $0x1740] sm:$0xf]  ;;  %v10823_v61 = vor.u32 %v12782_v53, %v10822_v52  ;;  %v12746_v3 = vld [vmem:[%s19646_s1 + $0x152c] sm:$0xf0]  ;;  %6561 = vmatpush.bf16.msrb.mxu0 %v10567_v57 }
  0xbd   :  { %v10550_v62 = vld [vmem:[%s19646_s1 + $0x1420] sm:$0xf]  ;;  %v10951_v2 = vor.u32 %v12814_v55, %v10950_v54  ;;  %v12778_v7 = vld [vmem:[%s19646_s1 + $0x162c] sm:$0xf0]  ;;  %v6332_v17 = vadd.f32 %v6331_v1, %v6319_v8  ;;  %6574 = vmatpush.bf16.msrb.mxu1 %v10695_v60  ;;  %v6320_v55 = vpop.f32.mrf.mxu1  ;;  %v1102_v60 = vunpack.c.l.b16 %v25_v36  ;;  %v1103_v1 = vunpack.c.h.b16 %v25_v36 }
  0xbe   :  { %v10678_v0 = vld [vmem:[%s19646_s1 + $0x1520] sm:$0xf]  ;;  %v12810_v11 = vld [vmem:[%s19646_s1 + $0x172c] sm:$0xf0]  ;;  %v10551_v13 = vor.u32 %v12714_v63, %v10550_v62  ;;  %6587 = vmatpush.bf16.msrb.mxu2 %v10823_v61  ;;  %v6333_v62 = vpop.f32.mrf.mxu2 }
  0xbf   :  { %v10806_v5 = vld [vmem:[%s19646_s1 + $0x1620] sm:$0xf]  ;;  %v12710_v14 = vld [vmem:[%s19646_s1 + $0x140c] sm:$0xf0]  ;;  %v10679_v18 = vor.u32 %v12746_v3, %v10678_v0  ;;  %6600 = vmatpush.bf16.msrb.mxu3 %v10951_v2  ;;  %v14366_v39 = vadd.f32 %v6344_v9, %v6332_v17  ;;  %v6346_v2 = vpop.f32.mrf.mxu3 }
  0xc0   :  { %v10934_v10 = vld [vmem:[%s19646_s1 + $0x1720] sm:$0xf]  ;;  %v12742_v16 = vld [vmem:[%s19646_s1 + $0x150c] sm:$0xf0]  ;;  %v10807_v19 = vor.u32 %v12778_v7, %v10806_v5  ;;  %6562 = vmatpush.bf16.msrb.mxu0 %v10551_v13 }
  0xc1   :  { %v10534_v12 = vld [vmem:[%s19646_s1 + $0x1400] sm:$0xf]  ;;  %v12774_v24 = vld [vmem:[%s19646_s1 + $0x160c] sm:$0xf0]  ;;  %v10935_v27 = vor.u32 %v12810_v11, %v10934_v10  ;;  %6575 = vmatpush.bf16.msrb.mxu1 %v10679_v18 }
  0xc2   :  { %v10662_v15 = vld [vmem:[%s19646_s1 + $0x1500] sm:$0xf]  ;;  %v24_v26 = vld [vmem:[%s19647_s0 + $0x50] sm:$0xff]  ;;  %v10535_v50 = vor.u32 %v12710_v14, %v10534_v12  ;;  %6588 = vmatpush.bf16.msrb.mxu2 %v10807_v19  ;;  %v14422_v19 = vpack.c.b16 %v1103_v1, %v1103_v1 }
  0xc3   :  { %v10790_v22 = vld [vmem:[%s19646_s1 + $0x1600] sm:$0xf]  ;;  %v12806_v34 = vld [vmem:[%s19646_s1 + $0x170c] sm:$0xf0]  ;;  %v1100_v54 = vunpack.c.l.b16 %v24_v26  ;;  %v10663_v56 = vor.u32 %v12742_v16, %v10662_v15  ;;  %v1101_v61 = vunpack.c.h.b16 %v24_v26  ;;  %6601 = vmatpush.bf16.msrb.mxu3 %v10935_v27  ;;  %v14412_v15 = vpack.c.b16 %v1102_v60, %v1102_v60 }
  0xc4   :  { %v10918_v32 = vld [vmem:[%s19646_s1 + $0x1700] sm:$0xf]  ;;  %v12866_v43 = vld [vmem:[%s19646_s1 + $0x18ec] sm:$0xf0]  ;;  %v10791_v57 = vor.u32 %v12774_v24, %v10790_v22  ;;  %6563 = vmatpush.bf16.msrb.mxu0 %v10535_v50 }
  0xc5   :  { %v11158_v40 = vld [vmem:[%s19646_s1 + $0x18e0] sm:$0xf]  ;;  %v12898_v51 = vld [vmem:[%s19646_s1 + $0x19ec] sm:$0xf0]  ;;  %v10919_v63 = vor.u32 %v12806_v34, %v10918_v32  ;;  %v14401_v11 = vpack.c.b16 %v1100_v54, %v1100_v54  ;;  %6576 = vmatpush.bf16.msrb.mxu1 %v10663_v56  ;;  %v14414_v16 = vpack.c.b16 %v1101_v61, %v1101_v61 }
  0xc6   :  { %v11286_v47 = vld [vmem:[%s19646_s1 + $0x19e0] sm:$0xf]  ;;  %v12930_v53 = vld [vmem:[%s19646_s1 + $0x1aec] sm:$0xf0]  ;;  %v11159_v0 = vor.u32 %v12866_v43, %v11158_v40  ;;  %6589 = vmatpush.bf16.msrb.mxu2 %v10791_v57 }
  0xc7   :  { %v11414_v52 = vld [vmem:[%s19646_s1 + $0x1ae0] sm:$0xf]  ;;  %v12962_v59 = vld [vmem:[%s19646_s1 + $0x1bec] sm:$0xf0]  ;;  %v11287_v3 = vor.u32 %v12898_v51, %v11286_v47  ;;  %6602 = vmatpush.bf16.msrb.mxu3 %v10919_v63  ;;  %6564 = vmatmul.bf16.vlgmr.msrb.gmra.mxu0 %v14401_v11 }
  0xc8   :  { %v11542_v58 = vld [vmem:[%s19646_s1 + $0x1be0] sm:$0xf]  ;;  %v11415_v5 = vor.u32 %v12930_v53, %v11414_v52  ;;  %v12862_v8 = vld [vmem:[%s19646_s1 + $0x18cc] sm:$0xf0]  ;;  %6608 = vmatpush.bf16.msra.mxu0 %v11159_v0  ;;  %6577 = vmatmul.bf16.vlgmr.msrb.gmra.mxu1 %v14414_v16  ;;  %v6357_v0 = vpop.f32.mrf.mxu0 }
  0xc9   :  { %v11142_v7 = vld [vmem:[%s19646_s1 + $0x18c0] sm:$0xf]  ;;  %v11543_v10 = vor.u32 %v12962_v59, %v11542_v58  ;;  %v12894_v12 = vld [vmem:[%s19646_s1 + $0x19cc] sm:$0xf0]  ;;  %6621 = vmatpush.bf16.msra.mxu1 %v11287_v3  ;;  %6590 = vmatmul.bf16.vlgmr.msrb.gmra.mxu2 %v14412_v15 }
  0xca   :  { %v11270_v9 = vld [vmem:[%s19646_s1 + $0x19c0] sm:$0xf]  ;;  %v12926_v14 = vld [vmem:[%s19646_s1 + $0x1acc] sm:$0xf0]  ;;  %v11143_v22 = vor.u32 %v12862_v8, %v11142_v7  ;;  %6634 = vmatpush.bf16.msra.mxu2 %v11415_v5  ;;  %6603 = vmatmul.bf16.vlgmr.msrb.gmra.mxu3 %v14422_v19  ;;  %v6358_v8 = vadd.f32 %v6357_v0, %v14366_v39 }
  0xcb   :  { %v11398_v13 = vld [vmem:[%s19646_s1 + $0x1ac0] sm:$0xf]  ;;  %v12958_v18 = vld [vmem:[%s19646_s1 + $0x1bcc] sm:$0xf0]  ;;  %v11271_v24 = vor.u32 %v12894_v12, %v11270_v9  ;;  %6647 = vmatpush.bf16.msra.mxu3 %v11543_v10  ;;  %v6370_v9 = vpop.f32.mrf.mxu1 }
  0xcc   :  { %v11526_v17 = vld [vmem:[%s19646_s1 + $0x1bc0] sm:$0xf]  ;;  %v11399_v26 = vor.u32 %v12926_v14, %v11398_v13  ;;  %v12858_v32 = vld [vmem:[%s19646_s1 + $0x18ac] sm:$0xf0]  ;;  %6609 = vmatpush.bf16.msra.mxu0 %v11143_v22 }
  0xcd   :  { %v11126_v27 = vld [vmem:[%s19646_s1 + $0x18a0] sm:$0xf]  ;;  %v11527_v36 = vor.u32 %v12958_v18, %v11526_v17  ;;  %v12890_v40 = vld [vmem:[%s19646_s1 + $0x19ac] sm:$0xf0]  ;;  %6622 = vmatpush.bf16.msra.mxu1 %v11271_v24  ;;  %v6371_v18 = vadd.f32 %v6370_v9, %v6358_v8 }
  0xce   :  { %v11254_v34 = vld [vmem:[%s19646_s1 + $0x19a0] sm:$0xf]  ;;  %v12922_v47 = vld [vmem:[%s19646_s1 + $0x1aac] sm:$0xf0]  ;;  %v11127_v51 = vor.u32 %v12858_v32, %v11126_v27  ;;  %6635 = vmatpush.bf16.msra.mxu2 %v11399_v26 }
  0xcf   :  { %v11382_v43 = vld [vmem:[%s19646_s1 + $0x1aa0] sm:$0xf]  ;;  %v12954_v50 = vld [vmem:[%s19646_s1 + $0x1bac] sm:$0xf0]  ;;  %v11255_v52 = vor.u32 %v12890_v40, %v11254_v34  ;;  %6648 = vmatpush.bf16.msra.mxu3 %v11527_v36  ;;  %v6383_v36 = vpop.f32.mrf.mxu2 }
  0xd0   :  { %v11510_v48 = vld [vmem:[%s19646_s1 + $0x1ba0] sm:$0xf]  ;;  %v11383_v53 = vor.u32 %v12922_v47, %v11382_v43  ;;  %v12854_v55 = vld [vmem:[%s19646_s1 + $0x188c] sm:$0xf0]  ;;  %6610 = vmatpush.bf16.msra.mxu0 %v11127_v51  ;;  %v6396_v51 = vpop.f32.mrf.mxu3 }
  0xd1   :  { %v11110_v54 = vld [vmem:[%s19646_s1 + $0x1880] sm:$0xf]  ;;  %v11511_v57 = vor.u32 %v12954_v50, %v11510_v48  ;;  %v12886_v58 = vld [vmem:[%s19646_s1 + $0x198c] sm:$0xf0]  ;;  %6623 = vmatpush.bf16.msra.mxu1 %v11255_v52  ;;  %v6384_v50 = vadd.f32 %v6383_v36, %v6371_v18 }
  0xd2   :  { %v11238_v56 = vld [vmem:[%s19646_s1 + $0x1980] sm:$0xf]  ;;  %v12918_v60 = vld [vmem:[%s19646_s1 + $0x1a8c] sm:$0xf0]  ;;  %v11111_v63 = vor.u32 %v12854_v55, %v11110_v54  ;;  %6636 = vmatpush.bf16.msra.mxu2 %v11383_v53 }
  0xd3   :  { %v11366_v59 = vld [vmem:[%s19646_s1 + $0x1a80] sm:$0xf]  ;;  %v12950_v62 = vld [vmem:[%s19646_s1 + $0x1b8c] sm:$0xf0]  ;;  %v11239_v1 = vor.u32 %v12886_v58, %v11238_v56  ;;  %6649 = vmatpush.bf16.msra.mxu3 %v11511_v57  ;;  %v14525_v55 = vadd.f32 %v6396_v51, %v6384_v50  ;;  %v6359_v56 = vpop.f32.mrf.mxu0 }
  0xd4   :  { %v11494_v61 = vld [vmem:[%s19646_s1 + $0x1b80] sm:$0xf]  ;;  %v11367_v2 = vor.u32 %v12918_v60, %v11366_v59  ;;  %v12850_v5 = vld [vmem:[%s19646_s1 + $0x186c] sm:$0xf0]  ;;  %6611 = vmatpush.bf16.msra.mxu0 %v11111_v63 }
  0xd5   :  { %v11094_v3 = vld [vmem:[%s19646_s1 + $0x1860] sm:$0xf]  ;;  %v11495_v10 = vor.u32 %v12950_v62, %v11494_v61  ;;  %v12882_v12 = vld [vmem:[%s19646_s1 + $0x196c] sm:$0xf0]  ;;  %6624 = vmatpush.bf16.msra.mxu1 %v11239_v1  ;;  %v6372_v62 = vpop.f32.mrf.mxu1 }
  0xd6   :  { %v11222_v7 = vld [vmem:[%s19646_s1 + $0x1960] sm:$0xf]  ;;  %v12914_v14 = vld [vmem:[%s19646_s1 + $0x1a6c] sm:$0xf0]  ;;  %v11095_v22 = vor.u32 %v12850_v5, %v11094_v3  ;;  %6637 = vmatpush.bf16.msra.mxu2 %v11367_v2 }
  0xd7   :  { %v11350_v13 = vld [vmem:[%s19646_s1 + $0x1a60] sm:$0xf]  ;;  %v12946_v39 = vld [vmem:[%s19646_s1 + $0x1b6c] sm:$0xf0]  ;;  %v11223_v24 = vor.u32 %v12882_v12, %v11222_v7  ;;  %6650 = vmatpush.bf16.msra.mxu3 %v11495_v10 }
  0xd8   :  { %v11478_v17 = vld [vmem:[%s19646_s1 + $0x1b60] sm:$0xf]  ;;  %v11351_v26 = vor.u32 %v12914_v14, %v11350_v13  ;;  %v12846_v32 = vld [vmem:[%s19646_s1 + $0x184c] sm:$0xf0]  ;;  %6612 = vmatpush.bf16.msra.mxu0 %v11095_v22  ;;  %v6385_v22 = vpop.f32.mrf.mxu2 }
  0xd9   :  { %v11078_v27 = vld [vmem:[%s19646_s1 + $0x1840] sm:$0xf]  ;;  %v11479_v40 = vor.u32 %v12946_v39, %v11478_v17  ;;  %v12878_v43 = vld [vmem:[%s19646_s1 + $0x194c] sm:$0xf0]  ;;  %6625 = vmatpush.bf16.msra.mxu1 %v11223_v24 }
  0xda   :  { %v11206_v34 = vld [vmem:[%s19646_s1 + $0x1940] sm:$0xf]  ;;  %v12910_v48 = vld [vmem:[%s19646_s1 + $0x1a4c] sm:$0xf0]  ;;  %v11079_v54 = vor.u32 %v12846_v32, %v11078_v27  ;;  %6638 = vmatpush.bf16.msra.mxu2 %v11351_v26  ;;  %v27_v32 = vld [vmem:[%s19647_s0 + $0x68] sm:$0xff] }
  0xdb   :  { %v11334_v47 = vld [vmem:[%s19646_s1 + $0x1a40] sm:$0xf]  ;;  %v12942_v53 = vld [vmem:[%s19646_s1 + $0x1b4c] sm:$0xf0]  ;;  %v11207_v57 = vor.u32 %v12878_v43, %v11206_v34  ;;  %6651 = vmatpush.bf16.msra.mxu3 %v11479_v40  ;;  %v6398_v34 = vpop.f32.mrf.mxu3  ;;  %v1107_v62 = vunpack.c.h.b16 %v27_v32 }
  0xdc   :  { %v11462_v52 = vld [vmem:[%s19646_s1 + $0x1b40] sm:$0xf]  ;;  %v11335_v58 = vor.u32 %v12910_v48, %v11334_v47  ;;  %v12842_v60 = vld [vmem:[%s19646_s1 + $0x182c] sm:$0xf0]  ;;  %6613 = vmatpush.bf16.msra.mxu0 %v11079_v54 }
  0xdd   :  { %v11062_v59 = vld [vmem:[%s19646_s1 + $0x1820] sm:$0xf]  ;;  %v11463_v63 = vor.u32 %v12942_v53, %v11462_v52  ;;  %v12874_v0 = vld [vmem:[%s19646_s1 + $0x192c] sm:$0xf0]  ;;  %6626 = vmatpush.bf16.msra.mxu1 %v11207_v57 }
  0xde   :  { %v11190_v61 = vld [vmem:[%s19646_s1 + $0x1920] sm:$0xf]  ;;  %v12906_v2 = vld [vmem:[%s19646_s1 + $0x1a2c] sm:$0xf0]  ;;  %v11063_v8 = vor.u32 %v12842_v60, %v11062_v59  ;;  %6639 = vmatpush.bf16.msra.mxu2 %v11335_v58  ;;  %v1106_v58 = vunpack.c.l.b16 %v27_v32 }
  0xdf   :  { %v11318_v1 = vld [vmem:[%s19646_s1 + $0x1a20] sm:$0xf]  ;;  %v12938_v5 = vld [vmem:[%s19646_s1 + $0x1b2c] sm:$0xf0]  ;;  %v11191_v13 = vor.u32 %v12874_v0, %v11190_v61  ;;  %6652 = vmatpush.bf16.msra.mxu3 %v11463_v63 }
  0xe0   :  { %v11446_v3 = vld [vmem:[%s19646_s1 + $0x1b20] sm:$0xf]  ;;  %v12838_v9 = vld [vmem:[%s19646_s1 + $0x180c] sm:$0xf0]  ;;  %v11319_v14 = vor.u32 %v12906_v2, %v11318_v1  ;;  %6614 = vmatpush.bf16.msra.mxu0 %v11063_v8 }
  0xe1   :  { %v11046_v7 = vld [vmem:[%s19646_s1 + $0x1800] sm:$0xf]  ;;  %v12870_v12 = vld [vmem:[%s19646_s1 + $0x190c] sm:$0xf0]  ;;  %v11447_v24 = vor.u32 %v12938_v5, %v11446_v3  ;;  %6627 = vmatpush.bf16.msra.mxu1 %v11191_v13 }
  0xe2   :  { %v11174_v10 = vld [vmem:[%s19646_s1 + $0x1900] sm:$0xf]  ;;  %v12902_v39 = vld [vmem:[%s19646_s1 + $0x1a0c] sm:$0xf0]  ;;  %v11047_v47 = vor.u32 %v12838_v9, %v11046_v7  ;;  %6640 = vmatpush.bf16.msra.mxu2 %v11319_v14 }
  0xe3   :  { %v11302_v17 = vld [vmem:[%s19646_s1 + $0x1a00] sm:$0xf]  ;;  %v12934_v27 = vld [vmem:[%s19646_s1 + $0x1b0c] sm:$0xf0]  ;;  %v11175_v53 = vor.u32 %v12870_v12, %v11174_v10  ;;  %6653 = vmatpush.bf16.msra.mxu3 %v11447_v24  ;;  %v14625_v12 = vpack.c.b16 %v1106_v58, %v1106_v58 }
  0xe4   :  { %v26_v18 = vld [vmem:[%s19647_s0 + $0x60] sm:$0xff]  ;;  %v12994_v40 = vld [vmem:[%s19646_s1 + $0x1cec] sm:$0xf0]  ;;  %v11303_v54 = vor.u32 %v12902_v39, %v11302_v17  ;;  %6615 = vmatpush.bf16.msra.mxu0 %v11047_v47  ;;  %v14635_v39 = vpack.c.b16 %v1107_v62, %v1107_v62 }
  0xe5   :  { %v11430_v26 = vld [vmem:[%s19646_s1 + $0x1b00] sm:$0xf]  ;;  %v13026_v48 = vld [vmem:[%s19646_s1 + $0x1dec] sm:$0xf0]  ;;  %v1104_v52 = vunpack.c.l.b16 %v26_v18  ;;  %v1105_v59 = vunpack.c.h.b16 %v26_v18  ;;  %6628 = vmatpush.bf16.msra.mxu1 %v11175_v53 }
  0xe6   :  { %v11670_v36 = vld [vmem:[%s19646_s1 + $0x1ce0] sm:$0xf]  ;;  %v13058_v51 = vld [vmem:[%s19646_s1 + $0x1eec] sm:$0xf0]  ;;  %v11431_v60 = vor.u32 %v12934_v27, %v11430_v26  ;;  %6641 = vmatpush.bf16.msra.mxu2 %v11303_v54 }
  0xe7   :  { %v11798_v43 = vld [vmem:[%s19646_s1 + $0x1de0] sm:$0xf]  ;;  %v13090_v57 = vld [vmem:[%s19646_s1 + $0x1fec] sm:$0xf0]  ;;  %v11671_v61 = vor.u32 %v12994_v40, %v11670_v36  ;;  %v14614_v7 = vpack.c.b16 %v1104_v52, %v1104_v52  ;;  %v14627_v13 = vpack.c.b16 %v1105_v59, %v1105_v59 }
  0xe8   :  { %v11926_v50 = vld [vmem:[%s19646_s1 + $0x1ee0] sm:$0xf]  ;;  %v11799_v63 = vor.u32 %v13026_v48, %v11798_v43  ;;  %v12990_v2 = vld [vmem:[%s19646_s1 + $0x1ccc] sm:$0xf0]  ;;  %6654 = vmatpush.bf16.msra.mxu3 %v11431_v60 }
  0xe9   :  { %v12054_v56 = vld [vmem:[%s19646_s1 + $0x1fe0] sm:$0xf]  ;;  %v11927_v0 = vor.u32 %v13058_v51, %v11926_v50  ;;  %v13022_v8 = vld [vmem:[%s19646_s1 + $0x1dcc] sm:$0xf0]  ;;  %6660 = vmatpush.bf16.msrb.mxu0 %v11671_v61  ;;  %6642 = vmatmul.bf16.vlgmr.msra.gmra.mxu2 %v14625_v12  ;;  %v6409_v61 = vpop.f32.mrf.mxu0 }
  0xea   :  { %v11654_v1 = vld [vmem:[%s19646_s1 + $0x1cc0] sm:$0xf]  ;;  %v12055_v5 = vor.u32 %v13090_v57, %v12054_v56  ;;  %v13054_v10 = vld [vmem:[%s19646_s1 + $0x1ecc] sm:$0xf0]  ;;  %6673 = vmatpush.bf16.msrb.mxu1 %v11799_v63  ;;  %6616 = vmatmul.bf16.vlgmr.msra.gmra.mxu0 %v14614_v7 }
  0xeb   :  { %v11782_v3 = vld [vmem:[%s19646_s1 + $0x1dc0] sm:$0xf]  ;;  %v13086_v17 = vld [vmem:[%s19646_s1 + $0x1fcc] sm:$0xf0]  ;;  %v11655_v18 = vor.u32 %v12990_v2, %v11654_v1  ;;  %6686 = vmatpush.bf16.msrb.mxu2 %v11927_v0  ;;  %6629 = vmatmul.bf16.vlgmr.msra.gmra.mxu1 %v14627_v13  ;;  %v6410_v0 = vadd.f32 %v6409_v61, %v14525_v55  ;;  %v6422_v2 = vpop.f32.mrf.mxu1 }
  0xec   :  { %v11910_v9 = vld [vmem:[%s19646_s1 + $0x1ec0] sm:$0xf]  ;;  %v11783_v22 = vor.u32 %v13022_v8, %v11782_v3  ;;  %v12986_v27 = vld [vmem:[%s19646_s1 + $0x1cac] sm:$0xf0]  ;;  %6699 = vmatpush.bf16.msrb.mxu3 %v12055_v5 }
  0xed   :  { %v12038_v14 = vld [vmem:[%s19646_s1 + $0x1fc0] sm:$0xf]  ;;  %v11911_v24 = vor.u32 %v13054_v10, %v11910_v9  ;;  %v13018_v36 = vld [vmem:[%s19646_s1 + $0x1dac] sm:$0xf0]  ;;  %6655 = vmatmul.bf16.vlgmr.msra.gmra.mxu3 %v14635_v39  ;;  %6661 = vmatpush.bf16.msrb.mxu0 %v11655_v18 }
  0xee   :  { %v11638_v26 = vld [vmem:[%s19646_s1 + $0x1ca0] sm:$0xf]  ;;  %v12039_v34 = vor.u32 %v13086_v17, %v12038_v14  ;;  %v13050_v43 = vld [vmem:[%s19646_s1 + $0x1eac] sm:$0xf0]  ;;  %6674 = vmatpush.bf16.msrb.mxu1 %v11783_v22  ;;  %v6423_v14 = vadd.f32 %v6422_v2, %v6410_v0 }
  0xef   :  { %v11766_v32 = vld [vmem:[%s19646_s1 + $0x1da0] sm:$0xf]  ;;  %v13082_v48 = vld [vmem:[%s19646_s1 + $0x1fac] sm:$0xf0]  ;;  %v11639_v50 = vor.u32 %v12986_v27, %v11638_v26  ;;  %6687 = vmatpush.bf16.msrb.mxu2 %v11911_v24 }
  0xf0   :  { %v11894_v40 = vld [vmem:[%s19646_s1 + $0x1ea0] sm:$0xf]  ;;  %v11767_v51 = vor.u32 %v13018_v36, %v11766_v32  ;;  %v12982_v54 = vld [vmem:[%s19646_s1 + $0x1c8c] sm:$0xf0]  ;;  %6700 = vmatpush.bf16.msrb.mxu3 %v12039_v34 }
  0xf1   :  { %v12022_v47 = vld [vmem:[%s19646_s1 + $0x1fa0] sm:$0xf]  ;;  %v11895_v52 = vor.u32 %v13050_v43, %v11894_v40  ;;  %v13014_v58 = vld [vmem:[%s19646_s1 + $0x1d8c] sm:$0xf0]  ;;  %6662 = vmatpush.bf16.msrb.mxu0 %v11639_v50 }
  0xf2   :  { %v11622_v53 = vld [vmem:[%s19646_s1 + $0x1c80] sm:$0xf]  ;;  %v12023_v57 = vor.u32 %v13082_v48, %v12022_v47  ;;  %v13046_v60 = vld [vmem:[%s19646_s1 + $0x1e8c] sm:$0xf0]  ;;  %6675 = vmatpush.bf16.msrb.mxu1 %v11767_v51  ;;  %v6435_v48 = vpop.f32.mrf.mxu2 }
  0xf3   :  { %v11750_v56 = vld [vmem:[%s19646_s1 + $0x1d80] sm:$0xf]  ;;  %v13078_v63 = vld [vmem:[%s19646_s1 + $0x1f8c] sm:$0xf0]  ;;  %v11623_v1 = vor.u32 %v12982_v54, %v11622_v53  ;;  %6688 = vmatpush.bf16.msrb.mxu2 %v11895_v52  ;;  %v6436_v53 = vadd.f32 %v6435_v48, %v6423_v14  ;;  %v6448_v54 = vpop.f32.mrf.mxu3  ;;  %v29_v48 = vld [vmem:[%s19647_s0 + $0x78] sm:$0xff] }
  0xf4   :  { %v11878_v59 = vld [vmem:[%s19646_s1 + $0x1e80] sm:$0xf]  ;;  %v11751_v3 = vor.u32 %v13014_v58, %v11750_v56  ;;  %v12978_v9 = vld [vmem:[%s19646_s1 + $0x1c6c] sm:$0xf0]  ;;  %6701 = vmatpush.bf16.msrb.mxu3 %v12023_v57  ;;  %v6411_v58 = vpop.f32.mrf.mxu0 }
  0xf5   :  { %v12006_v62 = vld [vmem:[%s19646_s1 + $0x1f80] sm:$0xf]  ;;  %v11879_v5 = vor.u32 %v13046_v60, %v11878_v59  ;;  %v13010_v17 = vld [vmem:[%s19646_s1 + $0x1d6c] sm:$0xf0]  ;;  %6663 = vmatpush.bf16.msrb.mxu0 %v11623_v1  ;;  %v6424_v60 = vpop.f32.mrf.mxu1  ;;  %v14738_v61 = vadd.f32 %v6448_v54, %v6436_v53  ;;  %v12128_v53 = vld [vmem:[%s19646_s1 + $0x1e4] sm:$0xf] }
  0xf6   :  { %v11606_v8 = vld [vmem:[%s19646_s1 + $0x1c60] sm:$0xf]  ;;  %v12007_v55 = vor.u32 %v13078_v63, %v12006_v62  ;;  %v13042_v22 = vld [vmem:[%s19646_s1 + $0x1e6c] sm:$0xf0]  ;;  %6676 = vmatpush.bf16.msrb.mxu1 %v11751_v3  ;;  %v12160_v58 = vld [vmem:[%s19646_s1 + $0x2e4] sm:$0xf] }
  0xf7   :  { %v11734_v10 = vld [vmem:[%s19646_s1 + $0x1d60] sm:$0xf]  ;;  %v13074_v26 = vld [vmem:[%s19646_s1 + $0x1f6c] sm:$0xf0]  ;;  %v11607_v27 = vor.u32 %v12978_v9, %v11606_v8  ;;  %6689 = vmatpush.bf16.msrb.mxu2 %v11879_v5 }
  0xf8   :  { %v11862_v18 = vld [vmem:[%s19646_s1 + $0x1e60] sm:$0xf]  ;;  %v11735_v32 = vor.u32 %v13010_v17, %v11734_v10  ;;  %v12974_v40 = vld [vmem:[%s19646_s1 + $0x1c4c] sm:$0xf0]  ;;  %6702 = vmatpush.bf16.msrb.mxu3 %v12007_v55 }
  0xf9   :  { %v11990_v24 = vld [vmem:[%s19646_s1 + $0x1f60] sm:$0xf]  ;;  %v11863_v34 = vor.u32 %v13042_v22, %v11862_v18  ;;  %v13006_v50 = vld [vmem:[%s19646_s1 + $0x1d4c] sm:$0xf0]  ;;  %6664 = vmatpush.bf16.msrb.mxu0 %v11607_v27 }
  0xfa   :  { %v11590_v36 = vld [vmem:[%s19646_s1 + $0x1c40] sm:$0xf]  ;;  %v11991_v47 = vor.u32 %v13074_v26, %v11990_v24  ;;  %v13038_v52 = vld [vmem:[%s19646_s1 + $0x1e4c] sm:$0xf0]  ;;  %6677 = vmatpush.bf16.msrb.mxu1 %v11735_v32 }
  0xfb   :  { %v11718_v43 = vld [vmem:[%s19646_s1 + $0x1d40] sm:$0xf]  ;;  %v13070_v57 = vld [vmem:[%s19646_s1 + $0x1f4c] sm:$0xf0]  ;;  %v11591_v59 = vor.u32 %v12974_v40, %v11590_v36  ;;  %6690 = vmatpush.bf16.msrb.mxu2 %v11863_v34  ;;  %v6450_v54 = vpop.f32.mrf.mxu3 }
  0xfc   :  { %v11846_v51 = vld [vmem:[%s19646_s1 + $0x1e40] sm:$0xf]  ;;  %v11719_v62 = vor.u32 %v13006_v50, %v11718_v43  ;;  %v12970_v1 = vld [vmem:[%s19646_s1 + $0x1c2c] sm:$0xf0]  ;;  %6703 = vmatpush.bf16.msrb.mxu3 %v11991_v47  ;;  %v6437_v50 = vpop.f32.mrf.mxu2  ;;  %v12120_v54 = vld [vmem:[%s19646_s1 + $0x1a4] sm:$0xf] }
  0xfd   :  { %v11974_v56 = vld [vmem:[%s19646_s1 + $0x1f40] sm:$0xf]  ;;  %v11847_v63 = vor.u32 %v13038_v52, %v11846_v51  ;;  %v13002_v5 = vld [vmem:[%s19646_s1 + $0x1d2c] sm:$0xf0]  ;;  %6665 = vmatpush.bf16.msrb.mxu0 %v11591_v59  ;;  %v12096_v51 = vld [vmem:[%s19646_s1 + $0xe4] sm:$0xf] }
  0xfe   :  { %v11574_v0 = vld [vmem:[%s19646_s1 + $0x1c20] sm:$0xf]  ;;  %v11975_v3 = vor.u32 %v13070_v57, %v11974_v56  ;;  %v13034_v9 = vld [vmem:[%s19646_s1 + $0x1e2c] sm:$0xf0]  ;;  %6678 = vmatpush.bf16.msrb.mxu1 %v11719_v62  ;;  %v8088_v52 = vld [vmem:[%s19646_s1 + $0xf0] sm:$0xf0] }
  0xff   :  { %v11702_v2 = vld [vmem:[%s19646_s1 + $0x1d20] sm:$0xf]  ;;  %v13066_v55 = vld [vmem:[%s19646_s1 + $0x1f2c] sm:$0xf0]  ;;  %v11575_v17 = vor.u32 %v12970_v1, %v11574_v0  ;;  %6691 = vmatpush.bf16.msrb.mxu2 %v11847_v63  ;;  %v8216_v57 = vld [vmem:[%s19646_s1 + $0x1f0] sm:$0xf0] }
 0x100   :  { %v11830_v8 = vld [vmem:[%s19646_s1 + $0x1e20] sm:$0xf]  ;;  %v12966_v18 = vld [vmem:[%s19646_s1 + $0x1c0c] sm:$0xf0]  ;;  %v11703_v26 = vor.u32 %v13002_v5, %v11702_v2  ;;  %6704 = vmatpush.bf16.msrb.mxu3 %v11975_v3  ;;  %v8344_v59 = vld [vmem:[%s19646_s1 + $0x2f0] sm:$0xf0]  ;;  %v1110_v2 = vunpack.c.l.b16 %v29_v48 }
 0x101   :  { %v11958_v10 = vld [vmem:[%s19646_s1 + $0x1f20] sm:$0xf]  ;;  %v12998_v24 = vld [vmem:[%s19646_s1 + $0x1d0c] sm:$0xf0]  ;;  %v11831_v27 = vor.u32 %v13034_v9, %v11830_v8  ;;  %6666 = vmatpush.bf16.msrb.mxu0 %v11575_v17  ;;  %v12192_v0 = vld [vmem:[%s19646_s1 + $0x3e4] sm:$0xf]  ;;  %v8091_v8 = vor.u32 %v12096_v51, %v8088_v52  ;;  %v1111_v9 = vunpack.c.h.b16 %v29_v48 }
 0x102   :  { %v11558_v14 = vld [vmem:[%s19646_s1 + $0x1c00] sm:$0xf]  ;;  %v13030_v34 = vld [vmem:[%s19646_s1 + $0x1e0c] sm:$0xf0]  ;;  %v11959_v40 = vor.u32 %v13066_v55, %v11958_v10  ;;  %6679 = vmatpush.bf16.msrb.mxu1 %v11703_v26  ;;  %v8472_v1 = vld [vmem:[%s19646_s1 + $0x3f0] sm:$0xf0]  ;;  %v8219_v10 = vor.u32 %v12128_v53, %v8216_v57  ;;  %v8347_v55 = vor.u32 %v12160_v58, %v8344_v59 }
 0x103   :  { %v11686_v22 = vld [vmem:[%s19646_s1 + $0x1d00] sm:$0xf]  ;;  %v28_v36 = vld [vmem:[%s19647_s0 + $0x70] sm:$0xff]  ;;  %v11559_v56 = vor.u32 %v12966_v18, %v11558_v14  ;;  %6692 = vmatpush.bf16.msrb.mxu2 %v11831_v27  ;;  %v12092_v14 = vld [vmem:[%s19646_s1 + $0xc4] sm:$0xf] }
 0x104   :  { %v11814_v32 = vld [vmem:[%s19646_s1 + $0x1e00] sm:$0xf]  ;;  %v13062_v47 = vld [vmem:[%s19646_s1 + $0x1f0c] sm:$0xf0]  ;;  %v1108_v60 = vunpack.c.l.b16 %v28_v36  ;;  %v11687_v62 = vor.u32 %v12998_v24, %v11686_v22  ;;  %v1109_v3 = vunpack.c.h.b16 %v28_v36  ;;  %6705 = vmatpush.bf16.msrb.mxu3 %v11959_v40  ;;  %v8072_v17 = vld [vmem:[%s19646_s1 + $0xd0] sm:$0xf0]  ;;  %v8475_v22 = vor.u32 %v12192_v0, %v8472_v1 }
 0x105   :  { %v11942_v43 = vld [vmem:[%s19646_s1 + $0x1f00] sm:$0xf]  ;;  %v11815_v63 = vor.u32 %v13030_v34, %v11814_v32  ;;  %v12124_v18 = vld [vmem:[%s19646_s1 + $0x1c4] sm:$0xf]  ;;  %6667 = vmatpush.bf16.msrb.mxu0 %v11559_v56  ;;  %v8200_v26 = vld [vmem:[%s19646_s1 + $0x1d0] sm:$0xf0]  ;;  %v14838_v34 = vpack.c.b16 %v1110_v2, %v1110_v2  ;;  %v8075_v48 = vor.u32 %v12092_v14, %v8072_v17  ;;  %v6461_v14 = vpop.f32.mrf.mxu0 }
 0x106   :  { %v11943_v5 = vor.u32 %v13062_v47, %v11942_v43  ;;  %v14827_v24 = vpack.c.b16 %v1108_v60, %v1108_v60  ;;  %v12156_v27 = vld [vmem:[%s19646_s1 + $0x2c4] sm:$0xf]  ;;  %v8328_v32 = vld [vmem:[%s19646_s1 + $0x2d0] sm:$0xf0]  ;;  %6680 = vmatpush.bf16.msrb.mxu1 %v11687_v62  ;;  %v14840_v36 = vpack.c.b16 %v1109_v3, %v1109_v3  ;;  %v14848_v47 = vpack.c.b16 %v1111_v9, %v1111_v9 }
 0x107   :  { %6693 = vmatpush.bf16.msrb.mxu2 %v11815_v63  ;;  %v12188_v40 = vld [vmem:[%s19646_s1 + $0x3c4] sm:$0xf]  ;;  %v8456_v43 = vld [vmem:[%s19646_s1 + $0x3d0] sm:$0xf0]  ;;  %v8203_v50 = vor.u32 %v12124_v18, %v8200_v26  ;;  %v8331_v51 = vor.u32 %v12156_v27, %v8328_v32  ;;  %v6474_v27 = vpop.f32.mrf.mxu1 }
 0x108   :  { %6706 = vmatpush.bf16.msrb.mxu3 %v11943_v5  ;;  %v12088_v52 = vld [vmem:[%s19646_s1 + $0xa4] sm:$0xf]  ;;  %v8056_v53 = vld [vmem:[%s19646_s1 + $0xb0] sm:$0xf0]  ;;  %6668 = vmatmul.bf16.vlgmr.msrb.gmra.mxu0 %v14827_v24  ;;  %v8459_v56 = vor.u32 %v12188_v40, %v8456_v43 }
 0x109   :  { %6712 = vmatpush.bf16.msra.mxu0 %v8091_v8  ;;  %v8184_v57 = vld [vmem:[%s19646_s1 + $0x1b0] sm:$0xf0]  ;;  %v12152_v58 = vld [vmem:[%s19646_s1 + $0x2a4] sm:$0xf]  ;;  %6681 = vmatmul.bf16.vlgmr.msrb.gmra.mxu1 %v14840_v36  ;;  %v8059_v63 = vor.u32 %v12088_v52, %v8056_v53 }
 0x10a   :  { %6725 = vmatpush.bf16.msra.mxu1 %v8219_v10  ;;  %v8312_v59 = vld [vmem:[%s19646_s1 + $0x2b0] sm:$0xf0]  ;;  %6694 = vmatmul.bf16.vlgmr.msrb.gmra.mxu2 %v14838_v34  ;;  %v12184_v60 = vld [vmem:[%s19646_s1 + $0x3a4] sm:$0xf]  ;;  %v8187_v0 = vor.u32 %v12120_v54, %v8184_v57 }
 0x10b   :  { %6738 = vmatpush.bf16.msra.mxu2 %v8347_v55  ;;  %v8440_v62 = vld [vmem:[%s19646_s1 + $0x3b0] sm:$0xf0]  ;;  %6707 = vmatmul.bf16.vlgmr.msrb.gmra.mxu3 %v14848_v47  ;;  %v8315_v1 = vor.u32 %v12152_v58, %v8312_v59  ;;  %v12084_v2 = vld [vmem:[%s19646_s1 + $0x84] sm:$0xf] }
 0x10c   :  { %6751 = vmatpush.bf16.msra.mxu3 %v8475_v22  ;;  %v8040_v3 = vld [vmem:[%s19646_s1 + $0x90] sm:$0xf0]  ;;  %v12116_v5 = vld [vmem:[%s19646_s1 + $0x184] sm:$0xf]  ;;  %v8443_v8 = vor.u32 %v12184_v60, %v8440_v62  ;;  %v6462_v22 = vadd.f32 %v6461_v14, %v14738_v61 }
 0x10d   :  { %6713 = vmatpush.bf16.msra.mxu0 %v8075_v48  ;;  %v8168_v9 = vld [vmem:[%s19646_s1 + $0x190] sm:$0xf0]  ;;  %v12148_v10 = vld [vmem:[%s19646_s1 + $0x284] sm:$0xf]  ;;  %v8043_v26 = vor.u32 %v12084_v2, %v8040_v3  ;;  %v6487_v2 = vpop.f32.mrf.mxu2 }
 0x10e   :  { %6726 = vmatpush.bf16.msra.mxu1 %v8203_v50  ;;  %v8296_v55 = vld [vmem:[%s19646_s1 + $0x290] sm:$0xf0]  ;;  %v12180_v17 = vld [vmem:[%s19646_s1 + $0x384] sm:$0xf]  ;;  %v8171_v32 = vor.u32 %v12116_v5, %v8168_v9 }
 0x10f   :  { %6739 = vmatpush.bf16.msra.mxu2 %v8331_v51  ;;  %v8424_v18 = vld [vmem:[%s19646_s1 + $0x390] sm:$0xf0]  ;;  %v8299_v40 = vor.u32 %v12148_v10, %v8296_v55  ;;  %v12080_v43 = vld [vmem:[%s19646_s1 + $0x64] sm:$0xf]  ;;  %v6475_v51 = vadd.f32 %v6474_v27, %v6462_v22  ;;  %v6500_v10 = vpop.f32.mrf.mxu3  ;;  %v6476_v22 = vpop.f32.mrf.mxu1 }
 0x110   :  { %6752 = vmatpush.bf16.msra.mxu3 %v8459_v56  ;;  %v8024_v48 = vld [vmem:[%s19646_s1 + $0x70] sm:$0xf0]  ;;  %v12112_v50 = vld [vmem:[%s19646_s1 + $0x164] sm:$0xf]  ;;  %v8427_v61 = vor.u32 %v12180_v17, %v8424_v18  ;;  %v6463_v17 = vpop.f32.mrf.mxu0 }
 0x111   :  { %6714 = vmatpush.bf16.msra.mxu0 %v8059_v63  ;;  %v8152_v52 = vld [vmem:[%s19646_s1 + $0x170] sm:$0xf0]  ;;  %v12144_v53 = vld [vmem:[%s19646_s1 + $0x264] sm:$0xf]  ;;  %v8027_v58 = vor.u32 %v12080_v43, %v8024_v48  ;;  %v6488_v9 = vadd.f32 %v6487_v2, %v6475_v51 }
 0x112   :  { %6727 = vmatpush.bf16.msra.mxu1 %v8187_v0  ;;  %v8280_v54 = vld [vmem:[%s19646_s1 + $0x270] sm:$0xf0]  ;;  %v12176_v56 = vld [vmem:[%s19646_s1 + $0x364] sm:$0xf]  ;;  %v8155_v59 = vor.u32 %v12112_v50, %v8152_v52 }
 0x113   :  { %6740 = vmatpush.bf16.msra.mxu2 %v8315_v1  ;;  %v8408_v57 = vld [vmem:[%s19646_s1 + $0x370] sm:$0xf0]  ;;  %v8283_v60 = vor.u32 %v12144_v53, %v8280_v54  ;;  %v12076_v62 = vld [vmem:[%s19646_s1 + $0x44] sm:$0xf] }
 0x114   :  { %6753 = vmatpush.bf16.msra.mxu3 %v8443_v8  ;;  %v8008_v63 = vld [vmem:[%s19646_s1 + $0x50] sm:$0xf0]  ;;  %v12108_v0 = vld [vmem:[%s19646_s1 + $0x144] sm:$0xf]  ;;  %v8411_v1 = vor.u32 %v12176_v56, %v8408_v57 }
 0x115   :  { %6715 = vmatpush.bf16.msra.mxu0 %v8043_v26  ;;  %v8136_v3 = vld [vmem:[%s19646_s1 + $0x150] sm:$0xf0]  ;;  %v12140_v5 = vld [vmem:[%s19646_s1 + $0x244] sm:$0xf]  ;;  %v8011_v18 = vor.u32 %v12076_v62, %v8008_v63  ;;  %v14951_v26 = vadd.f32 %v6500_v10, %v6488_v9 }
 0x116   :  { %6728 = vmatpush.bf16.msra.mxu1 %v8171_v32  ;;  %v8264_v8 = vld [vmem:[%s19646_s1 + $0x250] sm:$0xf0]  ;;  %v12172_v55 = vld [vmem:[%s19646_s1 + $0x344] sm:$0xf]  ;;  %v8139_v27 = vor.u32 %v12108_v0, %v8136_v3 }
 0x117   :  { %6741 = vmatpush.bf16.msra.mxu2 %v8299_v40  ;;  %v8392_v14 = vld [vmem:[%s19646_s1 + $0x350] sm:$0xf0]  ;;  %v8267_v32 = vor.u32 %v12140_v5, %v8264_v8  ;;  %v12072_v40 = vld [vmem:[%s19646_s1 + $0x24] sm:$0xf]  ;;  %v6489_v8 = vpop.f32.mrf.mxu2 }
 0x118   :  { %6754 = vmatpush.bf16.msra.mxu3 %v8427_v61  ;;  %v7992_v43 = vld [vmem:[%s19646_s1 + $0x30] sm:$0xf0]  ;;  %v12104_v48 = vld [vmem:[%s19646_s1 + $0x124] sm:$0xf]  ;;  %v8395_v50 = vor.u32 %v12172_v55, %v8392_v14  ;;  %v6502_v14 = vpop.f32.mrf.mxu3 }
 0x119   :  { %6716 = vmatpush.bf16.msra.mxu0 %v8027_v58  ;;  %v8120_v61 = vld [vmem:[%s19646_s1 + $0x130] sm:$0xf0]  ;;  %v12136_v51 = vld [vmem:[%s19646_s1 + $0x224] sm:$0xf]  ;;  %v7995_v56 = vor.u32 %v12072_v40, %v7992_v43 }
 0x11a   :  { %6729 = vmatpush.bf16.msra.mxu1 %v8155_v59  ;;  %v8248_v52 = vld [vmem:[%s19646_s1 + $0x230] sm:$0xf0]  ;;  %v12168_v53 = vld [vmem:[%s19646_s1 + $0x324] sm:$0xf]  ;;  %v8123_v59 = vor.u32 %v12104_v48, %v8120_v61 }
 0x11b   :  { %6742 = vmatpush.bf16.msra.mxu2 %v8283_v60  ;;  %v8376_v54 = vld [vmem:[%s19646_s1 + $0x330] sm:$0xf0]  ;;  %v12068_v57 = vld [vmem:[%s19646_s1 + $0x4] sm:$0xf]  ;;  %v8251_v60 = vor.u32 %v12136_v51, %v8248_v52 }
 0x11c   :  { %6755 = vmatpush.bf16.msra.mxu3 %v8411_v1  ;;  %v7976_v58 = vld [vmem:[%s19646_s1 + $0x10] sm:$0xf0]  ;;  %v12100_v62 = vld [vmem:[%s19646_s1 + $0x104] sm:$0xf]  ;;  %v8379_v1 = vor.u32 %v12168_v53, %v8376_v54 }
 0x11d   :  { %6717 = vmatpush.bf16.msra.mxu0 %v8011_v18  ;;  %v8104_v63 = vld [vmem:[%s19646_s1 + $0x110] sm:$0xf0]  ;;  %v12132_v0 = vld [vmem:[%s19646_s1 + $0x204] sm:$0xf]  ;;  %v7979_v17 = vor.u32 %v12068_v57, %v7976_v58 }
 0x11e   :  { %6730 = vmatpush.bf16.msra.mxu1 %v8139_v27  ;;  %v8232_v2 = vld [vmem:[%s19646_s1 + $0x210] sm:$0xf0]  ;;  %v12164_v3 = vld [vmem:[%s19646_s1 + $0x304] sm:$0xf] }
 0x11f   :  { %6743 = vmatpush.bf16.msra.mxu2 %v8267_v32  ;;  %v8360_v5 = vld [vmem:[%s19646_s1 + $0x310] sm:$0xf0]  ;;  %v12224_v9 = vld [vmem:[%s19646_s1 + $0x4e4] sm:$0xf]  ;;  %v8107_v32 = vor.u32 %v12100_v62, %v8104_v63  ;;  %v8235_v40 = vor.u32 %v12132_v0, %v8232_v2 }
 0x120   :  { %6756 = vmatpush.bf16.msra.mxu3 %v8395_v50  ;;  %v8600_v10 = vld [vmem:[%s19646_s1 + $0x4f0] sm:$0xf0]  ;;  %v12256_v55 = vld [vmem:[%s19646_s1 + $0x5e4] sm:$0xf]  ;;  %v8363_v50 = vor.u32 %v12164_v3, %v8360_v5 }
 0x121   :  { %6718 = vmatpush.bf16.msra.mxu0 %v7995_v56  ;;  %v8728_v18 = vld [vmem:[%s19646_s1 + $0x5f0] sm:$0xf0]  ;;  %v12288_v22 = vld [vmem:[%s19646_s1 + $0x6e4] sm:$0xf]  ;;  %v8603_v61 = vor.u32 %v12224_v9, %v8600_v10 }
 0x122   :  { %v8856_v27 = vld [vmem:[%s19646_s1 + $0x6f0] sm:$0xf0]  ;;  %6731 = vmatpush.bf16.msra.mxu1 %v8123_v59  ;;  %v12320_v43 = vld [vmem:[%s19646_s1 + $0x7e4] sm:$0xf]  ;;  %v8731_v51 = vor.u32 %v12256_v55, %v8728_v18 }
 0x123   :  { %6744 = vmatpush.bf16.msra.mxu2 %v8251_v60  ;;  %v8984_v48 = vld [vmem:[%s19646_s1 + $0x7f0] sm:$0xf0]  ;;  %v8859_v52 = vor.u32 %v12288_v22, %v8856_v27  ;;  %v12220_v53 = vld [vmem:[%s19646_s1 + $0x4c4] sm:$0xf] }
 0x124   :  { %6757 = vmatpush.bf16.msra.mxu3 %v8379_v1  ;;  %v8584_v54 = vld [vmem:[%s19646_s1 + $0x4d0] sm:$0xf0]  ;;  %v12252_v56 = vld [vmem:[%s19646_s1 + $0x5c4] sm:$0xf]  ;;  %v8987_v57 = vor.u32 %v12320_v43, %v8984_v48 }
 0x125   :  { %6719 = vmatpush.bf16.msra.mxu0 %v7979_v17  ;;  %v8712_v58 = vld [vmem:[%s19646_s1 + $0x5d0] sm:$0xf0]  ;;  %v12284_v59 = vld [vmem:[%s19646_s1 + $0x6c4] sm:$0xf]  ;;  %v8587_v0 = vor.u32 %v12220_v53, %v8584_v54  ;;  %v6513_v53 = vpop.f32.mrf.mxu0 }
 0x126   :  { %v8840_v60 = vld [vmem:[%s19646_s1 + $0x6d0] sm:$0xf0]  ;;  %6732 = vmatpush.bf16.msra.mxu1 %v8107_v32  ;;  %v12316_v62 = vld [vmem:[%s19646_s1 + $0x7c4] sm:$0xf]  ;;  %v8715_v1 = vor.u32 %v12252_v56, %v8712_v58 }
 0x127   :  { %6745 = vmatpush.bf16.msra.mxu2 %v8235_v40  ;;  %v8968_v63 = vld [vmem:[%s19646_s1 + $0x7d0] sm:$0xf0]  ;;  %v8843_v2 = vor.u32 %v12284_v59, %v8840_v60  ;;  %v12216_v3 = vld [vmem:[%s19646_s1 + $0x4a4] sm:$0xf]  ;;  %v6526_v59 = vpop.f32.mrf.mxu1 }
 0x128   :  { %6758 = vmatpush.bf16.msra.mxu3 %v8363_v50  ;;  %v8568_v5 = vld [vmem:[%s19646_s1 + $0x4b0] sm:$0xf0]  ;;  %v12248_v8 = vld [vmem:[%s19646_s1 + $0x5a4] sm:$0xf]  ;;  %v8971_v9 = vor.u32 %v12316_v62, %v8968_v63  ;;  %6720 = vmatmul.bf16.vlgmr.msra.gmra.mxu0 %v13414_v20 }
 0x129   :  { %6764 = vmatpush.bf16.msrb.mxu0 %v8603_v61  ;;  %v8696_v10 = vld [vmem:[%s19646_s1 + $0x5b0] sm:$0xf0]  ;;  %v12280_v55 = vld [vmem:[%s19646_s1 + $0x6a4] sm:$0xf]  ;;  %v8571_v22 = vor.u32 %v12216_v3, %v8568_v5  ;;  %6733 = vmatmul.bf16.vlgmr.msra.gmra.mxu1 %v13417_v21 }
 0x12a   :  { %6777 = vmatpush.bf16.msrb.mxu1 %v8731_v51  ;;  %v8824_v14 = vld [vmem:[%s19646_s1 + $0x6b0] sm:$0xf0]  ;;  %6746 = vmatmul.bf16.vlgmr.msra.gmra.mxu2 %v13382_v4  ;;  %v12312_v17 = vld [vmem:[%s19646_s1 + $0x7a4] sm:$0xf]  ;;  %v8699_v27 = vor.u32 %v12248_v8, %v8696_v10 }
 0x12b   :  { %6790 = vmatpush.bf16.msrb.mxu2 %v8859_v52  ;;  %v8952_v18 = vld [vmem:[%s19646_s1 + $0x7b0] sm:$0xf0]  ;;  %6759 = vmatmul.bf16.vlgmr.msra.gmra.mxu3 %v13387_v6  ;;  %v8827_v32 = vor.u32 %v12280_v55, %v8824_v14  ;;  %v12212_v40 = vld [vmem:[%s19646_s1 + $0x484] sm:$0xf] }
 0x12c   :  { %6803 = vmatpush.bf16.msrb.mxu3 %v8987_v57  ;;  %v8552_v43 = vld [vmem:[%s19646_s1 + $0x490] sm:$0xf0]  ;;  %v12244_v48 = vld [vmem:[%s19646_s1 + $0x584] sm:$0xf]  ;;  %v8955_v50 = vor.u32 %v12312_v17, %v8952_v18  ;;  %v6514_v57 = vadd.f32 %v6513_v53, %v14951_v26 }
 0x12d   :  { %6765 = vmatpush.bf16.msrb.mxu0 %v8587_v0  ;;  %v8680_v61 = vld [vmem:[%s19646_s1 + $0x590] sm:$0xf0]  ;;  %v12276_v51 = vld [vmem:[%s19646_s1 + $0x684] sm:$0xf]  ;;  %v8555_v58 = vor.u32 %v12212_v40, %v8552_v43  ;;  %v6539_v40 = vpop.f32.mrf.mxu2 }
 0x12e   :  { %6778 = vmatpush.bf16.msrb.mxu1 %v8715_v1  ;;  %v8808_v52 = vld [vmem:[%s19646_s1 + $0x690] sm:$0xf0]  ;;  %v12308_v54 = vld [vmem:[%s19646_s1 + $0x784] sm:$0xf]  ;;  %v8683_v60 = vor.u32 %v12244_v48, %v8680_v61 }
 0x12f   :  { %6791 = vmatpush.bf16.msrb.mxu2 %v8843_v2  ;;  %v8936_v56 = vld [vmem:[%s19646_s1 + $0x790] sm:$0xf0]  ;;  %v8811_v62 = vor.u32 %v12276_v51, %v8808_v52  ;;  %v12208_v63 = vld [vmem:[%s19646_s1 + $0x464] sm:$0xf]  ;;  %v6527_v2 = vadd.f32 %v6526_v59, %v6514_v57  ;;  %v6552_v51 = vpop.f32.mrf.mxu3  ;;  %v6528_v57 = vpop.f32.mrf.mxu1 }
 0x130   :  { %6804 = vmatpush.bf16.msrb.mxu3 %v8971_v9  ;;  %v8536_v0 = vld [vmem:[%s19646_s1 + $0x470] sm:$0xf0]  ;;  %v12240_v1 = vld [vmem:[%s19646_s1 + $0x564] sm:$0xf]  ;;  %v8939_v26 = vor.u32 %v12308_v54, %v8936_v56  ;;  %v6515_v54 = vpop.f32.mrf.mxu0 }
 0x131   :  { %6766 = vmatpush.bf16.msrb.mxu0 %v8571_v22  ;;  %v8664_v3 = vld [vmem:[%s19646_s1 + $0x570] sm:$0xf0]  ;;  %v12272_v5 = vld [vmem:[%s19646_s1 + $0x664] sm:$0xf]  ;;  %v8539_v55 = vor.u32 %v12208_v63, %v8536_v0  ;;  %v6540_v61 = vadd.f32 %v6539_v40, %v6527_v2 }
 0x132   :  { %6779 = vmatpush.bf16.msrb.mxu1 %v8699_v27  ;;  %v8792_v8 = vld [vmem:[%s19646_s1 + $0x670] sm:$0xf0]  ;;  %v12304_v9 = vld [vmem:[%s19646_s1 + $0x764] sm:$0xf]  ;;  %v8667_v14 = vor.u32 %v12240_v1, %v8664_v3 }
 0x133   :  { %6792 = vmatpush.bf16.msrb.mxu2 %v8827_v32  ;;  %v8920_v10 = vld [vmem:[%s19646_s1 + $0x770] sm:$0xf0]  ;;  %v8795_v17 = vor.u32 %v12272_v5, %v8792_v8  ;;  %v12204_v18 = vld [vmem:[%s19646_s1 + $0x444] sm:$0xf] }
 0x134   :  { %6805 = vmatpush.bf16.msrb.mxu3 %v8955_v50  ;;  %v8520_v22 = vld [vmem:[%s19646_s1 + $0x450] sm:$0xf0]  ;;  %v12236_v27 = vld [vmem:[%s19646_s1 + $0x544] sm:$0xf]  ;;  %v8923_v32 = vor.u32 %v12304_v9, %v8920_v10 }
 0x135   :  { %6767 = vmatpush.bf16.msrb.mxu0 %v8555_v58  ;;  %v8648_v43 = vld [vmem:[%s19646_s1 + $0x550] sm:$0xf0]  ;;  %v12268_v48 = vld [vmem:[%s19646_s1 + $0x644] sm:$0xf]  ;;  %v8523_v56 = vor.u32 %v12204_v18, %v8520_v22  ;;  %v15150_v58 = vadd.f32 %v6552_v51, %v6540_v61 }
 0x136   :  { %6780 = vmatpush.bf16.msrb.mxu1 %v8683_v60  ;;  %v8776_v50 = vld [vmem:[%s19646_s1 + $0x650] sm:$0xf0]  ;;  %v12300_v52 = vld [vmem:[%s19646_s1 + $0x744] sm:$0xf]  ;;  %v8651_v59 = vor.u32 %v12236_v27, %v8648_v43 }
 0x137   :  { %6793 = vmatpush.bf16.msrb.mxu2 %v8811_v62  ;;  %v8904_v53 = vld [vmem:[%s19646_s1 + $0x750] sm:$0xf0]  ;;  %v8779_v60 = vor.u32 %v12268_v48, %v8776_v50  ;;  %v12200_v62 = vld [vmem:[%s19646_s1 + $0x424] sm:$0xf]  ;;  %v6541_v50 = vpop.f32.mrf.mxu2 }
 0x138   :  { %6806 = vmatpush.bf16.msrb.mxu3 %v8939_v26  ;;  %v8504_v63 = vld [vmem:[%s19646_s1 + $0x430] sm:$0xf0]  ;;  %v12232_v0 = vld [vmem:[%s19646_s1 + $0x524] sm:$0xf]  ;;  %v8907_v1 = vor.u32 %v12300_v52, %v8904_v53  ;;  %v6554_v53 = vpop.f32.mrf.mxu3 }
 0x139   :  { %6768 = vmatpush.bf16.msrb.mxu0 %v8539_v55  ;;  %v8632_v26 = vld [vmem:[%s19646_s1 + $0x530] sm:$0xf0]  ;;  %v12264_v2 = vld [vmem:[%s19646_s1 + $0x624] sm:$0xf]  ;;  %v8507_v9 = vor.u32 %v12200_v62, %v8504_v63 }
 0x13a   :  { %6781 = vmatpush.bf16.msrb.mxu1 %v8667_v14  ;;  %v8760_v3 = vld [vmem:[%s19646_s1 + $0x630] sm:$0xf0]  ;;  %v12296_v5 = vld [vmem:[%s19646_s1 + $0x724] sm:$0xf]  ;;  %v8635_v14 = vor.u32 %v12232_v0, %v8632_v26 }
 0x13b   :  { %6794 = vmatpush.bf16.msrb.mxu2 %v8795_v17  ;;  %v8888_v8 = vld [vmem:[%s19646_s1 + $0x730] sm:$0xf0]  ;;  %v12196_v10 = vld [vmem:[%s19646_s1 + $0x404] sm:$0xf]  ;;  %v8763_v17 = vor.u32 %v12264_v2, %v8760_v3 }
 0x13c   :  { %6807 = vmatpush.bf16.msrb.mxu3 %v8923_v32  ;;  %v8488_v55 = vld [vmem:[%s19646_s1 + $0x410] sm:$0xf0]  ;;  %v12228_v18 = vld [vmem:[%s19646_s1 + $0x504] sm:$0xf]  ;;  %v8891_v32 = vor.u32 %v12296_v5, %v8888_v8 }
 0x13d   :  { %6769 = vmatpush.bf16.msrb.mxu0 %v8523_v56  ;;  %v8616_v22 = vld [vmem:[%s19646_s1 + $0x510] sm:$0xf0]  ;;  %v12260_v27 = vld [vmem:[%s19646_s1 + $0x604] sm:$0xf]  ;;  %v8491_v54 = vor.u32 %v12196_v10, %v8488_v55 }
 0x13e   :  { %6782 = vmatpush.bf16.msrb.mxu1 %v8651_v59  ;;  %v8744_v40 = vld [vmem:[%s19646_s1 + $0x610] sm:$0xf0]  ;;  %v12292_v43 = vld [vmem:[%s19646_s1 + $0x704] sm:$0xf] }
 0x13f   :  { %6795 = vmatpush.bf16.msrb.mxu2 %v8779_v60  ;;  %v8872_v48 = vld [vmem:[%s19646_s1 + $0x710] sm:$0xf0]  ;;  %v12352_v61 = vld [vmem:[%s19646_s1 + $0x8e4] sm:$0xf]  ;;  %v8619_v60 = vor.u32 %v12228_v18, %v8616_v22  ;;  %v8747_v62 = vor.u32 %v12260_v27, %v8744_v40 }
 0x140   :  { %6808 = vmatpush.bf16.msrb.mxu3 %v8907_v1  ;;  %v9112_v51 = vld [vmem:[%s19646_s1 + $0x8f0] sm:$0xf0]  ;;  %v12384_v52 = vld [vmem:[%s19646_s1 + $0x9e4] sm:$0xf]  ;;  %v8875_v1 = vor.u32 %v12292_v43, %v8872_v48 }
 0x141   :  { %6770 = vmatpush.bf16.msrb.mxu0 %v8507_v9  ;;  %v9240_v56 = vld [vmem:[%s19646_s1 + $0x9f0] sm:$0xf0]  ;;  %v12416_v57 = vld [vmem:[%s19646_s1 + $0xae4] sm:$0xf]  ;;  %v9115_v26 = vor.u32 %v12352_v61, %v9112_v51 }
 0x142   :  { %v9368_v59 = vld [vmem:[%s19646_s1 + $0xaf0] sm:$0xf0]  ;;  %6783 = vmatpush.bf16.msrb.mxu1 %v8635_v14  ;;  %v12448_v63 = vld [vmem:[%s19646_s1 + $0xbe4] sm:$0xf]  ;;  %v9243_v2 = vor.u32 %v12384_v52, %v9240_v56 }
 0x143   :  { %6796 = vmatpush.bf16.msrb.mxu2 %v8763_v17  ;;  %v9496_v0 = vld [vmem:[%s19646_s1 + $0xbf0] sm:$0xf0]  ;;  %v9371_v3 = vor.u32 %v12416_v57, %v9368_v59  ;;  %v12348_v5 = vld [vmem:[%s19646_s1 + $0x8c4] sm:$0xf] }
 0x144   :  { %6809 = vmatpush.bf16.msrb.mxu3 %v8891_v32  ;;  %v9096_v8 = vld [vmem:[%s19646_s1 + $0x8d0] sm:$0xf0]  ;;  %v12380_v9 = vld [vmem:[%s19646_s1 + $0x9c4] sm:$0xf]  ;;  %v9499_v10 = vor.u32 %v12448_v63, %v9496_v0 }
 0x145   :  { %6771 = vmatpush.bf16.msrb.mxu0 %v8491_v54  ;;  %v9224_v55 = vld [vmem:[%s19646_s1 + $0x9d0] sm:$0xf0]  ;;  %v12412_v14 = vld [vmem:[%s19646_s1 + $0xac4] sm:$0xf]  ;;  %v9099_v27 = vor.u32 %v12348_v5, %v9096_v8  ;;  %v15294_v5 = vpop.f32.mrf.mxu0 }
 0x146   :  { %v9352_v17 = vld [vmem:[%s19646_s1 + $0xad0] sm:$0xf0]  ;;  %6784 = vmatpush.bf16.msrb.mxu1 %v8619_v60  ;;  %v12444_v18 = vld [vmem:[%s19646_s1 + $0xbc4] sm:$0xf]  ;;  %v9227_v32 = vor.u32 %v12380_v9, %v9224_v55  ;;  %v15302_v55 = vpop.f32.mrf.mxu1 }
 0x147   :  { %6797 = vmatpush.bf16.msrb.mxu2 %v8747_v62  ;;  %v9480_v22 = vld [vmem:[%s19646_s1 + $0xbd0] sm:$0xf0]  ;;  %v9355_v40 = vor.u32 %v12412_v14, %v9352_v17  ;;  %v12344_v43 = vld [vmem:[%s19646_s1 + $0x8a4] sm:$0xf] }
 0x148   :  { %6810 = vmatpush.bf16.msrb.mxu3 %v8875_v1  ;;  %v9080_v48 = vld [vmem:[%s19646_s1 + $0x8b0] sm:$0xf0]  ;;  %v12376_v50 = vld [vmem:[%s19646_s1 + $0x9a4] sm:$0xf]  ;;  %v9483_v61 = vor.u32 %v12444_v18, %v9480_v22  ;;  %6772 = vmatmul.bf16.vlgmr.msrb.gmra.mxu0 %v13573_v41 }
 0x149   :  { %6816 = vmatpush.bf16.msra.mxu0 %v9115_v26  ;;  %v9208_v51 = vld [vmem:[%s19646_s1 + $0x9b0] sm:$0xf0]  ;;  %v12408_v52 = vld [vmem:[%s19646_s1 + $0xaa4] sm:$0xf]  ;;  %v9083_v57 = vor.u32 %v12344_v43, %v9080_v48  ;;  %6785 = vmatmul.bf16.vlgmr.msrb.gmra.mxu1 %v13577_v44 }
 0x14a   :  { %6829 = vmatpush.bf16.msra.mxu1 %v9243_v2  ;;  %6798 = vmatmul.bf16.vlgmr.msrb.gmra.mxu2 %v13565_v38  ;;  %v9336_v53 = vld [vmem:[%s19646_s1 + $0xab0] sm:$0xf0]  ;;  %v12440_v54 = vld [vmem:[%s19646_s1 + $0xba4] sm:$0xf]  ;;  %v9211_v59 = vor.u32 %v12376_v50, %v9208_v51 }
 0x14b   :  { %6842 = vmatpush.bf16.msra.mxu2 %v9371_v3  ;;  %6811 = vmatmul.bf16.vlgmr.msrb.gmra.mxu3 %v13575_v42  ;;  %v9464_v56 = vld [vmem:[%s19646_s1 + $0xbb0] sm:$0xf0]  ;;  %v9339_v60 = vor.u32 %v12408_v52, %v9336_v53  ;;  %v12340_v62 = vld [vmem:[%s19646_s1 + $0x884] sm:$0xf] }
 0x14c   :  { %6855 = vmatpush.bf16.msra.mxu3 %v9499_v10  ;;  %v9064_v63 = vld [vmem:[%s19646_s1 + $0x890] sm:$0xf0]  ;;  %v12372_v0 = vld [vmem:[%s19646_s1 + $0x984] sm:$0xf]  ;;  %v9467_v1 = vor.u32 %v12440_v54, %v9464_v56 }
 0x14d   :  { %6817 = vmatpush.bf16.msra.mxu0 %v9099_v27  ;;  %v9192_v26 = vld [vmem:[%s19646_s1 + $0x990] sm:$0xf0]  ;;  %v12404_v2 = vld [vmem:[%s19646_s1 + $0xa84] sm:$0xf]  ;;  %v9067_v10 = vor.u32 %v12340_v62, %v9064_v63 }
 0x14e   :  { %6830 = vmatpush.bf16.msra.mxu1 %v9227_v32  ;;  %v9320_v3 = vld [vmem:[%s19646_s1 + $0xa90] sm:$0xf0]  ;;  %v12436_v8 = vld [vmem:[%s19646_s1 + $0xb84] sm:$0xf]  ;;  %v9195_v14 = vor.u32 %v12372_v0, %v9192_v26 }
 0x14f   :  { %6843 = vmatpush.bf16.msra.mxu2 %v9355_v40  ;;  %v9448_v9 = vld [vmem:[%s19646_s1 + $0xb90] sm:$0xf0]  ;;  %v9323_v17 = vor.u32 %v12404_v2, %v9320_v3  ;;  %v12336_v18 = vld [vmem:[%s19646_s1 + $0x864] sm:$0xf]  ;;  %v6567_v3 = vpop.f32.mrf.mxu0 }
 0x150   :  { %6856 = vmatpush.bf16.msra.mxu3 %v9483_v61  ;;  %v9048_v22 = vld [vmem:[%s19646_s1 + $0x870] sm:$0xf0]  ;;  %v12368_v27 = vld [vmem:[%s19646_s1 + $0x964] sm:$0xf]  ;;  %v9451_v32 = vor.u32 %v12436_v8, %v9448_v9  ;;  %v6580_v9 = vpop.f32.mrf.mxu1 }
 0x151   :  { %6818 = vmatpush.bf16.msra.mxu0 %v9083_v57  ;;  %v9176_v40 = vld [vmem:[%s19646_s1 + $0x970] sm:$0xf0]  ;;  %v12400_v43 = vld [vmem:[%s19646_s1 + $0xa64] sm:$0xf]  ;;  %v9051_v51 = vor.u32 %v12336_v18, %v9048_v22 }
 0x152   :  { %6831 = vmatpush.bf16.msra.mxu1 %v9211_v59  ;;  %v9304_v48 = vld [vmem:[%s19646_s1 + $0xa70] sm:$0xf0]  ;;  %v12432_v50 = vld [vmem:[%s19646_s1 + $0xb64] sm:$0xf]  ;;  %v9179_v52 = vor.u32 %v12368_v27, %v9176_v40 }
 0x153   :  { %6844 = vmatpush.bf16.msra.mxu2 %v9339_v60  ;;  %v9432_v61 = vld [vmem:[%s19646_s1 + $0xb70] sm:$0xf0]  ;;  %v9307_v53 = vor.u32 %v12400_v43, %v9304_v48  ;;  %v12332_v54 = vld [vmem:[%s19646_s1 + $0x844] sm:$0xf]  ;;  %v15337_v60 = vpop.f32.mrf.mxu2 }
 0x154   :  { %6857 = vmatpush.bf16.msra.mxu3 %v9467_v1  ;;  %v9032_v56 = vld [vmem:[%s19646_s1 + $0x850] sm:$0xf0]  ;;  %v12364_v57 = vld [vmem:[%s19646_s1 + $0x944] sm:$0xf]  ;;  %v9435_v59 = vor.u32 %v12432_v50, %v9432_v61  ;;  %v15348_v1 = vpop.f32.mrf.mxu3 }
 0x155   :  { %6819 = vmatpush.bf16.msra.mxu0 %v9067_v10  ;;  %v9160_v62 = vld [vmem:[%s19646_s1 + $0x950] sm:$0xf0]  ;;  %v12396_v63 = vld [vmem:[%s19646_s1 + $0xa44] sm:$0xf]  ;;  %v9035_v8 = vor.u32 %v12332_v54, %v9032_v56 }
 0x156   :  { %6832 = vmatpush.bf16.msra.mxu1 %v9195_v14  ;;  %v9288_v0 = vld [vmem:[%s19646_s1 + $0xa50] sm:$0xf0]  ;;  %v12428_v26 = vld [vmem:[%s19646_s1 + $0xb44] sm:$0xf]  ;;  %v9163_v10 = vor.u32 %v12364_v57, %v9160_v62 }
 0x157   :  { %6845 = vmatpush.bf16.msra.mxu2 %v9323_v17  ;;  %v9416_v2 = vld [vmem:[%s19646_s1 + $0xb50] sm:$0xf0]  ;;  %v9291_v14 = vor.u32 %v12396_v63, %v9288_v0  ;;  %v12328_v17 = vld [vmem:[%s19646_s1 + $0x824] sm:$0xf] }
 0x158   :  { %6858 = vmatpush.bf16.msra.mxu3 %v9451_v32  ;;  %v9016_v18 = vld [vmem:[%s19646_s1 + $0x830] sm:$0xf0]  ;;  %v12360_v22 = vld [vmem:[%s19646_s1 + $0x924] sm:$0xf]  ;;  %v9419_v27 = vor.u32 %v12428_v26, %v9416_v2 }
 0x159   :  { %6820 = vmatpush.bf16.msra.mxu0 %v9051_v51  ;;  %v9144_v32 = vld [vmem:[%s19646_s1 + $0x930] sm:$0xf0]  ;;  %v12392_v40 = vld [vmem:[%s19646_s1 + $0xa24] sm:$0xf]  ;;  %v9019_v61 = vor.u32 %v12328_v17, %v9016_v18 }
 0x15a   :  { %6833 = vmatpush.bf16.msra.mxu1 %v9179_v52  ;;  %v9272_v43 = vld [vmem:[%s19646_s1 + $0xa30] sm:$0xf0]  ;;  %v12424_v48 = vld [vmem:[%s19646_s1 + $0xb24] sm:$0xf] }
 0x15b   :  { %6846 = vmatpush.bf16.msra.mxu2 %v9307_v53  ;;  %v9400_v50 = vld [vmem:[%s19646_s1 + $0xb30] sm:$0xf0]  ;;  %v12324_v51 = vld [vmem:[%s19646_s1 + $0x804] sm:$0xf]  ;;  %v9147_v53 = vor.u32 %v12360_v22, %v9144_v32  ;;  %v9275_v54 = vor.u32 %v12392_v40, %v9272_v43  ;;  %v6593_v2 = vpop.f32.mrf.mxu2 }
 0x15c   :  { %6859 = vmatpush.bf16.msra.mxu3 %v9435_v59  ;;  %v9000_v52 = vld [vmem:[%s19646_s1 + $0x810] sm:$0xf0]  ;;  %v12356_v56 = vld [vmem:[%s19646_s1 + $0x904] sm:$0xf]  ;;  %v9403_v62 = vor.u32 %v12424_v48, %v9400_v50 }
 0x15d   :  { %6821 = vmatpush.bf16.msra.mxu0 %v9035_v8  ;;  %v9128_v57 = vld [vmem:[%s19646_s1 + $0x910] sm:$0xf0]  ;;  %v12388_v59 = vld [vmem:[%s19646_s1 + $0xa04] sm:$0xf] }
 0x15e   :  { %6834 = vmatpush.bf16.msra.mxu1 %v9163_v10  ;;  %v9256_v63 = vld [vmem:[%s19646_s1 + $0xa10] sm:$0xf0]  ;;  %v12420_v0 = vld [vmem:[%s19646_s1 + $0xb04] sm:$0xf]  ;;  %v6606_v10 = vpop.f32.mrf.mxu3 }
 0x15f   :  { %6847 = vmatpush.bf16.msra.mxu2 %v9291_v14  ;;  %v9384_v26 = vld [vmem:[%s19646_s1 + $0xb10] sm:$0xf0]  ;;  %v12480_v3 = vld [vmem:[%s19646_s1 + $0xce4] sm:$0xf]  ;;  %v9003_v14 = vor.u32 %v12324_v51, %v9000_v52  ;;  %v9259_v32 = vor.u32 %v12388_v59, %v9256_v63 }
 0x160   :  { %6860 = vmatpush.bf16.msra.mxu3 %v9419_v27  ;;  %v9624_v8 = vld [vmem:[%s19646_s1 + $0xcf0] sm:$0xf0]  ;;  %v12512_v9 = vld [vmem:[%s19646_s1 + $0xde4] sm:$0xf]  ;;  %v9131_v27 = vor.u32 %v12356_v56, %v9128_v57  ;;  %v9387_v48 = vor.u32 %v12420_v0, %v9384_v26 }
 0x161   :  { %6822 = vmatpush.bf16.msra.mxu0 %v9019_v61  ;;  %v9752_v17 = vld [vmem:[%s19646_s1 + $0xdf0] sm:$0xf0]  ;;  %v12544_v18 = vld [vmem:[%s19646_s1 + $0xee4] sm:$0xf]  ;;  %v9627_v50 = vor.u32 %v12480_v3, %v9624_v8 }
 0x162   :  { %v9880_v22 = vld [vmem:[%s19646_s1 + $0xef0] sm:$0xf0]  ;;  %6835 = vmatpush.bf16.msra.mxu1 %v9147_v53  ;;  %v12576_v40 = vld [vmem:[%s19646_s1 + $0xfe4] sm:$0xf]  ;;  %v9755_v61 = vor.u32 %v12512_v9, %v9752_v17 }
 0x163   :  { %6848 = vmatpush.bf16.msra.mxu2 %v9275_v54  ;;  %v10008_v43 = vld [vmem:[%s19646_s1 + $0xff0] sm:$0xf0]  ;;  %v9883_v51 = vor.u32 %v12544_v18, %v9880_v22  ;;  %v12476_v52 = vld [vmem:[%s19646_s1 + $0xcc4] sm:$0xf] }
 0x164   :  { %6861 = vmatpush.bf16.msra.mxu3 %v9403_v62  ;;  %v9608_v53 = vld [vmem:[%s19646_s1 + $0xcd0] sm:$0xf0]  ;;  %v12508_v54 = vld [vmem:[%s19646_s1 + $0xdc4] sm:$0xf]  ;;  %v10011_v56 = vor.u32 %v12576_v40, %v10008_v43 }
 0x165   :  { %6823 = vmatpush.bf16.msra.mxu0 %v9003_v14  ;;  %v9736_v57 = vld [vmem:[%s19646_s1 + $0xdd0] sm:$0xf0]  ;;  %v12540_v59 = vld [vmem:[%s19646_s1 + $0xec4] sm:$0xf]  ;;  %v9611_v26 = vor.u32 %v12476_v52, %v9608_v53 }
 0x166   :  { %v9864_v62 = vld [vmem:[%s19646_s1 + $0xed0] sm:$0xf0]  ;;  %6836 = vmatpush.bf16.msra.mxu1 %v9131_v27  ;;  %v12572_v63 = vld [vmem:[%s19646_s1 + $0xfc4] sm:$0xf]  ;;  %v9739_v2 = vor.u32 %v12508_v54, %v9736_v57 }
 0x167   :  { %6849 = vmatpush.bf16.msra.mxu2 %v9259_v32  ;;  %v9992_v0 = vld [vmem:[%s19646_s1 + $0xfd0] sm:$0xf0]  ;;  %v9867_v3 = vor.u32 %v12540_v59, %v9864_v62  ;;  %v12472_v8 = vld [vmem:[%s19646_s1 + $0xca4] sm:$0xf]  ;;  %v15498_v57 = vpop.f32.mrf.mxu0 }
 0x168   :  { %6862 = vmatpush.bf16.msra.mxu3 %v9387_v48  ;;  %v9592_v9 = vld [vmem:[%s19646_s1 + $0xcb0] sm:$0xf0]  ;;  %v12504_v10 = vld [vmem:[%s19646_s1 + $0xda4] sm:$0xf]  ;;  %6824 = vmatmul.bf16.vlgmr.msra.gmra.mxu0 %v13766_v25  ;;  %v9995_v14 = vor.u32 %v12572_v63, %v9992_v0  ;;  %v15506_v0 = vpop.f32.mrf.mxu1 }
 0x169   :  { %6868 = vmatpush.bf16.msrb.mxu0 %v9627_v50  ;;  %v9720_v17 = vld [vmem:[%s19646_s1 + $0xdb0] sm:$0xf0]  ;;  %v12536_v18 = vld [vmem:[%s19646_s1 + $0xea4] sm:$0xf]  ;;  %6837 = vmatmul.bf16.vlgmr.msra.gmra.mxu1 %v13779_v30  ;;  %v9595_v40 = vor.u32 %v12472_v8, %v9592_v9 }
 0x16a   :  { %6881 = vmatpush.bf16.msrb.mxu1 %v9755_v61  ;;  %v9848_v22 = vld [vmem:[%s19646_s1 + $0xeb0] sm:$0xf0]  ;;  %6850 = vmatmul.bf16.vlgmr.msra.gmra.mxu2 %v13777_v29  ;;  %v12568_v27 = vld [vmem:[%s19646_s1 + $0xfa4] sm:$0xf]  ;;  %v9723_v43 = vor.u32 %v12504_v10, %v9720_v17 }
 0x16b   :  { %6894 = vmatpush.bf16.msrb.mxu2 %v9883_v51  ;;  %v9976_v32 = vld [vmem:[%s19646_s1 + $0xfb0] sm:$0xf0]  ;;  %6863 = vmatmul.bf16.vlgmr.msra.gmra.mxu3 %v13787_v33  ;;  %v9851_v48 = vor.u32 %v12536_v18, %v9848_v22  ;;  %v12468_v50 = vld [vmem:[%s19646_s1 + $0xc84] sm:$0xf] }
 0x16c   :  { %6907 = vmatpush.bf16.msrb.mxu3 %v10011_v56  ;;  %v9576_v61 = vld [vmem:[%s19646_s1 + $0xc90] sm:$0xf0]  ;;  %v12500_v51 = vld [vmem:[%s19646_s1 + $0xd84] sm:$0xf]  ;;  %v9979_v52 = vor.u32 %v12568_v27, %v9976_v32 }
 0x16d   :  { %6869 = vmatpush.bf16.msrb.mxu0 %v9611_v26  ;;  %v9704_v53 = vld [vmem:[%s19646_s1 + $0xd90] sm:$0xf0]  ;;  %v12532_v54 = vld [vmem:[%s19646_s1 + $0xe84] sm:$0xf]  ;;  %v9579_v63 = vor.u32 %v12468_v50, %v9576_v61 }
 0x16e   :  { %6882 = vmatpush.bf16.msrb.mxu1 %v9739_v2  ;;  %v9832_v56 = vld [vmem:[%s19646_s1 + $0xe90] sm:$0xf0]  ;;  %v12564_v59 = vld [vmem:[%s19646_s1 + $0xf84] sm:$0xf]  ;;  %v9707_v26 = vor.u32 %v12500_v51, %v9704_v53 }
 0x16f   :  { %6895 = vmatpush.bf16.msrb.mxu2 %v9867_v3  ;;  %v9960_v62 = vld [vmem:[%s19646_s1 + $0xf90] sm:$0xf0]  ;;  %v9835_v2 = vor.u32 %v12532_v54, %v9832_v56  ;;  %v12464_v3 = vld [vmem:[%s19646_s1 + $0xc64] sm:$0xf] }
 0x170   :  { %6908 = vmatpush.bf16.msrb.mxu3 %v9995_v14  ;;  %v9560_v8 = vld [vmem:[%s19646_s1 + $0xc70] sm:$0xf0]  ;;  %v12496_v9 = vld [vmem:[%s19646_s1 + $0xd64] sm:$0xf]  ;;  %v9963_v10 = vor.u32 %v12564_v59, %v9960_v62  ;;  %v6566_v59 = vadd.f32 %v15294_v5, %v15150_v58  ;;  %v15554_v62 = vpop.f32.mrf.mxu3 }
 0x171   :  { %6870 = vmatpush.bf16.msrb.mxu0 %v9595_v40  ;;  %v9688_v14 = vld [vmem:[%s19646_s1 + $0xd70] sm:$0xf0]  ;;  %v12528_v17 = vld [vmem:[%s19646_s1 + $0xe64] sm:$0xf]  ;;  %v9563_v32 = vor.u32 %v12464_v3, %v9560_v8  ;;  %v6632_v8 = vpop.f32.mrf.mxu1 }
 0x172   :  { %6883 = vmatpush.bf16.msrb.mxu1 %v9723_v43  ;;  %v9816_v18 = vld [vmem:[%s19646_s1 + $0xe70] sm:$0xf0]  ;;  %v12560_v22 = vld [vmem:[%s19646_s1 + $0xf64] sm:$0xf]  ;;  %v9691_v40 = vor.u32 %v12496_v9, %v9688_v14 }
 0x173   :  { %6896 = vmatpush.bf16.msrb.mxu2 %v9851_v48  ;;  %v9944_v27 = vld [vmem:[%s19646_s1 + $0xf70] sm:$0xf0]  ;;  %v9819_v43 = vor.u32 %v12528_v17, %v9816_v18  ;;  %v12460_v48 = vld [vmem:[%s19646_s1 + $0xc44] sm:$0xf] }
 0x174   :  { %6909 = vmatpush.bf16.msrb.mxu3 %v9979_v52  ;;  %v9544_v50 = vld [vmem:[%s19646_s1 + $0xc50] sm:$0xf0]  ;;  %v12492_v61 = vld [vmem:[%s19646_s1 + $0xd44] sm:$0xf]  ;;  %v9947_v51 = vor.u32 %v12560_v22, %v9944_v27  ;;  %v15541_v52 = vpop.f32.mrf.mxu2 }
 0x175   :  { %6871 = vmatpush.bf16.msrb.mxu0 %v9579_v63  ;;  %v9672_v53 = vld [vmem:[%s19646_s1 + $0xd50] sm:$0xf0]  ;;  %v12524_v54 = vld [vmem:[%s19646_s1 + $0xe44] sm:$0xf]  ;;  %v9547_v3 = vor.u32 %v12460_v48, %v9544_v50 }
 0x176   :  { %6884 = vmatpush.bf16.msrb.mxu1 %v9707_v26  ;;  %v9800_v56 = vld [vmem:[%s19646_s1 + $0xe50] sm:$0xf0]  ;;  %v12556_v63 = vld [vmem:[%s19646_s1 + $0xf44] sm:$0xf]  ;;  %v9675_v9 = vor.u32 %v12492_v61, %v9672_v53 }
 0x177   :  { %6897 = vmatpush.bf16.msrb.mxu2 %v9835_v2  ;;  %v9928_v26 = vld [vmem:[%s19646_s1 + $0xf50] sm:$0xf0]  ;;  %v6619_v2 = vpop.f32.mrf.mxu0  ;;  %v12456_v58 = vld [vmem:[%s19646_s1 + $0xc24] sm:$0xf] }
 0x178   :  { %6910 = vmatpush.bf16.msrb.mxu3 %v9963_v10  ;;  %v9803_v10 = vor.u32 %v12524_v54, %v9800_v56  ;;  %v9528_v5 = vld [vmem:[%s19646_s1 + $0xc30] sm:$0xf0]  ;;  %v12488_v14 = vld [vmem:[%s19646_s1 + $0xd24] sm:$0xf]  ;;  %v9931_v17 = vor.u32 %v12556_v63, %v9928_v26 }
 0x179   :  { %6872 = vmatpush.bf16.msrb.mxu0 %v9563_v32  ;;  %v9656_v18 = vld [vmem:[%s19646_s1 + $0xd30] sm:$0xf0]  ;;  %v12520_v22 = vld [vmem:[%s19646_s1 + $0xe24] sm:$0xf]  ;;  %v6579_v32 = vadd.f32 %v15302_v55, %v6566_v59  ;;  %v9531_v48 = vor.u32 %v12456_v58, %v9528_v5  ;;  %v6658_v58 = vpop.f32.mrf.mxu3 }
 0x17a   :  { %6885 = vmatpush.bf16.msrb.mxu1 %v9691_v40  ;;  %v9784_v27 = vld [vmem:[%s19646_s1 + $0xe30] sm:$0xf0]  ;;  %v12552_v40 = vld [vmem:[%s19646_s1 + $0xf24] sm:$0xf] }
 0x17b   :  { %6898 = vmatpush.bf16.msrb.mxu2 %v9819_v43  ;;  %v9912_v43 = vld [vmem:[%s19646_s1 + $0xf30] sm:$0xf0]  ;;  %v12452_v50 = vld [vmem:[%s19646_s1 + $0xc04] sm:$0xf]  ;;  %v6592_v55 = vadd.f32 %v15337_v60, %v6579_v32  ;;  %v9787_v53 = vor.u32 %v12520_v22, %v9784_v27 }
 0x17c   :  { %6911 = vmatpush.bf16.msrb.mxu3 %v9947_v51  ;;  %v9512_v61 = vld [vmem:[%s19646_s1 + $0xc10] sm:$0xf0]  ;;  %v9659_v51 = vor.u32 %v12488_v14, %v9656_v18  ;;  %v12484_v54 = vld [vmem:[%s19646_s1 + $0xd04] sm:$0xf]  ;;  %v9915_v63 = vor.u32 %v12552_v40, %v9912_v43 }
 0x17d   :  { %6873 = vmatpush.bf16.msrb.mxu0 %v9547_v3  ;;  %v9640_v56 = vld [vmem:[%s19646_s1 + $0xd10] sm:$0xf0]  ;;  %v12516_v59 = vld [vmem:[%s19646_s1 + $0xe04] sm:$0xf]  ;;  %v6645_v3 = vpop.f32.mrf.mxu2  ;;  %v9515_v5 = vor.u32 %v12452_v50, %v9512_v61  ;;  %v6605_v22 = vadd.f32 %v15348_v1, %v6592_v55 }
 0x17e   :  { %6886 = vmatpush.bf16.msrb.mxu1 %v9675_v9  ;;  %v9768_v60 = vld [vmem:[%s19646_s1 + $0xe10] sm:$0xf0]  ;;  %v12548_v26 = vld [vmem:[%s19646_s1 + $0xf04] sm:$0xf]  ;;  %v9643_v27 = vor.u32 %v12484_v54, %v9640_v56 }
 0x17f   :  { %6899 = vmatpush.bf16.msrb.mxu2 %v9803_v10  ;;  %v9896_v2 = vld [vmem:[%s19646_s1 + $0xf10] sm:$0xf0]  ;;  %v12608_v8 = vld [vmem:[%s19646_s1 + $0x10e4] sm:$0xf]  ;;  %v9771_v32 = vor.u32 %v12516_v59, %v9768_v60  ;;  %v6618_v61 = vadd.f32 %v15498_v57, %v6605_v22 }
 0x180   :  { %6912 = vmatpush.bf16.msrb.mxu3 %v9931_v17  ;;  %v10136_v9 = vld [vmem:[%s19646_s1 + $0x10f0] sm:$0xf0]  ;;  %v12640_v10 = vld [vmem:[%s19646_s1 + $0x11e4] sm:$0xf] }
 0x181   :  { %6874 = vmatpush.bf16.msrb.mxu0 %v9531_v48  ;;  %v10264_v14 = vld [vmem:[%s19646_s1 + $0x11f0] sm:$0xf0]  ;;  %v12672_v17 = vld [vmem:[%s19646_s1 + $0x12e4] sm:$0xf]  ;;  %v9899_v48 = vor.u32 %v12548_v26, %v9896_v2  ;;  %v10139_v50 = vor.u32 %v12608_v8, %v10136_v9  ;;  %v6631_v26 = vadd.f32 %v15506_v0, %v6618_v61 }
 0x182   :  { %v10392_v18 = vld [vmem:[%s19646_s1 + $0x12f0] sm:$0xf0]  ;;  %6887 = vmatpush.bf16.msrb.mxu1 %v9659_v51  ;;  %v12704_v40 = vld [vmem:[%s19646_s1 + $0x13e4] sm:$0xf]  ;;  %v10267_v3 = vor.u32 %v12640_v10, %v10264_v14 }
 0x183   :  { %6900 = vmatpush.bf16.msrb.mxu2 %v9787_v53  ;;  %v10520_v43 = vld [vmem:[%s19646_s1 + $0x13f0] sm:$0xf0]  ;;  %v10395_v58 = vor.u32 %v12672_v17, %v10392_v18  ;;  %v12604_v1 = vld [vmem:[%s19646_s1 + $0x10c4] sm:$0xf]  ;;  %v6644_v22 = vadd.f32 %v15541_v52, %v6631_v26 }
 0x184   :  { %6913 = vmatpush.bf16.msrb.mxu3 %v9915_v63  ;;  %v10120_v55 = vld [vmem:[%s19646_s1 + $0x10d0] sm:$0xf0]  ;;  %v12636_v51 = vld [vmem:[%s19646_s1 + $0x11c4] sm:$0xf]  ;;  %v10523_v53 = vor.u32 %v12704_v40, %v10520_v43 }
 0x185   :  { %6875 = vmatpush.bf16.msrb.mxu0 %v9515_v5  ;;  %v10248_v57 = vld [vmem:[%s19646_s1 + $0x11d0] sm:$0xf0]  ;;  %v12668_v54 = vld [vmem:[%s19646_s1 + $0x12c4] sm:$0xf]  ;;  %v10123_v60 = vor.u32 %v12604_v1, %v10120_v55 }
 0x186   :  { %v10376_v56 = vld [vmem:[%s19646_s1 + $0x12d0] sm:$0xf0]  ;;  %6888 = vmatpush.bf16.msrb.mxu1 %v9643_v27  ;;  %v12700_v59 = vld [vmem:[%s19646_s1 + $0x13c4] sm:$0xf]  ;;  %v10251_v2 = vor.u32 %v12636_v51, %v10248_v57  ;;  %v6657_v51 = vadd.f32 %v15554_v62, %v6644_v22 }
 0x187   :  { %6901 = vmatpush.bf16.msrb.mxu2 %v9771_v32  ;;  %v10504_v63 = vld [vmem:[%s19646_s1 + $0x13d0] sm:$0xf0]  ;;  %v10379_v8 = vor.u32 %v12668_v54, %v10376_v56  ;;  %v12600_v9 = vld [vmem:[%s19646_s1 + $0x10a4] sm:$0xf] }
 0x188   :  { %6914 = vmatpush.bf16.msrb.mxu3 %v9899_v48  ;;  %v10104_v10 = vld [vmem:[%s19646_s1 + $0x10b0] sm:$0xf0]  ;;  %v12632_v5 = vld [vmem:[%s19646_s1 + $0x11a4] sm:$0xf]  ;;  %6876 = vmatmul.bf16.vlgmr.msrb.gmra.mxu0 %v13976_v23  ;;  %v10507_v0 = vor.u32 %v12700_v59, %v10504_v63  ;;  %v6682_v59 = vpop.f32.mrf.mxu1 }
 0x189   :  { %6920 = vmatpush.bf16.msra.mxu0 %v10139_v50  ;;  %v10232_v14 = vld [vmem:[%s19646_s1 + $0x11b0] sm:$0xf0]  ;;  %v12664_v17 = vld [vmem:[%s19646_s1 + $0x12a4] sm:$0xf]  ;;  %6889 = vmatmul.bf16.vlgmr.msrb.gmra.mxu1 %v13989_v31  ;;  %v10107_v40 = vor.u32 %v12600_v9, %v10104_v10 }
 0x18a   :  { %6933 = vmatpush.bf16.msra.mxu1 %v10267_v3  ;;  %v10360_v18 = vld [vmem:[%s19646_s1 + $0x12b0] sm:$0xf0]  ;;  %6902 = vmatmul.bf16.vlgmr.msrb.gmra.mxu2 %v13987_v28  ;;  %v12696_v27 = vld [vmem:[%s19646_s1 + $0x13a4] sm:$0xf]  ;;  %v10235_v43 = vor.u32 %v12632_v5, %v10232_v14 }
 0x18b   :  { %6946 = vmatpush.bf16.msra.mxu2 %v10395_v58  ;;  %v10488_v32 = vld [vmem:[%s19646_s1 + $0x13b0] sm:$0xf0]  ;;  %6915 = vmatmul.bf16.vlgmr.msrb.gmra.mxu3 %v13997_v35  ;;  %v10363_v52 = vor.u32 %v12664_v17, %v10360_v18  ;;  %v12596_v48 = vld [vmem:[%s19646_s1 + $0x1084] sm:$0xf] }
 0x18c   :  { %6959 = vmatpush.bf16.msra.mxu3 %v10523_v53  ;;  %v10088_v50 = vld [vmem:[%s19646_s1 + $0x1090] sm:$0xf0]  ;;  %v12628_v61 = vld [vmem:[%s19646_s1 + $0x1184] sm:$0xf]  ;;  %v10491_v3 = vor.u32 %v12696_v27, %v10488_v32  ;;  %v6669_v53 = vpop.f32.mrf.mxu0 }
 0x18d   :  { %6921 = vmatpush.bf16.msra.mxu0 %v10123_v60  ;;  %v10216_v58 = vld [vmem:[%s19646_s1 + $0x1190] sm:$0xf0]  ;;  %v12660_v1 = vld [vmem:[%s19646_s1 + $0x1284] sm:$0xf]  ;;  %v10091_v56 = vor.u32 %v12596_v48, %v10088_v50  ;;  %v6670_v63 = vadd.f32 %v6669_v53, %v6657_v51  ;;  %v6695_v50 = vpop.f32.mrf.mxu2 }
 0x18e   :  { %6934 = vmatpush.bf16.msra.mxu1 %v10251_v2  ;;  %v10344_v55 = vld [vmem:[%s19646_s1 + $0x1290] sm:$0xf0]  ;;  %v12692_v57 = vld [vmem:[%s19646_s1 + $0x1384] sm:$0xf]  ;;  %v10219_v60 = vor.u32 %v12628_v61, %v10216_v58 }
 0x18f   :  { %6947 = vmatpush.bf16.msra.mxu2 %v10379_v8  ;;  %v10472_v54 = vld [vmem:[%s19646_s1 + $0x1390] sm:$0xf0]  ;;  %v10347_v26 = vor.u32 %v12660_v1, %v10344_v55  ;;  %v12592_v62 = vld [vmem:[%s19646_s1 + $0x1064] sm:$0xf]  ;;  %v6683_v22 = vadd.f32 %v6682_v59, %v6670_v63  ;;  %v6708_v55 = vpop.f32.mrf.mxu3 }
 0x190   :  { %6960 = vmatpush.bf16.msra.mxu3 %v10507_v0  ;;  %v10072_v2 = vld [vmem:[%s19646_s1 + $0x1070] sm:$0xf0]  ;;  %v12624_v8 = vld [vmem:[%s19646_s1 + $0x1164] sm:$0xf]  ;;  %v10475_v9 = vor.u32 %v12692_v57, %v10472_v54 }
 0x191   :  { %6922 = vmatpush.bf16.msra.mxu0 %v10107_v40  ;;  %v10200_v10 = vld [vmem:[%s19646_s1 + $0x1170] sm:$0xf0]  ;;  %v12656_v5 = vld [vmem:[%s19646_s1 + $0x1264] sm:$0xf]  ;;  %v10075_v18 = vor.u32 %v12592_v62, %v10072_v2  ;;  %v6696_v1 = vadd.f32 %v6695_v50, %v6683_v22 }
 0x192   :  { %6935 = vmatpush.bf16.msra.mxu1 %v10235_v43  ;;  %v10328_v0 = vld [vmem:[%s19646_s1 + $0x1270] sm:$0xf0]  ;;  %v12688_v14 = vld [vmem:[%s19646_s1 + $0x1364] sm:$0xf]  ;;  %v10203_v27 = vor.u32 %v12624_v8, %v10200_v10 }
 0x193   :  { %6948 = vmatpush.bf16.msra.mxu2 %v10363_v52  ;;  %v10456_v17 = vld [vmem:[%s19646_s1 + $0x1370] sm:$0xf0]  ;;  %v10331_v32 = vor.u32 %v12656_v5, %v10328_v0  ;;  %v12588_v40 = vld [vmem:[%s19646_s1 + $0x1044] sm:$0xf]  ;;  %v6709_v59 = vadd.f32 %v6708_v55, %v6696_v1 }
 0x194   :  { %6961 = vmatpush.bf16.msra.mxu3 %v10491_v3  ;;  %v10056_v43 = vld [vmem:[%s19646_s1 + $0x1050] sm:$0xf0]  ;;  %v12620_v52 = vld [vmem:[%s19646_s1 + $0x1144] sm:$0xf]  ;;  %v10459_v48 = vor.u32 %v12688_v14, %v10456_v17  ;;  %v6671_v57 = vpop.f32.mrf.mxu0 }
 0x195   :  { %6923 = vmatpush.bf16.msra.mxu0 %v10091_v56  ;;  %v10184_v61 = vld [vmem:[%s19646_s1 + $0x1150] sm:$0xf0]  ;;  %v12652_v3 = vld [vmem:[%s19646_s1 + $0x1244] sm:$0xf]  ;;  %v10059_v54 = vor.u32 %v12588_v40, %v10056_v43  ;;  %v6684_v56 = vpop.f32.mrf.mxu1  ;;  %v7960_v0 = vmax.f32 %v6709_v59, 0.0  ;;  %v6697_v1 = vpop.f32.mrf.mxu2 }
 0x196   :  { %6936 = vmatpush.bf16.msra.mxu1 %v10219_v60  ;;  %v10312_v58 = vld [vmem:[%s19646_s1 + $0x1250] sm:$0xf0]  ;;  %v12684_v51 = vld [vmem:[%s19646_s1 + $0x1344] sm:$0xf]  ;;  %v10187_v63 = vor.u32 %v12620_v52, %v10184_v61 }
 0x197   :  { %6949 = vmatpush.bf16.msra.mxu2 %v10347_v26  ;;  %v10440_v53 = vld [vmem:[%s19646_s1 + $0x1350] sm:$0xf0]  ;;  %v10315_v60 = vor.u32 %v12652_v3, %v10312_v58  ;;  %v12584_v26 = vld [vmem:[%s19646_s1 + $0x1024] sm:$0xf]  ;;  %7964 = vst [vmem:[%s19649_s3] sm:$0xff] %v7960_v0  ;;  %v6710_v57 = vpop.f32.mrf.mxu3 }
 0x198   :  { %6962 = vmatpush.bf16.msra.mxu3 %v10475_v9  ;;  %v10040_v62 = vld [vmem:[%s19646_s1 + $0x1030] sm:$0xf0]  ;;  %v12616_v2 = vld [vmem:[%s19646_s1 + $0x1124] sm:$0xf]  ;;  %v10443_v8 = vor.u32 %v12684_v51, %v10440_v53 }
 0x199   :  { %6924 = vmatpush.bf16.msra.mxu0 %v10075_v18  ;;  %v10168_v9 = vld [vmem:[%s19646_s1 + $0x1130] sm:$0xf0]  ;;  %v12648_v10 = vld [vmem:[%s19646_s1 + $0x1224] sm:$0xf]  ;;  %v10043_v18 = vor.u32 %v12584_v26, %v10040_v62 }
 0x19a   :  { %6937 = vmatpush.bf16.msra.mxu1 %v10203_v27  ;;  %v10296_v5 = vld [vmem:[%s19646_s1 + $0x1230] sm:$0xf0]  ;;  %v12680_v14 = vld [vmem:[%s19646_s1 + $0x1324] sm:$0xf] }
 0x19b   :  { %6950 = vmatpush.bf16.msra.mxu2 %v10331_v32  ;;  %v10424_v17 = vld [vmem:[%s19646_s1 + $0x1330] sm:$0xf0]  ;;  %v12580_v22 = vld [vmem:[%s19646_s1 + $0x1004] sm:$0xf]  ;;  %v10171_v32 = vor.u32 %v12616_v2, %v10168_v9  ;;  %v10299_v40 = vor.u32 %v12648_v10, %v10296_v5 }
 0x19c   :  { %6963 = vmatpush.bf16.msra.mxu3 %v10459_v48  ;;  %v10024_v27 = vld [vmem:[%s19646_s1 + $0x1010] sm:$0xf0]  ;;  %v12612_v43 = vld [vmem:[%s19646_s1 + $0x1104] sm:$0xf]  ;;  %v10427_v50 = vor.u32 %v12680_v14, %v10424_v17 }
 0x19d   :  { %6925 = vmatpush.bf16.msra.mxu0 %v10059_v54  ;;  %v10152_v52 = vld [vmem:[%s19646_s1 + $0x1110] sm:$0xf0]  ;;  %v12644_v48 = vld [vmem:[%s19646_s1 + $0x1204] sm:$0xf]  ;;  %v10027_v54 = vor.u32 %v12580_v22, %v10024_v27 }
 0x19e   :  { %6938 = vmatpush.bf16.msra.mxu1 %v10187_v63  ;;  %v10280_v61 = vld [vmem:[%s19646_s1 + $0x1210] sm:$0xf0]  ;;  %v12676_v3 = vld [vmem:[%s19646_s1 + $0x1304] sm:$0xf] }
 0x19f   :  { %6951 = vmatpush.bf16.msra.mxu2 %v10315_v60  ;;  %v10408_v58 = vld [vmem:[%s19646_s1 + $0x1310] sm:$0xf0]  ;;  %v12736_v55 = vld [vmem:[%s19646_s1 + $0x14e4] sm:$0xf]  ;;  %v10155_v60 = vor.u32 %v12612_v43, %v10152_v52  ;;  %v10283_v26 = vor.u32 %v12644_v48, %v10280_v61 }
 0x1a0   :  { %6964 = vmatpush.bf16.msra.mxu3 %v10443_v8  ;;  %v10648_v51 = vld [vmem:[%s19646_s1 + $0x14f0] sm:$0xf0]  ;;  %v12768_v53 = vld [vmem:[%s19646_s1 + $0x15e4] sm:$0xf]  ;;  %v10411_v8 = vor.u32 %v12676_v3, %v10408_v58 }
 0x1a1   :  { %6926 = vmatpush.bf16.msra.mxu0 %v10043_v18  ;;  %v10776_v56 = vld [vmem:[%s19646_s1 + $0x15f0] sm:$0xf0]  ;;  %v12800_v59 = vld [vmem:[%s19646_s1 + $0x16e4] sm:$0xf]  ;;  %v10651_v9 = vor.u32 %v12736_v55, %v10648_v51 }
 0x1a2   :  { %v10904_v63 = vld [vmem:[%s19646_s1 + $0x16f0] sm:$0xf0]  ;;  %6939 = vmatpush.bf16.msra.mxu1 %v10171_v32  ;;  %v12832_v62 = vld [vmem:[%s19646_s1 + $0x17e4] sm:$0xf]  ;;  %v10779_v10 = vor.u32 %v12768_v53, %v10776_v56 }
 0x1a3   :  { %6952 = vmatpush.bf16.msra.mxu2 %v10299_v40  ;;  %v11032_v2 = vld [vmem:[%s19646_s1 + $0x17f0] sm:$0xf0]  ;;  %v10907_v5 = vor.u32 %v12800_v59, %v10904_v63  ;;  %v12732_v0 = vld [vmem:[%s19646_s1 + $0x14c4] sm:$0xf] }
 0x1a4   :  { %6965 = vmatpush.bf16.msra.mxu3 %v10427_v50  ;;  %v10632_v14 = vld [vmem:[%s19646_s1 + $0x14d0] sm:$0xf0]  ;;  %v12764_v17 = vld [vmem:[%s19646_s1 + $0x15c4] sm:$0xf]  ;;  %v11035_v18 = vor.u32 %v12832_v62, %v11032_v2  ;;  %v13092_v2 = vld [vmem:[%s19648_s2] sm:$0xf] }
 0x1a5   :  { %6927 = vmatpush.bf16.msra.mxu0 %v10027_v54  ;;  %v10760_v22 = vld [vmem:[%s19646_s1 + $0x15d0] sm:$0xf0]  ;;  %v12796_v27 = vld [vmem:[%s19646_s1 + $0x16c4] sm:$0xf]  ;;  %v10635_v52 = vor.u32 %v12732_v0, %v10632_v14 }
 0x1a6   :  { %v10888_v32 = vld [vmem:[%s19646_s1 + $0x16d0] sm:$0xf0]  ;;  %6940 = vmatpush.bf16.msra.mxu1 %v10155_v60  ;;  %v12828_v40 = vld [vmem:[%s19646_s1 + $0x17c4] sm:$0xf]  ;;  %v10763_v48 = vor.u32 %v12764_v17, %v10760_v22  ;;  %v6721_v22 = vpop.f32.mrf.mxu0 }
 0x1a7   :  { %6953 = vmatpush.bf16.msra.mxu2 %v10283_v26  ;;  %v11016_v43 = vld [vmem:[%s19646_s1 + $0x17d0] sm:$0xf0]  ;;  %v10891_v50 = vor.u32 %v12796_v27, %v10888_v32  ;;  %v12728_v61 = vld [vmem:[%s19646_s1 + $0x14a4] sm:$0xf] }
 0x1a8   :  { %6966 = vmatpush.bf16.msra.mxu3 %v10411_v8  ;;  %v10616_v3 = vld [vmem:[%s19646_s1 + $0x14b0] sm:$0xf0]  ;;  %v12760_v58 = vld [vmem:[%s19646_s1 + $0x15a4] sm:$0xf]  ;;  %6928 = vmatmul.bf16.vlgmr.msra.gmra.mxu0 %v14186_v37  ;;  %v11019_v1 = vor.u32 %v12828_v40, %v11016_v43  ;;  %v1057_v8 = vperm.slane %v13092_v2, 1 }
 0x1a9   :  { %6972 = vmatpush.bf16.msrb.mxu0 %v10651_v9  ;;  %v10744_v55 = vld [vmem:[%s19646_s1 + $0x15b0] sm:$0xf0]  ;;  %v12792_v51 = vld [vmem:[%s19646_s1 + $0x16a4] sm:$0xf]  ;;  %6941 = vmatmul.bf16.vlgmr.msra.gmra.mxu1 %v14199_v46  ;;  %v10619_v56 = vor.u32 %v12728_v61, %v10616_v3 }
 0x1aa   :  { %6985 = vmatpush.bf16.msrb.mxu1 %v10779_v10  ;;  %v10872_v53 = vld [vmem:[%s19646_s1 + $0x16b0] sm:$0xf0]  ;;  %6954 = vmatmul.bf16.vlgmr.msra.gmra.mxu2 %v14197_v45  ;;  %v12824_v57 = vld [vmem:[%s19646_s1 + $0x17a4] sm:$0xf]  ;;  %v10747_v63 = vor.u32 %v12760_v58, %v10744_v55 }
 0x1ab   :  { %6998 = vmatpush.bf16.msrb.mxu2 %v10907_v5  ;;  %v11000_v54 = vld [vmem:[%s19646_s1 + $0x17b0] sm:$0xf0]  ;;  %6967 = vmatmul.bf16.vlgmr.msra.gmra.mxu3 %v14207_v49  ;;  %v12724_v59 = vld [vmem:[%s19646_s1 + $0x1484] sm:$0xf]  ;;  %v10875_v60 = vor.u32 %v12792_v51, %v10872_v53 }
 0x1ac   :  { %7011 = vmatpush.bf16.msrb.mxu3 %v11035_v18  ;;  %v10600_v26 = vld [vmem:[%s19646_s1 + $0x1490] sm:$0xf0]  ;;  %v12756_v62 = vld [vmem:[%s19646_s1 + $0x1584] sm:$0xf]  ;;  %v11003_v9 = vor.u32 %v12824_v57, %v11000_v54 }
 0x1ad   :  { %6973 = vmatpush.bf16.msrb.mxu0 %v10635_v52  ;;  %v10728_v10 = vld [vmem:[%s19646_s1 + $0x1590] sm:$0xf0]  ;;  %v12788_v5 = vld [vmem:[%s19646_s1 + $0x1684] sm:$0xf]  ;;  %v10603_v18 = vor.u32 %v12724_v59, %v10600_v26  ;;  %v6747_v26 = vpop.f32.mrf.mxu2 }
 0x1ae   :  { %6986 = vmatpush.bf16.msrb.mxu1 %v10763_v48  ;;  %v10856_v0 = vld [vmem:[%s19646_s1 + $0x1690] sm:$0xf0]  ;;  %v12820_v14 = vld [vmem:[%s19646_s1 + $0x1784] sm:$0xf]  ;;  %v10731_v27 = vor.u32 %v12756_v62, %v10728_v10  ;;  %v6722_v48 = vadd.f32 %v6721_v22, %v1057_v8  ;;  %v6723_v22 = vpop.f32.mrf.mxu0 }
 0x1af   :  { %6999 = vmatpush.bf16.msrb.mxu2 %v10891_v50  ;;  %v10984_v17 = vld [vmem:[%s19646_s1 + $0x1790] sm:$0xf0]  ;;  %v10859_v32 = vor.u32 %v12788_v5, %v10856_v0  ;;  %v12720_v40 = vld [vmem:[%s19646_s1 + $0x1464] sm:$0xf]  ;;  %v6734_v50 = vpop.f32.mrf.mxu1  ;;  %v6760_v5 = vpop.f32.mrf.mxu3 }
 0x1b0   :  { %7012 = vmatpush.bf16.msrb.mxu3 %v11019_v1  ;;  %v10584_v43 = vld [vmem:[%s19646_s1 + $0x1470] sm:$0xf0]  ;;  %v12752_v52 = vld [vmem:[%s19646_s1 + $0x1564] sm:$0xf]  ;;  %v10987_v61 = vor.u32 %v12820_v14, %v10984_v17  ;;  %v6735_v53 = vadd.f32 %v6734_v50, %v6722_v48 }
 0x1b1   :  { %6974 = vmatpush.bf16.msrb.mxu0 %v10619_v56  ;;  %v10712_v3 = vld [vmem:[%s19646_s1 + $0x1570] sm:$0xf0]  ;;  %v12784_v58 = vld [vmem:[%s19646_s1 + $0x1664] sm:$0xf]  ;;  %v10587_v57 = vor.u32 %v12720_v40, %v10584_v43 }
 0x1b2   :  { %6987 = vmatpush.bf16.msrb.mxu1 %v10747_v63  ;;  %v10840_v1 = vld [vmem:[%s19646_s1 + $0x1670] sm:$0xf0]  ;;  %v12816_v55 = vld [vmem:[%s19646_s1 + $0x1764] sm:$0xf]  ;;  %v10715_v54 = vor.u32 %v12752_v52, %v10712_v3  ;;  %v6748_v10 = vadd.f32 %v6747_v26, %v6735_v53 }
 0x1b3   :  { %7000 = vmatpush.bf16.msrb.mxu2 %v10875_v60  ;;  %v10968_v51 = vld [vmem:[%s19646_s1 + $0x1770] sm:$0xf0]  ;;  %v10843_v56 = vor.u32 %v12784_v58, %v10840_v1  ;;  %v12716_v59 = vld [vmem:[%s19646_s1 + $0x1444] sm:$0xf] }
 0x1b4   :  { %7013 = vmatpush.bf16.msrb.mxu3 %v11003_v9  ;;  %v10568_v63 = vld [vmem:[%s19646_s1 + $0x1450] sm:$0xf0]  ;;  %v12748_v60 = vld [vmem:[%s19646_s1 + $0x1544] sm:$0xf]  ;;  %v10971_v62 = vor.u32 %v12816_v55, %v10968_v51 }
 0x1b5   :  { %6975 = vmatpush.bf16.msrb.mxu0 %v10603_v18  ;;  %v10696_v2 = vld [vmem:[%s19646_s1 + $0x1550] sm:$0xf0]  ;;  %v12780_v8 = vld [vmem:[%s19646_s1 + $0x1644] sm:$0xf]  ;;  %v10571_v17 = vor.u32 %v12716_v59, %v10568_v63  ;;  %v15967_v18 = vadd.f32 %v6760_v5, %v6748_v10  ;;  %v6749_v26 = vpop.f32.mrf.mxu2 }
 0x1b6   :  { %6988 = vmatpush.bf16.msrb.mxu1 %v10731_v27  ;;  %v10824_v9 = vld [vmem:[%s19646_s1 + $0x1650] sm:$0xf0]  ;;  %v12812_v0 = vld [vmem:[%s19646_s1 + $0x1744] sm:$0xf]  ;;  %v10699_v27 = vor.u32 %v12748_v60, %v10696_v2 }
 0x1b7   :  { %7001 = vmatpush.bf16.msrb.mxu2 %v10859_v32  ;;  %v10952_v14 = vld [vmem:[%s19646_s1 + $0x1750] sm:$0xf0]  ;;  %v10827_v32 = vor.u32 %v12780_v8, %v10824_v9  ;;  %v12712_v40 = vld [vmem:[%s19646_s1 + $0x1424] sm:$0xf]  ;;  %v6736_v48 = vpop.f32.mrf.mxu1  ;;  %v6762_v10 = vpop.f32.mrf.mxu3 }
 0x1b8   :  { %7014 = vmatpush.bf16.msrb.mxu3 %v10987_v61  ;;  %v10552_v43 = vld [vmem:[%s19646_s1 + $0x1430] sm:$0xf0]  ;;  %v12744_v52 = vld [vmem:[%s19646_s1 + $0x1524] sm:$0xf]  ;;  %v10955_v50 = vor.u32 %v12812_v0, %v10952_v14 }
 0x1b9   :  { %6976 = vmatpush.bf16.msrb.mxu0 %v10587_v57  ;;  %v10680_v61 = vld [vmem:[%s19646_s1 + $0x1530] sm:$0xf0]  ;;  %v12776_v3 = vld [vmem:[%s19646_s1 + $0x1624] sm:$0xf]  ;;  %v10555_v51 = vor.u32 %v12712_v40, %v10552_v43 }
 0x1ba   :  { %6989 = vmatpush.bf16.msrb.mxu1 %v10715_v54  ;;  %v10808_v58 = vld [vmem:[%s19646_s1 + $0x1630] sm:$0xf0]  ;;  %v12808_v1 = vld [vmem:[%s19646_s1 + $0x1724] sm:$0xf]  ;;  %v10683_v54 = vor.u32 %v12744_v52, %v10680_v61 }
 0x1bb   :  { %7002 = vmatpush.bf16.msrb.mxu2 %v10843_v56  ;;  %v10936_v55 = vld [vmem:[%s19646_s1 + $0x1730] sm:$0xf0]  ;;  %v12708_v53 = vld [vmem:[%s19646_s1 + $0x1404] sm:$0xf]  ;;  %v10811_v56 = vor.u32 %v12776_v3, %v10808_v58 }
 0x1bc   :  { %7015 = vmatpush.bf16.msrb.mxu3 %v10971_v62  ;;  %v10536_v57 = vld [vmem:[%s19646_s1 + $0x1410] sm:$0xf0]  ;;  %v12740_v59 = vld [vmem:[%s19646_s1 + $0x1504] sm:$0xf]  ;;  %v10939_v62 = vor.u32 %v12808_v1, %v10936_v55 }
 0x1bd   :  { %6977 = vmatpush.bf16.msrb.mxu0 %v10571_v17  ;;  %v10664_v63 = vld [vmem:[%s19646_s1 + $0x1510] sm:$0xf0]  ;;  %v12772_v60 = vld [vmem:[%s19646_s1 + $0x1604] sm:$0xf]  ;;  %v10539_v17 = vor.u32 %v12708_v53, %v10536_v57 }
 0x1be   :  { %6990 = vmatpush.bf16.msrb.mxu1 %v10699_v27  ;;  %v10792_v2 = vld [vmem:[%s19646_s1 + $0x1610] sm:$0xf0]  ;;  %v12804_v8 = vld [vmem:[%s19646_s1 + $0x1704] sm:$0xf]  ;;  %v10667_v40 = vor.u32 %v12740_v59, %v10664_v63 }
 0x1bf   :  { %7003 = vmatpush.bf16.msrb.mxu2 %v10827_v32  ;;  %v10920_v9 = vld [vmem:[%s19646_s1 + $0x1710] sm:$0xf0]  ;;  %v12864_v5 = vld [vmem:[%s19646_s1 + $0x18e4] sm:$0xf]  ;;  %v10795_v43 = vor.u32 %v12772_v60, %v10792_v2 }
 0x1c0   :  { %7016 = vmatpush.bf16.msrb.mxu3 %v10955_v50  ;;  %v11160_v0 = vld [vmem:[%s19646_s1 + $0x18f0] sm:$0xf0]  ;;  %v12896_v14 = vld [vmem:[%s19646_s1 + $0x19e4] sm:$0xf]  ;;  %v10923_v50 = vor.u32 %v12804_v8, %v10920_v9 }
 0x1c1   :  { %6978 = vmatpush.bf16.msrb.mxu0 %v10555_v51  ;;  %v11288_v22 = vld [vmem:[%s19646_s1 + $0x19f0] sm:$0xf0]  ;;  %v12928_v27 = vld [vmem:[%s19646_s1 + $0x1ae4] sm:$0xf]  ;;  %v11163_v61 = vor.u32 %v12864_v5, %v11160_v0 }
 0x1c2   :  { %v11416_v32 = vld [vmem:[%s19646_s1 + $0x1af0] sm:$0xf0]  ;;  %6991 = vmatpush.bf16.msrb.mxu1 %v10683_v54  ;;  %v12960_v52 = vld [vmem:[%s19646_s1 + $0x1be4] sm:$0xf]  ;;  %v11291_v3 = vor.u32 %v12896_v14, %v11288_v22 }
 0x1c3   :  { %7004 = vmatpush.bf16.msrb.mxu2 %v10811_v56  ;;  %v11544_v48 = vld [vmem:[%s19646_s1 + $0x1bf0] sm:$0xf0]  ;;  %v11419_v58 = vor.u32 %v12928_v27, %v11416_v32  ;;  %v12860_v1 = vld [vmem:[%s19646_s1 + $0x18c4] sm:$0xf] }
 0x1c4   :  { %7017 = vmatpush.bf16.msrb.mxu3 %v10939_v62  ;;  %v11144_v55 = vld [vmem:[%s19646_s1 + $0x18d0] sm:$0xf0]  ;;  %v12892_v51 = vld [vmem:[%s19646_s1 + $0x19c4] sm:$0xf]  ;;  %v11547_v53 = vor.u32 %v12960_v52, %v11544_v48 }
 0x1c5   :  { %6979 = vmatpush.bf16.msrb.mxu0 %v10539_v17  ;;  %v11272_v57 = vld [vmem:[%s19646_s1 + $0x19d0] sm:$0xf0]  ;;  %v12924_v54 = vld [vmem:[%s19646_s1 + $0x1ac4] sm:$0xf]  ;;  %v11147_v60 = vor.u32 %v12860_v1, %v11144_v55 }
 0x1c6   :  { %v11400_v56 = vld [vmem:[%s19646_s1 + $0x1ad0] sm:$0xf0]  ;;  %6992 = vmatpush.bf16.msrb.mxu1 %v10667_v40  ;;  %v12956_v59 = vld [vmem:[%s19646_s1 + $0x1bc4] sm:$0xf]  ;;  %v11275_v26 = vor.u32 %v12892_v51, %v11272_v57 }
 0x1c7   :  { %7005 = vmatpush.bf16.msrb.mxu2 %v10795_v43  ;;  %v11528_v63 = vld [vmem:[%s19646_s1 + $0x1bd0] sm:$0xf0]  ;;  %v11403_v62 = vor.u32 %v12924_v54, %v11400_v56  ;;  %v12856_v2 = vld [vmem:[%s19646_s1 + $0x18a4] sm:$0xf] }
 0x1c8   :  { %7018 = vmatpush.bf16.msrb.mxu3 %v10923_v50  ;;  %v11128_v8 = vld [vmem:[%s19646_s1 + $0x18b0] sm:$0xf0]  ;;  %v12888_v9 = vld [vmem:[%s19646_s1 + $0x19a4] sm:$0xf]  ;;  %6980 = vmatmul.bf16.vlgmr.msrb.gmra.mxu0 %v14401_v11  ;;  %v11531_v10 = vor.u32 %v12956_v59, %v11528_v63 }
 0x1c9   :  { %7024 = vmatpush.bf16.msra.mxu0 %v11163_v61  ;;  %v11256_v5 = vld [vmem:[%s19646_s1 + $0x19b0] sm:$0xf0]  ;;  %v12920_v0 = vld [vmem:[%s19646_s1 + $0x1aa4] sm:$0xf]  ;;  %6993 = vmatmul.bf16.vlgmr.msrb.gmra.mxu1 %v14414_v16  ;;  %v11131_v27 = vor.u32 %v12856_v2, %v11128_v8 }
 0x1ca   :  { %7037 = vmatpush.bf16.msra.mxu1 %v11291_v3  ;;  %v11384_v14 = vld [vmem:[%s19646_s1 + $0x1ab0] sm:$0xf0]  ;;  %7006 = vmatmul.bf16.vlgmr.msrb.gmra.mxu2 %v14412_v15  ;;  %v12952_v17 = vld [vmem:[%s19646_s1 + $0x1ba4] sm:$0xf]  ;;  %v11259_v32 = vor.u32 %v12888_v9, %v11256_v5 }
 0x1cb   :  { %7050 = vmatpush.bf16.msra.mxu2 %v11419_v58  ;;  %v11512_v22 = vld [vmem:[%s19646_s1 + $0x1bb0] sm:$0xf0]  ;;  %7019 = vmatmul.bf16.vlgmr.msrb.gmra.mxu3 %v14422_v19  ;;  %v11387_v40 = vor.u32 %v12920_v0, %v11384_v14  ;;  %v12852_v43 = vld [vmem:[%s19646_s1 + $0x1884] sm:$0xf] }
 0x1cc   :  { %7063 = vmatpush.bf16.msra.mxu3 %v11547_v53  ;;  %v11112_v52 = vld [vmem:[%s19646_s1 + $0x1890] sm:$0xf0]  ;;  %v12884_v48 = vld [vmem:[%s19646_s1 + $0x1984] sm:$0xf]  ;;  %v11515_v50 = vor.u32 %v12952_v17, %v11512_v22  ;;  %v6773_v53 = vpop.f32.mrf.mxu0 }
 0x1cd   :  { %7025 = vmatpush.bf16.msra.mxu0 %v11147_v60  ;;  %v11240_v61 = vld [vmem:[%s19646_s1 + $0x1990] sm:$0xf0]  ;;  %v12916_v3 = vld [vmem:[%s19646_s1 + $0x1a84] sm:$0xf]  ;;  %v11115_v51 = vor.u32 %v12852_v43, %v11112_v52  ;;  %v6774_v60 = vadd.f32 %v6773_v53, %v15967_v18 }
 0x1ce   :  { %7038 = vmatpush.bf16.msra.mxu1 %v11275_v26  ;;  %v11368_v58 = vld [vmem:[%s19646_s1 + $0x1a90] sm:$0xf0]  ;;  %v12948_v1 = vld [vmem:[%s19646_s1 + $0x1b84] sm:$0xf]  ;;  %v11243_v57 = vor.u32 %v12884_v48, %v11240_v61  ;;  %v6786_v26 = vpop.f32.mrf.mxu1 }
 0x1cf   :  { %7051 = vmatpush.bf16.msra.mxu2 %v11403_v62  ;;  %v11496_v55 = vld [vmem:[%s19646_s1 + $0x1b90] sm:$0xf0]  ;;  %v11371_v54 = vor.u32 %v12916_v3, %v11368_v58  ;;  %v12848_v56 = vld [vmem:[%s19646_s1 + $0x1864] sm:$0xf]  ;;  %v6787_v5 = vadd.f32 %v6786_v26, %v6774_v60  ;;  %v6812_v3 = vpop.f32.mrf.mxu3 }
 0x1d0   :  { %7064 = vmatpush.bf16.msra.mxu3 %v11531_v10  ;;  %v11096_v59 = vld [vmem:[%s19646_s1 + $0x1870] sm:$0xf0]  ;;  %v12880_v63 = vld [vmem:[%s19646_s1 + $0x1964] sm:$0xf]  ;;  %v11499_v62 = vor.u32 %v12948_v1, %v11496_v55 }
 0x1d1   :  { %7026 = vmatpush.bf16.msra.mxu0 %v11131_v27  ;;  %v11224_v2 = vld [vmem:[%s19646_s1 + $0x1970] sm:$0xf0]  ;;  %v12912_v8 = vld [vmem:[%s19646_s1 + $0x1a64] sm:$0xf]  ;;  %v11099_v0 = vor.u32 %v12848_v56, %v11096_v59 }
 0x1d2   :  { %7039 = vmatpush.bf16.msra.mxu1 %v11259_v32  ;;  %v11352_v9 = vld [vmem:[%s19646_s1 + $0x1a70] sm:$0xf0]  ;;  %v12944_v10 = vld [vmem:[%s19646_s1 + $0x1b64] sm:$0xf]  ;;  %v11227_v14 = vor.u32 %v12880_v63, %v11224_v2 }
 0x1d3   :  { %7052 = vmatpush.bf16.msra.mxu2 %v11387_v40  ;;  %v11480_v18 = vld [vmem:[%s19646_s1 + $0x1b70] sm:$0xf0]  ;;  %v11355_v17 = vor.u32 %v12912_v8, %v11352_v9  ;;  %v12844_v22 = vld [vmem:[%s19646_s1 + $0x1844] sm:$0xf]  ;;  %v6799_v40 = vpop.f32.mrf.mxu2 }
 0x1d4   :  { %7065 = vmatpush.bf16.msra.mxu3 %v11515_v50  ;;  %v11080_v27 = vld [vmem:[%s19646_s1 + $0x1850] sm:$0xf0]  ;;  %v12876_v32 = vld [vmem:[%s19646_s1 + $0x1944] sm:$0xf]  ;;  %v11483_v43 = vor.u32 %v12944_v10, %v11480_v18  ;;  %v6800_v61 = vadd.f32 %v6799_v40, %v6787_v5  ;;  %v6775_v53 = vpop.f32.mrf.mxu0 }
 0x1d5   :  { %7027 = vmatpush.bf16.msra.mxu0 %v11115_v51  ;;  %v11208_v52 = vld [vmem:[%s19646_s1 + $0x1950] sm:$0xf0]  ;;  %v12908_v48 = vld [vmem:[%s19646_s1 + $0x1a44] sm:$0xf]  ;;  %v11083_v55 = vor.u32 %v12844_v22, %v11080_v27 }
 0x1d6   :  { %7040 = vmatpush.bf16.msra.mxu1 %v11243_v57  ;;  %v11336_v50 = vld [vmem:[%s19646_s1 + $0x1a50] sm:$0xf0]  ;;  %v12940_v58 = vld [vmem:[%s19646_s1 + $0x1b44] sm:$0xf]  ;;  %v16166_v51 = vadd.f32 %v6812_v3, %v6800_v61  ;;  %v11211_v57 = vor.u32 %v12876_v32, %v11208_v52  ;;  %v6788_v60 = vpop.f32.mrf.mxu1 }
 0x1d7   :  { %7053 = vmatpush.bf16.msra.mxu2 %v11371_v54  ;;  %v11464_v1 = vld [vmem:[%s19646_s1 + $0x1b50] sm:$0xf0]  ;;  %v11339_v54 = vor.u32 %v12908_v48, %v11336_v50  ;;  %v12840_v56 = vld [vmem:[%s19646_s1 + $0x1824] sm:$0xf]  ;;  %v6814_v61 = vpop.f32.mrf.mxu3 }
 0x1d8   :  { %7066 = vmatpush.bf16.msra.mxu3 %v11499_v62  ;;  %v11064_v59 = vld [vmem:[%s19646_s1 + $0x1830] sm:$0xf0]  ;;  %v12872_v63 = vld [vmem:[%s19646_s1 + $0x1924] sm:$0xf]  ;;  %v11467_v26 = vor.u32 %v12940_v58, %v11464_v1 }
 0x1d9   :  { %7028 = vmatpush.bf16.msra.mxu0 %v11099_v0  ;;  %v11192_v62 = vld [vmem:[%s19646_s1 + $0x1930] sm:$0xf0]  ;;  %v12904_v2 = vld [vmem:[%s19646_s1 + $0x1a24] sm:$0xf]  ;;  %v11067_v18 = vor.u32 %v12840_v56, %v11064_v59 }
 0x1da   :  { %7041 = vmatpush.bf16.msra.mxu1 %v11227_v14  ;;  %v11320_v8 = vld [vmem:[%s19646_s1 + $0x1a30] sm:$0xf0]  ;;  %v12936_v9 = vld [vmem:[%s19646_s1 + $0x1b24] sm:$0xf]  ;;  %v11195_v14 = vor.u32 %v12872_v63, %v11192_v62 }
 0x1db   :  { %7054 = vmatpush.bf16.msra.mxu2 %v11355_v17  ;;  %v11448_v10 = vld [vmem:[%s19646_s1 + $0x1b30] sm:$0xf0]  ;;  %v12836_v5 = vld [vmem:[%s19646_s1 + $0x1804] sm:$0xf]  ;;  %v11323_v17 = vor.u32 %v12904_v2, %v11320_v8  ;;  %v6801_v40 = vpop.f32.mrf.mxu2 }
 0x1dc   :  { %7067 = vmatpush.bf16.msra.mxu3 %v11483_v43  ;;  %v11048_v0 = vld [vmem:[%s19646_s1 + $0x1810] sm:$0xf0]  ;;  %v12868_v22 = vld [vmem:[%s19646_s1 + $0x1904] sm:$0xf]  ;;  %v11451_v43 = vor.u32 %v12936_v9, %v11448_v10 }
 0x1dd   :  { %7029 = vmatpush.bf16.msra.mxu0 %v11083_v55  ;;  %v11176_v27 = vld [vmem:[%s19646_s1 + $0x1910] sm:$0xf0]  ;;  %v12900_v32 = vld [vmem:[%s19646_s1 + $0x1a04] sm:$0xf]  ;;  %v11051_v55 = vor.u32 %v12836_v5, %v11048_v0 }
 0x1de   :  { %7042 = vmatpush.bf16.msra.mxu1 %v11211_v57  ;;  %v11304_v52 = vld [vmem:[%s19646_s1 + $0x1a10] sm:$0xf0]  ;;  %v12932_v48 = vld [vmem:[%s19646_s1 + $0x1b04] sm:$0xf]  ;;  %v11179_v56 = vor.u32 %v12868_v22, %v11176_v27 }
 0x1df   :  { %7055 = vmatpush.bf16.msra.mxu2 %v11339_v54  ;;  %v11432_v50 = vld [vmem:[%s19646_s1 + $0x1b10] sm:$0xf0]  ;;  %v12992_v3 = vld [vmem:[%s19646_s1 + $0x1ce4] sm:$0xf]  ;;  %v11307_v59 = vor.u32 %v12900_v32, %v11304_v52 }
 0x1e0   :  { %7068 = vmatpush.bf16.msra.mxu3 %v11467_v26  ;;  %v11672_v58 = vld [vmem:[%s19646_s1 + $0x1cf0] sm:$0xf0]  ;;  %v13024_v1 = vld [vmem:[%s19646_s1 + $0x1de4] sm:$0xf]  ;;  %v11435_v26 = vor.u32 %v12932_v48, %v11432_v50 }
 0x1e1   :  { %7030 = vmatpush.bf16.msra.mxu0 %v11067_v18  ;;  %v11800_v53 = vld [vmem:[%s19646_s1 + $0x1df0] sm:$0xf0]  ;;  %v13056_v57 = vld [vmem:[%s19646_s1 + $0x1ee4] sm:$0xf]  ;;  %v11675_v62 = vor.u32 %v12992_v3, %v11672_v58 }
 0x1e2   :  { %v11928_v54 = vld [vmem:[%s19646_s1 + $0x1ef0] sm:$0xf0]  ;;  %7043 = vmatpush.bf16.msra.mxu1 %v11195_v14  ;;  %v13088_v63 = vld [vmem:[%s19646_s1 + $0x1fe4] sm:$0xf]  ;;  %v11803_v2 = vor.u32 %v13024_v1, %v11800_v53 }
 0x1e3   :  { %7056 = vmatpush.bf16.msra.mxu2 %v11323_v17  ;;  %v12056_v60 = vld [vmem:[%s19646_s1 + $0x1ff0] sm:$0xf0]  ;;  %v11931_v8 = vor.u32 %v13056_v57, %v11928_v54  ;;  %v12988_v9 = vld [vmem:[%s19646_s1 + $0x1cc4] sm:$0xf] }
 0x1e4   :  { %7069 = vmatpush.bf16.msra.mxu3 %v11451_v43  ;;  %v11656_v10 = vld [vmem:[%s19646_s1 + $0x1cd0] sm:$0xf0]  ;;  %v13020_v18 = vld [vmem:[%s19646_s1 + $0x1dc4] sm:$0xf]  ;;  %v12059_v5 = vor.u32 %v13088_v63, %v12056_v60 }
 0x1e5   :  { %7031 = vmatpush.bf16.msra.mxu0 %v11051_v55  ;;  %v11784_v0 = vld [vmem:[%s19646_s1 + $0x1dd0] sm:$0xf0]  ;;  %v13052_v14 = vld [vmem:[%s19646_s1 + $0x1ec4] sm:$0xf]  ;;  %v11659_v32 = vor.u32 %v12988_v9, %v11656_v10  ;;  %v6825_v9 = vpop.f32.mrf.mxu0 }
 0x1e6   :  { %v11912_v17 = vld [vmem:[%s19646_s1 + $0x1ed0] sm:$0xf0]  ;;  %7044 = vmatpush.bf16.msra.mxu1 %v11179_v56  ;;  %v13084_v22 = vld [vmem:[%s19646_s1 + $0x1fc4] sm:$0xf]  ;;  %v11787_v40 = vor.u32 %v13020_v18, %v11784_v0 }
 0x1e7   :  { %7057 = vmatpush.bf16.msra.mxu2 %v11307_v59  ;;  %v12040_v27 = vld [vmem:[%s19646_s1 + $0x1fd0] sm:$0xf0]  ;;  %v11915_v43 = vor.u32 %v13052_v14, %v11912_v17  ;;  %v12984_v52 = vld [vmem:[%s19646_s1 + $0x1ca4] sm:$0xf]  ;;  %v6838_v14 = vpop.f32.mrf.mxu1 }
 0x1e8   :  { %7070 = vmatpush.bf16.msra.mxu3 %v11435_v26  ;;  %v11640_v48 = vld [vmem:[%s19646_s1 + $0x1cb0] sm:$0xf0]  ;;  %v13016_v50 = vld [vmem:[%s19646_s1 + $0x1da4] sm:$0xf]  ;;  %7032 = vmatmul.bf16.vlgmr.msra.gmra.mxu0 %v14614_v7  ;;  %v12043_v61 = vor.u32 %v13084_v22, %v12040_v27 }
 0x1e9   :  { %7076 = vmatpush.bf16.msrb.mxu0 %v11675_v62  ;;  %v11768_v3 = vld [vmem:[%s19646_s1 + $0x1db0] sm:$0xf0]  ;;  %v13048_v58 = vld [vmem:[%s19646_s1 + $0x1ea4] sm:$0xf]  ;;  %7045 = vmatmul.bf16.vlgmr.msra.gmra.mxu1 %v14627_v13  ;;  %v11643_v57 = vor.u32 %v12984_v52, %v11640_v48 }
 0x1ea   :  { %7089 = vmatpush.bf16.msrb.mxu1 %v11803_v2  ;;  %v11896_v1 = vld [vmem:[%s19646_s1 + $0x1eb0] sm:$0xf0]  ;;  %7058 = vmatmul.bf16.vlgmr.msra.gmra.mxu2 %v14625_v12  ;;  %v13080_v55 = vld [vmem:[%s19646_s1 + $0x1fa4] sm:$0xf]  ;;  %v11771_v54 = vor.u32 %v13016_v50, %v11768_v3 }
 0x1eb   :  { %7102 = vmatpush.bf16.msrb.mxu2 %v11931_v8  ;;  %v12024_v53 = vld [vmem:[%s19646_s1 + $0x1fb0] sm:$0xf0]  ;;  %7071 = vmatmul.bf16.vlgmr.msra.gmra.mxu3 %v14635_v39  ;;  %v11899_v56 = vor.u32 %v13048_v58, %v11896_v1  ;;  %v12980_v59 = vld [vmem:[%s19646_s1 + $0x1c84] sm:$0xf] }
 0x1ec   :  { %7115 = vmatpush.bf16.msrb.mxu3 %v12059_v5  ;;  %v11624_v63 = vld [vmem:[%s19646_s1 + $0x1c90] sm:$0xf0]  ;;  %v13012_v60 = vld [vmem:[%s19646_s1 + $0x1d84] sm:$0xf]  ;;  %v12027_v26 = vor.u32 %v13080_v55, %v12024_v53  ;;  %v6826_v5 = vadd.f32 %v6825_v9, %v16166_v51 }
 0x1ed   :  { %7077 = vmatpush.bf16.msrb.mxu0 %v11659_v32  ;;  %v11752_v62 = vld [vmem:[%s19646_s1 + $0x1d90] sm:$0xf0]  ;;  %v13044_v2 = vld [vmem:[%s19646_s1 + $0x1e84] sm:$0xf]  ;;  %v11627_v0 = vor.u32 %v12980_v59, %v11624_v63  ;;  %v6851_v59 = vpop.f32.mrf.mxu2 }
 0x1ee   :  { %7090 = vmatpush.bf16.msrb.mxu1 %v11787_v40  ;;  %v11880_v8 = vld [vmem:[%s19646_s1 + $0x1e90] sm:$0xf0]  ;;  %v13076_v10 = vld [vmem:[%s19646_s1 + $0x1f84] sm:$0xf]  ;;  %v11755_v17 = vor.u32 %v13012_v60, %v11752_v62 }
 0x1ef   :  { %7103 = vmatpush.bf16.msrb.mxu2 %v11915_v43  ;;  %v12008_v18 = vld [vmem:[%s19646_s1 + $0x1f90] sm:$0xf0]  ;;  %v11883_v22 = vor.u32 %v13044_v2, %v11880_v8  ;;  %v12976_v27 = vld [vmem:[%s19646_s1 + $0x1c64] sm:$0xf]  ;;  %v6839_v43 = vadd.f32 %v6838_v14, %v6826_v5  ;;  %v6864_v2 = vpop.f32.mrf.mxu3  ;;  %v6840_v5 = vpop.f32.mrf.mxu1 }
 0x1f0   :  { %7116 = vmatpush.bf16.msrb.mxu3 %v12043_v61  ;;  %v11608_v32 = vld [vmem:[%s19646_s1 + $0x1c70] sm:$0xf0]  ;;  %v13008_v40 = vld [vmem:[%s19646_s1 + $0x1d64] sm:$0xf]  ;;  %v12011_v51 = vor.u32 %v13076_v10, %v12008_v18  ;;  %v6827_v10 = vpop.f32.mrf.mxu0  ;;  %v8350_v5 = vld [vmem:[%s19646_s1 + $0x2e8] sm:$0xf] }
 0x1f1   :  { %7078 = vmatpush.bf16.msrb.mxu0 %v11643_v57  ;;  %v11736_v52 = vld [vmem:[%s19646_s1 + $0x1d70] sm:$0xf0]  ;;  %v13040_v48 = vld [vmem:[%s19646_s1 + $0x1e64] sm:$0xf]  ;;  %v11611_v58 = vor.u32 %v12976_v27, %v11608_v32  ;;  %v6852_v62 = vadd.f32 %v6851_v59, %v6839_v43 }
 0x1f2   :  { %7091 = vmatpush.bf16.msrb.mxu1 %v11771_v54  ;;  %v11864_v50 = vld [vmem:[%s19646_s1 + $0x1e70] sm:$0xf0]  ;;  %v13072_v61 = vld [vmem:[%s19646_s1 + $0x1f64] sm:$0xf]  ;;  %v11739_v1 = vor.u32 %v13008_v40, %v11736_v52 }
 0x1f3   :  { %7104 = vmatpush.bf16.msrb.mxu2 %v11899_v56  ;;  %v11992_v3 = vld [vmem:[%s19646_s1 + $0x1f70] sm:$0xf0]  ;;  %v11867_v55 = vor.u32 %v13040_v48, %v11864_v50  ;;  %v12972_v53 = vld [vmem:[%s19646_s1 + $0x1c44] sm:$0xf] }
 0x1f4   :  { %7117 = vmatpush.bf16.msrb.mxu3 %v12027_v26  ;;  %v11592_v57 = vld [vmem:[%s19646_s1 + $0x1c50] sm:$0xf0]  ;;  %v13004_v54 = vld [vmem:[%s19646_s1 + $0x1d44] sm:$0xf]  ;;  %v11995_v56 = vor.u32 %v13072_v61, %v11992_v3 }
 0x1f5   :  { %7079 = vmatpush.bf16.msrb.mxu0 %v11627_v0  ;;  %v11720_v63 = vld [vmem:[%s19646_s1 + $0x1d50] sm:$0xf0]  ;;  %v13036_v60 = vld [vmem:[%s19646_s1 + $0x1e44] sm:$0xf]  ;;  %v11595_v18 = vor.u32 %v12972_v53, %v11592_v57  ;;  %v16365_v0 = vadd.f32 %v6864_v2, %v6852_v62  ;;  %v8094_v62 = vld [vmem:[%s19646_s1 + $0xe8] sm:$0xf] }
 0x1f6   :  { %7092 = vmatpush.bf16.msrb.mxu1 %v11755_v17  ;;  %v11848_v26 = vld [vmem:[%s19646_s1 + $0x1e50] sm:$0xf0]  ;;  %v13068_v8 = vld [vmem:[%s19646_s1 + $0x1f44] sm:$0xf]  ;;  %v11723_v14 = vor.u32 %v13004_v54, %v11720_v63  ;;  %v12099_v2 = vld [vmem:[%s19646_s1 + $0xf4] sm:$0xf0] }
 0x1f7   :  { %7105 = vmatpush.bf16.msrb.mxu2 %v11883_v22  ;;  %v11976_v9 = vld [vmem:[%s19646_s1 + $0x1f50] sm:$0xf0]  ;;  %v11851_v17 = vor.u32 %v13036_v60, %v11848_v26  ;;  %v12968_v22 = vld [vmem:[%s19646_s1 + $0x1c24] sm:$0xf]  ;;  %v6853_v26 = vpop.f32.mrf.mxu2 }
 0x1f8   :  { %7118 = vmatpush.bf16.msrb.mxu3 %v12011_v51  ;;  %v11576_v27 = vld [vmem:[%s19646_s1 + $0x1c30] sm:$0xf0]  ;;  %v13000_v32 = vld [vmem:[%s19646_s1 + $0x1d24] sm:$0xf]  ;;  %v11979_v40 = vor.u32 %v13068_v8, %v11976_v9  ;;  %v8222_v8 = vld [vmem:[%s19646_s1 + $0x1e8] sm:$0xf]  ;;  %v6866_v9 = vpop.f32.mrf.mxu3 }
 0x1f9   :  { %7080 = vmatpush.bf16.msrb.mxu0 %v11611_v58  ;;  %v11704_v51 = vld [vmem:[%s19646_s1 + $0x1d30] sm:$0xf0]  ;;  %v13032_v43 = vld [vmem:[%s19646_s1 + $0x1e24] sm:$0xf]  ;;  %v11579_v61 = vor.u32 %v12968_v22, %v11576_v27  ;;  %v8478_v27 = vld [vmem:[%s19646_s1 + $0x3e8] sm:$0xf] }
 0x1fa   :  { %7093 = vmatpush.bf16.msrb.mxu1 %v11739_v1  ;;  %v11832_v52 = vld [vmem:[%s19646_s1 + $0x1e30] sm:$0xf0]  ;;  %v13064_v48 = vld [vmem:[%s19646_s1 + $0x1f24] sm:$0xf]  ;;  %v11707_v1 = vor.u32 %v13000_v32, %v11704_v51  ;;  %v12195_v32 = vld [vmem:[%s19646_s1 + $0x3f4] sm:$0xf0]  ;;  %v8095_v51 = vor.u32 %v12099_v2, %v8094_v62 }
 0x1fb   :  { %7106 = vmatpush.bf16.msrb.mxu2 %v11867_v55  ;;  %v11960_v50 = vld [vmem:[%s19646_s1 + $0x1f30] sm:$0xf0]  ;;  %v12964_v3 = vld [vmem:[%s19646_s1 + $0x1c04] sm:$0xf]  ;;  %v11835_v55 = vor.u32 %v13032_v43, %v11832_v52  ;;  %v8190_v26 = vld [vmem:[%s19646_s1 + $0x1a8] sm:$0xf] }
 0x1fc   :  { %7119 = vmatpush.bf16.msrb.mxu3 %v11995_v56  ;;  %v11560_v58 = vld [vmem:[%s19646_s1 + $0x1c10] sm:$0xf0]  ;;  %v12996_v53 = vld [vmem:[%s19646_s1 + $0x1d04] sm:$0xf]  ;;  %v11963_v56 = vor.u32 %v13064_v48, %v11960_v50  ;;  %v8078_v48 = vld [vmem:[%s19646_s1 + $0xc8] sm:$0xf] }
 0x1fd   :  { %7081 = vmatpush.bf16.msrb.mxu0 %v11595_v18  ;;  %v11688_v57 = vld [vmem:[%s19646_s1 + $0x1d10] sm:$0xf0]  ;;  %v13028_v54 = vld [vmem:[%s19646_s1 + $0x1e04] sm:$0xf]  ;;  %v11563_v10 = vor.u32 %v12964_v3, %v11560_v58  ;;  %v12131_v18 = vld [vmem:[%s19646_s1 + $0x1f4] sm:$0xf0]  ;;  %v8479_v3 = vor.u32 %v12195_v32, %v8478_v27 }
 0x1fe   :  { %7094 = vmatpush.bf16.msrb.mxu1 %v11723_v14  ;;  %v11816_v59 = vld [vmem:[%s19646_s1 + $0x1e10] sm:$0xf0]  ;;  %v13060_v63 = vld [vmem:[%s19646_s1 + $0x1f04] sm:$0xf]  ;;  %v12163_v14 = vld [vmem:[%s19646_s1 + $0x2f4] sm:$0xf0]  ;;  %v8223_v43 = vor.u32 %v12131_v18, %v8222_v8 }
 0x1ff   :  { %7107 = vmatpush.bf16.msrb.mxu2 %v11851_v17  ;;  %v11944_v60 = vld [vmem:[%s19646_s1 + $0x1f10] sm:$0xf0]  ;;  %v11691_v17 = vor.u32 %v12996_v53, %v11688_v57  ;;  %v11819_v22 = vor.u32 %v13028_v54, %v11816_v59  ;;  %v8351_v52 = vor.u32 %v12163_v14, %v8350_v5  ;;  %v12095_v50 = vld [vmem:[%s19646_s1 + $0xd4] sm:$0xf0]  ;;  %v8462_v53 = vld [vmem:[%s19646_s1 + $0x3c8] sm:$0xf] }
 0x200   :  { %7120 = vmatpush.bf16.msrb.mxu3 %v11979_v40  ;;  %v11947_v40 = vor.u32 %v13060_v63, %v11944_v60  ;;  %v12127_v58 = vld [vmem:[%s19646_s1 + $0x1d4] sm:$0xf0]  ;;  %v8079_v54 = vor.u32 %v12095_v50, %v8078_v48  ;;  %v8062_v63 = vld [vmem:[%s19646_s1 + $0xa8] sm:$0xf] }
 0x201   :  { %7082 = vmatpush.bf16.msrb.mxu0 %v11579_v61  ;;  %v8206_v61 = vld [vmem:[%s19646_s1 + $0x1c8] sm:$0xf]  ;;  %v12191_v57 = vld [vmem:[%s19646_s1 + $0x3d4] sm:$0xf0] }
 0x202   :  { %7095 = vmatpush.bf16.msrb.mxu1 %v11707_v1  ;;  %v8334_v1 = vld [vmem:[%s19646_s1 + $0x2c8] sm:$0xf]  ;;  %v12091_v60 = vld [vmem:[%s19646_s1 + $0xb4] sm:$0xf0]  ;;  %v8463_v62 = vor.u32 %v12191_v57, %v8462_v53 }
 0x203   :  { %7108 = vmatpush.bf16.msrb.mxu2 %v11835_v55  ;;  %v12159_v55 = vld [vmem:[%s19646_s1 + $0x2d4] sm:$0xf0]  ;;  %v8318_v8 = vld [vmem:[%s19646_s1 + $0x2a8] sm:$0xf]  ;;  %v8063_v5 = vor.u32 %v12091_v60, %v8062_v63 }
 0x204   :  { %7121 = vmatpush.bf16.msrb.mxu3 %v11963_v56  ;;  %v8207_v56 = vor.u32 %v12127_v58, %v8206_v61  ;;  %v8335_v59 = vor.u32 %v12159_v55, %v8334_v1  ;;  %v12123_v2 = vld [vmem:[%s19646_s1 + $0x1b4] sm:$0xf0]  ;;  %v8174_v32 = vld [vmem:[%s19646_s1 + $0x188] sm:$0xf] }
 0x205   :  { %7083 = vmatpush.bf16.msrb.mxu0 %v11563_v10  ;;  %v12155_v9 = vld [vmem:[%s19646_s1 + $0x2b4] sm:$0xf0]  ;;  %v8446_v10 = vld [vmem:[%s19646_s1 + $0x3a8] sm:$0xf]  ;;  %v8191_v14 = vor.u32 %v12123_v2, %v8190_v26  ;;  %v6877_v48 = vpop.f32.mrf.mxu0 }
 0x206   :  { %7096 = vmatpush.bf16.msrb.mxu1 %v11691_v17  ;;  %v12187_v18 = vld [vmem:[%s19646_s1 + $0x3b4] sm:$0xf0]  ;;  %v8319_v17 = vor.u32 %v12155_v9, %v8318_v8  ;;  %v8430_v50 = vld [vmem:[%s19646_s1 + $0x388] sm:$0xf]  ;;  %v6890_v1 = vpop.f32.mrf.mxu1 }
 0x207   :  { %7109 = vmatpush.bf16.msrb.mxu2 %v11819_v22  ;;  %v8046_v22 = vld [vmem:[%s19646_s1 + $0x88] sm:$0xf]  ;;  %v12087_v27 = vld [vmem:[%s19646_s1 + $0x94] sm:$0xf0] }
 0x208   :  { %7122 = vmatpush.bf16.msrb.mxu3 %v11947_v40  ;;  %7084 = vmatmul.bf16.vlgmr.msrb.gmra.mxu0 %v14827_v24  ;;  %v8447_v40 = vor.u32 %v12187_v18, %v8446_v10  ;;  %v12183_v61 = vld [vmem:[%s19646_s1 + $0x394] sm:$0xf0]  ;;  %v8047_v58 = vor.u32 %v12087_v27, %v8046_v22  ;;  %v8030_v57 = vld [vmem:[%s19646_s1 + $0x68] sm:$0xf] }
 0x209   :  { %7128 = vmatpush.bf16.msra.mxu0 %v8095_v51  ;;  %7097 = vmatmul.bf16.vlgmr.msrb.gmra.mxu1 %v14840_v36  ;;  %v12119_v51 = vld [vmem:[%s19646_s1 + $0x194] sm:$0xf0]  ;;  %v8286_v60 = vld [vmem:[%s19646_s1 + $0x268] sm:$0xf] }
 0x20a   :  { %7141 = vmatpush.bf16.msra.mxu1 %v8223_v43  ;;  %7110 = vmatmul.bf16.vlgmr.msrb.gmra.mxu2 %v14838_v34  ;;  %v8302_v43 = vld [vmem:[%s19646_s1 + $0x288] sm:$0xf]  ;;  %v8175_v55 = vor.u32 %v12119_v51, %v8174_v32  ;;  %v12115_v63 = vld [vmem:[%s19646_s1 + $0x174] sm:$0xf0] }
 0x20b   :  { %7154 = vmatpush.bf16.msra.mxu2 %v8351_v52  ;;  %7123 = vmatmul.bf16.vlgmr.msrb.gmra.mxu3 %v14848_v47  ;;  %v12151_v52 = vld [vmem:[%s19646_s1 + $0x294] sm:$0xf0]  ;;  %v8014_v18 = vld [vmem:[%s19646_s1 + $0x48] sm:$0xf] }
 0x20c   :  { %7167 = vmatpush.bf16.msra.mxu3 %v8479_v3  ;;  %v6878_v3 = vadd.f32 %v6877_v48, %v16365_v0  ;;  %v8303_v53 = vor.u32 %v12151_v52, %v8302_v43  ;;  %v8431_v0 = vor.u32 %v12183_v61, %v8430_v50  ;;  %v12147_v26 = vld [vmem:[%s19646_s1 + $0x274] sm:$0xf0]  ;;  %v8270_v32 = vld [vmem:[%s19646_s1 + $0x248] sm:$0xf] }
 0x20d   :  { %7129 = vmatpush.bf16.msra.mxu0 %v8079_v54  ;;  %v12083_v54 = vld [vmem:[%s19646_s1 + $0x74] sm:$0xf0]  ;;  %v8287_v10 = vor.u32 %v12147_v26, %v8286_v60  ;;  %v6903_v22 = vpop.f32.mrf.mxu2  ;;  %v8398_v52 = vld [vmem:[%s19646_s1 + $0x348] sm:$0xf]  ;;  %v6879_v50 = vpop.f32.mrf.mxu0 }
 0x20e   :  { %7142 = vmatpush.bf16.msra.mxu1 %v8207_v56  ;;  %v8158_v56 = vld [vmem:[%s19646_s1 + $0x168] sm:$0xf]  ;;  %v12179_v2 = vld [vmem:[%s19646_s1 + $0x374] sm:$0xf0]  ;;  %v8031_v8 = vor.u32 %v12083_v54, %v8030_v57  ;;  %v6916_v43 = vpop.f32.mrf.mxu3 }
 0x20f   :  { %7155 = vmatpush.bf16.msra.mxu2 %v8335_v59  ;;  %v6891_v59 = vadd.f32 %v6890_v1, %v6878_v3  ;;  %v8159_v9 = vor.u32 %v12115_v63, %v8158_v56  ;;  %v12111_v27 = vld [vmem:[%s19646_s1 + $0x154] sm:$0xf0]  ;;  %v6892_v3 = vpop.f32.mrf.mxu1  ;;  %v8126_v54 = vld [vmem:[%s19646_s1 + $0x128] sm:$0xf] }
 0x210   :  { %7168 = vmatpush.bf16.msra.mxu3 %v8463_v62  ;;  %v8414_v62 = vld [vmem:[%s19646_s1 + $0x368] sm:$0xf]  ;;  %v12175_v48 = vld [vmem:[%s19646_s1 + $0x354] sm:$0xf0] }
 0x211   :  { %7130 = vmatpush.bf16.msra.mxu0 %v8063_v5  ;;  %v12079_v5 = vld [vmem:[%s19646_s1 + $0x54] sm:$0xf0]  ;;  %v6904_v51 = vadd.f32 %v6903_v22, %v6891_v59  ;;  %v8399_v56 = vor.u32 %v12175_v48, %v8398_v52  ;;  %v8254_v59 = vld [vmem:[%s19646_s1 + $0x228] sm:$0xf] }
 0x212   :  { %7143 = vmatpush.bf16.msra.mxu1 %v8191_v14  ;;  %v8142_v14 = vld [vmem:[%s19646_s1 + $0x148] sm:$0xf]  ;;  %v8015_v61 = vor.u32 %v12079_v5, %v8014_v18  ;;  %v12075_v57 = vld [vmem:[%s19646_s1 + $0x34] sm:$0xf0] }
 0x213   :  { %7156 = vmatpush.bf16.msra.mxu2 %v8319_v17  ;;  %v8415_v17 = vor.u32 %v12179_v2, %v8414_v62  ;;  %v8143_v1 = vor.u32 %v12111_v27, %v8142_v14  ;;  %v12139_v63 = vld [vmem:[%s19646_s1 + $0x234] sm:$0xf0]  ;;  %v8382_v60 = vld [vmem:[%s19646_s1 + $0x328] sm:$0xf] }
 0x214   :  { %7169 = vmatpush.bf16.msra.mxu3 %v8447_v40  ;;  %v12143_v40 = vld [vmem:[%s19646_s1 + $0x254] sm:$0xf0]  ;;  %v7982_v2 = vld [vmem:[%s19646_s1 + $0x8] sm:$0xf] }
 0x215   :  { %7131 = vmatpush.bf16.msra.mxu0 %v8047_v58  ;;  %v16564_v58 = vadd.f32 %v6916_v43, %v6904_v51  ;;  %v12171_v26 = vld [vmem:[%s19646_s1 + $0x334] sm:$0xf0]  ;;  %v8110_v18 = vld [vmem:[%s19646_s1 + $0x108] sm:$0xf] }
 0x216   :  { %7144 = vmatpush.bf16.msra.mxu1 %v8175_v55  ;;  %v8271_v55 = vor.u32 %v12143_v40, %v8270_v32  ;;  %v12103_v5 = vld [vmem:[%s19646_s1 + $0x114] sm:$0xf0]  ;;  %v8238_v14 = vld [vmem:[%s19646_s1 + $0x208] sm:$0xf]  ;;  %v6905_v40 = vpop.f32.mrf.mxu2  ;;  %v6918_v48 = vpop.f32.mrf.mxu3 }
 0x217   :  { %7157 = vmatpush.bf16.msra.mxu2 %v8303_v53  ;;  %v7998_v53 = vld [vmem:[%s19646_s1 + $0x28] sm:$0xf]  ;;  %v12135_v22 = vld [vmem:[%s19646_s1 + $0x214] sm:$0xf0] }
 0x218   :  { %7170 = vmatpush.bf16.msra.mxu3 %v8431_v0  ;;  %v12107_v0 = vld [vmem:[%s19646_s1 + $0x134] sm:$0xf0]  ;;  %v7999_v62 = vor.u32 %v12075_v57, %v7998_v53  ;;  %v8366_v27 = vld [vmem:[%s19646_s1 + $0x308] sm:$0xf]  ;;  %v8239_v53 = vor.u32 %v12135_v22, %v8238_v14 }
 0x219   :  { %7132 = vmatpush.bf16.msra.mxu0 %v8031_v8  ;;  %v12071_v8 = vld [vmem:[%s19646_s1 + $0x14] sm:$0xf0]  ;;  %v8606_v51 = vld [vmem:[%s19646_s1 + $0x4e8] sm:$0xf] }
 0x21a   :  { %7145 = vmatpush.bf16.msra.mxu1 %v8159_v9  ;;  %v8127_v9 = vor.u32 %v12107_v0, %v8126_v54  ;;  %v12167_v32 = vld [vmem:[%s19646_s1 + $0x314] sm:$0xf0]  ;;  %v8734_v52 = vld [vmem:[%s19646_s1 + $0x5e8] sm:$0xf]  ;;  %v7983_v50 = vor.u32 %v12071_v8, %v7982_v2 }
 0x21b   :  { %7158 = vmatpush.bf16.msra.mxu2 %v8287_v10  ;;  %v8255_v10 = vor.u32 %v12139_v63, %v8254_v59  ;;  %v12227_v43 = vld [vmem:[%s19646_s1 + $0x4f4] sm:$0xf0]  ;;  %v8862_v3 = vld [vmem:[%s19646_s1 + $0x6e8] sm:$0xf] }
 0x21c   :  { %7171 = vmatpush.bf16.msra.mxu3 %v8415_v17  ;;  %v8383_v17 = vor.u32 %v12171_v26, %v8382_v60  ;;  %v8990_v57 = vld [vmem:[%s19646_s1 + $0x7e8] sm:$0xf]  ;;  %v12323_v54 = vld [vmem:[%s19646_s1 + $0x7f4] sm:$0xf0]  ;;  %v8607_v0 = vor.u32 %v12227_v43, %v8606_v51 }
 0x21d   :  { %7133 = vmatpush.bf16.msra.mxu0 %v8015_v61  ;;  %v12259_v61 = vld [vmem:[%s19646_s1 + $0x5f4] sm:$0xf0]  ;;  %v8590_v60 = vld [vmem:[%s19646_s1 + $0x4c8] sm:$0xf]  ;;  %v8991_v2 = vor.u32 %v12323_v54, %v8990_v57 }
 0x21e   :  { %7146 = vmatpush.bf16.msra.mxu1 %v8143_v1  ;;  %v12291_v1 = vld [vmem:[%s19646_s1 + $0x6f4] sm:$0xf0]  ;;  %v8735_v59 = vor.u32 %v12259_v61, %v8734_v52  ;;  %v8702_v40 = vld [vmem:[%s19646_s1 + $0x5a8] sm:$0xf] }
 0x21f   :  { %7159 = vmatpush.bf16.msra.mxu2 %v8271_v55  ;;  %v8111_v55 = vor.u32 %v12103_v5, %v8110_v18  ;;  %v8863_v63 = vor.u32 %v12291_v1, %v8862_v3  ;;  %v12223_v26 = vld [vmem:[%s19646_s1 + $0x4d4] sm:$0xf0]  ;;  %v8974_v18 = vld [vmem:[%s19646_s1 + $0x7c8] sm:$0xf] }
 0x220   :  { %7172 = vmatpush.bf16.msra.mxu3 %v8399_v56  ;;  %v8367_v56 = vor.u32 %v12167_v32, %v8366_v27  ;;  %v12255_v8 = vld [vmem:[%s19646_s1 + $0x5d4] sm:$0xf0]  ;;  %v8591_v14 = vor.u32 %v12223_v26, %v8590_v60  ;;  %v8574_v27 = vld [vmem:[%s19646_s1 + $0x4a8] sm:$0xf] }
 0x221   :  { %7134 = vmatpush.bf16.msra.mxu0 %v7999_v62  ;;  %v8718_v62 = vld [vmem:[%s19646_s1 + $0x5c8] sm:$0xf]  ;;  %v12319_v5 = vld [vmem:[%s19646_s1 + $0x7d4] sm:$0xf0] }
 0x222   :  { %7147 = vmatpush.bf16.msra.mxu1 %v8127_v9  ;;  %v8846_v9 = vld [vmem:[%s19646_s1 + $0x6c8] sm:$0xf]  ;;  %v12219_v32 = vld [vmem:[%s19646_s1 + $0x4b4] sm:$0xf0]  ;;  %v8975_v51 = vor.u32 %v12319_v5, %v8974_v18 }
 0x223   :  { %7160 = vmatpush.bf16.msra.mxu2 %v8255_v10  ;;  %v12287_v10 = vld [vmem:[%s19646_s1 + $0x6d4] sm:$0xf0]  ;;  %v8830_v52 = vld [vmem:[%s19646_s1 + $0x6a8] sm:$0xf]  ;;  %v8575_v3 = vor.u32 %v12219_v32, %v8574_v27 }
 0x224   :  { %7173 = vmatpush.bf16.msra.mxu3 %v8383_v17  ;;  %v8719_v17 = vor.u32 %v12255_v8, %v8718_v62  ;;  %v8847_v22 = vor.u32 %v12287_v10, %v8846_v9  ;;  %v12251_v43 = vld [vmem:[%s19646_s1 + $0x5b4] sm:$0xf0]  ;;  %v8686_v54 = vld [vmem:[%s19646_s1 + $0x588] sm:$0xf] }
 0x225   :  { %7135 = vmatpush.bf16.msra.mxu0 %v7983_v50  ;;  %v12283_v48 = vld [vmem:[%s19646_s1 + $0x6b4] sm:$0xf0]  ;;  %v8958_v50 = vld [vmem:[%s19646_s1 + $0x7a8] sm:$0xf]  ;;  %v8703_v1 = vor.u32 %v12251_v43, %v8702_v40  ;;  %v6929_v60 = vpop.f32.mrf.mxu0 }
 0x226   :  { %7148 = vmatpush.bf16.msra.mxu1 %v8111_v55  ;;  %v12315_v61 = vld [vmem:[%s19646_s1 + $0x7b4] sm:$0xf0]  ;;  %v8831_v55 = vor.u32 %v12283_v48, %v8830_v52  ;;  %v8942_v26 = vld [vmem:[%s19646_s1 + $0x788] sm:$0xf]  ;;  %v6942_v9 = vpop.f32.mrf.mxu1 }
 0x227   :  { %7161 = vmatpush.bf16.msra.mxu2 %v8239_v53  ;;  %v8558_v53 = vld [vmem:[%s19646_s1 + $0x488] sm:$0xf]  ;;  %v12215_v57 = vld [vmem:[%s19646_s1 + $0x494] sm:$0xf0] }
 0x228   :  { %7174 = vmatpush.bf16.msra.mxu3 %v8367_v56  ;;  %7136 = vmatmul.bf16.vlgmr.msra.gmra.mxu0 %v13414_v20  ;;  %v8959_v56 = vor.u32 %v12315_v61, %v8958_v50  ;;  %v12311_v62 = vld [vmem:[%s19646_s1 + $0x794] sm:$0xf0]  ;;  %v8559_v8 = vor.u32 %v12215_v57, %v8558_v53  ;;  %v8542_v5 = vld [vmem:[%s19646_s1 + $0x468] sm:$0xf] }
 0x229   :  { %7180 = vmatpush.bf16.msrb.mxu0 %v8607_v0  ;;  %7149 = vmatmul.bf16.vlgmr.msra.gmra.mxu1 %v13417_v21  ;;  %v12247_v0 = vld [vmem:[%s19646_s1 + $0x594] sm:$0xf0]  ;;  %v8798_v32 = vld [vmem:[%s19646_s1 + $0x668] sm:$0xf] }
 0x22a   :  { %7193 = vmatpush.bf16.msrb.mxu1 %v8735_v59  ;;  %7162 = vmatmul.bf16.vlgmr.msra.gmra.mxu2 %v13382_v4  ;;  %v8814_v59 = vld [vmem:[%s19646_s1 + $0x688] sm:$0xf]  ;;  %v8687_v10 = vor.u32 %v12247_v0, %v8686_v54  ;;  %v12243_v27 = vld [vmem:[%s19646_s1 + $0x574] sm:$0xf0] }
 0x22b   :  { %7206 = vmatpush.bf16.msrb.mxu2 %v8863_v63  ;;  %7175 = vmatmul.bf16.vlgmr.msra.gmra.mxu3 %v13387_v6  ;;  %v12279_v63 = vld [vmem:[%s19646_s1 + $0x694] sm:$0xf0]  ;;  %v8526_v61 = vld [vmem:[%s19646_s1 + $0x448] sm:$0xf] }
 0x22c   :  { %7219 = vmatpush.bf16.msrb.mxu3 %v8991_v2  ;;  %v6930_v2 = vadd.f32 %v6929_v60, %v16564_v58  ;;  %v8815_v18 = vor.u32 %v12279_v63, %v8814_v59  ;;  %v8943_v58 = vor.u32 %v12311_v62, %v8942_v26  ;;  %v12275_v40 = vld [vmem:[%s19646_s1 + $0x674] sm:$0xf0]  ;;  %v8782_v54 = vld [vmem:[%s19646_s1 + $0x648] sm:$0xf] }
 0x22d   :  { %7181 = vmatpush.bf16.msrb.mxu0 %v8591_v14  ;;  %v12211_v14 = vld [vmem:[%s19646_s1 + $0x474] sm:$0xf0]  ;;  %v8799_v50 = vor.u32 %v12275_v40, %v8798_v32  ;;  %v6955_v53 = vpop.f32.mrf.mxu2  ;;  %v8910_v63 = vld [vmem:[%s19646_s1 + $0x748] sm:$0xf]  ;;  %v6931_v26 = vpop.f32.mrf.mxu0 }
 0x22e   :  { %7194 = vmatpush.bf16.msrb.mxu1 %v8719_v17  ;;  %v8670_v17 = vld [vmem:[%s19646_s1 + $0x568] sm:$0xf]  ;;  %v12307_v43 = vld [vmem:[%s19646_s1 + $0x774] sm:$0xf0]  ;;  %v8543_v52 = vor.u32 %v12211_v14, %v8542_v5  ;;  %v6968_v59 = vpop.f32.mrf.mxu3 }
 0x22f   :  { %7207 = vmatpush.bf16.msrb.mxu2 %v8847_v22  ;;  %v6943_v22 = vadd.f32 %v6942_v9, %v6930_v2  ;;  %v8671_v48 = vor.u32 %v12243_v27, %v8670_v17  ;;  %v12239_v57 = vld [vmem:[%s19646_s1 + $0x554] sm:$0xf0]  ;;  %v6944_v2 = vpop.f32.mrf.mxu1  ;;  %v8638_v14 = vld [vmem:[%s19646_s1 + $0x528] sm:$0xf] }
 0x230   :  { %7220 = vmatpush.bf16.msrb.mxu3 %v8975_v51  ;;  %v8926_v51 = vld [vmem:[%s19646_s1 + $0x768] sm:$0xf]  ;;  %v12303_v60 = vld [vmem:[%s19646_s1 + $0x754] sm:$0xf0] }
 0x231   :  { %7182 = vmatpush.bf16.msrb.mxu0 %v8575_v3  ;;  %v12207_v3 = vld [vmem:[%s19646_s1 + $0x454] sm:$0xf0]  ;;  %v6956_v0 = vadd.f32 %v6955_v53, %v6943_v22  ;;  %v8911_v17 = vor.u32 %v12303_v60, %v8910_v63  ;;  %v8766_v22 = vld [vmem:[%s19646_s1 + $0x628] sm:$0xf] }
 0x232   :  { %7195 = vmatpush.bf16.msrb.mxu1 %v8703_v1  ;;  %v8654_v1 = vld [vmem:[%s19646_s1 + $0x548] sm:$0xf]  ;;  %v8527_v62 = vor.u32 %v12207_v3, %v8526_v61  ;;  %v12203_v5 = vld [vmem:[%s19646_s1 + $0x434] sm:$0xf0] }
 0x233   :  { %7208 = vmatpush.bf16.msrb.mxu2 %v8831_v55  ;;  %v8927_v55 = vor.u32 %v12307_v43, %v8926_v51  ;;  %v8655_v9 = vor.u32 %v12239_v57, %v8654_v1  ;;  %v12267_v27 = vld [vmem:[%s19646_s1 + $0x634] sm:$0xf0]  ;;  %v8894_v32 = vld [vmem:[%s19646_s1 + $0x728] sm:$0xf] }
 0x234   :  { %7221 = vmatpush.bf16.msrb.mxu3 %v8959_v56  ;;  %v12271_v56 = vld [vmem:[%s19646_s1 + $0x654] sm:$0xf0]  ;;  %v8494_v43 = vld [vmem:[%s19646_s1 + $0x408] sm:$0xf] }
 0x235   :  { %7183 = vmatpush.bf16.msrb.mxu0 %v8559_v8  ;;  %v16763_v8 = vadd.f32 %v6968_v59, %v6956_v0  ;;  %v12299_v40 = vld [vmem:[%s19646_s1 + $0x734] sm:$0xf0]  ;;  %v8622_v61 = vld [vmem:[%s19646_s1 + $0x508] sm:$0xf] }
 0x236   :  { %7196 = vmatpush.bf16.msrb.mxu1 %v8687_v10  ;;  %v8783_v10 = vor.u32 %v12271_v56, %v8782_v54  ;;  %v12231_v3 = vld [vmem:[%s19646_s1 + $0x514] sm:$0xf0]  ;;  %v8750_v1 = vld [vmem:[%s19646_s1 + $0x608] sm:$0xf]  ;;  %v6957_v56 = vpop.f32.mrf.mxu2  ;;  %v6970_v60 = vpop.f32.mrf.mxu3 }
 0x237   :  { %7209 = vmatpush.bf16.msrb.mxu2 %v8815_v18  ;;  %v8510_v18 = vld [vmem:[%s19646_s1 + $0x428] sm:$0xf]  ;;  %v12263_v53 = vld [vmem:[%s19646_s1 + $0x614] sm:$0xf0] }
 0x238   :  { %7222 = vmatpush.bf16.msrb.mxu3 %v8943_v58  ;;  %v12235_v58 = vld [vmem:[%s19646_s1 + $0x534] sm:$0xf0]  ;;  %v8511_v51 = vor.u32 %v12203_v5, %v8510_v18  ;;  %v8878_v57 = vld [vmem:[%s19646_s1 + $0x708] sm:$0xf]  ;;  %v8751_v18 = vor.u32 %v12263_v53, %v8750_v1 }
 0x239   :  { %7184 = vmatpush.bf16.msrb.mxu0 %v8543_v52  ;;  %v12199_v52 = vld [vmem:[%s19646_s1 + $0x414] sm:$0xf0]  ;;  %v9118_v0 = vld [vmem:[%s19646_s1 + $0x8e8] sm:$0xf] }
 0x23a   :  { %7197 = vmatpush.bf16.msrb.mxu1 %v8671_v48  ;;  %v8639_v48 = vor.u32 %v12235_v58, %v8638_v14  ;;  %v12295_v54 = vld [vmem:[%s19646_s1 + $0x714] sm:$0xf0]  ;;  %v9246_v63 = vld [vmem:[%s19646_s1 + $0x9e8] sm:$0xf]  ;;  %v8495_v26 = vor.u32 %v12199_v52, %v8494_v43 }
 0x23b   :  { %7210 = vmatpush.bf16.msrb.mxu2 %v8799_v50  ;;  %v8767_v50 = vor.u32 %v12267_v27, %v8766_v22  ;;  %v12355_v59 = vld [vmem:[%s19646_s1 + $0x8f4] sm:$0xf0]  ;;  %v9374_v2 = vld [vmem:[%s19646_s1 + $0xae8] sm:$0xf] }
 0x23c   :  { %7223 = vmatpush.bf16.msrb.mxu3 %v8927_v55  ;;  %v8895_v55 = vor.u32 %v12299_v40, %v8894_v32  ;;  %v9502_v5 = vld [vmem:[%s19646_s1 + $0xbe8] sm:$0xf]  ;;  %v12451_v14 = vld [vmem:[%s19646_s1 + $0xbf4] sm:$0xf0]  ;;  %v9119_v58 = vor.u32 %v12355_v59, %v9118_v0 }
 0x23d   :  { %7185 = vmatpush.bf16.msrb.mxu0 %v8527_v62  ;;  %v12387_v62 = vld [vmem:[%s19646_s1 + $0x9f4] sm:$0xf0]  ;;  %v9102_v32 = vld [vmem:[%s19646_s1 + $0x8c8] sm:$0xf]  ;;  %v9503_v43 = vor.u32 %v12451_v14, %v9502_v5 }
 0x23e   :  { %7198 = vmatpush.bf16.msrb.mxu1 %v8655_v9  ;;  %v12419_v9 = vld [vmem:[%s19646_s1 + $0xaf4] sm:$0xf0]  ;;  %v9247_v22 = vor.u32 %v12387_v62, %v9246_v63  ;;  %v9214_v56 = vld [vmem:[%s19646_s1 + $0x9a8] sm:$0xf] }
 0x23f   :  { %7211 = vmatpush.bf16.msrb.mxu2 %v8783_v10  ;;  %v8623_v10 = vor.u32 %v12231_v3, %v8622_v61  ;;  %v9375_v27 = vor.u32 %v12419_v9, %v9374_v2  ;;  %v12351_v40 = vld [vmem:[%s19646_s1 + $0x8d4] sm:$0xf0]  ;;  %v9486_v61 = vld [vmem:[%s19646_s1 + $0xbc8] sm:$0xf] }
 0x240   :  { %7224 = vmatpush.bf16.msrb.mxu3 %v8911_v17  ;;  %v8879_v17 = vor.u32 %v12295_v54, %v8878_v57  ;;  %v12383_v52 = vld [vmem:[%s19646_s1 + $0x9d4] sm:$0xf0]  ;;  %v9103_v1 = vor.u32 %v12351_v40, %v9102_v32  ;;  %v9086_v57 = vld [vmem:[%s19646_s1 + $0x8a8] sm:$0xf] }
 0x241   :  { %7186 = vmatpush.bf16.msrb.mxu0 %v8511_v51  ;;  %v9230_v51 = vld [vmem:[%s19646_s1 + $0x9c8] sm:$0xf]  ;;  %v12447_v3 = vld [vmem:[%s19646_s1 + $0xbd4] sm:$0xf0] }
 0x242   :  { %7199 = vmatpush.bf16.msrb.mxu1 %v8639_v48  ;;  %v9358_v48 = vld [vmem:[%s19646_s1 + $0xac8] sm:$0xf]  ;;  %v12347_v54 = vld [vmem:[%s19646_s1 + $0x8b4] sm:$0xf0]  ;;  %v9487_v0 = vor.u32 %v12447_v3, %v9486_v61 }
 0x243   :  { %7212 = vmatpush.bf16.msrb.mxu2 %v8767_v50  ;;  %v12415_v50 = vld [vmem:[%s19646_s1 + $0xad4] sm:$0xf0]  ;;  %v9342_v63 = vld [vmem:[%s19646_s1 + $0xaa8] sm:$0xf]  ;;  %v9087_v2 = vor.u32 %v12347_v54, %v9086_v57 }
 0x244   :  { %7225 = vmatpush.bf16.msrb.mxu3 %v8895_v55  ;;  %v9231_v55 = vor.u32 %v12383_v52, %v9230_v51  ;;  %v9359_v53 = vor.u32 %v12415_v50, %v9358_v48  ;;  %v12379_v59 = vld [vmem:[%s19646_s1 + $0x9b4] sm:$0xf0]  ;;  %v9198_v14 = vld [vmem:[%s19646_s1 + $0x988] sm:$0xf] }
 0x245   :  { %7187 = vmatpush.bf16.msrb.mxu0 %v8495_v26  ;;  %v12411_v60 = vld [vmem:[%s19646_s1 + $0xab4] sm:$0xf0]  ;;  %v9470_v26 = vld [vmem:[%s19646_s1 + $0xba8] sm:$0xf]  ;;  %v9215_v9 = vor.u32 %v12379_v59, %v9214_v56  ;;  %v16907_v32 = vpop.f32.mrf.mxu0 }
 0x246   :  { %7200 = vmatpush.bf16.msrb.mxu1 %v8623_v10  ;;  %v12443_v62 = vld [vmem:[%s19646_s1 + $0xbb4] sm:$0xf0]  ;;  %v9343_v10 = vor.u32 %v12411_v60, %v9342_v63  ;;  %v9454_v40 = vld [vmem:[%s19646_s1 + $0xb88] sm:$0xf]  ;;  %v16915_v52 = vpop.f32.mrf.mxu1 }
 0x247   :  { %7213 = vmatpush.bf16.msrb.mxu2 %v8751_v18  ;;  %v9070_v18 = vld [vmem:[%s19646_s1 + $0x888] sm:$0xf]  ;;  %v12343_v5 = vld [vmem:[%s19646_s1 + $0x894] sm:$0xf0] }
 0x248   :  { %7226 = vmatpush.bf16.msrb.mxu3 %v8879_v17  ;;  %7188 = vmatmul.bf16.vlgmr.msrb.gmra.mxu0 %v13573_v41  ;;  %v9471_v17 = vor.u32 %v12443_v62, %v9470_v26  ;;  %v12439_v51 = vld [vmem:[%s19646_s1 + $0xb94] sm:$0xf0]  ;;  %v9054_v61 = vld [vmem:[%s19646_s1 + $0x868] sm:$0xf] }
 0x249   :  { %7232 = vmatpush.bf16.msra.mxu0 %v9119_v58  ;;  %7201 = vmatmul.bf16.vlgmr.msrb.gmra.mxu1 %v13577_v44  ;;  %v12375_v58 = vld [vmem:[%s19646_s1 + $0x994] sm:$0xf0]  ;;  %v9310_v57 = vld [vmem:[%s19646_s1 + $0xa68] sm:$0xf] }
 0x24a   :  { %7245 = vmatpush.bf16.msra.mxu1 %v9247_v22  ;;  %7214 = vmatmul.bf16.vlgmr.msrb.gmra.mxu2 %v13565_v38  ;;  %v9326_v22 = vld [vmem:[%s19646_s1 + $0xa88] sm:$0xf]  ;;  %v9199_v48 = vor.u32 %v12375_v58, %v9198_v14  ;;  %v12339_v3 = vld [vmem:[%s19646_s1 + $0x874] sm:$0xf0] }
 0x24b   :  { %7258 = vmatpush.bf16.msra.mxu2 %v9375_v27  ;;  %7227 = vmatmul.bf16.vlgmr.msrb.gmra.mxu3 %v13575_v42  ;;  %v12407_v27 = vld [vmem:[%s19646_s1 + $0xa94] sm:$0xf0]  ;;  %v9438_v56 = vld [vmem:[%s19646_s1 + $0xb68] sm:$0xf]  ;;  %v9055_v59 = vor.u32 %v12339_v3, %v9054_v61 }
 0x24c   :  { %7271 = vmatpush.bf16.msra.mxu3 %v9503_v43  ;;  %v9071_v43 = vor.u32 %v12343_v5, %v9070_v18  ;;  %v9327_v50 = vor.u32 %v12407_v27, %v9326_v22  ;;  %v12403_v54 = vld [vmem:[%s19646_s1 + $0xa74] sm:$0xf0]  ;;  %v9038_v26 = vld [vmem:[%s19646_s1 + $0x848] sm:$0xf] }
 0x24d   :  { %7233 = vmatpush.bf16.msra.mxu0 %v9103_v1  ;;  %v9182_v1 = vld [vmem:[%s19646_s1 + $0x968] sm:$0xf]  ;;  %v9311_v60 = vor.u32 %v12403_v54, %v9310_v57  ;;  %v12335_v62 = vld [vmem:[%s19646_s1 + $0x854] sm:$0xf0]  ;;  %v6983_v27 = vpop.f32.mrf.mxu0 }
 0x24e   :  { %7246 = vmatpush.bf16.msra.mxu1 %v9231_v55  ;;  %v9455_v55 = vor.u32 %v12439_v51, %v9454_v40  ;;  %v12367_v18 = vld [vmem:[%s19646_s1 + $0x954] sm:$0xf0]  ;;  %v9294_v5 = vld [vmem:[%s19646_s1 + $0xa48] sm:$0xf]  ;;  %v9039_v40 = vor.u32 %v12335_v62, %v9038_v26  ;;  %v6996_v51 = vpop.f32.mrf.mxu1 }
 0x24f   :  { %7259 = vmatpush.bf16.msra.mxu2 %v9359_v53  ;;  %v12371_v53 = vld [vmem:[%s19646_s1 + $0x974] sm:$0xf0]  ;;  %v9422_v58 = vld [vmem:[%s19646_s1 + $0xb48] sm:$0xf] }
 0x250   :  { %7272 = vmatpush.bf16.msra.mxu3 %v9487_v0  ;;  %v12435_v0 = vld [vmem:[%s19646_s1 + $0xb74] sm:$0xf0]  ;;  %v9183_v63 = vor.u32 %v12371_v53, %v9182_v1  ;;  %v9150_v3 = vld [vmem:[%s19646_s1 + $0x928] sm:$0xf] }
 0x251   :  { %7234 = vmatpush.bf16.msra.mxu0 %v9087_v2  ;;  %v9166_v2 = vld [vmem:[%s19646_s1 + $0x948] sm:$0xf]  ;;  %v12399_v14 = vld [vmem:[%s19646_s1 + $0xa54] sm:$0xf0] }
 0x252   :  { %7247 = vmatpush.bf16.msra.mxu1 %v9215_v9  ;;  %v9439_v9 = vor.u32 %v12435_v0, %v9438_v56  ;;  %v12431_v22 = vld [vmem:[%s19646_s1 + $0xb54] sm:$0xf0]  ;;  %v9278_v53 = vld [vmem:[%s19646_s1 + $0xa28] sm:$0xf] }
 0x253   :  { %7260 = vmatpush.bf16.msra.mxu2 %v9343_v10  ;;  %v16950_v10 = vpop.f32.mrf.mxu2  ;;  %v12331_v61 = vld [vmem:[%s19646_s1 + $0x834] sm:$0xf0]  ;;  %v9423_v1 = vor.u32 %v12431_v22, %v9422_v58  ;;  %v9406_v54 = vld [vmem:[%s19646_s1 + $0xb28] sm:$0xf] }
 0x254   :  { %7273 = vmatpush.bf16.msra.mxu3 %v9471_v17  ;;  %v16961_v17 = vpop.f32.mrf.mxu3  ;;  %v12395_v57 = vld [vmem:[%s19646_s1 + $0xa34] sm:$0xf0]  ;;  %v9134_v62 = vld [vmem:[%s19646_s1 + $0x908] sm:$0xf] }
 0x255   :  { %7235 = vmatpush.bf16.msra.mxu0 %v9071_v43  ;;  %v9167_v43 = vor.u32 %v12367_v18, %v9166_v2  ;;  %v12427_v56 = vld [vmem:[%s19646_s1 + $0xb34] sm:$0xf0]  ;;  %v9279_v26 = vor.u32 %v12395_v57, %v9278_v53  ;;  %v9630_v27 = vld [vmem:[%s19646_s1 + $0xce8] sm:$0xf] }
 0x256   :  { %7248 = vmatpush.bf16.msra.mxu1 %v9199_v48  ;;  %v9295_v48 = vor.u32 %v12399_v14, %v9294_v5  ;;  %v12359_v2 = vld [vmem:[%s19646_s1 + $0x914] sm:$0xf0]  ;;  %v9407_v18 = vor.u32 %v12427_v56, %v9406_v54  ;;  %v9390_v14 = vld [vmem:[%s19646_s1 + $0xb08] sm:$0xf] }
 0x257   :  { %7261 = vmatpush.bf16.msra.mxu2 %v9327_v50  ;;  %v9022_v50 = vld [vmem:[%s19646_s1 + $0x828] sm:$0xf]  ;;  %v12391_v5 = vld [vmem:[%s19646_s1 + $0xa14] sm:$0xf0] }
 0x258   :  { %7274 = vmatpush.bf16.msra.mxu3 %v9455_v55  ;;  %v12363_v55 = vld [vmem:[%s19646_s1 + $0x934] sm:$0xf0]  ;;  %v9023_v0 = vor.u32 %v12331_v61, %v9022_v50  ;;  %v9758_v51 = vld [vmem:[%s19646_s1 + $0xde8] sm:$0xf] }
 0x259   :  { %7236 = vmatpush.bf16.msra.mxu0 %v9055_v59  ;;  %v9006_v59 = vld [vmem:[%s19646_s1 + $0x808] sm:$0xf]  ;;  %v12423_v58 = vld [vmem:[%s19646_s1 + $0xb14] sm:$0xf0] }
 0x25a   :  { %7249 = vmatpush.bf16.msra.mxu1 %v9183_v63  ;;  %v12327_v63 = vld [vmem:[%s19646_s1 + $0x814] sm:$0xf0]  ;;  %v9886_v61 = vld [vmem:[%s19646_s1 + $0xee8] sm:$0xf]  ;;  %v9391_v54 = vor.u32 %v12423_v58, %v9390_v14 }
 0x25b   :  { %7262 = vmatpush.bf16.msra.mxu2 %v9311_v60  ;;  %v9151_v60 = vor.u32 %v12363_v55, %v9150_v3  ;;  %v7009_v22 = vpop.f32.mrf.mxu2  ;;  %v12515_v50 = vld [vmem:[%s19646_s1 + $0xdf4] sm:$0xf0]  ;;  %v10014_v53 = vld [vmem:[%s19646_s1 + $0xfe8] sm:$0xf] }
 0x25c   :  { %7275 = vmatpush.bf16.msra.mxu3 %v9439_v9  ;;  %v9262_v9 = vld [vmem:[%s19646_s1 + $0xa08] sm:$0xf]  ;;  %v12547_v3 = vld [vmem:[%s19646_s1 + $0xef4] sm:$0xf0] }
 0x25d   :  { %7237 = vmatpush.bf16.msra.mxu0 %v9039_v40  ;;  %v12483_v40 = vld [vmem:[%s19646_s1 + $0xcf4] sm:$0xf0]  ;;  %v9263_v55 = vor.u32 %v12391_v5, %v9262_v9  ;;  %v9870_v9 = vld [vmem:[%s19646_s1 + $0xec8] sm:$0xf] }
 0x25e   :  { %7250 = vmatpush.bf16.msra.mxu1 %v9167_v43  ;;  %v7022_v43 = vpop.f32.mrf.mxu3  ;;  %v12579_v57 = vld [vmem:[%s19646_s1 + $0xff4] sm:$0xf0]  ;;  %v9631_v56 = vor.u32 %v12483_v40, %v9630_v27  ;;  %v9998_v5 = vld [vmem:[%s19646_s1 + $0xfc8] sm:$0xf] }
 0x25f   :  { %7263 = vmatpush.bf16.msra.mxu2 %v9295_v48  ;;  %v9007_v48 = vor.u32 %v12327_v63, %v9006_v59  ;;  %v9887_v59 = vor.u32 %v12547_v3, %v9886_v61  ;;  %v9614_v63 = vld [vmem:[%s19646_s1 + $0xcc8] sm:$0xf]  ;;  %v12575_v14 = vld [vmem:[%s19646_s1 + $0xfd4] sm:$0xf0] }
 0x260   :  { %7276 = vmatpush.bf16.msra.mxu3 %v9423_v1  ;;  %v9135_v1 = vor.u32 %v12359_v2, %v9134_v62  ;;  %v10015_v62 = vor.u32 %v12579_v57, %v10014_v53  ;;  %v12511_v2 = vld [vmem:[%s19646_s1 + $0xdd4] sm:$0xf0]  ;;  %v9598_v40 = vld [vmem:[%s19646_s1 + $0xca8] sm:$0xf] }
 0x261   :  { %7238 = vmatpush.bf16.msra.mxu0 %v9023_v0  ;;  %v9759_v0 = vor.u32 %v12515_v50, %v9758_v51  ;;  %v12475_v51 = vld [vmem:[%s19646_s1 + $0xcb4] sm:$0xf0]  ;;  %v9726_v43 = vld [vmem:[%s19646_s1 + $0xda8] sm:$0xf] }
 0x262   :  { %7251 = vmatpush.bf16.msra.mxu1 %v9151_v60  ;;  %v12479_v60 = vld [vmem:[%s19646_s1 + $0xcd4] sm:$0xf0]  ;;  %v9854_v61 = vld [vmem:[%s19646_s1 + $0xea8] sm:$0xf]  ;;  %v9599_v53 = vor.u32 %v12475_v51, %v9598_v40 }
 0x263   :  { %7264 = vmatpush.bf16.msra.mxu2 %v9279_v26  ;;  %v9742_v26 = vld [vmem:[%s19646_s1 + $0xdc8] sm:$0xf]  ;;  %v9615_v58 = vor.u32 %v12479_v60, %v9614_v63  ;;  %v12507_v50 = vld [vmem:[%s19646_s1 + $0xdb4] sm:$0xf0] }
 0x264   :  { %7277 = vmatpush.bf16.msra.mxu3 %v9407_v18  ;;  %v12543_v18 = vld [vmem:[%s19646_s1 + $0xed4] sm:$0xf0]  ;;  %v9743_v22 = vor.u32 %v12511_v2, %v9742_v26  ;;  %v9727_v57 = vor.u32 %v12507_v50, %v9726_v43  ;;  %v9838_v26 = vld [vmem:[%s19646_s1 + $0xe88] sm:$0xf] }
 0x265   :  { %7239 = vmatpush.bf16.msra.mxu0 %v9007_v48  ;;  %v9871_v27 = vor.u32 %v12543_v18, %v9870_v9  ;;  %v9999_v48 = vor.u32 %v12575_v14, %v9998_v5  ;;  %v12539_v3 = vld [vmem:[%s19646_s1 + $0xeb4] sm:$0xf0]  ;;  %v17111_v2 = vpop.f32.mrf.mxu0  ;;  %v9966_v9 = vld [vmem:[%s19646_s1 + $0xf88] sm:$0xf] }
 0x266   :  { %7252 = vmatpush.bf16.msra.mxu1 %v9135_v1  ;;  %v9982_v1 = vld [vmem:[%s19646_s1 + $0xfa8] sm:$0xf]  ;;  %v12503_v60 = vld [vmem:[%s19646_s1 + $0xd94] sm:$0xf0]  ;;  %v17119_v14 = vpop.f32.mrf.mxu1 }
 0x267   :  { %7265 = vmatpush.bf16.msra.mxu2 %v9263_v55  ;;  %v12571_v55 = vld [vmem:[%s19646_s1 + $0xfb4] sm:$0xf0]  ;;  %v9694_v51 = vld [vmem:[%s19646_s1 + $0xd68] sm:$0xf] }
 0x268   :  { %7278 = vmatpush.bf16.msra.mxu3 %v9391_v54  ;;  %7240 = vmatmul.bf16.vlgmr.msra.gmra.mxu0 %v13766_v25  ;;  %v9855_v54 = vor.u32 %v12539_v3, %v9854_v61  ;;  %v9983_v63 = vor.u32 %v12571_v55, %v9982_v1  ;;  %v12567_v18 = vld [vmem:[%s19646_s1 + $0xf94] sm:$0xf0]  ;;  %v9822_v50 = vld [vmem:[%s19646_s1 + $0xe68] sm:$0xf] }
 0x269   :  { %7284 = vmatpush.bf16.msrb.mxu0 %v9631_v56  ;;  %7253 = vmatmul.bf16.vlgmr.msra.gmra.mxu1 %v13779_v30  ;;  %v9582_v56 = vld [vmem:[%s19646_s1 + $0xc88] sm:$0xf]  ;;  %v12467_v40 = vld [vmem:[%s19646_s1 + $0xc74] sm:$0xf0]  ;;  %v9967_v43 = vor.u32 %v12567_v18, %v9966_v9  ;;  %v6982_v9 = vadd.f32 %v16907_v32, %v16763_v8 }
 0x26a   :  { %7297 = vmatpush.bf16.msrb.mxu1 %v9759_v0  ;;  %7266 = vmatmul.bf16.vlgmr.msra.gmra.mxu2 %v13777_v29  ;;  %v12471_v0 = vld [vmem:[%s19646_s1 + $0xc94] sm:$0xf0]  ;;  %v9950_v3 = vld [vmem:[%s19646_s1 + $0xf68] sm:$0xf] }
 0x26b   :  { %7310 = vmatpush.bf16.msrb.mxu2 %v9887_v59  ;;  %7279 = vmatmul.bf16.vlgmr.msra.gmra.mxu3 %v13787_v33  ;;  %v9710_v59 = vld [vmem:[%s19646_s1 + $0xd88] sm:$0xf]  ;;  %v9583_v5 = vor.u32 %v12471_v0, %v9582_v56  ;;  %v12531_v61 = vld [vmem:[%s19646_s1 + $0xe74] sm:$0xf0] }
 0x26c   :  { %7323 = vmatpush.bf16.msrb.mxu3 %v10015_v62  ;;  %v12535_v62 = vld [vmem:[%s19646_s1 + $0xe94] sm:$0xf0]  ;;  %v9678_v0 = vld [vmem:[%s19646_s1 + $0xd48] sm:$0xf] }
 0x26d   :  { %7285 = vmatpush.bf16.msrb.mxu0 %v9615_v58  ;;  %v9711_v58 = vor.u32 %v12503_v60, %v9710_v59  ;;  %v12563_v1 = vld [vmem:[%s19646_s1 + $0xf74] sm:$0xf0]  ;;  %v9534_v8 = vld [vmem:[%s19646_s1 + $0xc28] sm:$0xf] }
 0x26e   :  { %7298 = vmatpush.bf16.msrb.mxu1 %v9743_v22  ;;  %v9839_v22 = vor.u32 %v12535_v62, %v9838_v26  ;;  %v12463_v56 = vld [vmem:[%s19646_s1 + $0xc54] sm:$0xf0]  ;;  %v9951_v59 = vor.u32 %v12563_v1, %v9950_v3  ;;  %v9806_v26 = vld [vmem:[%s19646_s1 + $0xe48] sm:$0xf]  ;;  %v17167_v18 = vpop.f32.mrf.mxu3 }
 0x26f   :  { %7311 = vmatpush.bf16.msrb.mxu2 %v9871_v27  ;;  %v9566_v27 = vld [vmem:[%s19646_s1 + $0xc68] sm:$0xf]  ;;  %v12495_v60 = vld [vmem:[%s19646_s1 + $0xd54] sm:$0xf0] }
 0x270   :  { %7324 = vmatpush.bf16.msrb.mxu3 %v9999_v48  ;;  %v12499_v48 = vld [vmem:[%s19646_s1 + $0xd74] sm:$0xf0]  ;;  %v9567_v55 = vor.u32 %v12467_v40, %v9566_v27  ;;  %v7048_v40 = vpop.f32.mrf.mxu1  ;;  %v9790_v3 = vld [vmem:[%s19646_s1 + $0xe28] sm:$0xf] }
 0x271   :  { %7286 = vmatpush.bf16.msrb.mxu0 %v9599_v53  ;;  %v9695_v53 = vor.u32 %v12499_v48, %v9694_v51  ;;  %v12527_v62 = vld [vmem:[%s19646_s1 + $0xe54] sm:$0xf0]  ;;  %v9679_v51 = vor.u32 %v12495_v60, %v9678_v0  ;;  %v9662_v48 = vld [vmem:[%s19646_s1 + $0xd28] sm:$0xf] }
 0x272   :  { %7299 = vmatpush.bf16.msrb.mxu1 %v9727_v57  ;;  %v9823_v57 = vor.u32 %v12531_v61, %v9822_v50  ;;  %v12459_v32 = vld [vmem:[%s19646_s1 + $0xc34] sm:$0xf0]  ;;  %v10142_v40 = vld [vmem:[%s19646_s1 + $0x10e8] sm:$0xf] }
 0x273   :  { %7312 = vmatpush.bf16.msrb.mxu2 %v9855_v54  ;;  %v9550_v54 = vld [vmem:[%s19646_s1 + $0xc48] sm:$0xf]  ;;  %v12491_v61 = vld [vmem:[%s19646_s1 + $0xd34] sm:$0xf0] }
 0x274   :  { %7325 = vmatpush.bf16.msrb.mxu3 %v9983_v63  ;;  %v17154_v63 = vpop.f32.mrf.mxu2  ;;  %v9551_v27 = vor.u32 %v12463_v56, %v9550_v54  ;;  %v12523_v1 = vld [vmem:[%s19646_s1 + $0xe34] sm:$0xf0]  ;;  %v9535_v54 = vor.u32 %v12459_v32, %v9534_v8  ;;  %v9518_v56 = vld [vmem:[%s19646_s1 + $0xc08] sm:$0xf] }
 0x275   :  { %7287 = vmatpush.bf16.msrb.mxu0 %v9583_v5  ;;  %v9934_v5 = vld [vmem:[%s19646_s1 + $0xf48] sm:$0xf]  ;;  %v12455_v0 = vld [vmem:[%s19646_s1 + $0xc14] sm:$0xf0]  ;;  %v9791_v60 = vor.u32 %v12523_v1, %v9790_v3 }
 0x276   :  { %7300 = vmatpush.bf16.msrb.mxu1 %v9711_v58  ;;  %v12559_v58 = vld [vmem:[%s19646_s1 + $0xf54] sm:$0xf0]  ;;  %v7074_v8 = vpop.f32.mrf.mxu3  ;;  %v9519_v32 = vor.u32 %v12455_v0, %v9518_v56 }
 0x277   :  { %7313 = vmatpush.bf16.msrb.mxu2 %v9839_v22  ;;  %v7035_v22 = vpop.f32.mrf.mxu0  ;;  %v9935_v50 = vor.u32 %v12559_v58, %v9934_v5  ;;  %v9902_v58 = vld [vmem:[%s19646_s1 + $0xf08] sm:$0xf] }
 0x278   :  { %7326 = vmatpush.bf16.msrb.mxu3 %v9967_v43  ;;  %v9807_v43 = vor.u32 %v12527_v62, %v9806_v26  ;;  %v9646_v26 = vld [vmem:[%s19646_s1 + $0xd08] sm:$0xf]  ;;  %v12487_v62 = vld [vmem:[%s19646_s1 + $0xd14] sm:$0xf0] }
 0x279   :  { %7288 = vmatpush.bf16.msrb.mxu0 %v9567_v55  ;;  %v6995_v55 = vadd.f32 %v16915_v52, %v6982_v9  ;;  %v9774_v9 = vld [vmem:[%s19646_s1 + $0xe08] sm:$0xf]  ;;  %v12551_v22 = vld [vmem:[%s19646_s1 + $0xf14] sm:$0xf0]  ;;  %v9647_v1 = vor.u32 %v12487_v62, %v9646_v26 }
 0x27a   :  { %7301 = vmatpush.bf16.msrb.mxu1 %v9695_v53  ;;  %v9918_v53 = vld [vmem:[%s19646_s1 + $0xf28] sm:$0xf]  ;;  %v12671_v62 = vld [vmem:[%s19646_s1 + $0x12d4] sm:$0xf0] }
 0x27b   :  { %7314 = vmatpush.bf16.msrb.mxu2 %v9823_v57  ;;  %v12555_v57 = vld [vmem:[%s19646_s1 + $0xf34] sm:$0xf0]  ;;  %v7008_v52 = vadd.f32 %v16950_v10, %v6995_v55  ;;  %v10382_v26 = vld [vmem:[%s19646_s1 + $0x12c8] sm:$0xf] }
 0x27c   :  { %7327 = vmatpush.bf16.msrb.mxu3 %v9951_v59  ;;  %v9663_v59 = vor.u32 %v12491_v61, %v9662_v48  ;;  %v9919_v5 = vor.u32 %v12555_v57, %v9918_v53  ;;  %v12519_v10 = vld [vmem:[%s19646_s1 + $0xe14] sm:$0xf0]  ;;  %v10526_v53 = vld [vmem:[%s19646_s1 + $0x13e8] sm:$0xf] }
 0x27d   :  { %7289 = vmatpush.bf16.msrb.mxu0 %v9551_v27  ;;  %v7061_v27 = vpop.f32.mrf.mxu2  ;;  %v12643_v48 = vld [vmem:[%s19646_s1 + $0x11f4] sm:$0xf0]  ;;  %v7021_v3 = vadd.f32 %v16961_v17, %v7008_v52  ;;  %v9775_v55 = vor.u32 %v12519_v10, %v9774_v9  ;;  %v10126_v17 = vld [vmem:[%s19646_s1 + $0x10c8] sm:$0xf] }
 0x27e   :  { %7302 = vmatpush.bf16.msrb.mxu1 %v9679_v51  ;;  %v12611_v51 = vld [vmem:[%s19646_s1 + $0x10f4] sm:$0xf0]  ;;  %v10510_v9 = vld [vmem:[%s19646_s1 + $0x13c8] sm:$0xf] }
 0x27f   :  { %7315 = vmatpush.bf16.msrb.mxu2 %v9807_v43  ;;  %v10270_v43 = vld [vmem:[%s19646_s1 + $0x11e8] sm:$0xf]  ;;  %v12675_v61 = vld [vmem:[%s19646_s1 + $0x12f4] sm:$0xf0]  ;;  %v10143_v56 = vor.u32 %v12611_v51, %v10142_v40  ;;  %v7034_v0 = vadd.f32 %v17111_v2, %v7021_v3  ;;  %v10383_v40 = vor.u32 %v12671_v62, %v10382_v26 }
 0x280   :  { %7328 = vmatpush.bf16.msrb.mxu3 %v9935_v50  ;;  %v10398_v50 = vld [vmem:[%s19646_s1 + $0x12e8] sm:$0xf]  ;;  %v12707_v57 = vld [vmem:[%s19646_s1 + $0x13f4] sm:$0xf0]  ;;  %v10271_v27 = vor.u32 %v12643_v48, %v10270_v43 }
 0x281   :  { %7290 = vmatpush.bf16.msrb.mxu0 %v9535_v54  ;;  %v9903_v54 = vor.u32 %v12551_v22, %v9902_v58  ;;  %v10399_v8 = vor.u32 %v12675_v61, %v10398_v50  ;;  %v12607_v52 = vld [vmem:[%s19646_s1 + $0x10d4] sm:$0xf0]  ;;  %v7047_v58 = vadd.f32 %v17119_v14, %v7034_v0  ;;  %v10110_v51 = vld [vmem:[%s19646_s1 + $0x10a8] sm:$0xf] }
 0x282   :  { %7303 = vmatpush.bf16.msrb.mxu1 %v9663_v59  ;;  %v10254_v59 = vld [vmem:[%s19646_s1 + $0x11c8] sm:$0xf]  ;;  %v12639_v2 = vld [vmem:[%s19646_s1 + $0x11d4] sm:$0xf0]  ;;  %v10127_v10 = vor.u32 %v12607_v52, %v10126_v17 }
 0x283   :  { %7316 = vmatpush.bf16.msrb.mxu2 %v9791_v60  ;;  %v10527_v60 = vor.u32 %v12707_v57, %v10526_v53  ;;  %v10255_v22 = vor.u32 %v12639_v2, %v10254_v59  ;;  %v12603_v43 = vld [vmem:[%s19646_s1 + $0x10b4] sm:$0xf0]  ;;  %v10366_v50 = vld [vmem:[%s19646_s1 + $0x12a8] sm:$0xf]  ;;  %v7060_v3 = vadd.f32 %v17154_v63, %v7047_v58 }
 0x284   :  { %7329 = vmatpush.bf16.msrb.mxu3 %v9919_v5  ;;  %v12703_v5 = vld [vmem:[%s19646_s1 + $0x13d4] sm:$0xf0]  ;;  %v10111_v53 = vor.u32 %v12603_v43, %v10110_v51  ;;  %v10222_v0 = vld [vmem:[%s19646_s1 + $0x1188] sm:$0xf] }
 0x285   :  { %7291 = vmatpush.bf16.msrb.mxu0 %v9519_v32  ;;  %v10238_v32 = vld [vmem:[%s19646_s1 + $0x11a8] sm:$0xf]  ;;  %v10511_v14 = vor.u32 %v12703_v5, %v10510_v9  ;;  %v12635_v48 = vld [vmem:[%s19646_s1 + $0x11b4] sm:$0xf0]  ;;  %v7073_v59 = vadd.f32 %v17167_v18, %v7060_v3 }
 0x286   :  { %7304 = vmatpush.bf16.msrb.mxu1 %v9647_v1  ;;  %v12667_v61 = vld [vmem:[%s19646_s1 + $0x12b4] sm:$0xf0]  ;;  %v10494_v1 = vld [vmem:[%s19646_s1 + $0x13a8] sm:$0xf]  ;;  %v10239_v57 = vor.u32 %v12635_v48, %v10238_v32  ;;  %v7098_v9 = vpop.f32.mrf.mxu1 }
 0x287   :  { %7317 = vmatpush.bf16.msrb.mxu2 %v9775_v55  ;;  %v12699_v55 = vld [vmem:[%s19646_s1 + $0x13b4] sm:$0xf0]  ;;  %v10367_v63 = vor.u32 %v12667_v61, %v10366_v50  ;;  %v10350_v17 = vld [vmem:[%s19646_s1 + $0x1288] sm:$0xf] }
 0x288   :  { %7330 = vmatpush.bf16.msrb.mxu3 %v9903_v54  ;;  %7292 = vmatmul.bf16.vlgmr.msrb.gmra.mxu0 %v13976_v23  ;;  %v10094_v54 = vld [vmem:[%s19646_s1 + $0x1088] sm:$0xf]  ;;  %v12663_v52 = vld [vmem:[%s19646_s1 + $0x1294] sm:$0xf0] }
 0x289   :  { %7336 = vmatpush.bf16.msra.mxu0 %v10143_v56  ;;  %7305 = vmatmul.bf16.vlgmr.msrb.gmra.mxu1 %v13989_v31  ;;  %v12599_v56 = vld [vmem:[%s19646_s1 + $0x1094] sm:$0xf0]  ;;  %v10478_v2 = vld [vmem:[%s19646_s1 + $0x1388] sm:$0xf]  ;;  %v10351_v58 = vor.u32 %v12663_v52, %v10350_v17 }
 0x28a   :  { %7349 = vmatpush.bf16.msra.mxu1 %v10271_v27  ;;  %7318 = vmatmul.bf16.vlgmr.msrb.gmra.mxu2 %v13987_v28  ;;  %v10495_v27 = vor.u32 %v12699_v55, %v10494_v1  ;;  %v12695_v26 = vld [vmem:[%s19646_s1 + $0x1394] sm:$0xf0]  ;;  %v10095_v62 = vor.u32 %v12599_v56, %v10094_v54  ;;  %v10078_v18 = vld [vmem:[%s19646_s1 + $0x1068] sm:$0xf] }
 0x28b   :  { %7362 = vmatpush.bf16.msra.mxu2 %v10399_v8  ;;  %7331 = vmatmul.bf16.vlgmr.msrb.gmra.mxu3 %v13997_v35  ;;  %v12631_v8 = vld [vmem:[%s19646_s1 + $0x1194] sm:$0xf0]  ;;  %v10479_v51 = vor.u32 %v12695_v26, %v10478_v2  ;;  %v10334_v32 = vld [vmem:[%s19646_s1 + $0x1268] sm:$0xf] }
 0x28c   :  { %7375 = vmatpush.bf16.msra.mxu3 %v10527_v60  ;;  %v7085_v60 = vpop.f32.mrf.mxu0  ;;  %v12627_v43 = vld [vmem:[%s19646_s1 + $0x1174] sm:$0xf0]  ;;  %v10462_v48 = vld [vmem:[%s19646_s1 + $0x1368] sm:$0xf] }
 0x28d   :  { %7337 = vmatpush.bf16.msra.mxu0 %v10127_v10  ;;  %v7086_v5 = vadd.f32 %v7085_v60, %v7073_v59  ;;  %v10223_v10 = vor.u32 %v12631_v8, %v10222_v0  ;;  %v12691_v50 = vld [vmem:[%s19646_s1 + $0x1374] sm:$0xf0]  ;;  %v7111_v56 = vpop.f32.mrf.mxu2  ;;  %v10446_v59 = vld [vmem:[%s19646_s1 + $0x1348] sm:$0xf] }
 0x28e   :  { %7350 = vmatpush.bf16.msra.mxu1 %v10255_v22  ;;  %v12595_v22 = vld [vmem:[%s19646_s1 + $0x1074] sm:$0xf0]  ;;  %v10463_v54 = vor.u32 %v12691_v50, %v10462_v48  ;;  %v7124_v52 = vpop.f32.mrf.mxu3  ;;  %v10430_v48 = vld [vmem:[%s19646_s1 + $0x1328] sm:$0xf] }
 0x28f   :  { %7363 = vmatpush.bf16.msra.mxu2 %v10383_v40  ;;  %v10206_v40 = vld [vmem:[%s19646_s1 + $0x1168] sm:$0xf]  ;;  %v10079_v61 = vor.u32 %v12595_v22, %v10078_v18  ;;  %v7099_v3 = vadd.f32 %v7098_v9, %v7086_v5  ;;  %v12623_v0 = vld [vmem:[%s19646_s1 + $0x1154] sm:$0xf0] }
 0x290   :  { %7376 = vmatpush.bf16.msra.mxu3 %v10511_v14  ;;  %v12659_v14 = vld [vmem:[%s19646_s1 + $0x1274] sm:$0xf0]  ;;  %v10207_v1 = vor.u32 %v12627_v43, %v10206_v40  ;;  %v10174_v22 = vld [vmem:[%s19646_s1 + $0x1128] sm:$0xf] }
 0x291   :  { %7338 = vmatpush.bf16.msra.mxu0 %v10111_v53  ;;  %v10335_v55 = vor.u32 %v12659_v14, %v10334_v32  ;;  %v10062_v53 = vld [vmem:[%s19646_s1 + $0x1048] sm:$0xf]  ;;  %v12655_v8 = vld [vmem:[%s19646_s1 + $0x1254] sm:$0xf0]  ;;  %v7112_v17 = vadd.f32 %v7111_v56, %v7099_v3 }
 0x292   :  { %7351 = vmatpush.bf16.msra.mxu1 %v10239_v57  ;;  %v12591_v57 = vld [vmem:[%s19646_s1 + $0x1054] sm:$0xf0]  ;;  %v10302_v43 = vld [vmem:[%s19646_s1 + $0x1228] sm:$0xf] }
 0x293   :  { %7364 = vmatpush.bf16.msra.mxu2 %v10367_v63  ;;  %v10190_v63 = vld [vmem:[%s19646_s1 + $0x1148] sm:$0xf]  ;;  %v12687_v60 = vld [vmem:[%s19646_s1 + $0x1354] sm:$0xf0]  ;;  %v10063_v26 = vor.u32 %v12591_v57, %v10062_v53  ;;  %v7125_v9 = vadd.f32 %v7124_v52, %v7112_v17 }
 0x294   :  { %7377 = vmatpush.bf16.msra.mxu3 %v10495_v27  ;;  %v10318_v27 = vld [vmem:[%s19646_s1 + $0x1248] sm:$0xf]  ;;  %v7087_v2 = vpop.f32.mrf.mxu0  ;;  %v10191_v5 = vor.u32 %v12623_v0, %v10190_v63  ;;  %v12587_v18 = vld [vmem:[%s19646_s1 + $0x1034] sm:$0xf0]  ;;  %v10447_v40 = vor.u32 %v12687_v60, %v10446_v59 }
 0x295   :  { %7339 = vmatpush.bf16.msra.mxu0 %v10095_v62  ;;  %v7100_v62 = vpop.f32.mrf.mxu1  ;;  %v12651_v32 = vld [vmem:[%s19646_s1 + $0x1234] sm:$0xf0]  ;;  %v7961_v14 = vmax.f32 %v7125_v9, 0.0  ;;  %v10030_v3 = vld [vmem:[%s19646_s1 + $0x1008] sm:$0xf]  ;;  %v7113_v17 = vpop.f32.mrf.mxu2 }
 0x296   :  { %7352 = vmatpush.bf16.msra.mxu1 %v10223_v10  ;;  %v10319_v10 = vor.u32 %v12655_v8, %v10318_v27  ;;  %v12683_v50 = vld [vmem:[%s19646_s1 + $0x1334] sm:$0xf0]  ;;  %v10303_v57 = vor.u32 %v12651_v32, %v10302_v43  ;;  %v10414_v27 = vld [vmem:[%s19646_s1 + $0x1308] sm:$0xf]  ;;  %v7126_v2 = vpop.f32.mrf.mxu3 }
 0x297   :  { %7365 = vmatpush.bf16.msra.mxu2 %v10351_v58  ;;  %v10046_v58 = vld [vmem:[%s19646_s1 + $0x1028] sm:$0xf]  ;;  %7965 = vst [vmem:[%s19649_s3 + $0x8] sm:$0xff] %v7961_v14  ;;  %v12615_v63 = vld [vmem:[%s19646_s1 + $0x1114] sm:$0xf0]  ;;  %v10431_v56 = vor.u32 %v12683_v50, %v10430_v48 }
 0x298   :  { %7378 = vmatpush.bf16.msra.mxu3 %v10479_v51  ;;  %v12619_v51 = vld [vmem:[%s19646_s1 + $0x1134] sm:$0xf0]  ;;  %v10654_v52 = vld [vmem:[%s19646_s1 + $0x14e8] sm:$0xf] }
 0x299   :  { %7340 = vmatpush.bf16.msra.mxu0 %v10079_v61  ;;  %v10047_v61 = vor.u32 %v12587_v18, %v10046_v58  ;;  %v10175_v53 = vor.u32 %v12619_v51, %v10174_v22  ;;  %v12647_v0 = vld [vmem:[%s19646_s1 + $0x1214] sm:$0xf0]  ;;  %v10782_v60 = vld [vmem:[%s19646_s1 + $0x15e8] sm:$0xf] }
 0x29a   :  { %7353 = vmatpush.bf16.msra.mxu1 %v10207_v1  ;;  %v12583_v1 = vld [vmem:[%s19646_s1 + $0x1014] sm:$0xf0]  ;;  %v10910_v9 = vld [vmem:[%s19646_s1 + $0x16e8] sm:$0xf] }
 0x29b   :  { %7366 = vmatpush.bf16.msra.mxu2 %v10335_v55  ;;  %v10158_v55 = vld [vmem:[%s19646_s1 + $0x1108] sm:$0xf]  ;;  %v12679_v8 = vld [vmem:[%s19646_s1 + $0x1314] sm:$0xf0] }
 0x29c   :  { %7379 = vmatpush.bf16.msra.mxu3 %v10463_v54  ;;  %v10286_v54 = vld [vmem:[%s19646_s1 + $0x1208] sm:$0xf]  ;;  %v12739_v59 = vld [vmem:[%s19646_s1 + $0x14f4] sm:$0xf0] }
 0x29d   :  { %7341 = vmatpush.bf16.msra.mxu0 %v10063_v26  ;;  %v10031_v26 = vor.u32 %v12583_v1, %v10030_v3  ;;  %v12771_v62 = vld [vmem:[%s19646_s1 + $0x15f4] sm:$0xf0]  ;;  %v10287_v58 = vor.u32 %v12647_v0, %v10286_v54  ;;  %v11038_v18 = vld [vmem:[%s19646_s1 + $0x17e8] sm:$0xf]  ;;  %v10655_v51 = vor.u32 %v12739_v59, %v10654_v52 }
 0x29e   :  { %7354 = vmatpush.bf16.msra.mxu1 %v10191_v5  ;;  %v12803_v5 = vld [vmem:[%s19646_s1 + $0x16f4] sm:$0xf0]  ;;  %v10783_v43 = vor.u32 %v12771_v62, %v10782_v60  ;;  %v10638_v14 = vld [vmem:[%s19646_s1 + $0x14c8] sm:$0xf] }
 0x29f   :  { %7367 = vmatpush.bf16.msra.mxu2 %v10319_v10  ;;  %v10159_v10 = vor.u32 %v12615_v63, %v10158_v55  ;;  %v12835_v22 = vld [vmem:[%s19646_s1 + $0x17f4] sm:$0xf0]  ;;  %v10911_v32 = vor.u32 %v12803_v5, %v10910_v9  ;;  %v10766_v50 = vld [vmem:[%s19646_s1 + $0x15c8] sm:$0xf] }
 0x2a0   :  { %7380 = vmatpush.bf16.msra.mxu3 %v10447_v40  ;;  %v10415_v40 = vor.u32 %v12679_v8, %v10414_v27  ;;  %v12735_v48 = vld [vmem:[%s19646_s1 + $0x14d4] sm:$0xf0]  ;;  %v10894_v1 = vld [vmem:[%s19646_s1 + $0x16c8] sm:$0xf] }
 0x2a1   :  { %7342 = vmatpush.bf16.msra.mxu0 %v10047_v61  ;;  %v11039_v61 = vor.u32 %v12835_v22, %v11038_v18  ;;  %v12767_v3 = vld [vmem:[%s19646_s1 + $0x15d4] sm:$0xf0]  ;;  %v10639_v63 = vor.u32 %v12735_v48, %v10638_v14  ;;  %v10622_v0 = vld [vmem:[%s19646_s1 + $0x14a8] sm:$0xf]  ;;  %v13093_v22 = vld [vmem:[%s19648_s2] sm:$0xf] }
 0x2a2   :  { %7355 = vmatpush.bf16.msra.mxu1 %v10175_v53  ;;  %v12799_v55 = vld [vmem:[%s19646_s1 + $0x16d4] sm:$0xf0]  ;;  %v11022_v53 = vld [vmem:[%s19646_s1 + $0x17c8] sm:$0xf]  ;;  %v10767_v54 = vor.u32 %v12767_v3, %v10766_v50 }
 0x2a3   :  { %7368 = vmatpush.bf16.msra.mxu2 %v10303_v57  ;;  %v12831_v57 = vld [vmem:[%s19646_s1 + $0x17d4] sm:$0xf0]  ;;  %v10750_v8 = vld [vmem:[%s19646_s1 + $0x15a8] sm:$0xf] }
 0x2a4   :  { %7381 = vmatpush.bf16.msra.mxu3 %v10431_v56  ;;  %v10895_v56 = vor.u32 %v12799_v55, %v10894_v1  ;;  %v12731_v27 = vld [vmem:[%s19646_s1 + $0x14b4] sm:$0xf0]  ;;  %v11023_v17 = vor.u32 %v12831_v57, %v11022_v53  ;;  %v10878_v59 = vld [vmem:[%s19646_s1 + $0x16a8] sm:$0xf] }
 0x2a5   :  { %7343 = vmatpush.bf16.msra.mxu0 %v10031_v26  ;;  %v12763_v52 = vld [vmem:[%s19646_s1 + $0x15b4] sm:$0xf0]  ;;  %v11006_v2 = vld [vmem:[%s19646_s1 + $0x17a8] sm:$0xf]  ;;  %v10623_v62 = vor.u32 %v12731_v27, %v10622_v0  ;;  %v7137_v3 = vpop.f32.mrf.mxu0 }
 0x2a6   :  { %7356 = vmatpush.bf16.msra.mxu1 %v10159_v10  ;;  %v12795_v60 = vld [vmem:[%s19646_s1 + $0x16b4] sm:$0xf0]  ;;  %v10606_v9 = vld [vmem:[%s19646_s1 + $0x1488] sm:$0xf]  ;;  %v10751_v5 = vor.u32 %v12763_v52, %v10750_v8 }
 0x2a7   :  { %7369 = vmatpush.bf16.msra.mxu2 %v10287_v58  ;;  %v12827_v26 = vld [vmem:[%s19646_s1 + $0x17b4] sm:$0xf0]  ;;  %v10879_v10 = vor.u32 %v12795_v60, %v10878_v59  ;;  %v10734_v18 = vld [vmem:[%s19646_s1 + $0x1588] sm:$0xf] }
 0x2a8   :  { %7382 = vmatpush.bf16.msra.mxu3 %v10415_v40  ;;  %7344 = vmatmul.bf16.vlgmr.msra.gmra.mxu0 %v14186_v37  ;;  %v12727_v58 = vld [vmem:[%s19646_s1 + $0x1494] sm:$0xf0]  ;;  %v1058_v40 = vperm.slane %v13093_v22, 2  ;;  %v10990_v48 = vld [vmem:[%s19646_s1 + $0x1788] sm:$0xf] }
 0x2a9   :  { %7388 = vmatpush.bf16.msrb.mxu0 %v10655_v51  ;;  %7357 = vmatmul.bf16.vlgmr.msra.gmra.mxu1 %v14199_v46  ;;  %v11007_v51 = vor.u32 %v12827_v26, %v11006_v2  ;;  %v12791_v14 = vld [vmem:[%s19646_s1 + $0x1694] sm:$0xf0]  ;;  %v10590_v53 = vld [vmem:[%s19646_s1 + $0x1468] sm:$0xf] }
 0x2aa   :  { %7401 = vmatpush.bf16.msrb.mxu1 %v10783_v43  ;;  %7370 = vmatmul.bf16.vlgmr.msra.gmra.mxu2 %v14197_v45  ;;  %v12759_v43 = vld [vmem:[%s19646_s1 + $0x1594] sm:$0xf0]  ;;  %v10846_v8 = vld [vmem:[%s19646_s1 + $0x1668] sm:$0xf] }
 0x2ab   :  { %7414 = vmatpush.bf16.msrb.mxu2 %v10911_v32  ;;  %7383 = vmatmul.bf16.vlgmr.msra.gmra.mxu3 %v14207_v49  ;;  %v10862_v32 = vld [vmem:[%s19646_s1 + $0x1688] sm:$0xf]  ;;  %v12823_v50 = vld [vmem:[%s19646_s1 + $0x1794] sm:$0xf0]  ;;  %v10735_v1 = vor.u32 %v12759_v43, %v10734_v18 }
 0x2ac   :  { %7427 = vmatpush.bf16.msrb.mxu3 %v11039_v61  ;;  %v10607_v61 = vor.u32 %v12727_v58, %v10606_v9  ;;  %v10863_v55 = vor.u32 %v12791_v14, %v10862_v32  ;;  %v12723_v57 = vld [vmem:[%s19646_s1 + $0x1474] sm:$0xf0]  ;;  %v10991_v0 = vor.u32 %v12823_v50, %v10990_v48  ;;  %v10974_v52 = vld [vmem:[%s19646_s1 + $0x1768] sm:$0xf] }
 0x2ad   :  { %7389 = vmatpush.bf16.msrb.mxu0 %v10639_v63  ;;  %v10718_v63 = vld [vmem:[%s19646_s1 + $0x1568] sm:$0xf]  ;;  %v12755_v27 = vld [vmem:[%s19646_s1 + $0x1574] sm:$0xf0]  ;;  %v10591_v2 = vor.u32 %v12723_v57, %v10590_v53  ;;  %v7163_v58 = vpop.f32.mrf.mxu2 }
 0x2ae   :  { %7402 = vmatpush.bf16.msrb.mxu1 %v10767_v54  ;;  %v7138_v54 = vadd.f32 %v7137_v3, %v1058_v40  ;;  %v12819_v59 = vld [vmem:[%s19646_s1 + $0x1774] sm:$0xf0]  ;;  %v10719_v26 = vor.u32 %v12755_v27, %v10718_v63  ;;  %v10574_v9 = vld [vmem:[%s19646_s1 + $0x1448] sm:$0xf]  ;;  %v7176_v32 = vpop.f32.mrf.mxu3  ;;  %v7139_v3 = vpop.f32.mrf.mxu0 }
 0x2af   :  { %7415 = vmatpush.bf16.msrb.mxu2 %v10895_v56  ;;  %v7150_v56 = vpop.f32.mrf.mxu1  ;;  %v10975_v18 = vor.u32 %v12819_v59, %v10974_v52  ;;  %v12751_v22 = vld [vmem:[%s19646_s1 + $0x1554] sm:$0xf0]  ;;  %v10830_v40 = vld [vmem:[%s19646_s1 + $0x1648] sm:$0xf] }
 0x2b0   :  { %7428 = vmatpush.bf16.msrb.mxu3 %v11023_v17  ;;  %v12787_v17 = vld [vmem:[%s19646_s1 + $0x1674] sm:$0xf0]  ;;  %v7151_v60 = vadd.f32 %v7150_v56, %v7138_v54  ;;  %v10958_v14 = vld [vmem:[%s19646_s1 + $0x1748] sm:$0xf] }
 0x2b1   :  { %7390 = vmatpush.bf16.msrb.mxu0 %v10623_v62  ;;  %v10847_v62 = vor.u32 %v12787_v17, %v10846_v8  ;;  %v12815_v48 = vld [vmem:[%s19646_s1 + $0x1754] sm:$0xf0]  ;;  %v10558_v53 = vld [vmem:[%s19646_s1 + $0x1428] sm:$0xf] }
 0x2b2   :  { %7403 = vmatpush.bf16.msrb.mxu1 %v10751_v5  ;;  %v12719_v5 = vld [vmem:[%s19646_s1 + $0x1454] sm:$0xf0]  ;;  %v7164_v43 = vadd.f32 %v7163_v58, %v7151_v60  ;;  %v10686_v63 = vld [vmem:[%s19646_s1 + $0x1528] sm:$0xf]  ;;  %v10959_v56 = vor.u32 %v12815_v48, %v10958_v14 }
 0x2b3   :  { %7416 = vmatpush.bf16.msrb.mxu2 %v10879_v10  ;;  %v10702_v10 = vld [vmem:[%s19646_s1 + $0x1548] sm:$0xf]  ;;  %v10575_v50 = vor.u32 %v12719_v5, %v10574_v9  ;;  %v12715_v57 = vld [vmem:[%s19646_s1 + $0x1434] sm:$0xf0] }
 0x2b4   :  { %7429 = vmatpush.bf16.msrb.mxu3 %v11007_v51  ;;  %v12783_v51 = vld [vmem:[%s19646_s1 + $0x1654] sm:$0xf0]  ;;  %v10814_v27 = vld [vmem:[%s19646_s1 + $0x1628] sm:$0xf]  ;;  %v10559_v59 = vor.u32 %v12715_v57, %v10558_v53 }
 0x2b5   :  { %7391 = vmatpush.bf16.msrb.mxu0 %v10607_v61  ;;  %v17580_v61 = vadd.f32 %v7176_v32, %v7164_v43  ;;  %v12779_v8 = vld [vmem:[%s19646_s1 + $0x1634] sm:$0xf0]  ;;  %v10942_v17 = vld [vmem:[%s19646_s1 + $0x1728] sm:$0xf]  ;;  %v7165_v58 = vpop.f32.mrf.mxu2 }
 0x2b6   :  { %7404 = vmatpush.bf16.msrb.mxu1 %v10735_v1  ;;  %v10703_v1 = vor.u32 %v12751_v22, %v10702_v10  ;;  %v12811_v52 = vld [vmem:[%s19646_s1 + $0x1734] sm:$0xf0]  ;;  %v10542_v60 = vld [vmem:[%s19646_s1 + $0x1408] sm:$0xf]  ;;  %v7178_v43 = vpop.f32.mrf.mxu3 }
 0x2b7   :  { %7417 = vmatpush.bf16.msrb.mxu2 %v10863_v55  ;;  %v10831_v55 = vor.u32 %v12783_v51, %v10830_v40  ;;  %v7152_v54 = vpop.f32.mrf.mxu1  ;;  %v10670_v9 = vld [vmem:[%s19646_s1 + $0x1508] sm:$0xf]  ;;  %v12743_v5 = vld [vmem:[%s19646_s1 + $0x1514] sm:$0xf0] }
 0x2b8   :  { %7430 = vmatpush.bf16.msrb.mxu3 %v10991_v0  ;;  %v12747_v0 = vld [vmem:[%s19646_s1 + $0x1534] sm:$0xf0]  ;;  %v10798_v10 = vld [vmem:[%s19646_s1 + $0x1608] sm:$0xf]  ;;  %v10671_v53 = vor.u32 %v12743_v5, %v10670_v9 }
 0x2b9   :  { %7392 = vmatpush.bf16.msrb.mxu0 %v10591_v2  ;;  %v12711_v2 = vld [vmem:[%s19646_s1 + $0x1414] sm:$0xf0]  ;;  %v10926_v40 = vld [vmem:[%s19646_s1 + $0x1708] sm:$0xf] }
 0x2ba   :  { %7405 = vmatpush.bf16.msrb.mxu1 %v10719_v26  ;;  %v10687_v26 = vor.u32 %v12747_v0, %v10686_v63  ;;  %v12775_v22 = vld [vmem:[%s19646_s1 + $0x1614] sm:$0xf0]  ;;  %v11166_v32 = vld [vmem:[%s19646_s1 + $0x18e8] sm:$0xf] }
 0x2bb   :  { %7418 = vmatpush.bf16.msrb.mxu2 %v10847_v62  ;;  %v10815_v62 = vor.u32 %v12779_v8, %v10814_v27  ;;  %v12807_v51 = vld [vmem:[%s19646_s1 + $0x1714] sm:$0xf0]  ;;  %v11294_v48 = vld [vmem:[%s19646_s1 + $0x19e8] sm:$0xf]  ;;  %v10799_v57 = vor.u32 %v12775_v22, %v10798_v10 }
 0x2bc   :  { %7431 = vmatpush.bf16.msrb.mxu3 %v10975_v18  ;;  %v10943_v18 = vor.u32 %v12811_v52, %v10942_v17  ;;  %v12867_v14 = vld [vmem:[%s19646_s1 + $0x18f4] sm:$0xf0]  ;;  %v11550_v63 = vld [vmem:[%s19646_s1 + $0x1be8] sm:$0xf] }
 0x2bd   :  { %7393 = vmatpush.bf16.msrb.mxu0 %v10575_v50  ;;  %v10543_v50 = vor.u32 %v12711_v2, %v10542_v60  ;;  %v12899_v3 = vld [vmem:[%s19646_s1 + $0x19f4] sm:$0xf0]  ;;  %v11167_v0 = vor.u32 %v12867_v14, %v11166_v32  ;;  %v11150_v17 = vld [vmem:[%s19646_s1 + $0x18c8] sm:$0xf] }
 0x2be   :  { %7406 = vmatpush.bf16.msrb.mxu1 %v10703_v1  ;;  %v11422_v1 = vld [vmem:[%s19646_s1 + $0x1ae8] sm:$0xf]  ;;  %v12963_v54 = vld [vmem:[%s19646_s1 + $0x1bf4] sm:$0xf0]  ;;  %v11295_v27 = vor.u32 %v12899_v3, %v11294_v48 }
 0x2bf   :  { %7419 = vmatpush.bf16.msrb.mxu2 %v10831_v55  ;;  %v12931_v55 = vld [vmem:[%s19646_s1 + $0x1af4] sm:$0xf0]  ;;  %v11551_v60 = vor.u32 %v12963_v54, %v11550_v63  ;;  %v11534_v9 = vld [vmem:[%s19646_s1 + $0x1bc8] sm:$0xf] }
 0x2c0   :  { %7432 = vmatpush.bf16.msrb.mxu3 %v10959_v56  ;;  %v10927_v56 = vor.u32 %v12807_v51, %v10926_v40  ;;  %v11423_v8 = vor.u32 %v12931_v55, %v11422_v1  ;;  %v12863_v52 = vld [vmem:[%s19646_s1 + $0x18d4] sm:$0xf0]  ;;  %v11134_v22 = vld [vmem:[%s19646_s1 + $0x18a8] sm:$0xf] }
 0x2c1   :  { %7394 = vmatpush.bf16.msrb.mxu0 %v10559_v59  ;;  %v11278_v59 = vld [vmem:[%s19646_s1 + $0x19c8] sm:$0xf]  ;;  %v12895_v2 = vld [vmem:[%s19646_s1 + $0x19d4] sm:$0xf0]  ;;  %v11151_v10 = vor.u32 %v12863_v52, %v11150_v17 }
 0x2c2   :  { %7407 = vmatpush.bf16.msrb.mxu1 %v10687_v26  ;;  %v11406_v26 = vld [vmem:[%s19646_s1 + $0x1ac8] sm:$0xf]  ;;  %v12959_v5 = vld [vmem:[%s19646_s1 + $0x1bd4] sm:$0xf0]  ;;  %v11279_v58 = vor.u32 %v12895_v2, %v11278_v59 }
 0x2c3   :  { %7420 = vmatpush.bf16.msrb.mxu2 %v10815_v62  ;;  %v12927_v62 = vld [vmem:[%s19646_s1 + $0x1ad4] sm:$0xf0]  ;;  %v11262_v51 = vld [vmem:[%s19646_s1 + $0x19a8] sm:$0xf]  ;;  %v11535_v43 = vor.u32 %v12959_v5, %v11534_v9 }
 0x2c4   :  { %7433 = vmatpush.bf16.msrb.mxu3 %v10943_v18  ;;  %v11407_v18 = vor.u32 %v12927_v62, %v11406_v26  ;;  %v12859_v40 = vld [vmem:[%s19646_s1 + $0x18b4] sm:$0xf0]  ;;  %v11390_v14 = vld [vmem:[%s19646_s1 + $0x1aa8] sm:$0xf] }
 0x2c5   :  { %7395 = vmatpush.bf16.msrb.mxu0 %v10543_v50  ;;  %v12891_v32 = vld [vmem:[%s19646_s1 + $0x19b4] sm:$0xf0]  ;;  %v11518_v50 = vld [vmem:[%s19646_s1 + $0x1ba8] sm:$0xf]  ;;  %v11135_v1 = vor.u32 %v12859_v40, %v11134_v22 }
 0x2c6   :  { %7408 = vmatpush.bf16.msrb.mxu1 %v10671_v53  ;;  %v12923_v48 = vld [vmem:[%s19646_s1 + $0x1ab4] sm:$0xf0]  ;;  %v11263_v55 = vor.u32 %v12891_v32, %v11262_v51  ;;  %v11246_v54 = vld [vmem:[%s19646_s1 + $0x1988] sm:$0xf] }
 0x2c7   :  { %7421 = vmatpush.bf16.msrb.mxu2 %v10799_v57  ;;  %v12955_v3 = vld [vmem:[%s19646_s1 + $0x1bb4] sm:$0xf0]  ;;  %v11391_v53 = vor.u32 %v12923_v48, %v11390_v14  ;;  %v11118_v57 = vld [vmem:[%s19646_s1 + $0x1888] sm:$0xf] }
 0x2c8   :  { %7434 = vmatpush.bf16.msrb.mxu3 %v10927_v56  ;;  %7396 = vmatmul.bf16.vlgmr.msrb.gmra.mxu0 %v14401_v11  ;;  %v12855_v63 = vld [vmem:[%s19646_s1 + $0x1894] sm:$0xf0]  ;;  %v11519_v56 = vor.u32 %v12955_v3, %v11518_v50  ;;  %v11502_v17 = vld [vmem:[%s19646_s1 + $0x1b88] sm:$0xf] }
 0x2c9   :  { %7440 = vmatpush.bf16.msra.mxu0 %v11167_v0  ;;  %7409 = vmatmul.bf16.vlgmr.msrb.gmra.mxu1 %v14414_v16  ;;  %v12887_v0 = vld [vmem:[%s19646_s1 + $0x1994] sm:$0xf0]  ;;  %v11119_v59 = vor.u32 %v12855_v63, %v11118_v57  ;;  %v11102_v62 = vld [vmem:[%s19646_s1 + $0x1868] sm:$0xf] }
 0x2ca   :  { %7453 = vmatpush.bf16.msra.mxu1 %v11295_v27  ;;  %7422 = vmatmul.bf16.vlgmr.msrb.gmra.mxu2 %v14412_v15  ;;  %v11374_v27 = vld [vmem:[%s19646_s1 + $0x1a88] sm:$0xf]  ;;  %v12951_v52 = vld [vmem:[%s19646_s1 + $0x1b94] sm:$0xf0]  ;;  %v11247_v2 = vor.u32 %v12887_v0, %v11246_v54 }
 0x2cb   :  { %7466 = vmatpush.bf16.msra.mxu2 %v11423_v8  ;;  %7435 = vmatmul.bf16.vlgmr.msrb.gmra.mxu3 %v14422_v19  ;;  %v12919_v8 = vld [vmem:[%s19646_s1 + $0x1a94] sm:$0xf0]  ;;  %v11230_v5 = vld [vmem:[%s19646_s1 + $0x1968] sm:$0xf] }
 0x2cc   :  { %7479 = vmatpush.bf16.msra.mxu3 %v11551_v60  ;;  %v7189_v60 = vpop.f32.mrf.mxu0  ;;  %v11375_v26 = vor.u32 %v12919_v8, %v11374_v27  ;;  %v12851_v9 = vld [vmem:[%s19646_s1 + $0x1874] sm:$0xf0]  ;;  %v11358_v40 = vld [vmem:[%s19646_s1 + $0x1a68] sm:$0xf] }
 0x2cd   :  { %7441 = vmatpush.bf16.msra.mxu0 %v11151_v10  ;;  %v7190_v10 = vadd.f32 %v7189_v60, %v17580_v61  ;;  %v12883_v22 = vld [vmem:[%s19646_s1 + $0x1974] sm:$0xf0]  ;;  %v11103_v14 = vor.u32 %v12851_v9, %v11102_v62  ;;  %v11086_v3 = vld [vmem:[%s19646_s1 + $0x1848] sm:$0xf] }
 0x2ce   :  { %7454 = vmatpush.bf16.msra.mxu1 %v11279_v58  ;;  %v7202_v58 = vpop.f32.mrf.mxu1  ;;  %v12915_v51 = vld [vmem:[%s19646_s1 + $0x1a74] sm:$0xf0]  ;;  %v11231_v48 = vor.u32 %v12883_v22, %v11230_v5  ;;  %v11342_v54 = vld [vmem:[%s19646_s1 + $0x1a48] sm:$0xf]  ;;  %v7228_v27 = vpop.f32.mrf.mxu3 }
 0x2cf   :  { %7467 = vmatpush.bf16.msra.mxu2 %v11407_v18  ;;  %v11503_v18 = vor.u32 %v12951_v52, %v11502_v17  ;;  %v12947_v61 = vld [vmem:[%s19646_s1 + $0x1b74] sm:$0xf0]  ;;  %v7203_v32 = vadd.f32 %v7202_v58, %v7190_v10  ;;  %v11359_v50 = vor.u32 %v12915_v51, %v11358_v40  ;;  %v11470_v8 = vld [vmem:[%s19646_s1 + $0x1b48] sm:$0xf] }
 0x2d0   :  { %7480 = vmatpush.bf16.msra.mxu3 %v11535_v43  ;;  %v11486_v43 = vld [vmem:[%s19646_s1 + $0x1b68] sm:$0xf]  ;;  %v12879_v63 = vld [vmem:[%s19646_s1 + $0x1954] sm:$0xf0] }
 0x2d1   :  { %7442 = vmatpush.bf16.msra.mxu0 %v11135_v1  ;;  %v12847_v1 = vld [vmem:[%s19646_s1 + $0x1854] sm:$0xf0]  ;;  %v11487_v57 = vor.u32 %v12947_v61, %v11486_v43  ;;  %v11070_v62 = vld [vmem:[%s19646_s1 + $0x1828] sm:$0xf] }
 0x2d2   :  { %7455 = vmatpush.bf16.msra.mxu1 %v11263_v55  ;;  %v11214_v55 = vld [vmem:[%s19646_s1 + $0x1948] sm:$0xf]  ;;  %v12943_v17 = vld [vmem:[%s19646_s1 + $0x1b54] sm:$0xf0]  ;;  %v11087_v52 = vor.u32 %v12847_v1, %v11086_v3 }
 0x2d3   :  { %7468 = vmatpush.bf16.msra.mxu2 %v11391_v53  ;;  %v7215_v53 = vpop.f32.mrf.mxu2  ;;  %v12843_v9 = vld [vmem:[%s19646_s1 + $0x1834] sm:$0xf0]  ;;  %v11198_v5 = vld [vmem:[%s19646_s1 + $0x1928] sm:$0xf]  ;;  %v11471_v58 = vor.u32 %v12943_v17, %v11470_v8 }
 0x2d4   :  { %7481 = vmatpush.bf16.msra.mxu3 %v11519_v56  ;;  %v12911_v56 = vld [vmem:[%s19646_s1 + $0x1a54] sm:$0xf0]  ;;  %v7216_v0 = vadd.f32 %v7215_v53, %v7203_v32  ;;  %v7191_v60 = vpop.f32.mrf.mxu0  ;;  %v11326_v22 = vld [vmem:[%s19646_s1 + $0x1a28] sm:$0xf]  ;;  %v11071_v61 = vor.u32 %v12843_v9, %v11070_v62 }
 0x2d5   :  { %7443 = vmatpush.bf16.msra.mxu0 %v11119_v59  ;;  %v12907_v40 = vld [vmem:[%s19646_s1 + $0x1a34] sm:$0xf0]  ;;  %v11454_v51 = vld [vmem:[%s19646_s1 + $0x1b28] sm:$0xf] }
 0x2d6   :  { %7456 = vmatpush.bf16.msra.mxu1 %v11247_v2  ;;  %v17779_v59 = vadd.f32 %v7228_v27, %v7216_v0  ;;  %v11215_v2 = vor.u32 %v12879_v63, %v11214_v55  ;;  %v7204_v10 = vpop.f32.mrf.mxu1  ;;  %v12939_v43 = vld [vmem:[%s19646_s1 + $0x1b34] sm:$0xf0]  ;;  %v11054_v32 = vld [vmem:[%s19646_s1 + $0x1808] sm:$0xf]  ;;  %v7230_v0 = vpop.f32.mrf.mxu3 }
 0x2d7   :  { %7469 = vmatpush.bf16.msra.mxu2 %v11375_v26  ;;  %v11343_v26 = vor.u32 %v12911_v56, %v11342_v54  ;;  %v11182_v3 = vld [vmem:[%s19646_s1 + $0x1908] sm:$0xf]  ;;  %v12871_v1 = vld [vmem:[%s19646_s1 + $0x1914] sm:$0xf0] }
 0x2d8   :  { %7482 = vmatpush.bf16.msra.mxu3 %v11503_v18  ;;  %v12875_v18 = vld [vmem:[%s19646_s1 + $0x1934] sm:$0xf0]  ;;  %v11310_v55 = vld [vmem:[%s19646_s1 + $0x1a08] sm:$0xf]  ;;  %v11183_v62 = vor.u32 %v12871_v1, %v11182_v3 }
 0x2d9   :  { %7444 = vmatpush.bf16.msra.mxu0 %v11103_v14  ;;  %v12839_v14 = vld [vmem:[%s19646_s1 + $0x1814] sm:$0xf0]  ;;  %v11438_v54 = vld [vmem:[%s19646_s1 + $0x1b08] sm:$0xf] }
 0x2da   :  { %7457 = vmatpush.bf16.msra.mxu1 %v11231_v48  ;;  %v11199_v48 = vor.u32 %v12875_v18, %v11198_v5  ;;  %v12903_v63 = vld [vmem:[%s19646_s1 + $0x1a14] sm:$0xf0]  ;;  %v11678_v27 = vld [vmem:[%s19646_s1 + $0x1ce8] sm:$0xf] }
 0x2db   :  { %7470 = vmatpush.bf16.msra.mxu2 %v11359_v50  ;;  %v11327_v50 = vor.u32 %v12907_v40, %v11326_v22  ;;  %v7217_v53 = vpop.f32.mrf.mxu2  ;;  %v12935_v56 = vld [vmem:[%s19646_s1 + $0x1b14] sm:$0xf0]  ;;  %v11806_v17 = vld [vmem:[%s19646_s1 + $0x1de8] sm:$0xf]  ;;  %v11311_v9 = vor.u32 %v12903_v63, %v11310_v55 }
 0x2dc   :  { %7483 = vmatpush.bf16.msra.mxu3 %v11487_v57  ;;  %v11455_v57 = vor.u32 %v12939_v43, %v11454_v51  ;;  %v12995_v8 = vld [vmem:[%s19646_s1 + $0x1cf4] sm:$0xf0]  ;;  %v12062_v5 = vld [vmem:[%s19646_s1 + $0x1fe8] sm:$0xf] }
 0x2dd   :  { %7445 = vmatpush.bf16.msra.mxu0 %v11087_v52  ;;  %v11055_v52 = vor.u32 %v12839_v14, %v11054_v32  ;;  %v13027_v60 = vld [vmem:[%s19646_s1 + $0x1df4] sm:$0xf0]  ;;  %v11679_v18 = vor.u32 %v12995_v8, %v11678_v27  ;;  %v11662_v51 = vld [vmem:[%s19646_s1 + $0x1cc8] sm:$0xf] }
 0x2de   :  { %7458 = vmatpush.bf16.msra.mxu1 %v11215_v2  ;;  %v11934_v2 = vld [vmem:[%s19646_s1 + $0x1ee8] sm:$0xf]  ;;  %v13091_v10 = vld [vmem:[%s19646_s1 + $0x1ff4] sm:$0xf0]  ;;  %v11807_v22 = vor.u32 %v13027_v60, %v11806_v17 }
 0x2df   :  { %7471 = vmatpush.bf16.msra.mxu2 %v11343_v26  ;;  %v13059_v26 = vld [vmem:[%s19646_s1 + $0x1ef4] sm:$0xf0]  ;;  %v12063_v32 = vor.u32 %v13091_v10, %v12062_v5  ;;  %v12046_v3 = vld [vmem:[%s19646_s1 + $0x1fc8] sm:$0xf] }
 0x2e0   :  { %7484 = vmatpush.bf16.msra.mxu3 %v11471_v58  ;;  %v11439_v58 = vor.u32 %v12935_v56, %v11438_v54  ;;  %v11935_v40 = vor.u32 %v13059_v26, %v11934_v2  ;;  %v12991_v43 = vld [vmem:[%s19646_s1 + $0x1cd4] sm:$0xf0]  ;;  %v11646_v63 = vld [vmem:[%s19646_s1 + $0x1ca8] sm:$0xf] }
 0x2e1   :  { %7446 = vmatpush.bf16.msra.mxu0 %v11071_v61  ;;  %v11790_v61 = vld [vmem:[%s19646_s1 + $0x1dc8] sm:$0xf]  ;;  %v13023_v14 = vld [vmem:[%s19646_s1 + $0x1dd4] sm:$0xf0]  ;;  %v11663_v55 = vor.u32 %v12991_v43, %v11662_v51 }
 0x2e2   :  { %7459 = vmatpush.bf16.msra.mxu1 %v11199_v48  ;;  %v11918_v48 = vld [vmem:[%s19646_s1 + $0x1ec8] sm:$0xf]  ;;  %v13087_v1 = vld [vmem:[%s19646_s1 + $0x1fd4] sm:$0xf0]  ;;  %v11791_v53 = vor.u32 %v13023_v14, %v11790_v61 }
 0x2e3   :  { %7472 = vmatpush.bf16.msra.mxu2 %v11327_v50  ;;  %v13055_v50 = vld [vmem:[%s19646_s1 + $0x1ed4] sm:$0xf0]  ;;  %v11774_v56 = vld [vmem:[%s19646_s1 + $0x1da8] sm:$0xf]  ;;  %v12047_v0 = vor.u32 %v13087_v1, %v12046_v3 }
 0x2e4   :  { %7485 = vmatpush.bf16.msra.mxu3 %v11455_v57  ;;  %v11919_v57 = vor.u32 %v13055_v50, %v11918_v48  ;;  %v12987_v54 = vld [vmem:[%s19646_s1 + $0x1cb4] sm:$0xf0]  ;;  %v11902_v8 = vld [vmem:[%s19646_s1 + $0x1ea8] sm:$0xf] }
 0x2e5   :  { %7447 = vmatpush.bf16.msra.mxu0 %v11055_v52  ;;  %v13019_v27 = vld [vmem:[%s19646_s1 + $0x1db4] sm:$0xf0]  ;;  %v12030_v52 = vld [vmem:[%s19646_s1 + $0x1fa8] sm:$0xf]  ;;  %v11647_v2 = vor.u32 %v12987_v54, %v11646_v63  ;;  %v7241_v51 = vpop.f32.mrf.mxu0 }
 0x2e6   :  { %7460 = vmatpush.bf16.msra.mxu1 %v11183_v62  ;;  %v13051_v17 = vld [vmem:[%s19646_s1 + $0x1eb4] sm:$0xf0]  ;;  %v11775_v26 = vor.u32 %v13019_v27, %v11774_v56  ;;  %v11758_v10 = vld [vmem:[%s19646_s1 + $0x1d88] sm:$0xf]  ;;  %v7254_v48 = vpop.f32.mrf.mxu1 }
 0x2e7   :  { %7473 = vmatpush.bf16.msra.mxu2 %v11311_v9  ;;  %v13083_v60 = vld [vmem:[%s19646_s1 + $0x1fb4] sm:$0xf0]  ;;  %v11903_v62 = vor.u32 %v13051_v17, %v11902_v8  ;;  %v11630_v9 = vld [vmem:[%s19646_s1 + $0x1c88] sm:$0xf] }
 0x2e8   :  { %7486 = vmatpush.bf16.msra.mxu3 %v11439_v58  ;;  %7448 = vmatmul.bf16.vlgmr.msra.gmra.mxu0 %v14614_v7  ;;  %v12983_v5 = vld [vmem:[%s19646_s1 + $0x1c94] sm:$0xf0]  ;;  %v12031_v58 = vor.u32 %v13083_v60, %v12030_v52  ;;  %v12014_v43 = vld [vmem:[%s19646_s1 + $0x1f88] sm:$0xf] }
 0x2e9   :  { %7492 = vmatpush.bf16.msrb.mxu0 %v11679_v18  ;;  %7461 = vmatmul.bf16.vlgmr.msra.gmra.mxu1 %v14627_v13  ;;  %v13015_v18 = vld [vmem:[%s19646_s1 + $0x1d94] sm:$0xf0]  ;;  %v11631_v14 = vor.u32 %v12983_v5, %v11630_v9  ;;  %v11614_v1 = vld [vmem:[%s19646_s1 + $0x1c68] sm:$0xf] }
 0x2ea   :  { %7505 = vmatpush.bf16.msrb.mxu1 %v11807_v22  ;;  %7474 = vmatmul.bf16.vlgmr.msra.gmra.mxu2 %v14625_v12  ;;  %v11886_v22 = vld [vmem:[%s19646_s1 + $0x1e88] sm:$0xf]  ;;  %v13079_v61 = vld [vmem:[%s19646_s1 + $0x1f94] sm:$0xf0]  ;;  %v11759_v50 = vor.u32 %v13015_v18, %v11758_v10 }
 0x2eb   :  { %7518 = vmatpush.bf16.msrb.mxu2 %v11935_v40  ;;  %7487 = vmatmul.bf16.vlgmr.msra.gmra.mxu3 %v14635_v39  ;;  %v13047_v40 = vld [vmem:[%s19646_s1 + $0x1e94] sm:$0xf0]  ;;  %v11870_v54 = vld [vmem:[%s19646_s1 + $0x1e68] sm:$0xf] }
 0x2ec   :  { %7531 = vmatpush.bf16.msrb.mxu3 %v12063_v32  ;;  %v7242_v32 = vadd.f32 %v7241_v51, %v17779_v59  ;;  %v11887_v3 = vor.u32 %v13047_v40, %v11886_v22  ;;  %v12015_v59 = vor.u32 %v13079_v61, %v12014_v43  ;;  %v13011_v63 = vld [vmem:[%s19646_s1 + $0x1d74] sm:$0xf0]  ;;  %v11598_v60 = vld [vmem:[%s19646_s1 + $0x1c48] sm:$0xf] }
 0x2ed   :  { %7493 = vmatpush.bf16.msrb.mxu0 %v11663_v55  ;;  %v12979_v55 = vld [vmem:[%s19646_s1 + $0x1c74] sm:$0xf0]  ;;  %v7267_v9 = vpop.f32.mrf.mxu2  ;;  %v11854_v10 = vld [vmem:[%s19646_s1 + $0x1e48] sm:$0xf]  ;;  %v7243_v43 = vpop.f32.mrf.mxu0 }
 0x2ee   :  { %7506 = vmatpush.bf16.msrb.mxu1 %v11791_v53  ;;  %v11742_v53 = vld [vmem:[%s19646_s1 + $0x1d68] sm:$0xf]  ;;  %v13043_v56 = vld [vmem:[%s19646_s1 + $0x1e74] sm:$0xf0]  ;;  %v11615_v8 = vor.u32 %v12979_v55, %v11614_v1  ;;  %v7280_v22 = vpop.f32.mrf.mxu3 }
 0x2ef   :  { %7519 = vmatpush.bf16.msrb.mxu2 %v11919_v57  ;;  %v7255_v57 = vadd.f32 %v7254_v48, %v7242_v32  ;;  %v13075_v27 = vld [vmem:[%s19646_s1 + $0x1f74] sm:$0xf0]  ;;  %v11743_v17 = vor.u32 %v13011_v63, %v11742_v53  ;;  %v11871_v52 = vor.u32 %v13043_v56, %v11870_v54  ;;  %v11982_v40 = vld [vmem:[%s19646_s1 + $0x1f48] sm:$0xf]  ;;  %v7256_v32 = vpop.f32.mrf.mxu1 }
 0x2f0   :  { %7532 = vmatpush.bf16.msrb.mxu3 %v12047_v0  ;;  %v11998_v0 = vld [vmem:[%s19646_s1 + $0x1f68] sm:$0xf]  ;;  %v13007_v5 = vld [vmem:[%s19646_s1 + $0x1d54] sm:$0xf0]  ;;  %v12161_v32 = vld [vmem:[%s19646_s1 + $0x2ec] sm:$0xf] }
 0x2f1   :  { %7494 = vmatpush.bf16.msrb.mxu0 %v11647_v2  ;;  %v12975_v2 = vld [vmem:[%s19646_s1 + $0x1c54] sm:$0xf0]  ;;  %v7268_v18 = vadd.f32 %v7267_v9, %v7255_v57  ;;  %v11710_v55 = vld [vmem:[%s19646_s1 + $0x1d28] sm:$0xf] }
 0x2f2   :  { %7507 = vmatpush.bf16.msrb.mxu1 %v11775_v26  ;;  %v11726_v26 = vld [vmem:[%s19646_s1 + $0x1d48] sm:$0xf]  ;;  %v13071_v51 = vld [vmem:[%s19646_s1 + $0x1f54] sm:$0xf0]  ;;  %v11599_v61 = vor.u32 %v12975_v2, %v11598_v60 }
 0x2f3   :  { %7520 = vmatpush.bf16.msrb.mxu2 %v11903_v62  ;;  %v11999_v62 = vor.u32 %v13075_v27, %v11998_v0  ;;  %v11727_v48 = vor.u32 %v13007_v5, %v11726_v26  ;;  %v12971_v1 = vld [vmem:[%s19646_s1 + $0x1c34] sm:$0xf0]  ;;  %v11983_v53 = vor.u32 %v13071_v51, %v11982_v40  ;;  %v11838_v57 = vld [vmem:[%s19646_s1 + $0x1e28] sm:$0xf]  ;;  %v12129_v40 = vld [vmem:[%s19646_s1 + $0x1ec] sm:$0xf] }
 0x2f4   :  { %7533 = vmatpush.bf16.msrb.mxu3 %v12031_v58  ;;  %v13039_v58 = vld [vmem:[%s19646_s1 + $0x1e54] sm:$0xf0]  ;;  %v11966_v54 = vld [vmem:[%s19646_s1 + $0x1f28] sm:$0xf] }
 0x2f5   :  { %7495 = vmatpush.bf16.msrb.mxu0 %v11631_v14  ;;  %v17978_v14 = vadd.f32 %v7280_v22, %v7268_v18  ;;  %v13035_v63 = vld [vmem:[%s19646_s1 + $0x1e34] sm:$0xf0]  ;;  %v11566_v27 = vld [vmem:[%s19646_s1 + $0x1c08] sm:$0xf]  ;;  %v12097_v18 = vld [vmem:[%s19646_s1 + $0xec] sm:$0xf] }
 0x2f6   :  { %7508 = vmatpush.bf16.msrb.mxu1 %v11759_v50  ;;  %v11855_v50 = vor.u32 %v13039_v58, %v11854_v10  ;;  %v13067_v56 = vld [vmem:[%s19646_s1 + $0x1f34] sm:$0xf0]  ;;  %v11694_v60 = vld [vmem:[%s19646_s1 + $0x1d08] sm:$0xf]  ;;  %v7269_v58 = vpop.f32.mrf.mxu2  ;;  %v8096_v22 = vld [vmem:[%s19646_s1 + $0xf8] sm:$0xf0]  ;;  %v7282_v51 = vpop.f32.mrf.mxu3 }
 0x2f7   :  { %7521 = vmatpush.bf16.msrb.mxu2 %v11887_v3  ;;  %v11582_v3 = vld [vmem:[%s19646_s1 + $0x1c28] sm:$0xf]  ;;  %v12999_v2 = vld [vmem:[%s19646_s1 + $0x1d14] sm:$0xf0]  ;;  %v12121_v58 = vld [vmem:[%s19646_s1 + $0x1ac] sm:$0xf] }
 0x2f8   :  { %7534 = vmatpush.bf16.msrb.mxu3 %v12015_v59  ;;  %v13003_v59 = vld [vmem:[%s19646_s1 + $0x1d34] sm:$0xf0]  ;;  %v11583_v0 = vor.u32 %v12971_v1, %v11582_v3  ;;  %v11822_v26 = vld [vmem:[%s19646_s1 + $0x1e08] sm:$0xf]  ;;  %v12193_v1 = vld [vmem:[%s19646_s1 + $0x3ec] sm:$0xf] }
 0x2f9   :  { %7496 = vmatpush.bf16.msrb.mxu0 %v11615_v8  ;;  %v12967_v8 = vld [vmem:[%s19646_s1 + $0x1c14] sm:$0xf0]  ;;  %v11950_v5 = vld [vmem:[%s19646_s1 + $0x1f08] sm:$0xf]  ;;  %v8320_v51 = vld [vmem:[%s19646_s1 + $0x2b8] sm:$0xf0] }
 0x2fa   :  { %7509 = vmatpush.bf16.msrb.mxu1 %v11743_v17  ;;  %v11711_v17 = vor.u32 %v13003_v59, %v11710_v55  ;;  %v13031_v9 = vld [vmem:[%s19646_s1 + $0x1e14] sm:$0xf0]  ;;  %v11567_v43 = vor.u32 %v12967_v8, %v11566_v27  ;;  %v8480_v55 = vld [vmem:[%s19646_s1 + $0x3f8] sm:$0xf0]  ;;  %v8099_v59 = vor.u32 %v12097_v18, %v8096_v22 }
 0x2fb   :  { %7522 = vmatpush.bf16.msrb.mxu2 %v11871_v52  ;;  %v11839_v52 = vor.u32 %v13035_v63, %v11838_v57  ;;  %v13063_v10 = vld [vmem:[%s19646_s1 + $0x1f14] sm:$0xf0]  ;;  %v11823_v3 = vor.u32 %v13031_v9, %v11822_v26  ;;  %v8483_v27 = vor.u32 %v12193_v1, %v8480_v55  ;;  %v8208_v8 = vld [vmem:[%s19646_s1 + $0x1d8] sm:$0xf0]  ;;  %v12117_v55 = vld [vmem:[%s19646_s1 + $0x18c] sm:$0xf] }
 0x2fc   :  { %7535 = vmatpush.bf16.msrb.mxu3 %v11999_v62  ;;  %v11967_v62 = vor.u32 %v13067_v56, %v11966_v54  ;;  %v12093_v54 = vld [vmem:[%s19646_s1 + $0xcc] sm:$0xf]  ;;  %v8080_v56 = vld [vmem:[%s19646_s1 + $0xd8] sm:$0xf0] }
 0x2fd   :  { %7497 = vmatpush.bf16.msrb.mxu0 %v11599_v61  ;;  %v8224_v61 = vld [vmem:[%s19646_s1 + $0x1f8] sm:$0xf0]  ;;  %v8083_v26 = vor.u32 %v12093_v54, %v8080_v56  ;;  %v12181_v56 = vld [vmem:[%s19646_s1 + $0x38c] sm:$0xf] }
 0x2fe   :  { %7510 = vmatpush.bf16.msrb.mxu1 %v11727_v48  ;;  %v8352_v48 = vld [vmem:[%s19646_s1 + $0x2f8] sm:$0xf0]  ;;  %v8227_v57 = vor.u32 %v12129_v40, %v8224_v61  ;;  %v12153_v40 = vld [vmem:[%s19646_s1 + $0x2ac] sm:$0xf] }
 0x2ff   :  { %7523 = vmatpush.bf16.msrb.mxu2 %v11855_v50  ;;  %v11695_v50 = vor.u32 %v12999_v2, %v11694_v60  ;;  %v8355_v63 = vor.u32 %v12161_v32, %v8352_v48  ;;  %v12189_v60 = vld [vmem:[%s19646_s1 + $0x3cc] sm:$0xf]  ;;  %v8464_v2 = vld [vmem:[%s19646_s1 + $0x3d8] sm:$0xf0] }
 0x300   :  { %7536 = vmatpush.bf16.msrb.mxu3 %v11983_v53  ;;  %v11951_v53 = vor.u32 %v13063_v10, %v11950_v5  ;;  %v12089_v5 = vld [vmem:[%s19646_s1 + $0xac] sm:$0xf]  ;;  %v8064_v10 = vld [vmem:[%s19646_s1 + $0xb8] sm:$0xf0]  ;;  %v8467_v18 = vor.u32 %v12189_v60, %v8464_v2 }
 0x301   :  { %7498 = vmatpush.bf16.msrb.mxu0 %v11583_v0  ;;  %v12125_v0 = vld [vmem:[%s19646_s1 + $0x1cc] sm:$0xf]  ;;  %v8192_v22 = vld [vmem:[%s19646_s1 + $0x1b8] sm:$0xf0]  ;;  %v8067_v32 = vor.u32 %v12089_v5, %v8064_v10 }
 0x302   :  { %7511 = vmatpush.bf16.msrb.mxu1 %v11711_v17  ;;  %v12157_v17 = vld [vmem:[%s19646_s1 + $0x2cc] sm:$0xf]  ;;  %v8448_v61 = vld [vmem:[%s19646_s1 + $0x3b8] sm:$0xf0]  ;;  %v8195_v48 = vor.u32 %v12121_v58, %v8192_v22 }
 0x303   :  { %7524 = vmatpush.bf16.msrb.mxu2 %v11839_v52  ;;  %v8336_v52 = vld [vmem:[%s19646_s1 + $0x2d8] sm:$0xf0]  ;;  %v12081_v2 = vld [vmem:[%s19646_s1 + $0x6c] sm:$0xf] }
 0x304   :  { %7537 = vmatpush.bf16.msrb.mxu3 %v11967_v62  ;;  %v8211_v62 = vor.u32 %v12125_v0, %v8208_v8  ;;  %v8339_v9 = vor.u32 %v12157_v17, %v8336_v52  ;;  %v8048_v1 = vld [vmem:[%s19646_s1 + $0x98] sm:$0xf0]  ;;  %v12145_v10 = vld [vmem:[%s19646_s1 + $0x26c] sm:$0xf] }
 0x305   :  { %7499 = vmatpush.bf16.msrb.mxu0 %v11567_v43  ;;  %v12185_v43 = vld [vmem:[%s19646_s1 + $0x3ac] sm:$0xf]  ;;  %v7293_v54 = vpop.f32.mrf.mxu0  ;;  %v8432_v0 = vld [vmem:[%s19646_s1 + $0x398] sm:$0xf0] }
 0x306   :  { %7512 = vmatpush.bf16.msrb.mxu1 %v11695_v50  ;;  %v8323_v50 = vor.u32 %v12153_v40, %v8320_v51  ;;  %v7306_v17 = vpop.f32.mrf.mxu1  ;;  %v8160_v5 = vld [vmem:[%s19646_s1 + $0x178] sm:$0xf0] }
 0x307   :  { %7525 = vmatpush.bf16.msrb.mxu2 %v11823_v3  ;;  %v12085_v3 = vld [vmem:[%s19646_s1 + $0x8c] sm:$0xf]  ;;  %v8288_v58 = vld [vmem:[%s19646_s1 + $0x278] sm:$0xf0] }
 0x308   :  { %7538 = vmatpush.bf16.msrb.mxu3 %v11951_v53  ;;  %7500 = vmatmul.bf16.vlgmr.msrb.gmra.mxu0 %v14827_v24  ;;  %v8451_v53 = vor.u32 %v12185_v43, %v8448_v61  ;;  %v8051_v8 = vor.u32 %v12085_v3, %v8048_v1  ;;  %v8416_v22 = vld [vmem:[%s19646_s1 + $0x378] sm:$0xf0]  ;;  %v8291_v43 = vor.u32 %v12145_v10, %v8288_v58  ;;  %v12077_v61 = vld [vmem:[%s19646_s1 + $0x4c] sm:$0xf] }
 0x309   :  { %7544 = vmatpush.bf16.msra.mxu0 %v8099_v59  ;;  %7513 = vmatmul.bf16.vlgmr.msrb.gmra.mxu1 %v14840_v36  ;;  %v8176_v59 = vld [vmem:[%s19646_s1 + $0x198] sm:$0xf0]  ;;  %v12169_v10 = vld [vmem:[%s19646_s1 + $0x32c] sm:$0xf] }
 0x30a   :  { %7557 = vmatpush.bf16.msra.mxu1 %v8227_v57  ;;  %7526 = vmatmul.bf16.vlgmr.msrb.gmra.mxu2 %v14838_v34  ;;  %v12149_v57 = vld [vmem:[%s19646_s1 + $0x28c] sm:$0xf]  ;;  %v8179_v52 = vor.u32 %v12117_v55, %v8176_v59  ;;  %v8144_v1 = vld [vmem:[%s19646_s1 + $0x158] sm:$0xf0] }
 0x30b   :  { %7570 = vmatpush.bf16.msra.mxu2 %v8355_v63  ;;  %7539 = vmatmul.bf16.vlgmr.msrb.gmra.mxu3 %v14848_v47  ;;  %v8304_v63 = vld [vmem:[%s19646_s1 + $0x298] sm:$0xf0]  ;;  %v12141_v55 = vld [vmem:[%s19646_s1 + $0x24c] sm:$0xf] }
 0x30c   :  { %7583 = vmatpush.bf16.msra.mxu3 %v8483_v27  ;;  %v7294_v27 = vadd.f32 %v7293_v54, %v17978_v14  ;;  %v8307_v60 = vor.u32 %v12149_v57, %v8304_v63  ;;  %v8435_v14 = vor.u32 %v12181_v56, %v8432_v0  ;;  %v12173_v63 = vld [vmem:[%s19646_s1 + $0x34c] sm:$0xf]  ;;  %v8400_v54 = vld [vmem:[%s19646_s1 + $0x358] sm:$0xf0] }
 0x30d   :  { %7545 = vmatpush.bf16.msra.mxu0 %v8083_v26  ;;  %v8032_v26 = vld [vmem:[%s19646_s1 + $0x78] sm:$0xf0]  ;;  %v7319_v3 = vpop.f32.mrf.mxu2  ;;  %v7295_v56 = vpop.f32.mrf.mxu0 }
 0x30e   :  { %7558 = vmatpush.bf16.msra.mxu1 %v8211_v62  ;;  %v12113_v62 = vld [vmem:[%s19646_s1 + $0x16c] sm:$0xf]  ;;  %v8035_v40 = vor.u32 %v12081_v2, %v8032_v26  ;;  %v7332_v57 = vpop.f32.mrf.mxu3  ;;  %v8000_v2 = vld [vmem:[%s19646_s1 + $0x38] sm:$0xf0] }
 0x30f   :  { %7571 = vmatpush.bf16.msra.mxu2 %v8339_v9  ;;  %v7307_v9 = vadd.f32 %v7306_v17, %v7294_v27  ;;  %v8163_v51 = vor.u32 %v12113_v62, %v8160_v5  ;;  %v7308_v27 = vpop.f32.mrf.mxu1  ;;  %v12105_v26 = vld [vmem:[%s19646_s1 + $0x12c] sm:$0xf]  ;;  %v8403_v62 = vor.u32 %v12173_v63, %v8400_v54  ;;  %v8256_v5 = vld [vmem:[%s19646_s1 + $0x238] sm:$0xf0] }
 0x310   :  { %7584 = vmatpush.bf16.msra.mxu3 %v8467_v18  ;;  %v12177_v18 = vld [vmem:[%s19646_s1 + $0x36c] sm:$0xf]  ;;  %v8384_v58 = vld [vmem:[%s19646_s1 + $0x338] sm:$0xf0] }
 0x311   :  { %7546 = vmatpush.bf16.msra.mxu0 %v8067_v32  ;;  %v8016_v32 = vld [vmem:[%s19646_s1 + $0x58] sm:$0xf0]  ;;  %v7320_v59 = vadd.f32 %v7319_v3, %v7307_v9  ;;  %v12137_v9 = vld [vmem:[%s19646_s1 + $0x22c] sm:$0xf] }
 0x312   :  { %7559 = vmatpush.bf16.msra.mxu1 %v8195_v48  ;;  %v12109_v48 = vld [vmem:[%s19646_s1 + $0x14c] sm:$0xf]  ;;  %v8019_v0 = vor.u32 %v12077_v61, %v8016_v32  ;;  %v8112_v32 = vld [vmem:[%s19646_s1 + $0x118] sm:$0xf0] }
 0x313   :  { %7572 = vmatpush.bf16.msra.mxu2 %v8323_v50  ;;  %v8419_v50 = vor.u32 %v12177_v18, %v8416_v22  ;;  %v8147_v17 = vor.u32 %v12109_v48, %v8144_v1  ;;  %v12069_v22 = vld [vmem:[%s19646_s1 + $0xc] sm:$0xf]  ;;  %v8240_v3 = vld [vmem:[%s19646_s1 + $0x218] sm:$0xf0] }
 0x314   :  { %7585 = vmatpush.bf16.msra.mxu3 %v8451_v53  ;;  %v8272_v53 = vld [vmem:[%s19646_s1 + $0x258] sm:$0xf0]  ;;  %v12101_v61 = vld [vmem:[%s19646_s1 + $0x10c] sm:$0xf] }
 0x315   :  { %7547 = vmatpush.bf16.msra.mxu0 %v8051_v8  ;;  %v18177_v8 = vadd.f32 %v7332_v57, %v7320_v59  ;;  %v12133_v48 = vld [vmem:[%s19646_s1 + $0x20c] sm:$0xf]  ;;  %v8608_v57 = vld [vmem:[%s19646_s1 + $0x4f8] sm:$0xf0] }
 0x316   :  { %7560 = vmatpush.bf16.msra.mxu1 %v8179_v52  ;;  %v8275_v52 = vor.u32 %v12141_v55, %v8272_v53  ;;  %v12165_v1 = vld [vmem:[%s19646_s1 + $0x30c] sm:$0xf]  ;;  %v8368_v55 = vld [vmem:[%s19646_s1 + $0x318] sm:$0xf0]  ;;  %v7321_v53 = vpop.f32.mrf.mxu2  ;;  %v7334_v54 = vpop.f32.mrf.mxu3 }
 0x317   :  { %7573 = vmatpush.bf16.msra.mxu2 %v8307_v60  ;;  %v12073_v60 = vld [vmem:[%s19646_s1 + $0x2c] sm:$0xf]  ;;  %v8832_v54 = vld [vmem:[%s19646_s1 + $0x6b8] sm:$0xf0] }
 0x318   :  { %7586 = vmatpush.bf16.msra.mxu3 %v8435_v14  ;;  %v8128_v14 = vld [vmem:[%s19646_s1 + $0x138] sm:$0xf0]  ;;  %v8003_v18 = vor.u32 %v12073_v60, %v8000_v2  ;;  %v12225_v59 = vld [vmem:[%s19646_s1 + $0x4ec] sm:$0xf]  ;;  %v8243_v60 = vor.u32 %v12133_v48, %v8240_v3 }
 0x319   :  { %7548 = vmatpush.bf16.msra.mxu0 %v8035_v40  ;;  %v7984_v40 = vld [vmem:[%s19646_s1 + $0x18] sm:$0xf0]  ;;  %v12257_v63 = vld [vmem:[%s19646_s1 + $0x5ec] sm:$0xf] }
 0x31a   :  { %7561 = vmatpush.bf16.msra.mxu1 %v8163_v51  ;;  %v8131_v51 = vor.u32 %v12105_v26, %v8128_v14  ;;  %v7987_v56 = vor.u32 %v12069_v22, %v7984_v40  ;;  %v12289_v27 = vld [vmem:[%s19646_s1 + $0x6ec] sm:$0xf]  ;;  %v8992_v26 = vld [vmem:[%s19646_s1 + $0x7f8] sm:$0xf0]  ;;  %v8611_v14 = vor.u32 %v12225_v59, %v8608_v57 }
 0x31b   :  { %7574 = vmatpush.bf16.msra.mxu2 %v8291_v43  ;;  %v8259_v43 = vor.u32 %v12137_v9, %v8256_v5  ;;  %v12321_v2 = vld [vmem:[%s19646_s1 + $0x7ec] sm:$0xf]  ;;  %v8720_v40 = vld [vmem:[%s19646_s1 + $0x5d8] sm:$0xf0] }
 0x31c   :  { %7587 = vmatpush.bf16.msra.mxu3 %v8419_v50  ;;  %v8387_v50 = vor.u32 %v12169_v10, %v8384_v58  ;;  %v12221_v10 = vld [vmem:[%s19646_s1 + $0x4cc] sm:$0xf]  ;;  %v8592_v58 = vld [vmem:[%s19646_s1 + $0x4d8] sm:$0xf0]  ;;  %v8995_v22 = vor.u32 %v12321_v2, %v8992_v26 }
 0x31d   :  { %7549 = vmatpush.bf16.msra.mxu0 %v8019_v0  ;;  %v8736_v0 = vld [vmem:[%s19646_s1 + $0x5f8] sm:$0xf0]  ;;  %v8595_v48 = vor.u32 %v12221_v10, %v8592_v58  ;;  %v12249_v53 = vld [vmem:[%s19646_s1 + $0x5ac] sm:$0xf] }
 0x31e   :  { %7562 = vmatpush.bf16.msra.mxu1 %v8147_v17  ;;  %v8864_v17 = vld [vmem:[%s19646_s1 + $0x6f8] sm:$0xf0]  ;;  %v8739_v9 = vor.u32 %v12257_v63, %v8736_v0  ;;  %v12281_v63 = vld [vmem:[%s19646_s1 + $0x6ac] sm:$0xf] }
 0x31f   :  { %7575 = vmatpush.bf16.msra.mxu2 %v8275_v52  ;;  %v8115_v52 = vor.u32 %v12101_v61, %v8112_v32  ;;  %v8867_v5 = vor.u32 %v12289_v27, %v8864_v17  ;;  %v12317_v61 = vld [vmem:[%s19646_s1 + $0x7cc] sm:$0xf]  ;;  %v8976_v32 = vld [vmem:[%s19646_s1 + $0x7d8] sm:$0xf0] }
 0x320   :  { %7588 = vmatpush.bf16.msra.mxu3 %v8403_v62  ;;  %v8371_v62 = vor.u32 %v12165_v1, %v8368_v55  ;;  %v12217_v1 = vld [vmem:[%s19646_s1 + $0x4ac] sm:$0xf]  ;;  %v8576_v55 = vld [vmem:[%s19646_s1 + $0x4b8] sm:$0xf0]  ;;  %v8979_v59 = vor.u32 %v12317_v61, %v8976_v32 }
 0x321   :  { %7550 = vmatpush.bf16.msra.mxu0 %v8003_v18  ;;  %v12253_v18 = vld [vmem:[%s19646_s1 + $0x5cc] sm:$0xf]  ;;  %v8704_v57 = vld [vmem:[%s19646_s1 + $0x5b8] sm:$0xf0]  ;;  %v8579_v27 = vor.u32 %v12217_v1, %v8576_v55 }
 0x322   :  { %7563 = vmatpush.bf16.msra.mxu1 %v8131_v51  ;;  %v12285_v51 = vld [vmem:[%s19646_s1 + $0x6cc] sm:$0xf]  ;;  %v8960_v0 = vld [vmem:[%s19646_s1 + $0x7b8] sm:$0xf0]  ;;  %v8707_v17 = vor.u32 %v12249_v53, %v8704_v57 }
 0x323   :  { %7576 = vmatpush.bf16.msra.mxu2 %v8259_v43  ;;  %v8848_v43 = vld [vmem:[%s19646_s1 + $0x6d8] sm:$0xf0]  ;;  %v12277_v2 = vld [vmem:[%s19646_s1 + $0x68c] sm:$0xf] }
 0x324   :  { %7589 = vmatpush.bf16.msra.mxu3 %v8387_v50  ;;  %v8723_v50 = vor.u32 %v12253_v18, %v8720_v40  ;;  %v8851_v3 = vor.u32 %v12285_v51, %v8848_v43  ;;  %v8816_v26 = vld [vmem:[%s19646_s1 + $0x698] sm:$0xf0]  ;;  %v12209_v40 = vld [vmem:[%s19646_s1 + $0x46c] sm:$0xf] }
 0x325   :  { %7551 = vmatpush.bf16.msra.mxu0 %v7987_v56  ;;  %v12313_v56 = vld [vmem:[%s19646_s1 + $0x7ac] sm:$0xf]  ;;  %v8544_v51 = vld [vmem:[%s19646_s1 + $0x478] sm:$0xf0] }
 0x326   :  { %7564 = vmatpush.bf16.msra.mxu1 %v8115_v52  ;;  %v12213_v52 = vld [vmem:[%s19646_s1 + $0x48c] sm:$0xf]  ;;  %v7358_v58 = vpop.f32.mrf.mxu1  ;;  %v8672_v32 = vld [vmem:[%s19646_s1 + $0x578] sm:$0xf0]  ;;  %v8547_v55 = vor.u32 %v12209_v40, %v8544_v51 }
 0x327   :  { %7577 = vmatpush.bf16.msra.mxu2 %v8243_v60  ;;  %v8560_v60 = vld [vmem:[%s19646_s1 + $0x498] sm:$0xf0]  ;;  %v12241_v43 = vld [vmem:[%s19646_s1 + $0x56c] sm:$0xf] }
 0x328   :  { %7590 = vmatpush.bf16.msra.mxu3 %v8371_v62  ;;  %7552 = vmatmul.bf16.vlgmr.msra.gmra.mxu0 %v13414_v20  ;;  %v8963_v20 = vor.u32 %v12313_v56, %v8960_v0  ;;  %v7345_v62 = vpop.f32.mrf.mxu0  ;;  %v8563_v10 = vor.u32 %v12213_v52, %v8560_v60  ;;  %v8928_v1 = vld [vmem:[%s19646_s1 + $0x778] sm:$0xf0]  ;;  %v8675_v53 = vor.u32 %v12241_v43, %v8672_v32  ;;  %v12205_v57 = vld [vmem:[%s19646_s1 + $0x44c] sm:$0xf] }
 0x329   :  { %7596 = vmatpush.bf16.msrb.mxu0 %v8611_v14  ;;  %7565 = vmatmul.bf16.vlgmr.msra.gmra.mxu1 %v13417_v21  ;;  %v8688_v21 = vld [vmem:[%s19646_s1 + $0x598] sm:$0xf0]  ;;  %v12309_v14 = vld [vmem:[%s19646_s1 + $0x78c] sm:$0xf] }
 0x32a   :  { %7609 = vmatpush.bf16.msrb.mxu1 %v8739_v9  ;;  %7578 = vmatmul.bf16.vlgmr.msra.gmra.mxu2 %v13382_v4  ;;  %v8835_v4 = vor.u32 %v12281_v63, %v8832_v54  ;;  %v8944_v9 = vld [vmem:[%s19646_s1 + $0x798] sm:$0xf0]  ;;  %v12237_v54 = vld [vmem:[%s19646_s1 + $0x54c] sm:$0xf] }
 0x32b   :  { %7622 = vmatpush.bf16.msrb.mxu2 %v8867_v5  ;;  %7591 = vmatmul.bf16.vlgmr.msra.gmra.mxu3 %v13387_v6  ;;  %v12245_v6 = vld [vmem:[%s19646_s1 + $0x58c] sm:$0xf]  ;;  %v7346_v5 = vadd.f32 %v7345_v62, %v18177_v8  ;;  %v8947_v8 = vor.u32 %v12309_v14, %v8944_v9  ;;  %v8528_v63 = vld [vmem:[%s19646_s1 + $0x458] sm:$0xf0] }
 0x32c   :  { %7635 = vmatpush.bf16.msrb.mxu3 %v8995_v22  ;;  %v8691_v18 = vor.u32 %v12245_v6, %v8688_v21  ;;  %v8819_v22 = vor.u32 %v12277_v2, %v8816_v26  ;;  %v12301_v6 = vld [vmem:[%s19646_s1 + $0x74c] sm:$0xf]  ;;  %v8531_v2 = vor.u32 %v12205_v57, %v8528_v63  ;;  %v8768_v51 = vld [vmem:[%s19646_s1 + $0x638] sm:$0xf0] }
 0x32d   :  { %7597 = vmatpush.bf16.msrb.mxu0 %v8595_v48  ;;  %v7359_v61 = vadd.f32 %v7358_v58, %v7346_v5  ;;  %v12273_v48 = vld [vmem:[%s19646_s1 + $0x66c] sm:$0xf]  ;;  %v7371_v0 = vpop.f32.mrf.mxu2  ;;  %v8752_v57 = vld [vmem:[%s19646_s1 + $0x618] sm:$0xf0] }
 0x32e   :  { %7610 = vmatpush.bf16.msrb.mxu1 %v8723_v50  ;;  %v8800_v50 = vld [vmem:[%s19646_s1 + $0x678] sm:$0xf0]  ;;  %v7384_v60 = vpop.f32.mrf.mxu3  ;;  %v7360_v26 = vpop.f32.mrf.mxu1  ;;  %v12201_v5 = vld [vmem:[%s19646_s1 + $0x42c] sm:$0xf] }
 0x32f   :  { %7623 = vmatpush.bf16.msrb.mxu2 %v8851_v3  ;;  %v12305_v3 = vld [vmem:[%s19646_s1 + $0x76c] sm:$0xf]  ;;  %v7372_v52 = vadd.f32 %v7371_v0, %v7359_v61 }
 0x330   :  { %7636 = vmatpush.bf16.msrb.mxu3 %v8979_v59  ;;  %v8803_v59 = vor.u32 %v12273_v48, %v8800_v50  ;;  %v8931_v56 = vor.u32 %v12305_v3, %v8928_v1  ;;  %v7347_v21 = vpop.f32.mrf.mxu0  ;;  %v12233_v58 = vld [vmem:[%s19646_s1 + $0x52c] sm:$0xf]  ;;  %v8496_v48 = vld [vmem:[%s19646_s1 + $0x418] sm:$0xf0] }
 0x331   :  { %7598 = vmatpush.bf16.msrb.mxu0 %v8579_v27  ;;  %v8656_v27 = vld [vmem:[%s19646_s1 + $0x558] sm:$0xf0]  ;;  %v18376_v62 = vadd.f32 %v7384_v60, %v7372_v52  ;;  %v12265_v40 = vld [vmem:[%s19646_s1 + $0x62c] sm:$0xf] }
 0x332   :  { %7611 = vmatpush.bf16.msrb.mxu1 %v8707_v17  ;;  %v12269_v17 = vld [vmem:[%s19646_s1 + $0x64c] sm:$0xf]  ;;  %v8659_v14 = vor.u32 %v12237_v54, %v8656_v27  ;;  %v8771_v3 = vor.u32 %v12265_v40, %v8768_v51  ;;  %v8880_v54 = vld [vmem:[%s19646_s1 + $0x718] sm:$0xf0] }
 0x333   :  { %7624 = vmatpush.bf16.msrb.mxu2 %v8835_v4  ;;  %v8784_v4 = vld [vmem:[%s19646_s1 + $0x658] sm:$0xf0]  ;;  %v12297_v43 = vld [vmem:[%s19646_s1 + $0x72c] sm:$0xf] }
 0x334   :  { %7637 = vmatpush.bf16.msrb.mxu3 %v8963_v20  ;;  %v8912_v20 = vld [vmem:[%s19646_s1 + $0x758] sm:$0xf0]  ;;  %v8787_v9 = vor.u32 %v12269_v17, %v8784_v4  ;;  %v12197_v32 = vld [vmem:[%s19646_s1 + $0x40c] sm:$0xf] }
 0x335   :  { %7599 = vmatpush.bf16.msrb.mxu0 %v8563_v10  ;;  %v8512_v10 = vld [vmem:[%s19646_s1 + $0x438] sm:$0xf0]  ;;  %v12229_v1 = vld [vmem:[%s19646_s1 + $0x50c] sm:$0xf]  ;;  %v8499_v52 = vor.u32 %v12197_v32, %v8496_v48 }
 0x336   :  { %7612 = vmatpush.bf16.msrb.mxu1 %v8691_v18  ;;  %v8915_v18 = vor.u32 %v12301_v6, %v8912_v20  ;;  %v8515_v61 = vor.u32 %v12201_v5, %v8512_v10  ;;  %v12293_v63 = vld [vmem:[%s19646_s1 + $0x70c] sm:$0xf]  ;;  %v9120_v27 = vld [vmem:[%s19646_s1 + $0x8f8] sm:$0xf0]  ;;  %v7386_v4 = vpop.f32.mrf.mxu3 }
 0x337   :  { %7625 = vmatpush.bf16.msrb.mxu2 %v8819_v22  ;;  %v8640_v22 = vld [vmem:[%s19646_s1 + $0x538] sm:$0xf0]  ;;  %v12353_v0 = vld [vmem:[%s19646_s1 + $0x8ec] sm:$0xf] }
 0x338   :  { %7638 = vmatpush.bf16.msrb.mxu3 %v8947_v8  ;;  %v8896_v8 = vld [vmem:[%s19646_s1 + $0x738] sm:$0xf0]  ;;  %v8643_v50 = vor.u32 %v12233_v58, %v8640_v22  ;;  %v12385_v17 = vld [vmem:[%s19646_s1 + $0x9ec] sm:$0xf]  ;;  %v9123_v5 = vor.u32 %v12353_v0, %v9120_v27 }
 0x339   :  { %7600 = vmatpush.bf16.msrb.mxu0 %v8547_v55  ;;  %v8624_v55 = vld [vmem:[%s19646_s1 + $0x518] sm:$0xf0]  ;;  %v12417_v6 = vld [vmem:[%s19646_s1 + $0xaec] sm:$0xf] }
 0x33a   :  { %7613 = vmatpush.bf16.msrb.mxu1 %v8675_v53  ;;  %v12261_v53 = vld [vmem:[%s19646_s1 + $0x60c] sm:$0xf]  ;;  %v9248_v60 = vld [vmem:[%s19646_s1 + $0x9f8] sm:$0xf0]  ;;  %v8627_v21 = vor.u32 %v12229_v1, %v8624_v55 }
 0x33b   :  { %7626 = vmatpush.bf16.msrb.mxu2 %v8803_v59  ;;  %v8899_v59 = vor.u32 %v12297_v43, %v8896_v8  ;;  %v9376_v20 = vld [vmem:[%s19646_s1 + $0xaf8] sm:$0xf0]  ;;  %v12449_v26 = vld [vmem:[%s19646_s1 + $0xbec] sm:$0xf]  ;;  %v9251_v10 = vor.u32 %v12385_v17, %v9248_v60 }
 0x33c   :  { %7639 = vmatpush.bf16.msrb.mxu3 %v8931_v56  ;;  %v7373_v56 = vpop.f32.mrf.mxu2  ;;  %v9379_v58 = vor.u32 %v12417_v6, %v9376_v20  ;;  %v9104_v22 = vld [vmem:[%s19646_s1 + $0x8d8] sm:$0xf0]  ;;  %v12381_v40 = vld [vmem:[%s19646_s1 + $0x9cc] sm:$0xf] }
 0x33d   :  { %7601 = vmatpush.bf16.msrb.mxu0 %v8531_v2  ;;  %v8755_v2 = vor.u32 %v12261_v53, %v8752_v57  ;;  %v9232_v43 = vld [vmem:[%s19646_s1 + $0x9d8] sm:$0xf0]  ;;  %v12413_v8 = vld [vmem:[%s19646_s1 + $0xacc] sm:$0xf] }
 0x33e   :  { %7614 = vmatpush.bf16.msrb.mxu1 %v8659_v14  ;;  %v9504_v14 = vld [vmem:[%s19646_s1 + $0xbf8] sm:$0xf0]  ;;  %v12445_v32 = vld [vmem:[%s19646_s1 + $0xbcc] sm:$0xf] }
 0x33f   :  { %7627 = vmatpush.bf16.msrb.mxu2 %v8787_v9  ;;  %v8883_v9 = vor.u32 %v12293_v63, %v8880_v54  ;;  %v9507_v51 = vor.u32 %v12449_v26, %v9504_v14  ;;  %v9488_v48 = vld [vmem:[%s19646_s1 + $0xbd8] sm:$0xf0]  ;;  %v12345_v55 = vld [vmem:[%s19646_s1 + $0x8ac] sm:$0xf] }
 0x340   :  { %7640 = vmatpush.bf16.msrb.mxu3 %v8915_v18  ;;  %v12349_v18 = vld [vmem:[%s19646_s1 + $0x8cc] sm:$0xf]  ;;  %v9088_v53 = vld [vmem:[%s19646_s1 + $0x8b8] sm:$0xf0]  ;;  %v9491_v57 = vor.u32 %v12445_v32, %v9488_v48 }
 0x341   :  { %7602 = vmatpush.bf16.msrb.mxu0 %v8515_v61  ;;  %v9360_v61 = vld [vmem:[%s19646_s1 + $0xad8] sm:$0xf0]  ;;  %v12409_v54 = vld [vmem:[%s19646_s1 + $0xaac] sm:$0xf]  ;;  %v9091_v27 = vor.u32 %v12345_v55, %v9088_v53 }
 0x342   :  { %7615 = vmatpush.bf16.msrb.mxu1 %v8643_v50  ;;  %v9107_v50 = vor.u32 %v12349_v18, %v9104_v22  ;;  %v9363_v1 = vor.u32 %v12413_v8, %v9360_v61  ;;  %v9216_v63 = vld [vmem:[%s19646_s1 + $0x9b8] sm:$0xf0]  ;;  %v12405_v6 = vld [vmem:[%s19646_s1 + $0xa8c] sm:$0xf] }
 0x343   :  { %7628 = vmatpush.bf16.msrb.mxu2 %v8771_v3  ;;  %v9235_v3 = vor.u32 %v12381_v40, %v9232_v43  ;;  %v9344_v56 = vld [vmem:[%s19646_s1 + $0xab8] sm:$0xf0]  ;;  %v12369_v22 = vld [vmem:[%s19646_s1 + $0x96c] sm:$0xf] }
 0x344   :  { %7641 = vmatpush.bf16.msrb.mxu3 %v8899_v59  ;;  %v12377_v59 = vld [vmem:[%s19646_s1 + $0x9ac] sm:$0xf]  ;;  %v9472_v0 = vld [vmem:[%s19646_s1 + $0xbb8] sm:$0xf0]  ;;  %v9347_v4 = vor.u32 %v12409_v54, %v9344_v56 }
 0x345   :  { %7603 = vmatpush.bf16.msrb.mxu0 %v8499_v52  ;;  %v9219_v17 = vor.u32 %v12377_v59, %v9216_v63  ;;  %v12373_v52 = vld [vmem:[%s19646_s1 + $0x98c] sm:$0xf]  ;;  %v9328_v20 = vld [vmem:[%s19646_s1 + $0xa98] sm:$0xf0] }
 0x346   :  { %7616 = vmatpush.bf16.msrb.mxu1 %v8627_v21  ;;  %v18520_v21 = vpop.f32.mrf.mxu0  ;;  %v9456_v26 = vld [vmem:[%s19646_s1 + $0xb98] sm:$0xf0]  ;;  %v12401_v43 = vld [vmem:[%s19646_s1 + $0xa6c] sm:$0xf] }
 0x347   :  { %7629 = vmatpush.bf16.msrb.mxu2 %v8755_v2  ;;  %v12437_v2 = vld [vmem:[%s19646_s1 + $0xb8c] sm:$0xf]  ;;  %v9056_v18 = vld [vmem:[%s19646_s1 + $0x878] sm:$0xf0] }
 0x348   :  { %7642 = vmatpush.bf16.msrb.mxu3 %v8883_v9  ;;  %7604 = vmatmul.bf16.vlgmr.msrb.gmra.mxu0 %v13573_v41  ;;  %v12341_v41 = vld [vmem:[%s19646_s1 + $0x88c] sm:$0xf]  ;;  %v18528_v9 = vpop.f32.mrf.mxu1  ;;  %v9459_v40 = vor.u32 %v12437_v2, %v9456_v26  ;;  %v9312_v8 = vld [vmem:[%s19646_s1 + $0xa78] sm:$0xf0] }
 0x349   :  { %7648 = vmatpush.bf16.msra.mxu0 %v9123_v5  ;;  %7617 = vmatmul.bf16.vlgmr.msrb.gmra.mxu1 %v13577_v44  ;;  %v9200_v44 = vld [vmem:[%s19646_s1 + $0x998] sm:$0xf0]  ;;  %v12433_v61 = vld [vmem:[%s19646_s1 + $0xb6c] sm:$0xf] }
 0x34a   :  { %7661 = vmatpush.bf16.msra.mxu1 %v9251_v10  ;;  %7630 = vmatmul.bf16.vlgmr.msrb.gmra.mxu2 %v13565_v38  ;;  %v12441_v38 = vld [vmem:[%s19646_s1 + $0xbac] sm:$0xf]  ;;  %v9203_v5 = vor.u32 %v12373_v52, %v9200_v44  ;;  %v9331_v10 = vor.u32 %v12405_v6, %v9328_v20  ;;  %v9440_v32 = vld [vmem:[%s19646_s1 + $0xb78] sm:$0xf0] }
 0x34b   :  { %7674 = vmatpush.bf16.msra.mxu2 %v9379_v58  ;;  %7643 = vmatmul.bf16.vlgmr.msrb.gmra.mxu3 %v13575_v42  ;;  %v9072_v42 = vld [vmem:[%s19646_s1 + $0x898] sm:$0xf0]  ;;  %v9475_v60 = vor.u32 %v12441_v38, %v9472_v0  ;;  %v12337_v58 = vld [vmem:[%s19646_s1 + $0x86c] sm:$0xf]  ;;  %v9443_v59 = vor.u32 %v12433_v61, %v9440_v32 }
 0x34c   :  { %7687 = vmatpush.bf16.msra.mxu3 %v9507_v51  ;;  %v9075_v14 = vor.u32 %v12341_v41, %v9072_v42  ;;  %v9184_v51 = vld [vmem:[%s19646_s1 + $0x978] sm:$0xf0]  ;;  %v9059_v48 = vor.u32 %v12337_v58, %v9056_v18  ;;  %v12365_v53 = vld [vmem:[%s19646_s1 + $0x94c] sm:$0xf] }
 0x34d   :  { %7649 = vmatpush.bf16.msra.mxu0 %v9107_v50  ;;  %v9187_v50 = vor.u32 %v12369_v22, %v9184_v51  ;;  %v9040_v55 = vld [vmem:[%s19646_s1 + $0x858] sm:$0xf0]  ;;  %v12397_v54 = vld [vmem:[%s19646_s1 + $0xa4c] sm:$0xf] }
 0x34e   :  { %7662 = vmatpush.bf16.msra.mxu1 %v9235_v3  ;;  %v9315_v3 = vor.u32 %v12401_v43, %v9312_v8  ;;  %v9168_v63 = vld [vmem:[%s19646_s1 + $0x958] sm:$0xf0]  ;;  %v18574_v38 = vpop.f32.mrf.mxu3  ;;  %v12429_v0 = vld [vmem:[%s19646_s1 + $0xb4c] sm:$0xf] }
 0x34f   :  { %7675 = vmatpush.bf16.msra.mxu2 %v9363_v1  ;;  %v12333_v1 = vld [vmem:[%s19646_s1 + $0x84c] sm:$0xf]  ;;  %v9296_v56 = vld [vmem:[%s19646_s1 + $0xa58] sm:$0xf0]  ;;  %v9171_v42 = vor.u32 %v12365_v53, %v9168_v63 }
 0x350   :  { %7688 = vmatpush.bf16.msra.mxu3 %v9491_v57  ;;  %v18563_v57 = vpop.f32.mrf.mxu2  ;;  %v7412_v41 = vpop.f32.mrf.mxu1  ;;  %v9299_v52 = vor.u32 %v12397_v54, %v9296_v56  ;;  %v9024_v44 = vld [vmem:[%s19646_s1 + $0x838] sm:$0xf0]  ;;  %v12361_v6 = vld [vmem:[%s19646_s1 + $0x92c] sm:$0xf] }
 0x351   :  { %7650 = vmatpush.bf16.msra.mxu0 %v9091_v27  ;;  %v9424_v27 = vld [vmem:[%s19646_s1 + $0xb58] sm:$0xf0]  ;;  %v12393_v26 = vld [vmem:[%s19646_s1 + $0xa2c] sm:$0xf] }
 0x352   :  { %7663 = vmatpush.bf16.msra.mxu1 %v9219_v17  ;;  %v7399_v17 = vpop.f32.mrf.mxu0  ;;  %v9427_v20 = vor.u32 %v12429_v0, %v9424_v27  ;;  %v9152_v2 = vld [vmem:[%s19646_s1 + $0x938] sm:$0xf0]  ;;  %v12325_v18 = vld [vmem:[%s19646_s1 + $0x80c] sm:$0xf] }
 0x353   :  { %7676 = vmatpush.bf16.msra.mxu2 %v9347_v4  ;;  %v9043_v4 = vor.u32 %v12333_v1, %v9040_v55  ;;  %v9008_v22 = vld [vmem:[%s19646_s1 + $0x818] sm:$0xf0]  ;;  %v12357_v43 = vld [vmem:[%s19646_s1 + $0x90c] sm:$0xf] }
 0x354   :  { %7689 = vmatpush.bf16.msra.mxu3 %v9475_v60  ;;  %v12329_v60 = vld [vmem:[%s19646_s1 + $0x82c] sm:$0xf]  ;;  %v9136_v8 = vld [vmem:[%s19646_s1 + $0x918] sm:$0xf0]  ;;  %v9011_v54 = vor.u32 %v12325_v18, %v9008_v22 }
 0x355   :  { %7651 = vmatpush.bf16.msra.mxu0 %v9075_v14  ;;  %v9280_v14 = vld [vmem:[%s19646_s1 + $0xa38] sm:$0xf0]  ;;  %v9027_v58 = vor.u32 %v12329_v60, %v9024_v44  ;;  %v12389_v61 = vld [vmem:[%s19646_s1 + $0xa0c] sm:$0xf]  ;;  %v9139_v17 = vor.u32 %v12357_v43, %v9136_v8 }
 0x356   :  { %7664 = vmatpush.bf16.msra.mxu1 %v9203_v5  ;;  %v12425_v5 = vld [vmem:[%s19646_s1 + $0xb2c] sm:$0xf]  ;;  %v9283_v51 = vor.u32 %v12393_v26, %v9280_v14  ;;  %v9632_v53 = vld [vmem:[%s19646_s1 + $0xcf8] sm:$0xf0]  ;;  %v7438_v63 = vpop.f32.mrf.mxu3 }
 0x357   :  { %7677 = vmatpush.bf16.msra.mxu2 %v9331_v10  ;;  %v9408_v10 = vld [vmem:[%s19646_s1 + $0xb38] sm:$0xf0]  ;;  %v12481_v55 = vld [vmem:[%s19646_s1 + $0xcec] sm:$0xf] }
 0x358   :  { %7690 = vmatpush.bf16.msra.mxu3 %v9459_v40  ;;  %v9155_v40 = vor.u32 %v12361_v6, %v9152_v2  ;;  %v9411_v32 = vor.u32 %v12425_v5, %v9408_v10  ;;  %v7425_v1 = vpop.f32.mrf.mxu2  ;;  %v9760_v56 = vld [vmem:[%s19646_s1 + $0xdf8] sm:$0xf0]  ;;  %v12545_v0 = vld [vmem:[%s19646_s1 + $0xeec] sm:$0xf]  ;;  %v9635_v60 = vor.u32 %v12481_v55, %v9632_v53 }
 0x359   :  { %7652 = vmatpush.bf16.msra.mxu0 %v9059_v48  ;;  %v9264_v48 = vld [vmem:[%s19646_s1 + $0xa18] sm:$0xf0]  ;;  %v12577_v41 = vld [vmem:[%s19646_s1 + $0xfec] sm:$0xf] }
 0x35a   :  { %7665 = vmatpush.bf16.msra.mxu1 %v9187_v50  ;;  %v12421_v50 = vld [vmem:[%s19646_s1 + $0xb0c] sm:$0xf]  ;;  %v9888_v27 = vld [vmem:[%s19646_s1 + $0xef8] sm:$0xf0] }
 0x35b   :  { %7678 = vmatpush.bf16.msra.mxu2 %v9315_v3  ;;  %v9392_v3 = vld [vmem:[%s19646_s1 + $0xb18] sm:$0xf0]  ;;  %v9891_v6 = vor.u32 %v12545_v0, %v9888_v27  ;;  %v12509_v26 = vld [vmem:[%s19646_s1 + $0xdcc] sm:$0xf] }
 0x35c   :  { %7691 = vmatpush.bf16.msra.mxu3 %v9443_v59  ;;  %v12513_v59 = vld [vmem:[%s19646_s1 + $0xdec] sm:$0xf]  ;;  %v9616_v2 = vld [vmem:[%s19646_s1 + $0xcd8] sm:$0xf0] }
 0x35d   :  { %7653 = vmatpush.bf16.msra.mxu0 %v9043_v4  ;;  %v9267_v4 = vor.u32 %v12389_v61, %v9264_v48  ;;  %v9763_v44 = vor.u32 %v12513_v59, %v9760_v56  ;;  %v9744_v5 = vld [vmem:[%s19646_s1 + $0xdd8] sm:$0xf0]  ;;  %v12541_v10 = vld [vmem:[%s19646_s1 + $0xecc] sm:$0xf] }
 0x35e   :  { %7666 = vmatpush.bf16.msra.mxu1 %v9171_v42  ;;  %v10016_v42 = vld [vmem:[%s19646_s1 + $0xff8] sm:$0xf0]  ;;  %v12573_v18 = vld [vmem:[%s19646_s1 + $0xfcc] sm:$0xf] }
 0x35f   :  { %7679 = vmatpush.bf16.msra.mxu2 %v9299_v52  ;;  %v9395_v52 = vor.u32 %v12421_v50, %v9392_v3  ;;  %v10019_v14 = vor.u32 %v12577_v41, %v10016_v42  ;;  %v10000_v22 = vld [vmem:[%s19646_s1 + $0xfd8] sm:$0xf0]  ;;  %v12473_v8 = vld [vmem:[%s19646_s1 + $0xcac] sm:$0xf] }
 0x360   :  { %7692 = vmatpush.bf16.msra.mxu3 %v9427_v20  ;;  %v12477_v20 = vld [vmem:[%s19646_s1 + $0xccc] sm:$0xf]  ;;  %v9600_v61 = vld [vmem:[%s19646_s1 + $0xcb8] sm:$0xf0]  ;;  %v10003_v48 = vor.u32 %v12573_v18, %v10000_v22 }
 0x361   :  { %7654 = vmatpush.bf16.msra.mxu0 %v9027_v58  ;;  %v9872_v58 = vld [vmem:[%s19646_s1 + $0xed8] sm:$0xf0]  ;;  %v12537_v3 = vld [vmem:[%s19646_s1 + $0xeac] sm:$0xf]  ;;  %v9603_v53 = vor.u32 %v12473_v8, %v9600_v61 }
 0x362   :  { %7667 = vmatpush.bf16.msra.mxu1 %v9155_v40  ;;  %v9619_v40 = vor.u32 %v12477_v20, %v9616_v2  ;;  %v9875_v43 = vor.u32 %v12541_v10, %v9872_v58  ;;  %v9728_v50 = vld [vmem:[%s19646_s1 + $0xdb8] sm:$0xf0]  ;;  %v12533_v0 = vld [vmem:[%s19646_s1 + $0xe8c] sm:$0xf] }
 0x363   :  { %7680 = vmatpush.bf16.msra.mxu2 %v9283_v51  ;;  %v9747_v51 = vor.u32 %v12509_v26, %v9744_v5  ;;  %v9856_v1 = vld [vmem:[%s19646_s1 + $0xeb8] sm:$0xf0]  ;;  %v12497_v2 = vld [vmem:[%s19646_s1 + $0xd6c] sm:$0xf] }
 0x364   :  { %7693 = vmatpush.bf16.msra.mxu3 %v9411_v32  ;;  %v12505_v32 = vld [vmem:[%s19646_s1 + $0xdac] sm:$0xf]  ;;  %v9984_v55 = vld [vmem:[%s19646_s1 + $0xfb8] sm:$0xf0]  ;;  %v9859_v63 = vor.u32 %v12537_v3, %v9856_v1 }
 0x365   :  { %7655 = vmatpush.bf16.msra.mxu0 %v9011_v54  ;;  %v9731_v59 = vor.u32 %v12505_v32, %v9728_v50  ;;  %v12501_v54 = vld [vmem:[%s19646_s1 + $0xd8c] sm:$0xf]  ;;  %v9712_v56 = vld [vmem:[%s19646_s1 + $0xd98] sm:$0xf0] }
 0x366   :  { %7668 = vmatpush.bf16.msra.mxu1 %v9139_v17  ;;  %v9840_v27 = vld [vmem:[%s19646_s1 + $0xe98] sm:$0xf0]  ;;  %v18724_v17 = vpop.f32.mrf.mxu0  ;;  %v12529_v5 = vld [vmem:[%s19646_s1 + $0xe6c] sm:$0xf] }
 0x367   :  { %7681 = vmatpush.bf16.msra.mxu2 %v9267_v4  ;;  %v12565_v4 = vld [vmem:[%s19646_s1 + $0xf8c] sm:$0xf]  ;;  %v9968_v41 = vld [vmem:[%s19646_s1 + $0xf98] sm:$0xf0] }
 0x368   :  { %7694 = vmatpush.bf16.msra.mxu3 %v9395_v52  ;;  %7656 = vmatmul.bf16.vlgmr.msra.gmra.mxu0 %v13766_v25  ;;  %v12569_v25 = vld [vmem:[%s19646_s1 + $0xfac] sm:$0xf]  ;;  %v18732_v52 = vpop.f32.mrf.mxu1  ;;  %v9568_v20 = vld [vmem:[%s19646_s1 + $0xc78] sm:$0xf0]  ;;  %v9971_v26 = vor.u32 %v12565_v4, %v9968_v41 }
 0x369   :  { %7700 = vmatpush.bf16.msrb.mxu0 %v9635_v60  ;;  %7669 = vmatmul.bf16.vlgmr.msra.gmra.mxu1 %v13779_v30  ;;  %v9584_v30 = vld [vmem:[%s19646_s1 + $0xc98] sm:$0xf0]  ;;  %v9715_v60 = vor.u32 %v12501_v54, %v9712_v56  ;;  %v12561_v58 = vld [vmem:[%s19646_s1 + $0xf6c] sm:$0xf] }
 0x36a   :  { %7713 = vmatpush.bf16.msrb.mxu1 %v9763_v44  ;;  %7682 = vmatmul.bf16.vlgmr.msra.gmra.mxu2 %v13777_v29  ;;  %v12469_v29 = vld [vmem:[%s19646_s1 + $0xc8c] sm:$0xf]  ;;  %v9843_v44 = vor.u32 %v12533_v0, %v9840_v27  ;;  %v9824_v10 = vld [vmem:[%s19646_s1 + $0xe78] sm:$0xf0] }
 0x36b   :  { %7726 = vmatpush.bf16.msrb.mxu2 %v9891_v6  ;;  %7695 = vmatmul.bf16.vlgmr.msra.gmra.mxu3 %v13787_v33  ;;  %v9987_v33 = vor.u32 %v12569_v25, %v9984_v55  ;;  %v9587_v42 = vor.u32 %v12469_v29, %v9584_v30  ;;  %v12465_v6 = vld [vmem:[%s19646_s1 + $0xc6c] sm:$0xf]  ;;  %v9952_v18 = vld [vmem:[%s19646_s1 + $0xf78] sm:$0xf0]  ;;  %v7398_v25 = vadd.f32 %v18520_v21, %v18376_v62 }
 0x36c   :  { %7739 = vmatpush.bf16.msrb.mxu3 %v10019_v14  ;;  %v9696_v14 = vld [vmem:[%s19646_s1 + $0xd78] sm:$0xf0]  ;;  %v9571_v22 = vor.u32 %v12465_v6, %v9568_v20  ;;  %v12493_v61 = vld [vmem:[%s19646_s1 + $0xd4c] sm:$0xf]  ;;  %v9955_v32 = vor.u32 %v12561_v58, %v9952_v18 }
 0x36d   :  { %7701 = vmatpush.bf16.msrb.mxu0 %v9619_v40  ;;  %v9699_v40 = vor.u32 %v12497_v2, %v9696_v14  ;;  %v9552_v8 = vld [vmem:[%s19646_s1 + $0xc58] sm:$0xf0]  ;;  %v12525_v3 = vld [vmem:[%s19646_s1 + $0xe4c] sm:$0xf] }
 0x36e   :  { %7714 = vmatpush.bf16.msrb.mxu1 %v9747_v51  ;;  %v9827_v51 = vor.u32 %v12529_v5, %v9824_v10  ;;  %v9680_v50 = vld [vmem:[%s19646_s1 + $0xd58] sm:$0xf0]  ;;  %v18780_v55 = vpop.f32.mrf.mxu3  ;;  %v12457_v62 = vld [vmem:[%s19646_s1 + $0xc2c] sm:$0xf] }
 0x36f   :  { %7727 = vmatpush.bf16.msrb.mxu2 %v9875_v43  ;;  %v12461_v43 = vld [vmem:[%s19646_s1 + $0xc4c] sm:$0xf]  ;;  %v9808_v1 = vld [vmem:[%s19646_s1 + $0xe58] sm:$0xf0]  ;;  %v9683_v54 = vor.u32 %v12493_v61, %v9680_v50 }
 0x370   :  { %7740 = vmatpush.bf16.msrb.mxu3 %v10003_v48  ;;  %v18767_v48 = vpop.f32.mrf.mxu2  ;;  %v9555_v29 = vor.u32 %v12461_v43, %v9552_v8  ;;  %v7464_v30 = vpop.f32.mrf.mxu1  ;;  %v9536_v21 = vld [vmem:[%s19646_s1 + $0xc38] sm:$0xf0]  ;;  %v12489_v56 = vld [vmem:[%s19646_s1 + $0xd2c] sm:$0xf] }
 0x371   :  { %7702 = vmatpush.bf16.msrb.mxu0 %v9603_v53  ;;  %v12557_v53 = vld [vmem:[%s19646_s1 + $0xf4c] sm:$0xf]  ;;  %v9664_v27 = vld [vmem:[%s19646_s1 + $0xd38] sm:$0xf0]  ;;  %v9539_v6 = vor.u32 %v12457_v62, %v9536_v21 }
 0x372   :  { %7715 = vmatpush.bf16.msrb.mxu1 %v9731_v59  ;;  %v9936_v59 = vld [vmem:[%s19646_s1 + $0xf58] sm:$0xf0]  ;;  %v12521_v4 = vld [vmem:[%s19646_s1 + $0xe2c] sm:$0xf] }
 0x373   :  { %7728 = vmatpush.bf16.msrb.mxu2 %v9859_v63  ;;  %v7451_v63 = vpop.f32.mrf.mxu0  ;;  %v9939_v0 = vor.u32 %v12557_v53, %v9936_v59  ;;  %v9792_v41 = vld [vmem:[%s19646_s1 + $0xe38] sm:$0xf0]  ;;  %v12453_v20 = vld [vmem:[%s19646_s1 + $0xc0c] sm:$0xf] }
 0x374   :  { %7741 = vmatpush.bf16.msrb.mxu3 %v9987_v33  ;;  %v9811_v33 = vor.u32 %v12525_v3, %v9808_v1  ;;  %v9520_v2 = vld [vmem:[%s19646_s1 + $0xc18] sm:$0xf0]  ;;  %v9795_v14 = vor.u32 %v12521_v4, %v9792_v41  ;;  %v12485_v5 = vld [vmem:[%s19646_s1 + $0xd0c] sm:$0xf] }
 0x375   :  { %7703 = vmatpush.bf16.msrb.mxu0 %v9587_v42  ;;  %v7411_v42 = vadd.f32 %v18528_v9, %v7398_v25  ;;  %v9648_v10 = vld [vmem:[%s19646_s1 + $0xd18] sm:$0xf0]  ;;  %v12517_v58 = vld [vmem:[%s19646_s1 + $0xe0c] sm:$0xf]  ;;  %v9523_v50 = vor.u32 %v12453_v20, %v9520_v2 }
 0x376   :  { %7716 = vmatpush.bf16.msrb.mxu1 %v9715_v60  ;;  %v12553_v60 = vld [vmem:[%s19646_s1 + $0xf2c] sm:$0xf]  ;;  %v10144_v8 = vld [vmem:[%s19646_s1 + $0x10f8] sm:$0xf0]  ;;  %v9651_v59 = vor.u32 %v12485_v5, %v9648_v10 }
 0x377   :  { %7729 = vmatpush.bf16.msrb.mxu2 %v9843_v44  ;;  %v9920_v44 = vld [vmem:[%s19646_s1 + $0xf38] sm:$0xf0]  ;;  %v7424_v9 = vadd.f32 %v18563_v57, %v7411_v42  ;;  %v12609_v43 = vld [vmem:[%s19646_s1 + $0x10ec] sm:$0xf] }
 0x378   :  { %7742 = vmatpush.bf16.msrb.mxu3 %v9971_v26  ;;  %v9667_v26 = vor.u32 %v12489_v56, %v9664_v27  ;;  %v9923_v18 = vor.u32 %v12553_v60, %v9920_v44  ;;  %v9776_v57 = vld [vmem:[%s19646_s1 + $0xe18] sm:$0xf0]  ;;  %v12641_v61 = vld [vmem:[%s19646_s1 + $0x11ec] sm:$0xf] }
 0x379   :  { %7704 = vmatpush.bf16.msrb.mxu0 %v9571_v22  ;;  %v12549_v22 = vld [vmem:[%s19646_s1 + $0xf0c] sm:$0xf]  ;;  %v10272_v3 = vld [vmem:[%s19646_s1 + $0x11f8] sm:$0xf0]  ;;  %v7437_v53 = vadd.f32 %v18574_v38, %v7424_v9  ;;  %v9779_v63 = vor.u32 %v12517_v58, %v9776_v57 }
 0x37a   :  { %7717 = vmatpush.bf16.msrb.mxu1 %v9699_v40  ;;  %v9904_v40 = vld [vmem:[%s19646_s1 + $0xf18] sm:$0xf0]  ;;  %v12673_v1 = vld [vmem:[%s19646_s1 + $0x12ec] sm:$0xf]  ;;  %v10275_v21 = vor.u32 %v12641_v61, %v10272_v3 }
 0x37b   :  { %7730 = vmatpush.bf16.msrb.mxu2 %v9827_v51  ;;  %v7477_v51 = vpop.f32.mrf.mxu2  ;;  %v10400_v25 = vld [vmem:[%s19646_s1 + $0x12f8] sm:$0xf0]  ;;  %v7450_v62 = vadd.f32 %v18724_v17, %v7437_v53  ;;  %v12605_v38 = vld [vmem:[%s19646_s1 + $0x10cc] sm:$0xf] }
 0x37c   :  { %7743 = vmatpush.bf16.msrb.mxu3 %v9955_v32  ;;  %v7490_v32 = vpop.f32.mrf.mxu3  ;;  %v10528_v30 = vld [vmem:[%s19646_s1 + $0x13f8] sm:$0xf0]  ;;  %v10403_v56 = vor.u32 %v12673_v1, %v10400_v25  ;;  %v12637_v27 = vld [vmem:[%s19646_s1 + $0x11cc] sm:$0xf] }
 0x37d   :  { %7705 = vmatpush.bf16.msrb.mxu0 %v9555_v29  ;;  %v12705_v29 = vld [vmem:[%s19646_s1 + $0x13ec] sm:$0xf]  ;;  %v10256_v17 = vld [vmem:[%s19646_s1 + $0x11d8] sm:$0xf0]  ;;  %v7463_v20 = vadd.f32 %v18732_v52, %v7450_v62 }
 0x37e   :  { %7718 = vmatpush.bf16.msrb.mxu1 %v9683_v54  ;;  %v9907_v54 = vor.u32 %v12549_v22, %v9904_v40  ;;  %v10531_v4 = vor.u32 %v12705_v29, %v10528_v30  ;;  %v12669_v41 = vld [vmem:[%s19646_s1 + $0x12cc] sm:$0xf]  ;;  %v10384_v42 = vld [vmem:[%s19646_s1 + $0x12d8] sm:$0xf0]  ;;  %v10259_v2 = vor.u32 %v12637_v27, %v10256_v17 }
 0x37f   :  { %7731 = vmatpush.bf16.msrb.mxu2 %v9811_v33  ;;  %v10147_v33 = vor.u32 %v12609_v43, %v10144_v8  ;;  %v12701_v60 = vld [vmem:[%s19646_s1 + $0x13cc] sm:$0xf]  ;;  %v10512_v44 = vld [vmem:[%s19646_s1 + $0x13d8] sm:$0xf0]  ;;  %v10387_v9 = vor.u32 %v12669_v41, %v10384_v42  ;;  %v7476_v57 = vadd.f32 %v18767_v48, %v7463_v20 }
 0x380   :  { %7744 = vmatpush.bf16.msrb.mxu3 %v9939_v0  ;;  %v10128_v0 = vld [vmem:[%s19646_s1 + $0x10d8] sm:$0xf0]  ;;  %v12633_v5 = vld [vmem:[%s19646_s1 + $0x11ac] sm:$0xf]  ;;  %v10515_v52 = vor.u32 %v12701_v60, %v10512_v44 }
 0x381   :  { %7706 = vmatpush.bf16.msrb.mxu0 %v9539_v6  ;;  %v10131_v6 = vor.u32 %v12605_v38, %v10128_v0  ;;  %v10240_v10 = vld [vmem:[%s19646_s1 + $0x11b8] sm:$0xf0]  ;;  %v12665_v58 = vld [vmem:[%s19646_s1 + $0x12ac] sm:$0xf] }
 0x382   :  { %7719 = vmatpush.bf16.msrb.mxu1 %v9667_v26  ;;  %v12601_v26 = vld [vmem:[%s19646_s1 + $0x10ac] sm:$0xf]  ;;  %v10496_v22 = vld [vmem:[%s19646_s1 + $0x13b8] sm:$0xf0]  ;;  %v10243_v51 = vor.u32 %v12633_v5, %v10240_v10 }
 0x383   :  { %7732 = vmatpush.bf16.msrb.mxu2 %v9795_v14  ;;  %v10112_v14 = vld [vmem:[%s19646_s1 + $0x10b8] sm:$0xf0]  ;;  %v12629_v43 = vld [vmem:[%s19646_s1 + $0x118c] sm:$0xf] }
 0x384   :  { %7745 = vmatpush.bf16.msrb.mxu3 %v9923_v18  ;;  %v10368_v18 = vld [vmem:[%s19646_s1 + $0x12b8] sm:$0xf0]  ;;  %v10115_v40 = vor.u32 %v12601_v26, %v10112_v14  ;;  %v12661_v61 = vld [vmem:[%s19646_s1 + $0x128c] sm:$0xf] }
 0x385   :  { %7707 = vmatpush.bf16.msrb.mxu0 %v9523_v50  ;;  %v10371_v48 = vor.u32 %v12665_v58, %v10368_v18  ;;  %v10224_v8 = vld [vmem:[%s19646_s1 + $0x1198] sm:$0xf0]  ;;  %v7489_v50 = vadd.f32 %v18780_v55, %v7476_v57  ;;  %v7501_v3 = vpop.f32.mrf.mxu0  ;;  %v12693_v1 = vld [vmem:[%s19646_s1 + $0x138c] sm:$0xf] }
 0x386   :  { %7720 = vmatpush.bf16.msrb.mxu1 %v9651_v59  ;;  %v10352_v32 = vld [vmem:[%s19646_s1 + $0x1298] sm:$0xf0]  ;;  %v7514_v59 = vpop.f32.mrf.mxu1  ;;  %v10227_v29 = vor.u32 %v12629_v43, %v10224_v8  ;;  %v12593_v55 = vld [vmem:[%s19646_s1 + $0x106c] sm:$0xf] }
 0x387   :  { %7733 = vmatpush.bf16.msrb.mxu2 %v9779_v63  ;;  %v10480_v25 = vld [vmem:[%s19646_s1 + $0x1398] sm:$0xf0]  ;;  %v7502_v63 = vadd.f32 %v7501_v3, %v7489_v50  ;;  %v10355_v30 = vor.u32 %v12661_v61, %v10352_v32  ;;  %v12689_v0 = vld [vmem:[%s19646_s1 + $0x136c] sm:$0xf] }
 0x388   :  { %7746 = vmatpush.bf16.msrb.mxu3 %v9907_v54  ;;  %7708 = vmatmul.bf16.vlgmr.msrb.gmra.mxu0 %v13976_v23  ;;  %v12697_v23 = vld [vmem:[%s19646_s1 + $0x13ac] sm:$0xf]  ;;  %v10080_v54 = vld [vmem:[%s19646_s1 + $0x1078] sm:$0xf0]  ;;  %v10483_v62 = vor.u32 %v12693_v1, %v10480_v25 }
 0x389   :  { %7752 = vmatpush.bf16.msra.mxu0 %v10147_v33  ;;  %7721 = vmatmul.bf16.vlgmr.msrb.gmra.mxu1 %v13989_v31  ;;  %v10096_v31 = vld [vmem:[%s19646_s1 + $0x1098] sm:$0xf0]  ;;  %v12625_v33 = vld [vmem:[%s19646_s1 + $0x116c] sm:$0xf]  ;;  %v7515_v17 = vadd.f32 %v7514_v59, %v7502_v63 }
 0x38a   :  { %7765 = vmatpush.bf16.msra.mxu1 %v10275_v21  ;;  %7734 = vmatmul.bf16.vlgmr.msrb.gmra.mxu2 %v13987_v28  ;;  %v12597_v28 = vld [vmem:[%s19646_s1 + $0x108c] sm:$0xf]  ;;  %v10208_v21 = vld [vmem:[%s19646_s1 + $0x1178] sm:$0xf0] }
 0x38b   :  { %7778 = vmatpush.bf16.msra.mxu2 %v10403_v56  ;;  %7747 = vmatmul.bf16.vlgmr.msrb.gmra.mxu3 %v13997_v35  ;;  %v10499_v35 = vor.u32 %v12697_v23, %v10496_v22  ;;  %v10099_v53 = vor.u32 %v12597_v28, %v10096_v31  ;;  %v12657_v56 = vld [vmem:[%s19646_s1 + $0x126c] sm:$0xf]  ;;  %v10336_v38 = vld [vmem:[%s19646_s1 + $0x1278] sm:$0xf0]  ;;  %v10211_v41 = vor.u32 %v12625_v33, %v10208_v21 }
 0x38c   :  { %7791 = vmatpush.bf16.msra.mxu3 %v10531_v4  ;;  %v10464_v27 = vld [vmem:[%s19646_s1 + $0x1378] sm:$0xf0]  ;;  %v10083_v4 = vor.u32 %v12593_v55, %v10080_v54  ;;  %v10339_v42 = vor.u32 %v12657_v56, %v10336_v38  ;;  %v12589_v60 = vld [vmem:[%s19646_s1 + $0x104c] sm:$0xf] }
 0x38d   :  { %7753 = vmatpush.bf16.msra.mxu0 %v10131_v6  ;;  %v10064_v44 = vld [vmem:[%s19646_s1 + $0x1058] sm:$0xf0]  ;;  %v12621_v6 = vld [vmem:[%s19646_s1 + $0x114c] sm:$0xf]  ;;  %v10467_v20 = vor.u32 %v12689_v0, %v10464_v27  ;;  %v7503_v18 = vpop.f32.mrf.mxu0 }
 0x38e   :  { %7766 = vmatpush.bf16.msra.mxu1 %v10259_v2  ;;  %v7527_v2 = vpop.f32.mrf.mxu2  ;;  %v12653_v26 = vld [vmem:[%s19646_s1 + $0x124c] sm:$0xf]  ;;  %v10320_v14 = vld [vmem:[%s19646_s1 + $0x1258] sm:$0xf0]  ;;  %v10067_v57 = vor.u32 %v12589_v60, %v10064_v44  ;;  %v7516_v23 = vpop.f32.mrf.mxu1 }
 0x38f   :  { %7779 = vmatpush.bf16.msra.mxu2 %v10387_v9  ;;  %v10192_v9 = vld [vmem:[%s19646_s1 + $0x1158] sm:$0xf0]  ;;  %v7528_v5 = vadd.f32 %v7527_v2, %v7515_v17  ;;  %v12685_v10 = vld [vmem:[%s19646_s1 + $0x134c] sm:$0xf] }
 0x390   :  { %7792 = vmatpush.bf16.msra.mxu3 %v10515_v52  ;;  %v7540_v52 = vpop.f32.mrf.mxu3  ;;  %v10448_v58 = vld [vmem:[%s19646_s1 + $0x1358] sm:$0xf0]  ;;  %v12617_v31 = vld [vmem:[%s19646_s1 + $0x112c] sm:$0xf] }
 0x391   :  { %7754 = vmatpush.bf16.msra.mxu0 %v10115_v40  ;;  %v7541_v22 = vadd.f32 %v7540_v52, %v7528_v5  ;;  %v10195_v40 = vor.u32 %v12621_v6, %v10192_v9  ;;  %v10048_v28 = vld [vmem:[%s19646_s1 + $0x1038] sm:$0xf0]  ;;  %v10451_v43 = vor.u32 %v12685_v10, %v10448_v58  ;;  %v12649_v8 = vld [vmem:[%s19646_s1 + $0x122c] sm:$0xf] }
 0x392   :  { %7767 = vmatpush.bf16.msra.mxu1 %v10243_v51  ;;  %v10323_v51 = vor.u32 %v12653_v26, %v10320_v14  ;;  %v10304_v61 = vld [vmem:[%s19646_s1 + $0x1238] sm:$0xf0]  ;;  %v12681_v50 = vld [vmem:[%s19646_s1 + $0x132c] sm:$0xf] }
 0x393   :  { %7780 = vmatpush.bf16.msra.mxu2 %v10371_v48  ;;  %v12585_v48 = vld [vmem:[%s19646_s1 + $0x102c] sm:$0xf]  ;;  %v7962_v32 = vmax.f32 %v7541_v22, 0.0  ;;  %v10432_v3 = vld [vmem:[%s19646_s1 + $0x1338] sm:$0xf0] }
 0x394   :  { %7793 = vmatpush.bf16.msra.mxu3 %v10499_v35  ;;  %v10176_v35 = vld [vmem:[%s19646_s1 + $0x1138] sm:$0xf0]  ;;  %v10051_v1 = vor.u32 %v12585_v48, %v10048_v28  ;;  %v12581_v25 = vld [vmem:[%s19646_s1 + $0x100c] sm:$0xf]  ;;  %v10435_v54 = vor.u32 %v12681_v50, %v10432_v3 }
 0x395   :  { %7755 = vmatpush.bf16.msra.mxu0 %v10099_v53  ;;  %v10032_v53 = vld [vmem:[%s19646_s1 + $0x1018] sm:$0xf0]  ;;  %v12613_v59 = vld [vmem:[%s19646_s1 + $0x110c] sm:$0xf]  ;;  %7966 = vst [vmem:[%s19649_s3 + $0x10] sm:$0xff] %v7962_v32  ;;  %v10179_v63 = vor.u32 %v12617_v31, %v10176_v35 }
 0x396   :  { %7768 = vmatpush.bf16.msra.mxu1 %v10227_v29  ;;  %v10307_v29 = vor.u32 %v12649_v8, %v10304_v61  ;;  %v12645_v55 = vld [vmem:[%s19646_s1 + $0x120c] sm:$0xf]  ;;  %v10288_v33 = vld [vmem:[%s19646_s1 + $0x1218] sm:$0xf0]  ;;  %v7529_v56 = vpop.f32.mrf.mxu2  ;;  %v10035_v17 = vor.u32 %v12581_v25, %v10032_v53 }
 0x397   :  { %7781 = vmatpush.bf16.msra.mxu2 %v10355_v30  ;;  %v10160_v30 = vld [vmem:[%s19646_s1 + $0x1118] sm:$0xf0]  ;;  %v12737_v38 = vld [vmem:[%s19646_s1 + $0x14ec] sm:$0xf]  ;;  %v10291_v6 = vor.u32 %v12645_v55, %v10288_v33 }
 0x398   :  { %7794 = vmatpush.bf16.msra.mxu3 %v10483_v62  ;;  %v12677_v62 = vld [vmem:[%s19646_s1 + $0x130c] sm:$0xf]  ;;  %v10416_v21 = vld [vmem:[%s19646_s1 + $0x1318] sm:$0xf0]  ;;  %v10163_v44 = vor.u32 %v12613_v59, %v10160_v30 }
 0x399   :  { %7756 = vmatpush.bf16.msra.mxu0 %v10083_v4  ;;  %v10656_v0 = vld [vmem:[%s19646_s1 + $0x14f8] sm:$0xf0]  ;;  %v12769_v27 = vld [vmem:[%s19646_s1 + $0x15ec] sm:$0xf]  ;;  %v7542_v4 = vpop.f32.mrf.mxu3  ;;  %v10419_v9 = vor.u32 %v12677_v62, %v10416_v21 }
 0x39a   :  { %7769 = vmatpush.bf16.msra.mxu1 %v10211_v41  ;;  %v10784_v41 = vld [vmem:[%s19646_s1 + $0x15f8] sm:$0xf0]  ;;  %v10659_v26 = vor.u32 %v12737_v38, %v10656_v0  ;;  %v12733_v52 = vld [vmem:[%s19646_s1 + $0x14cc] sm:$0xf] }
 0x39b   :  { %7782 = vmatpush.bf16.msra.mxu2 %v10339_v42  ;;  %v12801_v42 = vld [vmem:[%s19646_s1 + $0x16ec] sm:$0xf]  ;;  %v10912_v60 = vld [vmem:[%s19646_s1 + $0x16f8] sm:$0xf0]  ;;  %v10787_v14 = vor.u32 %v12769_v27, %v10784_v41 }
 0x39c   :  { %7795 = vmatpush.bf16.msra.mxu3 %v10467_v20  ;;  %v12833_v20 = vld [vmem:[%s19646_s1 + $0x17ec] sm:$0xf]  ;;  %v11040_v2 = vld [vmem:[%s19646_s1 + $0x17f8] sm:$0xf0]  ;;  %v10915_v5 = vor.u32 %v12801_v42, %v10912_v60 }
 0x39d   :  { %7757 = vmatpush.bf16.msra.mxu0 %v10067_v57  ;;  %v10640_v10 = vld [vmem:[%s19646_s1 + $0x14d8] sm:$0xf0]  ;;  %v12765_v58 = vld [vmem:[%s19646_s1 + $0x15cc] sm:$0xf]  ;;  %v11043_v18 = vor.u32 %v12833_v20, %v11040_v2 }
 0x39e   :  { %7770 = vmatpush.bf16.msra.mxu1 %v10195_v40  ;;  %v10768_v57 = vld [vmem:[%s19646_s1 + $0x15d8] sm:$0xf0]  ;;  %v12797_v23 = vld [vmem:[%s19646_s1 + $0x16cc] sm:$0xf]  ;;  %v10643_v48 = vor.u32 %v12733_v52, %v10640_v10 }
 0x39f   :  { %7783 = vmatpush.bf16.msra.mxu2 %v10323_v51  ;;  %v10896_v22 = vld [vmem:[%s19646_s1 + $0x16d8] sm:$0xf0]  ;;  %v12829_v40 = vld [vmem:[%s19646_s1 + $0x17cc] sm:$0xf]  ;;  %v10771_v28 = vor.u32 %v12765_v58, %v10768_v57 }
 0x3a0   :  { %7796 = vmatpush.bf16.msra.mxu3 %v10451_v43  ;;  %v11024_v51 = vld [vmem:[%s19646_s1 + $0x17d8] sm:$0xf0]  ;;  %v10899_v31 = vor.u32 %v12797_v23, %v10896_v22  ;;  %v12729_v43 = vld [vmem:[%s19646_s1 + $0x14ac] sm:$0xf] }
 0x3a1   :  { %7758 = vmatpush.bf16.msra.mxu0 %v10051_v1  ;;  %v10624_v35 = vld [vmem:[%s19646_s1 + $0x14b8] sm:$0xf0]  ;;  %v12761_v8 = vld [vmem:[%s19646_s1 + $0x15ac] sm:$0xf]  ;;  %v11027_v61 = vor.u32 %v12829_v40, %v11024_v51 }
 0x3a2   :  { %7771 = vmatpush.bf16.msra.mxu1 %v10179_v63  ;;  %v10752_v32 = vld [vmem:[%s19646_s1 + $0x15b8] sm:$0xf0]  ;;  %v12793_v50 = vld [vmem:[%s19646_s1 + $0x16ac] sm:$0xf]  ;;  %v10627_v25 = vor.u32 %v12729_v43, %v10624_v35 }
 0x3a3   :  { %7784 = vmatpush.bf16.msra.mxu2 %v10307_v29  ;;  %v10880_v3 = vld [vmem:[%s19646_s1 + $0x16b8] sm:$0xf0]  ;;  %v12725_v53 = vld [vmem:[%s19646_s1 + $0x148c] sm:$0xf] }
 0x3a4   :  { %7797 = vmatpush.bf16.msra.mxu3 %v10435_v54  ;;  %v11008_v1 = vld [vmem:[%s19646_s1 + $0x17b8] sm:$0xf0]  ;;  %v12757_v63 = vld [vmem:[%s19646_s1 + $0x158c] sm:$0xf] }
 0x3a5   :  { %7759 = vmatpush.bf16.msra.mxu0 %v10035_v17  ;;  %v10608_v59 = vld [vmem:[%s19646_s1 + $0x1498] sm:$0xf0]  ;;  %v12789_v54 = vld [vmem:[%s19646_s1 + $0x168c] sm:$0xf]  ;;  %v7553_v38 = vpop.f32.mrf.mxu0 }
 0x3a6   :  { %7772 = vmatpush.bf16.msra.mxu1 %v10163_v44  ;;  %v10736_v55 = vld [vmem:[%s19646_s1 + $0x1598] sm:$0xf0]  ;;  %v12821_v62 = vld [vmem:[%s19646_s1 + $0x178c] sm:$0xf]  ;;  %v10611_v56 = vor.u32 %v12725_v53, %v10608_v59  ;;  %v7566_v60 = vpop.f32.mrf.mxu1 }
 0x3a7   :  { %7785 = vmatpush.bf16.msra.mxu2 %v10291_v6  ;;  %v10864_v33 = vld [vmem:[%s19646_s1 + $0x1698] sm:$0xf0]  ;;  %v10739_v0 = vor.u32 %v12757_v63, %v10736_v55  ;;  %v12721_v4 = vld [vmem:[%s19646_s1 + $0x146c] sm:$0xf] }
 0x3a8   :  { %7798 = vmatpush.bf16.msra.mxu3 %v10419_v9  ;;  %7760 = vmatmul.bf16.vlgmr.msra.gmra.mxu0 %v14186_v37  ;;  %v12825_v37 = vld [vmem:[%s19646_s1 + $0x17ac] sm:$0xf]  ;;  %v10992_v21 = vld [vmem:[%s19646_s1 + $0x1798] sm:$0xf0]  ;;  %v10867_v27 = vor.u32 %v12789_v54, %v10864_v33 }
 0x3a9   :  { %7804 = vmatpush.bf16.msrb.mxu0 %v10659_v26  ;;  %7773 = vmatmul.bf16.vlgmr.msra.gmra.mxu1 %v14199_v46  ;;  %v10883_v46 = vor.u32 %v12793_v50, %v10880_v3  ;;  %v11011_v30 = vor.u32 %v12825_v37, %v11008_v1  ;;  %v10592_v17 = vld [vmem:[%s19646_s1 + $0x1478] sm:$0xf0]  ;;  %v12753_v41 = vld [vmem:[%s19646_s1 + $0x156c] sm:$0xf]  ;;  %v10995_v44 = vor.u32 %v12821_v62, %v10992_v21 }
 0x3aa   :  { %7817 = vmatpush.bf16.msrb.mxu1 %v10787_v14  ;;  %7786 = vmatmul.bf16.vlgmr.msra.gmra.mxu2 %v14197_v45  ;;  %v10755_v45 = vor.u32 %v12761_v8, %v10752_v32  ;;  %v10720_v6 = vld [vmem:[%s19646_s1 + $0x1578] sm:$0xf0]  ;;  %v12785_v20 = vld [vmem:[%s19646_s1 + $0x166c] sm:$0xf] }
 0x3ab   :  { %7830 = vmatpush.bf16.msrb.mxu2 %v10915_v5  ;;  %7799 = vmatmul.bf16.vlgmr.msra.gmra.mxu3 %v14207_v49  ;;  %v13094_v49 = vld [vmem:[%s19648_s2] sm:$0xf]  ;;  %v10848_v2 = vld [vmem:[%s19646_s1 + $0x1678] sm:$0xf0]  ;;  %v12817_v9 = vld [vmem:[%s19646_s1 + $0x176c] sm:$0xf]  ;;  %v10595_v5 = vor.u32 %v12721_v4, %v10592_v17  ;;  %v10723_v52 = vor.u32 %v12753_v41, %v10720_v6 }
 0x3ac   :  { %7843 = vmatpush.bf16.msrb.mxu3 %v11043_v18  ;;  %v1059_v29 = vperm.slane %v13094_v49, 3  ;;  %v10976_v26 = vld [vmem:[%s19646_s1 + $0x1778] sm:$0xf0]  ;;  %v10851_v10 = vor.u32 %v12785_v20, %v10848_v2  ;;  %v12717_v58 = vld [vmem:[%s19646_s1 + $0x144c] sm:$0xf] }
 0x3ad   :  { %7805 = vmatpush.bf16.msrb.mxu0 %v10643_v48  ;;  %v10576_v18 = vld [vmem:[%s19646_s1 + $0x1458] sm:$0xf0]  ;;  %v12749_v57 = vld [vmem:[%s19646_s1 + $0x154c] sm:$0xf]  ;;  %v7579_v23 = vpop.f32.mrf.mxu2  ;;  %v10979_v22 = vor.u32 %v12817_v9, %v10976_v26  ;;  %v7555_v32 = vpop.f32.mrf.mxu0 }
 0x3ae   :  { %7818 = vmatpush.bf16.msrb.mxu1 %v10771_v28  ;;  %v7554_v42 = vadd.f32 %v7553_v38, %v1059_v29  ;;  %v10704_v40 = vld [vmem:[%s19646_s1 + $0x1558] sm:$0xf0]  ;;  %v12781_v51 = vld [vmem:[%s19646_s1 + $0x164c] sm:$0xf]  ;;  %v10579_v8 = vor.u32 %v12717_v58, %v10576_v18  ;;  %v7568_v53 = vpop.f32.mrf.mxu1 }
 0x3af   :  { %7831 = vmatpush.bf16.msrb.mxu2 %v10899_v31  ;;  %v10832_v48 = vld [vmem:[%s19646_s1 + $0x1658] sm:$0xf0]  ;;  %v7592_v31 = vpop.f32.mrf.mxu3  ;;  %v12813_v43 = vld [vmem:[%s19646_s1 + $0x174c] sm:$0xf]  ;;  %v10707_v50 = vor.u32 %v12749_v57, %v10704_v40 }
 0x3b0   :  { %7844 = vmatpush.bf16.msrb.mxu3 %v11027_v61  ;;  %v7567_v14 = vadd.f32 %v7566_v60, %v7554_v42  ;;  %v10960_v35 = vld [vmem:[%s19646_s1 + $0x1758] sm:$0xf0]  ;;  %v10835_v3 = vor.u32 %v12781_v51, %v10832_v48  ;;  %v12713_v37 = vld [vmem:[%s19646_s1 + $0x142c] sm:$0xf] }
 0x3b1   :  { %7806 = vmatpush.bf16.msrb.mxu0 %v10627_v25  ;;  %v10560_v1 = vld [vmem:[%s19646_s1 + $0x1438] sm:$0xf0]  ;;  %v12745_v25 = vld [vmem:[%s19646_s1 + $0x152c] sm:$0xf] }
 0x3b2   :  { %7819 = vmatpush.bf16.msrb.mxu1 %v10755_v45  ;;  %v7580_v28 = vadd.f32 %v7579_v23, %v7567_v14  ;;  %v10963_v45 = vor.u32 %v12813_v43, %v10960_v35  ;;  %v12777_v59 = vld [vmem:[%s19646_s1 + $0x162c] sm:$0xf]  ;;  %v10816_v63 = vld [vmem:[%s19646_s1 + $0x1638] sm:$0xf0] }
 0x3b3   :  { %7832 = vmatpush.bf16.msrb.mxu2 %v10883_v46  ;;  %v10688_v46 = vld [vmem:[%s19646_s1 + $0x1538] sm:$0xf0]  ;;  %v12809_v49 = vld [vmem:[%s19646_s1 + $0x172c] sm:$0xf]  ;;  %v10819_v62 = vor.u32 %v12777_v59, %v10816_v63 }
 0x3b4   :  { %7845 = vmatpush.bf16.msrb.mxu3 %v11011_v30  ;;  %v19193_v61 = vadd.f32 %v7592_v31, %v7580_v28  ;;  %v10944_v29 = vld [vmem:[%s19646_s1 + $0x1738] sm:$0xf0]  ;;  %v10563_v30 = vor.u32 %v12713_v37, %v10560_v1  ;;  %v12709_v55 = vld [vmem:[%s19646_s1 + $0x140c] sm:$0xf]  ;;  %v10691_v33 = vor.u32 %v12745_v25, %v10688_v46 }
 0x3b5   :  { %7807 = vmatpush.bf16.msrb.mxu0 %v10611_v56  ;;  %v10544_v54 = vld [vmem:[%s19646_s1 + $0x1418] sm:$0xf0]  ;;  %v12741_v21 = vld [vmem:[%s19646_s1 + $0x150c] sm:$0xf] }
 0x3b6   :  { %7820 = vmatpush.bf16.msrb.mxu1 %v10739_v0  ;;  %v10672_v56 = vld [vmem:[%s19646_s1 + $0x1518] sm:$0xf0]  ;;  %v12773_v38 = vld [vmem:[%s19646_s1 + $0x160c] sm:$0xf]  ;;  %v7581_v0 = vpop.f32.mrf.mxu2  ;;  %v10547_v20 = vor.u32 %v12709_v55, %v10544_v54 }
 0x3b7   :  { %7833 = vmatpush.bf16.msrb.mxu2 %v10867_v27  ;;  %v10947_v27 = vor.u32 %v12809_v49, %v10944_v29  ;;  %v10800_v4 = vld [vmem:[%s19646_s1 + $0x1618] sm:$0xf0]  ;;  %v12805_v17 = vld [vmem:[%s19646_s1 + $0x170c] sm:$0xf]  ;;  %v7594_v42 = vpop.f32.mrf.mxu3  ;;  %v10675_v14 = vor.u32 %v12741_v21, %v10672_v56 }
 0x3b8   :  { %7846 = vmatpush.bf16.msrb.mxu3 %v10995_v44  ;;  %v10928_v41 = vld [vmem:[%s19646_s1 + $0x1718] sm:$0xf0]  ;;  %v12865_v60 = vld [vmem:[%s19646_s1 + $0x18ec] sm:$0xf] }
 0x3b9   :  { %7808 = vmatpush.bf16.msrb.mxu0 %v10595_v5  ;;  %v11168_v44 = vld [vmem:[%s19646_s1 + $0x18f8] sm:$0xf0]  ;;  %v12897_v6 = vld [vmem:[%s19646_s1 + $0x19ec] sm:$0xf]  ;;  %v10803_v5 = vor.u32 %v12773_v38, %v10800_v4  ;;  %v10931_v58 = vor.u32 %v12805_v17, %v10928_v41 }
 0x3ba   :  { %7821 = vmatpush.bf16.msrb.mxu1 %v10723_v52  ;;  %v11296_v2 = vld [vmem:[%s19646_s1 + $0x19f8] sm:$0xf0]  ;;  %v12929_v9 = vld [vmem:[%s19646_s1 + $0x1aec] sm:$0xf]  ;;  %v11171_v18 = vor.u32 %v12865_v60, %v11168_v44 }
 0x3bb   :  { %7834 = vmatpush.bf16.msrb.mxu2 %v10851_v10  ;;  %v11424_v26 = vld [vmem:[%s19646_s1 + $0x1af8] sm:$0xf0]  ;;  %v12961_v52 = vld [vmem:[%s19646_s1 + $0x1bec] sm:$0xf]  ;;  %v11299_v57 = vor.u32 %v12897_v6, %v11296_v2 }
 0x3bc   :  { %7847 = vmatpush.bf16.msrb.mxu3 %v10979_v22  ;;  %v11552_v10 = vld [vmem:[%s19646_s1 + $0x1bf8] sm:$0xf0]  ;;  %v11427_v23 = vor.u32 %v12929_v9, %v11424_v26  ;;  %v12861_v22 = vld [vmem:[%s19646_s1 + $0x18cc] sm:$0xf] }
 0x3bd   :  { %7809 = vmatpush.bf16.msrb.mxu0 %v10579_v8  ;;  %v11152_v40 = vld [vmem:[%s19646_s1 + $0x18d8] sm:$0xf0]  ;;  %v12893_v51 = vld [vmem:[%s19646_s1 + $0x19cc] sm:$0xf]  ;;  %v11555_v48 = vor.u32 %v12961_v52, %v11552_v10 }
 0x3be   :  { %7822 = vmatpush.bf16.msrb.mxu1 %v10707_v50  ;;  %v11280_v28 = vld [vmem:[%s19646_s1 + $0x19d8] sm:$0xf0]  ;;  %v12925_v31 = vld [vmem:[%s19646_s1 + $0x1acc] sm:$0xf]  ;;  %v11155_v32 = vor.u32 %v12861_v22, %v11152_v40 }
 0x3bf   :  { %7835 = vmatpush.bf16.msrb.mxu2 %v10835_v3  ;;  %v11408_v43 = vld [vmem:[%s19646_s1 + $0x1ad8] sm:$0xf0]  ;;  %v12957_v35 = vld [vmem:[%s19646_s1 + $0x1bcc] sm:$0xf]  ;;  %v11283_v50 = vor.u32 %v12893_v51, %v11280_v28 }
 0x3c0   :  { %7848 = vmatpush.bf16.msrb.mxu3 %v10963_v45  ;;  %v11536_v8 = vld [vmem:[%s19646_s1 + $0x1bd8] sm:$0xf0]  ;;  %v11411_v3 = vor.u32 %v12925_v31, %v11408_v43  ;;  %v12857_v37 = vld [vmem:[%s19646_s1 + $0x18ac] sm:$0xf] }
 0x3c1   :  { %7810 = vmatpush.bf16.msrb.mxu0 %v10563_v30  ;;  %v11136_v1 = vld [vmem:[%s19646_s1 + $0x18b8] sm:$0xf0]  ;;  %v12889_v25 = vld [vmem:[%s19646_s1 + $0x19ac] sm:$0xf]  ;;  %v11539_v53 = vor.u32 %v12957_v35, %v11536_v8 }
 0x3c2   :  { %7823 = vmatpush.bf16.msrb.mxu1 %v10691_v33  ;;  %v11264_v45 = vld [vmem:[%s19646_s1 + $0x19b8] sm:$0xf0]  ;;  %v12921_v46 = vld [vmem:[%s19646_s1 + $0x1aac] sm:$0xf]  ;;  %v11139_v49 = vor.u32 %v12857_v37, %v11136_v1 }
 0x3c3   :  { %7836 = vmatpush.bf16.msrb.mxu2 %v10819_v62  ;;  %v11392_v59 = vld [vmem:[%s19646_s1 + $0x1ab8] sm:$0xf0]  ;;  %v11267_v29 = vor.u32 %v12889_v25, %v11264_v45  ;;  %v12885_v55 = vld [vmem:[%s19646_s1 + $0x198c] sm:$0xf] }
 0x3c4   :  { %7849 = vmatpush.bf16.msrb.mxu3 %v10947_v27  ;;  %v11520_v63 = vld [vmem:[%s19646_s1 + $0x1bb8] sm:$0xf0]  ;;  %v11395_v30 = vor.u32 %v12921_v46, %v11392_v59  ;;  %v12917_v33 = vld [vmem:[%s19646_s1 + $0x1a8c] sm:$0xf] }
 0x3c5   :  { %7811 = vmatpush.bf16.msrb.mxu0 %v10547_v20  ;;  %v11248_v54 = vld [vmem:[%s19646_s1 + $0x1998] sm:$0xf0]  ;;  %v12949_v21 = vld [vmem:[%s19646_s1 + $0x1b8c] sm:$0xf]  ;;  %v7605_v0 = vpop.f32.mrf.mxu0 }
 0x3c6   :  { %7824 = vmatpush.bf16.msrb.mxu1 %v10675_v14  ;;  %v11376_v62 = vld [vmem:[%s19646_s1 + $0x1a98] sm:$0xf0]  ;;  %v11251_v27 = vor.u32 %v12885_v55, %v11248_v54  ;;  %v12849_v17 = vld [vmem:[%s19646_s1 + $0x186c] sm:$0xf]  ;;  %v7606_v60 = vadd.f32 %v7605_v0, %v19193_v61  ;;  %v7618_v44 = vpop.f32.mrf.mxu1 }
 0x3c7   :  { %7837 = vmatpush.bf16.msrb.mxu2 %v10803_v5  ;;  %v11504_v56 = vld [vmem:[%s19646_s1 + $0x1b98] sm:$0xf0]  ;;  %v11379_v4 = vor.u32 %v12917_v33, %v11376_v62  ;;  %v12881_v42 = vld [vmem:[%s19646_s1 + $0x196c] sm:$0xf] }
 0x3c8   :  { %7850 = vmatpush.bf16.msrb.mxu3 %v10931_v58  ;;  %7812 = vmatmul.bf16.vlgmr.msrb.gmra.mxu0 %v14401_v11  ;;  %v12953_v11 = vld [vmem:[%s19646_s1 + $0x1bac] sm:$0xf]  ;;  %v11104_v41 = vld [vmem:[%s19646_s1 + $0x1878] sm:$0xf0]  ;;  %v11507_v6 = vor.u32 %v12949_v21, %v11504_v56  ;;  %v7619_v14 = vadd.f32 %v7618_v44, %v7606_v60 }
 0x3c9   :  { %7856 = vmatpush.bf16.msra.mxu0 %v11171_v18  ;;  %7825 = vmatmul.bf16.vlgmr.msrb.gmra.mxu1 %v14414_v16  ;;  %v11120_v16 = vld [vmem:[%s19646_s1 + $0x1898] sm:$0xf0]  ;;  %v12913_v2 = vld [vmem:[%s19646_s1 + $0x1a6c] sm:$0xf]  ;;  %v11107_v5 = vor.u32 %v12849_v17, %v11104_v41 }
 0x3ca   :  { %7869 = vmatpush.bf16.msra.mxu1 %v11299_v57  ;;  %7838 = vmatmul.bf16.vlgmr.msrb.gmra.mxu2 %v14412_v15  ;;  %v12853_v15 = vld [vmem:[%s19646_s1 + $0x188c] sm:$0xf]  ;;  %v11232_v20 = vld [vmem:[%s19646_s1 + $0x1978] sm:$0xf0] }
 0x3cb   :  { %7882 = vmatpush.bf16.msra.mxu2 %v11427_v23  ;;  %7851 = vmatmul.bf16.vlgmr.msrb.gmra.mxu3 %v14422_v19  ;;  %v11523_v19 = vor.u32 %v12953_v11, %v11520_v63  ;;  %v11123_v38 = vor.u32 %v12853_v15, %v11120_v16  ;;  %v11360_v9 = vld [vmem:[%s19646_s1 + $0x1a78] sm:$0xf0]  ;;  %v12945_v26 = vld [vmem:[%s19646_s1 + $0x1b6c] sm:$0xf]  ;;  %v11235_v52 = vor.u32 %v12881_v42, %v11232_v20 }
 0x3cc   :  { %7895 = vmatpush.bf16.msra.mxu3 %v11555_v48  ;;  %v11488_v61 = vld [vmem:[%s19646_s1 + $0x1b78] sm:$0xf0]  ;;  %v11363_v10 = vor.u32 %v12913_v2, %v11360_v9  ;;  %v12845_v58 = vld [vmem:[%s19646_s1 + $0x184c] sm:$0xf] }
 0x3cd   :  { %7857 = vmatpush.bf16.msra.mxu0 %v11155_v32  ;;  %v11088_v18 = vld [vmem:[%s19646_s1 + $0x1858] sm:$0xf0]  ;;  %v12877_v57 = vld [vmem:[%s19646_s1 + $0x194c] sm:$0xf]  ;;  %v7631_v23 = vpop.f32.mrf.mxu2  ;;  %v11491_v22 = vor.u32 %v12945_v26, %v11488_v61 }
 0x3ce   :  { %7870 = vmatpush.bf16.msra.mxu1 %v11283_v50  ;;  %v11216_v40 = vld [vmem:[%s19646_s1 + $0x1958] sm:$0xf0]  ;;  %v12909_v51 = vld [vmem:[%s19646_s1 + $0x1a4c] sm:$0xf]  ;;  %v7632_v28 = vadd.f32 %v7631_v23, %v7619_v14  ;;  %v7644_v31 = vpop.f32.mrf.mxu3  ;;  %v11091_v8 = vor.u32 %v12845_v58, %v11088_v18  ;;  %v7607_v50 = vpop.f32.mrf.mxu0 }
 0x3cf   :  { %7883 = vmatpush.bf16.msra.mxu2 %v11411_v3  ;;  %v11344_v48 = vld [vmem:[%s19646_s1 + $0x1a58] sm:$0xf0]  ;;  %v12941_v43 = vld [vmem:[%s19646_s1 + $0x1b4c] sm:$0xf]  ;;  %v11219_v3 = vor.u32 %v12877_v57, %v11216_v40  ;;  %v7620_v45 = vpop.f32.mrf.mxu1 }
 0x3d0   :  { %7896 = vmatpush.bf16.msra.mxu3 %v11539_v53  ;;  %v11472_v35 = vld [vmem:[%s19646_s1 + $0x1b58] sm:$0xf0]  ;;  %v19392_v32 = vadd.f32 %v7644_v31, %v7632_v28  ;;  %v11347_v37 = vor.u32 %v12909_v51, %v11344_v48  ;;  %v12841_v1 = vld [vmem:[%s19646_s1 + $0x182c] sm:$0xf] }
 0x3d1   :  { %7858 = vmatpush.bf16.msra.mxu0 %v11139_v49  ;;  %v11072_v25 = vld [vmem:[%s19646_s1 + $0x1838] sm:$0xf0]  ;;  %v12873_v53 = vld [vmem:[%s19646_s1 + $0x192c] sm:$0xf]  ;;  %v11475_v46 = vor.u32 %v12941_v43, %v11472_v35 }
 0x3d2   :  { %7871 = vmatpush.bf16.msra.mxu1 %v11267_v29  ;;  %v11200_v59 = vld [vmem:[%s19646_s1 + $0x1938] sm:$0xf0]  ;;  %v12905_v11 = vld [vmem:[%s19646_s1 + $0x1a2c] sm:$0xf] }
 0x3d3   :  { %7884 = vmatpush.bf16.msra.mxu2 %v11395_v30  ;;  %v11328_v63 = vld [vmem:[%s19646_s1 + $0x1a38] sm:$0xf0]  ;;  %v12937_v49 = vld [vmem:[%s19646_s1 + $0x1b2c] sm:$0xf]  ;;  %v11075_v30 = vor.u32 %v12841_v1, %v11072_v25  ;;  %v11203_v55 = vor.u32 %v12873_v53, %v11200_v59 }
 0x3d4   :  { %7897 = vmatpush.bf16.msra.mxu3 %v11523_v19  ;;  %v11456_v29 = vld [vmem:[%s19646_s1 + $0x1b38] sm:$0xf0]  ;;  %v12837_v15 = vld [vmem:[%s19646_s1 + $0x180c] sm:$0xf]  ;;  %v11331_v19 = vor.u32 %v12905_v11, %v11328_v63 }
 0x3d5   :  { %7859 = vmatpush.bf16.msra.mxu0 %v11123_v38  ;;  %v11056_v16 = vld [vmem:[%s19646_s1 + $0x1818] sm:$0xf0]  ;;  %v12869_v54 = vld [vmem:[%s19646_s1 + $0x190c] sm:$0xf]  ;;  %v7633_v21 = vpop.f32.mrf.mxu2  ;;  %v11459_v56 = vor.u32 %v12937_v49, %v11456_v29 }
 0x3d6   :  { %7872 = vmatpush.bf16.msra.mxu1 %v11251_v27  ;;  %v11184_v33 = vld [vmem:[%s19646_s1 + $0x1918] sm:$0xf0]  ;;  %v12901_v62 = vld [vmem:[%s19646_s1 + $0x1a0c] sm:$0xf]  ;;  %v11059_v60 = vor.u32 %v12837_v15, %v11056_v16 }
 0x3d7   :  { %7885 = vmatpush.bf16.msra.mxu2 %v11379_v4  ;;  %v11312_v38 = vld [vmem:[%s19646_s1 + $0x1a18] sm:$0xf0]  ;;  %v12933_v0 = vld [vmem:[%s19646_s1 + $0x1b0c] sm:$0xf]  ;;  %v7646_v4 = vpop.f32.mrf.mxu3  ;;  %v11187_v2 = vor.u32 %v12869_v54, %v11184_v33 }
 0x3d8   :  { %7898 = vmatpush.bf16.msra.mxu3 %v11507_v6  ;;  %v11440_v27 = vld [vmem:[%s19646_s1 + $0x1b18] sm:$0xf0]  ;;  %v12993_v17 = vld [vmem:[%s19646_s1 + $0x1cec] sm:$0xf]  ;;  %v11315_v9 = vor.u32 %v12901_v62, %v11312_v38 }
 0x3d9   :  { %7860 = vmatpush.bf16.msra.mxu0 %v11107_v5  ;;  %v11680_v41 = vld [vmem:[%s19646_s1 + $0x1cf8] sm:$0xf0]  ;;  %v13025_v42 = vld [vmem:[%s19646_s1 + $0x1dec] sm:$0xf]  ;;  %v11443_v14 = vor.u32 %v12933_v0, %v11440_v27 }
 0x3da   :  { %7873 = vmatpush.bf16.msra.mxu1 %v11235_v52  ;;  %v11808_v44 = vld [vmem:[%s19646_s1 + $0x1df8] sm:$0xf0]  ;;  %v13057_v6 = vld [vmem:[%s19646_s1 + $0x1eec] sm:$0xf]  ;;  %v11683_v5 = vor.u32 %v12993_v17, %v11680_v41 }
 0x3db   :  { %7886 = vmatpush.bf16.msra.mxu2 %v11363_v10  ;;  %v11936_v20 = vld [vmem:[%s19646_s1 + $0x1ef8] sm:$0xf0]  ;;  %v13089_v26 = vld [vmem:[%s19646_s1 + $0x1fec] sm:$0xf]  ;;  %v11811_v52 = vor.u32 %v13025_v42, %v11808_v44 }
 0x3dc   :  { %7899 = vmatpush.bf16.msra.mxu3 %v11491_v22  ;;  %v12064_v61 = vld [vmem:[%s19646_s1 + $0x1ff8] sm:$0xf0]  ;;  %v11939_v10 = vor.u32 %v13057_v6, %v11936_v20  ;;  %v12989_v58 = vld [vmem:[%s19646_s1 + $0x1ccc] sm:$0xf] }
 0x3dd   :  { %7861 = vmatpush.bf16.msra.mxu0 %v11091_v8  ;;  %v11664_v18 = vld [vmem:[%s19646_s1 + $0x1cd8] sm:$0xf0]  ;;  %v13021_v57 = vld [vmem:[%s19646_s1 + $0x1dcc] sm:$0xf]  ;;  %v12067_v23 = vor.u32 %v13089_v26, %v12064_v61 }
 0x3de   :  { %7874 = vmatpush.bf16.msra.mxu1 %v11219_v3  ;;  %v11792_v22 = vld [vmem:[%s19646_s1 + $0x1dd8] sm:$0xf0]  ;;  %v13053_v40 = vld [vmem:[%s19646_s1 + $0x1ecc] sm:$0xf]  ;;  %v11667_v31 = vor.u32 %v12989_v58, %v11664_v18 }
 0x3df   :  { %7887 = vmatpush.bf16.msra.mxu2 %v11347_v37  ;;  %v11920_v51 = vld [vmem:[%s19646_s1 + $0x1ed8] sm:$0xf0]  ;;  %v13085_v48 = vld [vmem:[%s19646_s1 + $0x1fcc] sm:$0xf]  ;;  %v11795_v43 = vor.u32 %v13021_v57, %v11792_v22 }
 0x3e0   :  { %7900 = vmatpush.bf16.msra.mxu3 %v11475_v46  ;;  %v12048_v28 = vld [vmem:[%s19646_s1 + $0x1fd8] sm:$0xf0]  ;;  %v11923_v35 = vor.u32 %v13053_v40, %v11920_v51  ;;  %v12985_v8 = vld [vmem:[%s19646_s1 + $0x1cac] sm:$0xf] }
 0x3e1   :  { %7862 = vmatpush.bf16.msra.mxu0 %v11075_v30  ;;  %v11648_v50 = vld [vmem:[%s19646_s1 + $0x1cb8] sm:$0xf0]  ;;  %v13017_v3 = vld [vmem:[%s19646_s1 + $0x1dac] sm:$0xf]  ;;  %v12051_v37 = vor.u32 %v13085_v48, %v12048_v28 }
 0x3e2   :  { %7875 = vmatpush.bf16.msra.mxu1 %v11203_v55  ;;  %v11776_v1 = vld [vmem:[%s19646_s1 + $0x1db8] sm:$0xf0]  ;;  %v13049_v25 = vld [vmem:[%s19646_s1 + $0x1eac] sm:$0xf]  ;;  %v11651_v46 = vor.u32 %v12985_v8, %v11648_v50 }
 0x3e3   :  { %7888 = vmatpush.bf16.msra.mxu2 %v11331_v19  ;;  %v11904_v53 = vld [vmem:[%s19646_s1 + $0x1eb8] sm:$0xf0]  ;;  %v11779_v59 = vor.u32 %v13017_v3, %v11776_v1  ;;  %v13013_v63 = vld [vmem:[%s19646_s1 + $0x1d8c] sm:$0xf] }
 0x3e4   :  { %7901 = vmatpush.bf16.msra.mxu3 %v11459_v56  ;;  %v12032_v45 = vld [vmem:[%s19646_s1 + $0x1fb8] sm:$0xf0]  ;;  %v11907_v11 = vor.u32 %v13049_v25, %v11904_v53  ;;  %v13045_v29 = vld [vmem:[%s19646_s1 + $0x1e8c] sm:$0xf] }
 0x3e5   :  { %7863 = vmatpush.bf16.msra.mxu0 %v11059_v60  ;;  %v11760_v49 = vld [vmem:[%s19646_s1 + $0x1d98] sm:$0xf0]  ;;  %v7657_v15 = vpop.f32.mrf.mxu0  ;;  %v13077_v16 = vld [vmem:[%s19646_s1 + $0x1f8c] sm:$0xf] }
 0x3e6   :  { %7876 = vmatpush.bf16.msra.mxu1 %v11187_v2  ;;  %v11888_v30 = vld [vmem:[%s19646_s1 + $0x1e98] sm:$0xf0]  ;;  %v7658_v19 = vadd.f32 %v7657_v15, %v19392_v32  ;;  %v7670_v33 = vpop.f32.mrf.mxu1  ;;  %v11763_v62 = vor.u32 %v13013_v63, %v11760_v49  ;;  %v12977_v56 = vld [vmem:[%s19646_s1 + $0x1c6c] sm:$0xf] }
 0x3e7   :  { %7889 = vmatpush.bf16.msra.mxu2 %v11315_v9  ;;  %v12016_v55 = vld [vmem:[%s19646_s1 + $0x1f98] sm:$0xf0]  ;;  %v11891_v21 = vor.u32 %v13045_v29, %v11888_v30  ;;  %v13009_v0 = vld [vmem:[%s19646_s1 + $0x1d6c] sm:$0xf] }
 0x3e8   :  { %7902 = vmatpush.bf16.msra.mxu3 %v11443_v14  ;;  %7864 = vmatmul.bf16.vlgmr.msra.gmra.mxu0 %v14614_v7  ;;  %v13081_v7 = vld [vmem:[%s19646_s1 + $0x1fac] sm:$0xf]  ;;  %v11616_v38 = vld [vmem:[%s19646_s1 + $0x1c78] sm:$0xf0]  ;;  %v12019_v32 = vor.u32 %v13077_v16, %v12016_v55  ;;  %v7671_v27 = vadd.f32 %v7670_v33, %v7658_v19 }
 0x3e9   :  { %7908 = vmatpush.bf16.msrb.mxu0 %v11683_v5  ;;  %7877 = vmatmul.bf16.vlgmr.msra.gmra.mxu1 %v14627_v13  ;;  %v11632_v13 = vld [vmem:[%s19646_s1 + $0x1c98] sm:$0xf0]  ;;  %v13041_v17 = vld [vmem:[%s19646_s1 + $0x1e6c] sm:$0xf]  ;;  %v11619_v44 = vor.u32 %v12977_v56, %v11616_v38 }
 0x3ea   :  { %7921 = vmatpush.bf16.msrb.mxu1 %v11811_v52  ;;  %7890 = vmatmul.bf16.vlgmr.msra.gmra.mxu2 %v14625_v12  ;;  %v12981_v12 = vld [vmem:[%s19646_s1 + $0x1c8c] sm:$0xf]  ;;  %v11744_v4 = vld [vmem:[%s19646_s1 + $0x1d78] sm:$0xf0] }
 0x3eb   :  { %7934 = vmatpush.bf16.msrb.mxu2 %v11939_v10  ;;  %7903 = vmatmul.bf16.vlgmr.msra.gmra.mxu3 %v14635_v39  ;;  %v12035_v39 = vor.u32 %v13081_v7, %v12032_v45  ;;  %v11635_v54 = vor.u32 %v12981_v12, %v11632_v13  ;;  %v11872_v41 = vld [vmem:[%s19646_s1 + $0x1e78] sm:$0xf0]  ;;  %v13073_v42 = vld [vmem:[%s19646_s1 + $0x1f6c] sm:$0xf]  ;;  %v11747_v6 = vor.u32 %v13009_v0, %v11744_v4 }
 0x3ec   :  { %7947 = vmatpush.bf16.msrb.mxu3 %v12067_v23  ;;  %v12000_v60 = vld [vmem:[%s19646_s1 + $0x1f78] sm:$0xf0]  ;;  %v11875_v20 = vor.u32 %v13041_v17, %v11872_v41  ;;  %v12973_v2 = vld [vmem:[%s19646_s1 + $0x1c4c] sm:$0xf] }
 0x3ed   :  { %7909 = vmatpush.bf16.msrb.mxu0 %v11667_v31  ;;  %v11600_v9 = vld [vmem:[%s19646_s1 + $0x1c58] sm:$0xf0]  ;;  %v13005_v26 = vld [vmem:[%s19646_s1 + $0x1d4c] sm:$0xf]  ;;  %v12003_v61 = vor.u32 %v13073_v42, %v12000_v60  ;;  %v7683_v14 = vpop.f32.mrf.mxu2  ;;  %v7659_v22 = vpop.f32.mrf.mxu0 }
 0x3ee   :  { %7922 = vmatpush.bf16.msrb.mxu1 %v11795_v43  ;;  %v11728_v5 = vld [vmem:[%s19646_s1 + $0x1d58] sm:$0xf0]  ;;  %v13037_v52 = vld [vmem:[%s19646_s1 + $0x1e4c] sm:$0xf]  ;;  %v7684_v58 = vadd.f32 %v7683_v14, %v7671_v27  ;;  %v7696_v18 = vpop.f32.mrf.mxu3  ;;  %v11603_v40 = vor.u32 %v12973_v2, %v11600_v9  ;;  %v7672_v51 = vpop.f32.mrf.mxu1 }
 0x3ef   :  { %7935 = vmatpush.bf16.msrb.mxu2 %v11923_v35  ;;  %v11856_v10 = vld [vmem:[%s19646_s1 + $0x1e58] sm:$0xf0]  ;;  %v13069_v57 = vld [vmem:[%s19646_s1 + $0x1f4c] sm:$0xf]  ;;  %v11731_v28 = vor.u32 %v13005_v26, %v11728_v5 }
 0x3f0   :  { %7948 = vmatpush.bf16.msrb.mxu3 %v12051_v37  ;;  %v11984_v23 = vld [vmem:[%s19646_s1 + $0x1f58] sm:$0xf0]  ;;  %v7697_v48 = vadd.f32 %v7696_v18, %v7684_v58  ;;  %v11859_v31 = vor.u32 %v13037_v52, %v11856_v10  ;;  %v12969_v43 = vld [vmem:[%s19646_s1 + $0x1c2c] sm:$0xf] }
 0x3f1   :  { %7910 = vmatpush.bf16.msrb.mxu0 %v11651_v46  ;;  %v11584_v35 = vld [vmem:[%s19646_s1 + $0x1c38] sm:$0xf0]  ;;  %v13001_v8 = vld [vmem:[%s19646_s1 + $0x1d2c] sm:$0xf]  ;;  %v11987_v50 = vor.u32 %v13069_v57, %v11984_v23 }
 0x3f2   :  { %7923 = vmatpush.bf16.msrb.mxu1 %v11779_v59  ;;  %v11712_v3 = vld [vmem:[%s19646_s1 + $0x1d38] sm:$0xf0]  ;;  %v13033_v37 = vld [vmem:[%s19646_s1 + $0x1e2c] sm:$0xf]  ;;  %v11587_v7 = vor.u32 %v12969_v43, %v11584_v35 }
 0x3f3   :  { %7936 = vmatpush.bf16.msrb.mxu2 %v11907_v11  ;;  %v11840_v1 = vld [vmem:[%s19646_s1 + $0x1e38] sm:$0xf0]  ;;  %v13065_v25 = vld [vmem:[%s19646_s1 + $0x1f2c] sm:$0xf]  ;;  %v11715_v45 = vor.u32 %v13001_v8, %v11712_v3 }
 0x3f4   :  { %7949 = vmatpush.bf16.msrb.mxu3 %v12035_v39  ;;  %v11968_v53 = vld [vmem:[%s19646_s1 + $0x1f38] sm:$0xf0]  ;;  %v11843_v46 = vor.u32 %v13033_v37, %v11840_v1  ;;  %v12965_v59 = vld [vmem:[%s19646_s1 + $0x1c0c] sm:$0xf] }
 0x3f5   :  { %7911 = vmatpush.bf16.msrb.mxu0 %v11635_v54  ;;  %v11568_v11 = vld [vmem:[%s19646_s1 + $0x1c18] sm:$0xf0]  ;;  %v12997_v12 = vld [vmem:[%s19646_s1 + $0x1d0c] sm:$0xf]  ;;  %v11971_v13 = vor.u32 %v13065_v25, %v11968_v53  ;;  %v7685_v29 = vpop.f32.mrf.mxu2 }
 0x3f6   :  { %7924 = vmatpush.bf16.msrb.mxu1 %v11763_v62  ;;  %v11696_v63 = vld [vmem:[%s19646_s1 + $0x1d18] sm:$0xf0]  ;;  %v13029_v39 = vld [vmem:[%s19646_s1 + $0x1e0c] sm:$0xf]  ;;  %v7698_v16 = vpop.f32.mrf.mxu3  ;;  %v11571_v55 = vor.u32 %v12965_v59, %v11568_v11 }
 0x3f7   :  { %7937 = vmatpush.bf16.msrb.mxu2 %v11891_v21  ;;  %v11824_v49 = vld [vmem:[%s19646_s1 + $0x1e18] sm:$0xf0]  ;;  %v13061_v30 = vld [vmem:[%s19646_s1 + $0x1f0c] sm:$0xf]  ;;  %v11699_v19 = vor.u32 %v12997_v12, %v11696_v63 }
 0x3f8   :  { %7950 = vmatpush.bf16.msrb.mxu3 %v12019_v32  ;;  %v11952_v15 = vld [vmem:[%s19646_s1 + $0x1f18] sm:$0xf0]  ;;  %v11827_v54 = vor.u32 %v13029_v39, %v11824_v49 }
 0x3f9   :  { %7912 = vmatpush.bf16.msrb.mxu0 %v11619_v44  ;;  %v11955_v33 = vor.u32 %v13061_v30, %v11952_v15 }
 0x3fa   :  { %7925 = vmatpush.bf16.msrb.mxu1 %v11747_v6 }
 0x3fb   :  { %7938 = vmatpush.bf16.msrb.mxu2 %v11875_v20 }
 0x3fc   :  { %7951 = vmatpush.bf16.msrb.mxu3 %v12003_v61 }
 0x3fd   :  { %7913 = vmatpush.bf16.msrb.mxu0 %v11603_v40 }
 0x3fe   :  { %7926 = vmatpush.bf16.msrb.mxu1 %v11731_v28 }
 0x3ff   :  { %7939 = vmatpush.bf16.msrb.mxu2 %v11859_v31 }
 0x400   :  { %7952 = vmatpush.bf16.msrb.mxu3 %v11987_v50 }
 0x401   :  { %7914 = vmatpush.bf16.msrb.mxu0 %v11587_v7 }
 0x402   :  { %7927 = vmatpush.bf16.msrb.mxu1 %v11715_v45 }
 0x403   :  { %7940 = vmatpush.bf16.msrb.mxu2 %v11843_v46 }
 0x404   :  { %7953 = vmatpush.bf16.msrb.mxu3 %v11971_v13 }
 0x405   :  { %7915 = vmatpush.bf16.msrb.mxu0 %v11571_v55  ;;  %v7709_v62 = vpop.f32.mrf.mxu0 }
 0x406   :  { %7928 = vmatpush.bf16.msrb.mxu1 %v11699_v19  ;;  %v7710_v21 = vadd.f32 %v7709_v62, %v7697_v48  ;;  %v7722_v56 = vpop.f32.mrf.mxu1 }
 0x407   :  { %7941 = vmatpush.bf16.msrb.mxu2 %v11827_v54 }
 0x408   :  { %7954 = vmatpush.bf16.msrb.mxu3 %v11955_v33  ;;  %7916 = vmatmul.bf16.vlgmr.msrb.gmra.mxu0 %v14827_v24  ;;  %v7723_v38 = vadd.f32 %v7722_v56, %v7710_v21 }
 0x409   :  { %7929 = vmatmul.bf16.vlgmr.msrb.gmra.mxu1 %v14840_v36 }
 0x40a   :  { %7942 = vmatmul.bf16.vlgmr.msrb.gmra.mxu2 %v14838_v34 }
 0x40b   :  { %7955 = vmatmul.bf16.vlgmr.msrb.gmra.mxu3 %v14848_v47 }
 0x40d   :  { %v7735_v0 = vpop.f32.mrf.mxu2  ;;  %v7711_v4 = vpop.f32.mrf.mxu0 }
 0x40e   :  { %v7736_v32 = vadd.f32 %v7735_v0, %v7723_v38  ;;  %v7748_v27 = vpop.f32.mrf.mxu3  ;;  %v7724_v17 = vpop.f32.mrf.mxu1 }
 0x410   :  { %v7749_v41 = vadd.f32 %v7748_v27, %v7736_v32 }
 0x415   :  { %v7737_v42 = vpop.f32.mrf.mxu2 }
 0x416   :  { %v7750_v60 = vpop.f32.mrf.mxu3 }
 0x425   :  { %v7761_v44 = vpop.f32.mrf.mxu0 }
 0x426   :  { %v7762_v24 = vadd.f32 %v7761_v44, %v7749_v41  ;;  %v7774_v6 = vpop.f32.mrf.mxu1 }
 0x428   :  { %v7775_v36 = vadd.f32 %v7774_v6, %v7762_v24 }
 0x42d   :  { %v7787_v20 = vpop.f32.mrf.mxu2  ;;  %v7763_v47 = vpop.f32.mrf.mxu0 }
 0x42e   :  { %v7788_v34 = vadd.f32 %v7787_v20, %v7775_v36  ;;  %v7800_v2 = vpop.f32.mrf.mxu3  ;;  %v7776_v9 = vpop.f32.mrf.mxu1 }
 0x430   :  { %v7801_v26 = vadd.f32 %v7800_v2, %v7788_v34 }
 0x435   :  { %v7789_v61 = vpop.f32.mrf.mxu2 }
 0x436   :  { %v7802_v14 = vpop.f32.mrf.mxu3 }
 0x445   :  { %v7813_v5 = vpop.f32.mrf.mxu0 }
 0x446   :  { %v7826_v52 = vpop.f32.mrf.mxu1  ;;  %v7814_v48 = vadd.f32 %v7813_v5, %v7801_v26 }
 0x448   :  { %v7827_v8 = vadd.f32 %v7826_v52, %v7814_v48 }
 0x44d   :  { %v7839_v10 = vpop.f32.mrf.mxu2  ;;  %v7815_v18 = vpop.f32.mrf.mxu0 }
 0x44e   :  { %v7852_v58 = vpop.f32.mrf.mxu3  ;;  %v7828_v57 = vpop.f32.mrf.mxu1  ;;  %v7840_v50 = vadd.f32 %v7839_v10, %v7827_v8 }
 0x450   :  { %v7853_v1 = vadd.f32 %v7852_v58, %v7840_v50 }
 0x455   :  { %v7841_v23 = vpop.f32.mrf.mxu2 }
 0x456   :  { %v7854_v22 = vpop.f32.mrf.mxu3 }
 0x465   :  { %v7865_v40 = vpop.f32.mrf.mxu0 }
 0x466   :  { %v7878_v51 = vpop.f32.mrf.mxu1  ;;  %v7866_v25 = vadd.f32 %v7865_v40, %v7853_v1 }
 0x468   :  { %v7879_v53 = vadd.f32 %v7878_v51, %v7866_v25 }
 0x46d   :  { %v7891_v28 = vpop.f32.mrf.mxu2  ;;  %v7867_v43 = vpop.f32.mrf.mxu0 }
 0x46e   :  { %v7904_v31 = vpop.f32.mrf.mxu3  ;;  %v7880_v35 = vpop.f32.mrf.mxu1  ;;  %v7892_v7 = vadd.f32 %v7891_v28, %v7879_v53 }
 0x470   :  { %v7905_v45 = vadd.f32 %v7904_v31, %v7892_v7 }
 0x475   :  { %v7893_v3 = vpop.f32.mrf.mxu2 }
 0x476   :  { %v7906_v37 = vpop.f32.mrf.mxu3 }
 0x485   :  { %v7917_v46 = vpop.f32.mrf.mxu0 }
 0x486   :  { %v7930_v59 = vpop.f32.mrf.mxu1  ;;  %v7918_v11 = vadd.f32 %v7917_v46, %v7905_v45 }
 0x488   :  { %v7931_v12 = vadd.f32 %v7930_v59, %v7918_v11 }
 0x48d   :  { %v7943_v13 = vpop.f32.mrf.mxu2  ;;  %v7919_v49 = vpop.f32.mrf.mxu0 }
 0x48e   :  { %v7944_v63 = vadd.f32 %v7943_v13, %v7931_v12  ;;  %v7956_v39 = vpop.f32.mrf.mxu3  ;;  %v7932_v29 = vpop.f32.mrf.mxu1 }
 0x490   :  { %v7957_v30 = vadd.f32 %v7956_v39, %v7944_v63 }
 0x492   :  { %v7963_v15 = vmax.f32 %v7957_v30, 0.0 }
 0x494   :  { %7967 = vst [vmem:[%s19649_s3 + $0x18] sm:$0xff] %v7963_v15 }
 0x495   :  { %v7945_v16 = vpop.f32.mrf.mxu2 }
 0x496   :  { %v7958_v55 = vpop.f32.mrf.mxu3 }

</bundles_post_ra>
